<compile_context>
chip_gen: v5e
topology: v5e:2x2
jax: 0.10.0
libtpu: 0.0.40
codegen_flags: <defaults>
</compile_context>

<pallas_src>
import functools

import jax
import jax.numpy as jnp
import numpy as np
from jax.experimental import pallas as pl
from jax.experimental.pallas import tpu as pltpu


STAGE_OFF = 8   # staging-row headroom: prev-tap reads start at STAGE_OFF-2; keep it >= 2 and a
                # multiple of 8 so every staging store is sublane aligned.


# -----------------------------------------------------------------------------
# In-kernel building blocks (batch-flattened activations: rows = b*l_cur + pos)
# -----------------------------------------------------------------------------
def _mask_edges(prev, nxt, l_cur, m):
    """Zero the prev tap on each element's first position and the next tap on its last one.

    Rows are element-major and l_cur is a power of two (asserted in the wrapper), so
    pos == row & (l_cur - 1).  These masks also neutralise the (garbage) scratch rows read just
    outside the staged region at the global ends.
    """
    pos = jax.lax.broadcasted_iota(jnp.int32, (m, 1), 0) & (l_cur - 1)
    prev = jnp.where(pos == 0, 0.0, prev)
    nxt = jnp.where(pos == l_cur - 1, 0.0, nxt)
    return prev, nxt


def _conv3_relu(prev, cur, nxt, w_ref, bias):
    """kernel=3 / padding=1 conv + bias + ReLU as three accumulating MXU dots (no lane concat).

    Taps are cast to bf16 individually (f32 accumulation on the MXU).
    w_ref is (3, Cin, Cout) bf16 with taps [prev, cur, next]; bias is (1, Cout) f32.
    """
    y = jnp.dot(prev.astype(jnp.bfloat16), w_ref[0], preferred_element_type=jnp.float32)
    y += jnp.dot(cur.astype(jnp.bfloat16), w_ref[1], preferred_element_type=jnp.float32)
    y += jnp.dot(nxt.astype(jnp.bfloat16), w_ref[2], preferred_element_type=jnp.float32)
    return jnp.maximum(y + bias, 0.0)


# -----------------------------------------------------------------------------
# Pallas kernel: full encoder + classifier for a Bt-element batch block per grid step
# -----------------------------------------------------------------------------
def encoder_classifier_kernel(x_ref, vec_ref, w1_ref, w2_ref, w3_ref, w4_ref, w5_ref,
                              gp_ref, wf_ref, wc_ref, out_ref, st_ref,
                              *, seq_len, in_ch, feat_dim):
    L = seq_len
    n = x_ref.shape[0]                       # Bt * L, element-major rows

    # packed per-channel vectors: one DMA, sliced here (all slices start at lane 0)
    ns = vec_ref[0:1, :in_ch]
    nt = vec_ref[1:2, :in_ch]
    b1 = vec_ref[2:3, :16]
    b2 = vec_ref[3:4, :32]
    b3 = vec_ref[4:5, :64]
    b4 = vec_ref[5:6, :64]
    b5 = vec_ref[6:7, :64]
    bf = vec_ref[7:8, :feat_dim]
    bc = vec_ref[8:9, :]

    # ---- input BatchNorm1d (eval): per-channel affine, applied BEFORE conv1's zero padding ----
    h = x_ref[...].astype(jnp.float32) * ns + nt                       # (n, Cin) f32

    # ---- conv1: stage the BN'd input once, read prev/next as sublane-offset slices ----
    st_ref[pl.ds(STAGE_OFF, n), :in_ch] = h
    prev = st_ref[pl.ds(STAGE_OFF - 1, n), :in_ch]
    nxt = st_ref[pl.ds(STAGE_OFF + 1, n), :in_ch]
    prev, nxt = _mask_edges(prev, nxt, L, n)
    y = _conv3_relu(prev, h, nxt, w1_ref, b1)                          # (n, 16) f32

    # ---- conv2..conv5: MaxPool1d(2) fused into the next conv's tap reads ----
    l_cur = L
    for w_ref, bias, cin in ((w2_ref, b2, 16), (w3_ref, b3, 32),
                             (w4_ref, b4, 64), (w5_ref, b5, 64)):
        rows = y.shape[0]
        st_ref[pl.ds(STAGE_OFF, rows), :cin] = y                       # stage conv_k output once
        m = rows // 2
        l_cur //= 2

        def pooled_tap(off, m=m, cin=cin):
            # pooled[j + d] = max(y[2j + 2d], y[2j + 2d + 1]); off = STAGE_OFF + 2d
            return jnp.maximum(st_ref[pl.ds(off, m, stride=2), :cin],
                               st_ref[pl.ds(off + 1, m, stride=2), :cin])

        prev = pooled_tap(STAGE_OFF - 2)
        cur = pooled_tap(STAGE_OFF)
        nxt = pooled_tap(STAGE_OFF + 2)
        prev, nxt = _mask_edges(prev, nxt, l_cur, m)
        y = _conv3_relu(prev, cur, nxt, w_ref, bias)                   # (m, Cout) f32

    # ---- AdaptiveAvgPool1d(1): per-element mean via tiny precomputed segment matrix ----
    # TODO(synk): for much larger L replace gp with an in-kernel two-stage segment reduction.
    g = jnp.dot(gp_ref[...], y, preferred_element_type=jnp.float32)    # (Bt, 64) f32

    # ---- feature layer: Linear + ReLU (Dropout == identity at inference) ----
    f = jnp.maximum(jnp.dot(g, wf_ref[...], preferred_element_type=jnp.float32) + bf, 0.0)

    # ---- F.normalize(p=2, dim=1): x / max(||x||, 1e-12) == x * rsqrt(max(||x||^2, 1e-24)) ----
    ssq = jnp.sum(f * f, axis=1, keepdims=True)
    f = f * jax.lax.rsqrt(jnp.maximum(ssq, 1e-24))

    # ---- classifier (Dropout == identity, then Linear); lane-dense padded logits ----
    out_ref[...] = jnp.dot(f, wc_ref[...], preferred_element_type=jnp.float32) + bc


# -----------------------------------------------------------------------------
# Wrapper
# -----------------------------------------------------------------------------
def _default_block_b(B):
    """Full batch (grid=(1,)) on single-TC chips (v5e/v6e); split over the two TCs on v4/v5p/v7x."""
    kind = ""
    try:
        kind = jax.devices()[0].device_kind.lower()
    except Exception:
        pass
    dual_tc = any(t in kind for t in ("v4", "v5p", "v7"))
    if dual_tc and B % 16 == 0:
        return B // 2
    return B


def encoder_classifier_forward(x, params, *, block_b=None):
    """x: (B, L, Cin) float32  ->  logits (B, num_classes) float32."""
    B, L, Cin = x.shape
    assert L % 16 == 0 and (L & (L - 1)) == 0, "L must be a power of two divisible by 16"
    assert Cin <= 64, "in_channels must fit the 64-wide staging scratch"

    feature_dim = params["wf"].shape[1]
    num_classes = params["wc"].shape[1]
    assert feature_dim <= 128 and num_classes <= 128

    Bt = _default_block_b(B) if block_b is None else block_b
    assert B % Bt == 0, "batch must be divisible by the batch block"
    assert Bt % 8 == 0 or Bt == B, "batch block must be a multiple of 8 (or the full batch)"

    ncp = 128                                    # lane-dense classifier / vector-pack width
    l16 = L // 16
    m5 = Bt * l16

    # one packed (16, 128) f32 array holding every small per-channel vector (one DMA, not nine)
    vec_rows = [params["ns"], params["nt"], params["b1"], params["b2"], params["b3"],
                params["b4"], params["b5"], params["bf"], params["bc"]]
    vecs = jnp.zeros((16, ncp), jnp.float32)
    for i, v in enumerate(vec_rows):
        v = jnp.asarray(v, jnp.float32).reshape(-1)
        vecs = vecs.at[i, : v.shape[0]].set(v)

    # AdaptiveAvgPool1d(1) as a per-element segment-mean matrix on the flattened layout
    rows = np.arange(Bt)[:, None]
    cols = np.arange(m5)[None, :]
    gp = jnp.asarray(((cols // l16) == rows).astype(np.float32) / l16)       # (Bt, Bt*L/16)

    # classifier weight padded to a lane-dense width (extra logits are exactly 0, sliced below)
    wc_p = jnp.zeros((feature_dim, ncp), jnp.float32).at[:, :num_classes].set(params["wc"])

    # conv weights as (3, Cin, Cout) bf16 tap slabs (MXU operands); everything else stays f32
    conv_w = [params[f"w{i}"].astype(jnp.bfloat16) for i in range(1, 6)]

    x_flat = x.reshape(B * L, Cin)               # element-major rows: row = b*L + l

    in_specs = [pl.BlockSpec((Bt * L, Cin), lambda b: (b, 0)),
                pl.BlockSpec(vecs.shape, lambda b: (0, 0))]
    in_specs += [pl.BlockSpec(w.shape, lambda b: (0, 0, 0)) for w in conv_w]
    in_specs += [pl.BlockSpec(gp.shape, lambda b: (0, 0)),
                 pl.BlockSpec(params["wf"].shape, lambda b: (0, 0)),
                 pl.BlockSpec(wc_p.shape, lambda b: (0, 0))]

    out = pl.pallas_call(
        functools.partial(encoder_classifier_kernel,
                          seq_len=L, in_ch=Cin, feat_dim=feature_dim),
        out_shape=jax.ShapeDtypeStruct((B, ncp), jnp.float32),
        grid=(B // Bt,),
        in_specs=in_specs,
        out_specs=pl.BlockSpec((Bt, ncp), lambda b: (b, 0)),
        scratch_shapes=[pltpu.VMEM((Bt * L + 2 * STAGE_OFF, 64), jnp.float32)],
        compiler_params=pltpu.CompilerParams(dimension_semantics=("parallel",)),
    )(x_flat, vecs, *conv_w, gp, params["wf"], wc_p)
    return out[:, :num_classes]


# -----------------------------------------------------------------------------
# Deterministic parameter construction (synthetic; BN folded, eval mode).
# Conv weights are (3, Cin, Cout) = [tap_prev, tap_cur, tap_next].
# -----------------------------------------------------------------------------
def make_params(key, in_channels, feature_dim, num_classes):
    eps = 1e-5

    def conv_bn(key, cin, cout, with_bn):
        k = jax.random.split(key, 6)
        w = 0.1 * jax.random.normal(k[0], (3, cin, cout), jnp.float32)   # (tap, Cin, Cout)
        b = 0.1 * jax.random.normal(k[1], (cout,), jnp.float32)
        if with_bn:
            gamma = 1.0 + 0.1 * jax.random.normal(k[2], (cout,), jnp.float32)
            beta = 0.1 * jax.random.normal(k[3], (cout,), jnp.float32)
            mean = 0.1 * jax.random.normal(k[4], (cout,), jnp.float32)
            var = 1.0 + 0.1 * jnp.abs(jax.random.normal(k[5], (cout,), jnp.float32))
            s = gamma / jnp.sqrt(var + eps)
            w = w * s[None, None, :]
            b = (b - mean) * s + beta
        return w, b.reshape(1, cout)

    keys = jax.random.split(key, 12)

    # input BatchNorm1d(in_channels) -> per-channel affine
    gamma = 1.0 + 0.1 * jax.random.normal(keys[0], (in_channels,), jnp.float32)
    beta = 0.1 * jax.random.normal(keys[1], (in_channels,), jnp.float32)
    mean = 0.1 * jax.random.normal(keys[2], (in_channels,), jnp.float32)
    var = 1.0 + 0.1 * jnp.abs(jax.random.normal(keys[3], (in_channels,), jnp.float32))
    ns = (gamma / jnp.sqrt(var + eps)).reshape(1, in_channels)
    nt = (beta - mean * gamma / jnp.sqrt(var + eps)).reshape(1, in_channels)

    w1, b1 = conv_bn(keys[4], in_channels, 16, with_bn=False)
    w2, b2 = conv_bn(keys[5], 16, 32, with_bn=True)
    w3, b3 = conv_bn(keys[6], 32, 64, with_bn=True)
    w4, b4 = conv_bn(keys[7], 64, 64, with_bn=True)
    w5, b5 = conv_bn(keys[8], 64, 64, with_bn=True)

    wf = 0.1 * jax.random.normal(keys[9], (64, feature_dim), jnp.float32)
    bf = 0.1 * jax.random.normal(keys[10], (1, feature_dim), jnp.float32)
    kc1, kc2 = jax.random.split(keys[11])
    wc = 0.1 * jax.random.normal(kc1, (feature_dim, num_classes), jnp.float32)
    bc = 0.1 * jax.random.normal(kc2, (1, num_classes), jnp.float32)

    return dict(ns=ns, nt=nt, w1=w1, b1=b1, w2=w2, b2=b2, w3=w3, b3=b3,
                w4=w4, b4=b4, w5=w5, b5=b5, wf=wf, bf=bf, wc=wc, bc=bc)


# -----------------------------------------------------------------------------
# Pure-JAX reference (same folded params; conv matmul operands cast to bf16 like the kernel,
# f32 accumulation everywhere else), for a correctness check.
# -----------------------------------------------------------------------------
def reference_forward(x, p):
    h = x * p["ns"] + p["nt"]

    def conv_relu(h, w, b):
        _, cin, cout = w.shape
        hp = jnp.pad(h, ((0, 0), (1, 1), (0, 0)))
        cat = jnp.concatenate([hp[:, :-2], hp[:, 1:-1], hp[:, 2:]], axis=-1)   # (B, L, 3*Cin)
        y = jnp.einsum("blk,kc->blc", cat.astype(jnp.bfloat16),
                       w.reshape(3 * cin, cout).astype(jnp.bfloat16),
                       preferred_element_type=jnp.float32) + b
        return jax.nn.relu(y)

    def pool(h):
        B, L, C = h.shape
        return h.reshape(B, L // 2, 2, C).max(axis=2)

    h = pool(conv_relu(h, p["w1"], p["b1"]))
    h = pool(conv_relu(h, p["w2"], p["b2"]))
    h = pool(conv_relu(h, p["w3"], p["b3"]))
    h = pool(conv_relu(h, p["w4"], p["b4"]))
    h = conv_relu(h, p["w5"], p["b5"])
    g = h.mean(axis=1)                                    # (B, 64)
    f = jax.nn.relu(g @ p["wf"] + p["bf"])
    f = f / jnp.maximum(jnp.linalg.norm(f, axis=1, keepdims=True), 1e-12)
    return f @ p["wc"] + p["bc"]


# -----------------------------------------------------------------------------
if __name__ == "__main__":
    B, Cin, L = 16, 4, 64            # L: power of two, divisible by 16 (four maxpools)
    hidden_dim = 32                  # unused by EnhancedCNN1D_embed (kept for signature parity)
    feature_dim = 32
    num_classes = 5

    root = jax.random.PRNGKey(0)
    kx, kp = jax.random.split(root)
    x = jax.random.normal(kx, (B, L, Cin), jnp.float32)   # layout: (B, L, C_in)
    params = make_params(kp, Cin, feature_dim, num_classes)

    logits = encoder_classifier_forward(x, params)        # block_b picked per chip generation
    logits = jax.block_until_ready(logits)

    ref = jax.block_until_ready(reference_forward(x, params))
    np.testing.assert_allclose(np.asarray(logits), np.asarray(ref),
                               rtol=1e-2, atol=1e-3)

    print("KERNEL_OK")
</pallas_src>

<mosaic_0001>
module attributes {stable_mosaic.version = 11 : i64} {
  func.func @encoder_classifier_kernel(%arg0: i32, %arg1: memref<1024x4xf32, #tpu.memory_space<vmem>>, %arg2: memref<16x128xf32, #tpu.memory_space<vmem>>, %arg3: memref<3x4x16xbf16, #tpu.memory_space<vmem>>, %arg4: memref<3x16x32xbf16, #tpu.memory_space<vmem>>, %arg5: memref<3x32x64xbf16, #tpu.memory_space<vmem>>, %arg6: memref<3x64x64xbf16, #tpu.memory_space<vmem>>, %arg7: memref<3x64x64xbf16, #tpu.memory_space<vmem>>, %arg8: memref<16x64xf32, #tpu.memory_space<vmem>>, %arg9: memref<64x32xf32, #tpu.memory_space<vmem>>, %arg10: memref<32x128xf32, #tpu.memory_space<vmem>>, %arg11: memref<16x128xf32, #tpu.memory_space<vmem>>, %arg12: memref<1040x64xf32, #tpu.memory_space<vmem>>) attributes {dimension_semantics = [#tpu.dimension_semantics<parallel>], iteration_bounds = array<i64: 1>, scalar_prefetch = 0 : i64, scratch_operands = 1 : i64, tpu.core_type = #tpu.core_type<tc>, window_params = [{transform_indices = @transform_0, window_bounds = array<i64: 1024, 4>}, {pipeline_mode = #tpu.pipeline_mode<synchronous>, transform_indices = @transform_1, window_bounds = array<i64: 16, 128>}, {pipeline_mode = #tpu.pipeline_mode<synchronous>, transform_indices = @transform_2, window_bounds = array<i64: 3, 4, 16>}, {pipeline_mode = #tpu.pipeline_mode<synchronous>, transform_indices = @transform_3, window_bounds = array<i64: 3, 16, 32>}, {pipeline_mode = #tpu.pipeline_mode<synchronous>, transform_indices = @transform_4, window_bounds = array<i64: 3, 32, 64>}, {pipeline_mode = #tpu.pipeline_mode<synchronous>, transform_indices = @transform_5, window_bounds = array<i64: 3, 64, 64>}, {pipeline_mode = #tpu.pipeline_mode<synchronous>, transform_indices = @transform_6, window_bounds = array<i64: 3, 64, 64>}, {pipeline_mode = #tpu.pipeline_mode<synchronous>, transform_indices = @transform_7, window_bounds = array<i64: 16, 64>}, {pipeline_mode = #tpu.pipeline_mode<synchronous>, transform_indices = @transform_8, window_bounds = array<i64: 64, 32>}, {pipeline_mode = #tpu.pipeline_mode<synchronous>, transform_indices = @transform_9, window_bounds = array<i64: 32, 128>}, {transform_indices = @transform_10, window_bounds = array<i64: 16, 128>}]} {
    %c0 = arith.constant 0 : index
    %c0_0 = arith.constant 0 : index
    %0 = vector.load %arg2[%c0, %c0_0] : memref<16x128xf32, #tpu.memory_space<vmem>>, vector<1x4xf32>
    %c1 = arith.constant 1 : index
    %c0_1 = arith.constant 0 : index
    %1 = vector.load %arg2[%c1, %c0_1] : memref<16x128xf32, #tpu.memory_space<vmem>>, vector<1x4xf32>
    %c2 = arith.constant 2 : index
    %c0_2 = arith.constant 0 : index
    %2 = vector.load %arg2[%c2, %c0_2] : memref<16x128xf32, #tpu.memory_space<vmem>>, vector<1x16xf32>
    %c3 = arith.constant 3 : index
    %c0_3 = arith.constant 0 : index
    %3 = vector.load %arg2[%c3, %c0_3] : memref<16x128xf32, #tpu.memory_space<vmem>>, vector<1x32xf32>
    %c4 = arith.constant 4 : index
    %c0_4 = arith.constant 0 : index
    %4 = vector.load %arg2[%c4, %c0_4] : memref<16x128xf32, #tpu.memory_space<vmem>>, vector<1x64xf32>
    %c5 = arith.constant 5 : index
    %c0_5 = arith.constant 0 : index
    %5 = vector.load %arg2[%c5, %c0_5] : memref<16x128xf32, #tpu.memory_space<vmem>>, vector<1x64xf32>
    %c6 = arith.constant 6 : index
    %c0_6 = arith.constant 0 : index
    %6 = vector.load %arg2[%c6, %c0_6] : memref<16x128xf32, #tpu.memory_space<vmem>>, vector<1x64xf32>
    %c7 = arith.constant 7 : index
    %c0_7 = arith.constant 0 : index
    %7 = vector.load %arg2[%c7, %c0_7] : memref<16x128xf32, #tpu.memory_space<vmem>>, vector<1x32xf32>
    %c8 = arith.constant 8 : index
    %c0_8 = arith.constant 0 : index
    %8 = vector.load %arg2[%c8, %c0_8] : memref<16x128xf32, #tpu.memory_space<vmem>>, vector<1x128xf32>
    %c0_9 = arith.constant 0 : index
    %c0_10 = arith.constant 0 : index
    %9 = vector.load %arg1[%c0_9, %c0_10] : memref<1024x4xf32, #tpu.memory_space<vmem>>, vector<1024x4xf32>
    %10 = vector.broadcast %0 : vector<1x4xf32> to vector<1024x4xf32>
    %11 = arith.mulf %9, %10 : vector<1024x4xf32>
    %12 = vector.broadcast %1 : vector<1x4xf32> to vector<1024x4xf32>
    %13 = arith.addf %11, %12 : vector<1024x4xf32>
    %c8_11 = arith.constant 8 : index
    %c0_12 = arith.constant 0 : index
    %14 = vector.load %arg12[%c8_11, %c0_12] : memref<1040x64xf32, #tpu.memory_space<vmem>>, vector<1024x4xf32>
    tpu.vector_store %arg12[%c8_11, %c0_12], %13 {strides = array<i32>} : memref<1040x64xf32, #tpu.memory_space<vmem>>, vector<1024x4xf32>,
    %c7_13 = arith.constant 7 : index
    %c0_14 = arith.constant 0 : index
    %15 = vector.load %arg12[%c7_13, %c0_14] : memref<1040x64xf32, #tpu.memory_space<vmem>>, vector<1024x4xf32>
    %c9 = arith.constant 9 : index
    %c0_15 = arith.constant 0 : index
    %16 = vector.load %arg12[%c9, %c0_15] : memref<1040x64xf32, #tpu.memory_space<vmem>>, vector<1024x4xf32>
    %17 = tpu.iota {dimensions = array<i32: 0>} : vector<1024x1xi32>
    %c63_i32 = arith.constant 63 : i32
    %18 = vector.broadcast %c63_i32 : i32 to vector<1024x1xi32>
    %19 = arith.andi %17, %18 : vector<1024x1xi32>
    %c0_i32 = arith.constant 0 : i32
    %20 = vector.broadcast %c0_i32 : i32 to vector<1024x1xi32>
    %21 = arith.cmpi eq, %19, %20 : vector<1024x1xi32>
    %cst = arith.constant 0.000000e+00 : f32
    %22 = vector.shape_cast %21 : vector<1024x1xi1> to vector<1024x1xi1>
    %23 = vector.broadcast %22 : vector<1024x1xi1> to vector<1024x4xi1>
    %24 = vector.broadcast %cst : f32 to vector<1024x4xf32>
    %25 = arith.select %23, %24, %15 : vector<1024x4xi1>, vector<1024x4xf32>
    %c63_i32_16 = arith.constant 63 : i32
    %26 = vector.broadcast %c63_i32_16 : i32 to vector<1024x1xi32>
    %27 = arith.cmpi eq, %19, %26 : vector<1024x1xi32>
    %cst_17 = arith.constant 0.000000e+00 : f32
    %28 = vector.shape_cast %27 : vector<1024x1xi1> to vector<1024x1xi1>
    %29 = vector.broadcast %28 : vector<1024x1xi1> to vector<1024x4xi1>
    %30 = vector.broadcast %cst_17 : f32 to vector<1024x4xf32>
    %31 = arith.select %29, %30, %16 : vector<1024x4xi1>, vector<1024x4xf32>
    %32 = arith.truncf %25 : vector<1024x4xf32> to vector<1024x4xbf16>
    %c0_18 = arith.constant 0 : index
    %c0_19 = arith.constant 0 : index
    %c0_20 = arith.constant 0 : index
    %33 = vector.load %arg3[%c0_18, %c0_19, %c0_20] : memref<3x4x16xbf16, #tpu.memory_space<vmem>>, vector<1x4x16xbf16>
    %34 = vector.shape_cast %33 : vector<1x4x16xbf16> to vector<4x16xbf16>
    %cst_21 = arith.constant dense<0.000000e+00> : vector<1024x16xf32>
    %35 = tpu.matmul %32, %34, %cst_21 {dimension_numbers = #tpu.dot_dimension_numbers<[1], [0], [0], [1], [0, 0, 1, 1], [], []>} : vector<1024x4xbf16>, vector<4x16xbf16>, vector<1024x16xf32> -> vector<1024x16xf32>
    %36 = arith.truncf %13 : vector<1024x4xf32> to vector<1024x4xbf16>
    %c1_22 = arith.constant 1 : index
    %c0_23 = arith.constant 0 : index
    %c0_24 = arith.constant 0 : index
    %37 = vector.load %arg3[%c1_22, %c0_23, %c0_24] : memref<3x4x16xbf16, #tpu.memory_space<vmem>>, vector<1x4x16xbf16>
    %38 = vector.shape_cast %37 : vector<1x4x16xbf16> to vector<4x16xbf16>
    %cst_25 = arith.constant dense<0.000000e+00> : vector<1024x16xf32>
    %39 = tpu.matmul %36, %38, %cst_25 {dimension_numbers = #tpu.dot_dimension_numbers<[1], [0], [0], [1], [0, 0, 1, 1], [], []>} : vector<1024x4xbf16>, vector<4x16xbf16>, vector<1024x16xf32> -> vector<1024x16xf32>
    %40 = arith.addf %35, %39 : vector<1024x16xf32>
    %41 = arith.truncf %31 : vector<1024x4xf32> to vector<1024x4xbf16>
    %c2_26 = arith.constant 2 : index
    %c0_27 = arith.constant 0 : index
    %c0_28 = arith.constant 0 : index
    %42 = vector.load %arg3[%c2_26, %c0_27, %c0_28] : memref<3x4x16xbf16, #tpu.memory_space<vmem>>, vector<1x4x16xbf16>
    %43 = vector.shape_cast %42 : vector<1x4x16xbf16> to vector<4x16xbf16>
    %cst_29 = arith.constant dense<0.000000e+00> : vector<1024x16xf32>
    %44 = tpu.matmul %41, %43, %cst_29 {dimension_numbers = #tpu.dot_dimension_numbers<[1], [0], [0], [1], [0, 0, 1, 1], [], []>} : vector<1024x4xbf16>, vector<4x16xbf16>, vector<1024x16xf32> -> vector<1024x16xf32>
    %45 = arith.addf %40, %44 : vector<1024x16xf32>
    %46 = vector.broadcast %2 : vector<1x16xf32> to vector<1024x16xf32>
    %47 = arith.addf %45, %46 : vector<1024x16xf32>
    %cst_30 = arith.constant 0.000000e+00 : f32
    %48 = vector.broadcast %cst_30 : f32 to vector<1024x16xf32>
    %49 = arith.maximumf %47, %48 : vector<1024x16xf32>
    %c8_31 = arith.constant 8 : index
    %c0_32 = arith.constant 0 : index
    %50 = vector.load %arg12[%c8_31, %c0_32] : memref<1040x64xf32, #tpu.memory_space<vmem>>, vector<1024x16xf32>
    tpu.vector_store %arg12[%c8_31, %c0_32], %49 {strides = array<i32>} : memref<1040x64xf32, #tpu.memory_space<vmem>>, vector<1024x16xf32>,
    %c6_33 = arith.constant 6 : index
    %c0_34 = arith.constant 0 : index
    %51 = tpu.strided_load %arg12[%c6_33, %c0_34] {strides = array<i32: 2, 1>} : memref<1040x64xf32, #tpu.memory_space<vmem>>, vector<512x16xf32>
    %c7_35 = arith.constant 7 : index
    %c0_36 = arith.constant 0 : index
    %52 = tpu.strided_load %arg12[%c7_35, %c0_36] {strides = array<i32: 2, 1>} : memref<1040x64xf32, #tpu.memory_space<vmem>>, vector<512x16xf32>
    %53 = arith.maximumf %51, %52 : vector<512x16xf32>
    %c8_37 = arith.constant 8 : index
    %c0_38 = arith.constant 0 : index
    %54 = tpu.strided_load %arg12[%c8_37, %c0_38] {strides = array<i32: 2, 1>} : memref<1040x64xf32, #tpu.memory_space<vmem>>, vector<512x16xf32>
    %c9_39 = arith.constant 9 : index
    %c0_40 = arith.constant 0 : index
    %55 = tpu.strided_load %arg12[%c9_39, %c0_40] {strides = array<i32: 2, 1>} : memref<1040x64xf32, #tpu.memory_space<vmem>>, vector<512x16xf32>
    %56 = arith.maximumf %54, %55 : vector<512x16xf32>
    %c10 = arith.constant 10 : index
    %c0_41 = arith.constant 0 : index
    %57 = tpu.strided_load %arg12[%c10, %c0_41] {strides = array<i32: 2, 1>} : memref<1040x64xf32, #tpu.memory_space<vmem>>, vector<512x16xf32>
    %c11 = arith.constant 11 : index
    %c0_42 = arith.constant 0 : index
    %58 = tpu.strided_load %arg12[%c11, %c0_42] {strides = array<i32: 2, 1>} : memref<1040x64xf32, #tpu.memory_space<vmem>>, vector<512x16xf32>
    %59 = arith.maximumf %57, %58 : vector<512x16xf32>
    %60 = tpu.iota {dimensions = array<i32: 0>} : vector<512x1xi32>
    %c31_i32 = arith.constant 31 : i32
    %61 = vector.broadcast %c31_i32 : i32 to vector<512x1xi32>
    %62 = arith.andi %60, %61 : vector<512x1xi32>
    %c0_i32_43 = arith.constant 0 : i32
    %63 = vector.broadcast %c0_i32_43 : i32 to vector<512x1xi32>
    %64 = arith.cmpi eq, %62, %63 : vector<512x1xi32>
    %cst_44 = arith.constant 0.000000e+00 : f32
    %65 = vector.shape_cast %64 : vector<512x1xi1> to vector<512x1xi1>
    %66 = vector.broadcast %65 : vector<512x1xi1> to vector<512x16xi1>
    %67 = vector.broadcast %cst_44 : f32 to vector<512x16xf32>
    %68 = arith.select %66, %67, %53 : vector<512x16xi1>, vector<512x16xf32>
    %c31_i32_45 = arith.constant 31 : i32
    %69 = vector.broadcast %c31_i32_45 : i32 to vector<512x1xi32>
    %70 = arith.cmpi eq, %62, %69 : vector<512x1xi32>
    %cst_46 = arith.constant 0.000000e+00 : f32
    %71 = vector.shape_cast %70 : vector<512x1xi1> to vector<512x1xi1>
    %72 = vector.broadcast %71 : vector<512x1xi1> to vector<512x16xi1>
    %73 = vector.broadcast %cst_46 : f32 to vector<512x16xf32>
    %74 = arith.select %72, %73, %59 : vector<512x16xi1>, vector<512x16xf32>
    %75 = arith.truncf %68 : vector<512x16xf32> to vector<512x16xbf16>
    %c0_47 = arith.constant 0 : index
    %c0_48 = arith.constant 0 : index
    %c0_49 = arith.constant 0 : index
    %76 = vector.load %arg4[%c0_47, %c0_48, %c0_49] : memref<3x16x32xbf16, #tpu.memory_space<vmem>>, vector<1x16x32xbf16>
    %77 = vector.shape_cast %76 : vector<1x16x32xbf16> to vector<16x32xbf16>
    %cst_50 = arith.constant dense<0.000000e+00> : vector<512x32xf32>
    %78 = tpu.matmul %75, %77, %cst_50 {dimension_numbers = #tpu.dot_dimension_numbers<[1], [0], [0], [1], [0, 0, 1, 1], [], []>} : vector<512x16xbf16>, vector<16x32xbf16>, vector<512x32xf32> -> vector<512x32xf32>
    %79 = arith.truncf %56 : vector<512x16xf32> to vector<512x16xbf16>
    %c1_51 = arith.constant 1 : index
    %c0_52 = arith.constant 0 : index
    %c0_53 = arith.constant 0 : index
    %80 = vector.load %arg4[%c1_51, %c0_52, %c0_53] : memref<3x16x32xbf16, #tpu.memory_space<vmem>>, vector<1x16x32xbf16>
    %81 = vector.shape_cast %80 : vector<1x16x32xbf16> to vector<16x32xbf16>
    %cst_54 = arith.constant dense<0.000000e+00> : vector<512x32xf32>
    %82 = tpu.matmul %79, %81, %cst_54 {dimension_numbers = #tpu.dot_dimension_numbers<[1], [0], [0], [1], [0, 0, 1, 1], [], []>} : vector<512x16xbf16>, vector<16x32xbf16>, vector<512x32xf32> -> vector<512x32xf32>
    %83 = arith.addf %78, %82 : vector<512x32xf32>
    %84 = arith.truncf %74 : vector<512x16xf32> to vector<512x16xbf16>
    %c2_55 = arith.constant 2 : index
    %c0_56 = arith.constant 0 : index
    %c0_57 = arith.constant 0 : index
    %85 = vector.load %arg4[%c2_55, %c0_56, %c0_57] : memref<3x16x32xbf16, #tpu.memory_space<vmem>>, vector<1x16x32xbf16>
    %86 = vector.shape_cast %85 : vector<1x16x32xbf16> to vector<16x32xbf16>
    %cst_58 = arith.constant dense<0.000000e+00> : vector<512x32xf32>
    %87 = tpu.matmul %84, %86, %cst_58 {dimension_numbers = #tpu.dot_dimension_numbers<[1], [0], [0], [1], [0, 0, 1, 1], [], []>} : vector<512x16xbf16>, vector<16x32xbf16>, vector<512x32xf32> -> vector<512x32xf32>
    %88 = arith.addf %83, %87 : vector<512x32xf32>
    %89 = vector.broadcast %3 : vector<1x32xf32> to vector<512x32xf32>
    %90 = arith.addf %88, %89 : vector<512x32xf32>
    %cst_59 = arith.constant 0.000000e+00 : f32
    %91 = vector.broadcast %cst_59 : f32 to vector<512x32xf32>
    %92 = arith.maximumf %90, %91 : vector<512x32xf32>
    %c8_60 = arith.constant 8 : index
    %c0_61 = arith.constant 0 : index
    %93 = vector.load %arg12[%c8_60, %c0_61] : memref<1040x64xf32, #tpu.memory_space<vmem>>, vector<512x32xf32>
    tpu.vector_store %arg12[%c8_60, %c0_61], %92 {strides = array<i32>} : memref<1040x64xf32, #tpu.memory_space<vmem>>, vector<512x32xf32>,
    %c6_62 = arith.constant 6 : index
    %c0_63 = arith.constant 0 : index
    %94 = tpu.strided_load %arg12[%c6_62, %c0_63] {strides = array<i32: 2, 1>} : memref<1040x64xf32, #tpu.memory_space<vmem>>, vector<256x32xf32>
    %c7_64 = arith.constant 7 : index
    %c0_65 = arith.constant 0 : index
    %95 = tpu.strided_load %arg12[%c7_64, %c0_65] {strides = array<i32: 2, 1>} : memref<1040x64xf32, #tpu.memory_space<vmem>>, vector<256x32xf32>
    %96 = arith.maximumf %94, %95 : vector<256x32xf32>
    %c8_66 = arith.constant 8 : index
    %c0_67 = arith.constant 0 : index
    %97 = tpu.strided_load %arg12[%c8_66, %c0_67] {strides = array<i32: 2, 1>} : memref<1040x64xf32, #tpu.memory_space<vmem>>, vector<256x32xf32>
    %c9_68 = arith.constant 9 : index
    %c0_69 = arith.constant 0 : index
    %98 = tpu.strided_load %arg12[%c9_68, %c0_69] {strides = array<i32: 2, 1>} : memref<1040x64xf32, #tpu.memory_space<vmem>>, vector<256x32xf32>
    %99 = arith.maximumf %97, %98 : vector<256x32xf32>
    %c10_70 = arith.constant 10 : index
    %c0_71 = arith.constant 0 : index
    %100 = tpu.strided_load %arg12[%c10_70, %c0_71] {strides = array<i32: 2, 1>} : memref<1040x64xf32, #tpu.memory_space<vmem>>, vector<256x32xf32>
    %c11_72 = arith.constant 11 : index
    %c0_73 = arith.constant 0 : index
    %101 = tpu.strided_load %arg12[%c11_72, %c0_73] {strides = array<i32: 2, 1>} : memref<1040x64xf32, #tpu.memory_space<vmem>>, vector<256x32xf32>
    %102 = arith.maximumf %100, %101 : vector<256x32xf32>
    %103 = tpu.iota {dimensions = array<i32: 0>} : vector<256x1xi32>
    %c15_i32 = arith.constant 15 : i32
    %104 = vector.broadcast %c15_i32 : i32 to vector<256x1xi32>
    %105 = arith.andi %103, %104 : vector<256x1xi32>
    %c0_i32_74 = arith.constant 0 : i32
    %106 = vector.broadcast %c0_i32_74 : i32 to vector<256x1xi32>
    %107 = arith.cmpi eq, %105, %106 : vector<256x1xi32>
    %cst_75 = arith.constant 0.000000e+00 : f32
    %108 = vector.shape_cast %107 : vector<256x1xi1> to vector<256x1xi1>
    %109 = vector.broadcast %108 : vector<256x1xi1> to vector<256x32xi1>
    %110 = vector.broadcast %cst_75 : f32 to vector<256x32xf32>
    %111 = arith.select %109, %110, %96 : vector<256x32xi1>, vector<256x32xf32>
    %c15_i32_76 = arith.constant 15 : i32
    %112 = vector.broadcast %c15_i32_76 : i32 to vector<256x1xi32>
    %113 = arith.cmpi eq, %105, %112 : vector<256x1xi32>
    %cst_77 = arith.constant 0.000000e+00 : f32
    %114 = vector.shape_cast %113 : vector<256x1xi1> to vector<256x1xi1>
    %115 = vector.broadcast %114 : vector<256x1xi1> to vector<256x32xi1>
    %116 = vector.broadcast %cst_77 : f32 to vector<256x32xf32>
    %117 = arith.select %115, %116, %102 : vector<256x32xi1>, vector<256x32xf32>
    %118 = arith.truncf %111 : vector<256x32xf32> to vector<256x32xbf16>
    %c0_78 = arith.constant 0 : index
    %c0_79 = arith.constant 0 : index
    %c0_80 = arith.constant 0 : index
    %119 = vector.load %arg5[%c0_78, %c0_79, %c0_80] : memref<3x32x64xbf16, #tpu.memory_space<vmem>>, vector<1x32x64xbf16>
    %120 = vector.shape_cast %119 : vector<1x32x64xbf16> to vector<32x64xbf16>
    %cst_81 = arith.constant dense<0.000000e+00> : vector<256x64xf32>
    %121 = tpu.matmul %118, %120, %cst_81 {dimension_numbers = #tpu.dot_dimension_numbers<[1], [0], [0], [1], [0, 0, 1, 1], [], []>} : vector<256x32xbf16>, vector<32x64xbf16>, vector<256x64xf32> -> vector<256x64xf32>
    %122 = arith.truncf %99 : vector<256x32xf32> to vector<256x32xbf16>
    %c1_82 = arith.constant 1 : index
    %c0_83 = arith.constant 0 : index
    %c0_84 = arith.constant 0 : index
    %123 = vector.load %arg5[%c1_82, %c0_83, %c0_84] : memref<3x32x64xbf16, #tpu.memory_space<vmem>>, vector<1x32x64xbf16>
    %124 = vector.shape_cast %123 : vector<1x32x64xbf16> to vector<32x64xbf16>
    %cst_85 = arith.constant dense<0.000000e+00> : vector<256x64xf32>
    %125 = tpu.matmul %122, %124, %cst_85 {dimension_numbers = #tpu.dot_dimension_numbers<[1], [0], [0], [1], [0, 0, 1, 1], [], []>} : vector<256x32xbf16>, vector<32x64xbf16>, vector<256x64xf32> -> vector<256x64xf32>
    %126 = arith.addf %121, %125 : vector<256x64xf32>
    %127 = arith.truncf %117 : vector<256x32xf32> to vector<256x32xbf16>
    %c2_86 = arith.constant 2 : index
    %c0_87 = arith.constant 0 : index
    %c0_88 = arith.constant 0 : index
    %128 = vector.load %arg5[%c2_86, %c0_87, %c0_88] : memref<3x32x64xbf16, #tpu.memory_space<vmem>>, vector<1x32x64xbf16>
    %129 = vector.shape_cast %128 : vector<1x32x64xbf16> to vector<32x64xbf16>
    %cst_89 = arith.constant dense<0.000000e+00> : vector<256x64xf32>
    %130 = tpu.matmul %127, %129, %cst_89 {dimension_numbers = #tpu.dot_dimension_numbers<[1], [0], [0], [1], [0, 0, 1, 1], [], []>} : vector<256x32xbf16>, vector<32x64xbf16>, vector<256x64xf32> -> vector<256x64xf32>
    %131 = arith.addf %126, %130 : vector<256x64xf32>
    %132 = vector.broadcast %4 : vector<1x64xf32> to vector<256x64xf32>
    %133 = arith.addf %131, %132 : vector<256x64xf32>
    %cst_90 = arith.constant 0.000000e+00 : f32
    %134 = vector.broadcast %cst_90 : f32 to vector<256x64xf32>
    %135 = arith.maximumf %133, %134 : vector<256x64xf32>
    %c8_91 = arith.constant 8 : index
    %c0_92 = arith.constant 0 : index
    %136 = vector.load %arg12[%c8_91, %c0_92] : memref<1040x64xf32, #tpu.memory_space<vmem>>, vector<256x64xf32>
    tpu.vector_store %arg12[%c8_91, %c0_92], %135 {strides = array<i32>} : memref<1040x64xf32, #tpu.memory_space<vmem>>, vector<256x64xf32>,
    %c6_93 = arith.constant 6 : index
    %c0_94 = arith.constant 0 : index
    %137 = tpu.strided_load %arg12[%c6_93, %c0_94] {strides = array<i32: 2, 1>} : memref<1040x64xf32, #tpu.memory_space<vmem>>, vector<128x64xf32>
    %c7_95 = arith.constant 7 : index
    %c0_96 = arith.constant 0 : index
    %138 = tpu.strided_load %arg12[%c7_95, %c0_96] {strides = array<i32: 2, 1>} : memref<1040x64xf32, #tpu.memory_space<vmem>>, vector<128x64xf32>
    %139 = arith.maximumf %137, %138 : vector<128x64xf32>
    %c8_97 = arith.constant 8 : index
    %c0_98 = arith.constant 0 : index
    %140 = tpu.strided_load %arg12[%c8_97, %c0_98] {strides = array<i32: 2, 1>} : memref<1040x64xf32, #tpu.memory_space<vmem>>, vector<128x64xf32>
    %c9_99 = arith.constant 9 : index
    %c0_100 = arith.constant 0 : index
    %141 = tpu.strided_load %arg12[%c9_99, %c0_100] {strides = array<i32: 2, 1>} : memref<1040x64xf32, #tpu.memory_space<vmem>>, vector<128x64xf32>
    %142 = arith.maximumf %140, %141 : vector<128x64xf32>
    %c10_101 = arith.constant 10 : index
    %c0_102 = arith.constant 0 : index
    %143 = tpu.strided_load %arg12[%c10_101, %c0_102] {strides = array<i32: 2, 1>} : memref<1040x64xf32, #tpu.memory_space<vmem>>, vector<128x64xf32>
    %c11_103 = arith.constant 11 : index
    %c0_104 = arith.constant 0 : index
    %144 = tpu.strided_load %arg12[%c11_103, %c0_104] {strides = array<i32: 2, 1>} : memref<1040x64xf32, #tpu.memory_space<vmem>>, vector<128x64xf32>
    %145 = arith.maximumf %143, %144 : vector<128x64xf32>
    %146 = tpu.iota {dimensions = array<i32: 0>} : vector<128x1xi32>
    %c7_i32 = arith.constant 7 : i32
    %147 = vector.broadcast %c7_i32 : i32 to vector<128x1xi32>
    %148 = arith.andi %146, %147 : vector<128x1xi32>
    %c0_i32_105 = arith.constant 0 : i32
    %149 = vector.broadcast %c0_i32_105 : i32 to vector<128x1xi32>
    %150 = arith.cmpi eq, %148, %149 : vector<128x1xi32>
    %cst_106 = arith.constant 0.000000e+00 : f32
    %151 = vector.shape_cast %150 : vector<128x1xi1> to vector<128x1xi1>
    %152 = vector.broadcast %151 : vector<128x1xi1> to vector<128x64xi1>
    %153 = vector.broadcast %cst_106 : f32 to vector<128x64xf32>
    %154 = arith.select %152, %153, %139 : vector<128x64xi1>, vector<128x64xf32>
    %c7_i32_107 = arith.constant 7 : i32
    %155 = vector.broadcast %c7_i32_107 : i32 to vector<128x1xi32>
    %156 = arith.cmpi eq, %148, %155 : vector<128x1xi32>
    %cst_108 = arith.constant 0.000000e+00 : f32
    %157 = vector.shape_cast %156 : vector<128x1xi1> to vector<128x1xi1>
    %158 = vector.broadcast %157 : vector<128x1xi1> to vector<128x64xi1>
    %159 = vector.broadcast %cst_108 : f32 to vector<128x64xf32>
    %160 = arith.select %158, %159, %145 : vector<128x64xi1>, vector<128x64xf32>
    %161 = arith.truncf %154 : vector<128x64xf32> to vector<128x64xbf16>
    %c0_109 = arith.constant 0 : index
    %c0_110 = arith.constant 0 : index
    %c0_111 = arith.constant 0 : index
    %162 = vector.load %arg6[%c0_109, %c0_110, %c0_111] : memref<3x64x64xbf16, #tpu.memory_space<vmem>>, vector<1x64x64xbf16>
    %163 = vector.shape_cast %162 : vector<1x64x64xbf16> to vector<64x64xbf16>
    %cst_112 = arith.constant dense<0.000000e+00> : vector<128x64xf32>
    %164 = tpu.matmul %161, %163, %cst_112 {dimension_numbers = #tpu.dot_dimension_numbers<[1], [0], [0], [1], [0, 0, 1, 1], [], []>} : vector<128x64xbf16>, vector<64x64xbf16>, vector<128x64xf32> -> vector<128x64xf32>
    %165 = arith.truncf %142 : vector<128x64xf32> to vector<128x64xbf16>
    %c1_113 = arith.constant 1 : index
    %c0_114 = arith.constant 0 : index
    %c0_115 = arith.constant 0 : index
    %166 = vector.load %arg6[%c1_113, %c0_114, %c0_115] : memref<3x64x64xbf16, #tpu.memory_space<vmem>>, vector<1x64x64xbf16>
    %167 = vector.shape_cast %166 : vector<1x64x64xbf16> to vector<64x64xbf16>
    %cst_116 = arith.constant dense<0.000000e+00> : vector<128x64xf32>
    %168 = tpu.matmul %165, %167, %cst_116 {dimension_numbers = #tpu.dot_dimension_numbers<[1], [0], [0], [1], [0, 0, 1, 1], [], []>} : vector<128x64xbf16>, vector<64x64xbf16>, vector<128x64xf32> -> vector<128x64xf32>
    %169 = arith.addf %164, %168 : vector<128x64xf32>
    %170 = arith.truncf %160 : vector<128x64xf32> to vector<128x64xbf16>
    %c2_117 = arith.constant 2 : index
    %c0_118 = arith.constant 0 : index
    %c0_119 = arith.constant 0 : index
    %171 = vector.load %arg6[%c2_117, %c0_118, %c0_119] : memref<3x64x64xbf16, #tpu.memory_space<vmem>>, vector<1x64x64xbf16>
    %172 = vector.shape_cast %171 : vector<1x64x64xbf16> to vector<64x64xbf16>
    %cst_120 = arith.constant dense<0.000000e+00> : vector<128x64xf32>
    %173 = tpu.matmul %170, %172, %cst_120 {dimension_numbers = #tpu.dot_dimension_numbers<[1], [0], [0], [1], [0, 0, 1, 1], [], []>} : vector<128x64xbf16>, vector<64x64xbf16>, vector<128x64xf32> -> vector<128x64xf32>
    %174 = arith.addf %169, %173 : vector<128x64xf32>
    %175 = vector.broadcast %5 : vector<1x64xf32> to vector<128x64xf32>
    %176 = arith.addf %174, %175 : vector<128x64xf32>
    %cst_121 = arith.constant 0.000000e+00 : f32
    %177 = vector.broadcast %cst_121 : f32 to vector<128x64xf32>
    %178 = arith.maximumf %176, %177 : vector<128x64xf32>
    %c8_122 = arith.constant 8 : index
    %c0_123 = arith.constant 0 : index
    %179 = vector.load %arg12[%c8_122, %c0_123] : memref<1040x64xf32, #tpu.memory_space<vmem>>, vector<128x64xf32>
    tpu.vector_store %arg12[%c8_122, %c0_123], %178 {strides = array<i32>} : memref<1040x64xf32, #tpu.memory_space<vmem>>, vector<128x64xf32>,
    %c6_124 = arith.constant 6 : index
    %c0_125 = arith.constant 0 : index
    %180 = tpu.strided_load %arg12[%c6_124, %c0_125] {strides = array<i32: 2, 1>} : memref<1040x64xf32, #tpu.memory_space<vmem>>, vector<64x64xf32>
    %c7_126 = arith.constant 7 : index
    %c0_127 = arith.constant 0 : index
    %181 = tpu.strided_load %arg12[%c7_126, %c0_127] {strides = array<i32: 2, 1>} : memref<1040x64xf32, #tpu.memory_space<vmem>>, vector<64x64xf32>
    %182 = arith.maximumf %180, %181 : vector<64x64xf32>
    %c8_128 = arith.constant 8 : index
    %c0_129 = arith.constant 0 : index
    %183 = tpu.strided_load %arg12[%c8_128, %c0_129] {strides = array<i32: 2, 1>} : memref<1040x64xf32, #tpu.memory_space<vmem>>, vector<64x64xf32>
    %c9_130 = arith.constant 9 : index
    %c0_131 = arith.constant 0 : index
    %184 = tpu.strided_load %arg12[%c9_130, %c0_131] {strides = array<i32: 2, 1>} : memref<1040x64xf32, #tpu.memory_space<vmem>>, vector<64x64xf32>
    %185 = arith.maximumf %183, %184 : vector<64x64xf32>
    %c10_132 = arith.constant 10 : index
    %c0_133 = arith.constant 0 : index
    %186 = tpu.strided_load %arg12[%c10_132, %c0_133] {strides = array<i32: 2, 1>} : memref<1040x64xf32, #tpu.memory_space<vmem>>, vector<64x64xf32>
    %c11_134 = arith.constant 11 : index
    %c0_135 = arith.constant 0 : index
    %187 = tpu.strided_load %arg12[%c11_134, %c0_135] {strides = array<i32: 2, 1>} : memref<1040x64xf32, #tpu.memory_space<vmem>>, vector<64x64xf32>
    %188 = arith.maximumf %186, %187 : vector<64x64xf32>
    %189 = tpu.iota {dimensions = array<i32: 0>} : vector<64x1xi32>
    %c3_i32 = arith.constant 3 : i32
    %190 = vector.broadcast %c3_i32 : i32 to vector<64x1xi32>
    %191 = arith.andi %189, %190 : vector<64x1xi32>
    %c0_i32_136 = arith.constant 0 : i32
    %192 = vector.broadcast %c0_i32_136 : i32 to vector<64x1xi32>
    %193 = arith.cmpi eq, %191, %192 : vector<64x1xi32>
    %cst_137 = arith.constant 0.000000e+00 : f32
    %194 = vector.shape_cast %193 : vector<64x1xi1> to vector<64x1xi1>
    %195 = vector.broadcast %194 : vector<64x1xi1> to vector<64x64xi1>
    %196 = vector.broadcast %cst_137 : f32 to vector<64x64xf32>
    %197 = arith.select %195, %196, %182 : vector<64x64xi1>, vector<64x64xf32>
    %c3_i32_138 = arith.constant 3 : i32
    %198 = vector.broadcast %c3_i32_138 : i32 to vector<64x1xi32>
    %199 = arith.cmpi eq, %191, %198 : vector<64x1xi32>
    %cst_139 = arith.constant 0.000000e+00 : f32
    %200 = vector.shape_cast %199 : vector<64x1xi1> to vector<64x1xi1>
    %201 = vector.broadcast %200 : vector<64x1xi1> to vector<64x64xi1>
    %202 = vector.broadcast %cst_139 : f32 to vector<64x64xf32>
    %203 = arith.select %201, %202, %188 : vector<64x64xi1>, vector<64x64xf32>
    %204 = arith.truncf %197 : vector<64x64xf32> to vector<64x64xbf16>
    %c0_140 = arith.constant 0 : index
    %c0_141 = arith.constant 0 : index
    %c0_142 = arith.constant 0 : index
    %205 = vector.load %arg7[%c0_140, %c0_141, %c0_142] : memref<3x64x64xbf16, #tpu.memory_space<vmem>>, vector<1x64x64xbf16>
    %206 = vector.shape_cast %205 : vector<1x64x64xbf16> to vector<64x64xbf16>
    %cst_143 = arith.constant dense<0.000000e+00> : vector<64x64xf32>
    %207 = tpu.matmul %204, %206, %cst_143 {dimension_numbers = #tpu.dot_dimension_numbers<[1], [0], [0], [1], [0, 0, 1, 1], [], []>} : vector<64x64xbf16>, vector<64x64xbf16>, vector<64x64xf32> -> vector<64x64xf32>
    %208 = arith.truncf %185 : vector<64x64xf32> to vector<64x64xbf16>
    %c1_144 = arith.constant 1 : index
    %c0_145 = arith.constant 0 : index
    %c0_146 = arith.constant 0 : index
    %209 = vector.load %arg7[%c1_144, %c0_145, %c0_146] : memref<3x64x64xbf16, #tpu.memory_space<vmem>>, vector<1x64x64xbf16>
    %210 = vector.shape_cast %209 : vector<1x64x64xbf16> to vector<64x64xbf16>
    %cst_147 = arith.constant dense<0.000000e+00> : vector<64x64xf32>
    %211 = tpu.matmul %208, %210, %cst_147 {dimension_numbers = #tpu.dot_dimension_numbers<[1], [0], [0], [1], [0, 0, 1, 1], [], []>} : vector<64x64xbf16>, vector<64x64xbf16>, vector<64x64xf32> -> vector<64x64xf32>
    %212 = arith.addf %207, %211 : vector<64x64xf32>
    %213 = arith.truncf %203 : vector<64x64xf32> to vector<64x64xbf16>
    %c2_148 = arith.constant 2 : index
    %c0_149 = arith.constant 0 : index
    %c0_150 = arith.constant 0 : index
    %214 = vector.load %arg7[%c2_148, %c0_149, %c0_150] : memref<3x64x64xbf16, #tpu.memory_space<vmem>>, vector<1x64x64xbf16>
    %215 = vector.shape_cast %214 : vector<1x64x64xbf16> to vector<64x64xbf16>
    %cst_151 = arith.constant dense<0.000000e+00> : vector<64x64xf32>
    %216 = tpu.matmul %213, %215, %cst_151 {dimension_numbers = #tpu.dot_dimension_numbers<[1], [0], [0], [1], [0, 0, 1, 1], [], []>} : vector<64x64xbf16>, vector<64x64xbf16>, vector<64x64xf32> -> vector<64x64xf32>
    %217 = arith.addf %212, %216 : vector<64x64xf32>
    %218 = vector.broadcast %6 : vector<1x64xf32> to vector<64x64xf32>
    %219 = arith.addf %217, %218 : vector<64x64xf32>
    %cst_152 = arith.constant 0.000000e+00 : f32
    %220 = vector.broadcast %cst_152 : f32 to vector<64x64xf32>
    %221 = arith.maximumf %219, %220 : vector<64x64xf32>
    %c0_153 = arith.constant 0 : index
    %c0_154 = arith.constant 0 : index
    %222 = vector.load %arg8[%c0_153, %c0_154] : memref<16x64xf32, #tpu.memory_space<vmem>>, vector<16x64xf32>
    %cst_155 = arith.constant dense<0.000000e+00> : vector<16x64xf32>
    %223 = tpu.matmul %222, %221, %cst_155 {dimension_numbers = #tpu.dot_dimension_numbers<[1], [0], [0], [1], [0, 0, 1, 1], [], []>} : vector<16x64xf32>, vector<64x64xf32>, vector<16x64xf32> -> vector<16x64xf32>
    %c0_156 = arith.constant 0 : index
    %c0_157 = arith.constant 0 : index
    %224 = vector.load %arg9[%c0_156, %c0_157] : memref<64x32xf32, #tpu.memory_space<vmem>>, vector<64x32xf32>
    %cst_158 = arith.constant dense<0.000000e+00> : vector<16x32xf32>
    %225 = tpu.matmul %223, %224, %cst_158 {dimension_numbers = #tpu.dot_dimension_numbers<[1], [0], [0], [1], [0, 0, 1, 1], [], []>} : vector<16x64xf32>, vector<64x32xf32>, vector<16x32xf32> -> vector<16x32xf32>
    %226 = vector.broadcast %7 : vector<1x32xf32> to vector<16x32xf32>
    %227 = arith.addf %225, %226 : vector<16x32xf32>
    %cst_159 = arith.constant 0.000000e+00 : f32
    %228 = vector.broadcast %cst_159 : f32 to vector<16x32xf32>
    %229 = arith.maximumf %227, %228 : vector<16x32xf32>
    %230 = arith.mulf %229, %229 : vector<16x32xf32>
    %cst_160 = arith.constant dense<0.000000e+00> : vector<16xf32>
    %231 = vector.multi_reduction <add>, %230, %cst_160 [1] : vector<16x32xf32> to vector<16xf32>
    %232 = vector.shape_cast %231 : vector<16xf32> to vector<16x1xf32>
    %cst_161 = arith.constant 1.000000e-24 : f32
    %233 = vector.broadcast %cst_161 : f32 to vector<16x1xf32>
    %234 = arith.maximumf %232, %233 : vector<16x1xf32>
    %235 = math.rsqrt %234 : vector<16x1xf32>
    %236 = vector.broadcast %235 : vector<16x1xf32> to vector<16x32xf32>
    %237 = arith.mulf %229, %236 : vector<16x32xf32>
    %c0_162 = arith.constant 0 : index
    %c0_163 = arith.constant 0 : index
    %238 = vector.load %arg10[%c0_162, %c0_163] : memref<32x128xf32, #tpu.memory_space<vmem>>, vector<32x128xf32>
    %cst_164 = arith.constant dense<0.000000e+00> : vector<16x128xf32>
    %239 = tpu.matmul %237, %238, %cst_164 {dimension_numbers = #tpu.dot_dimension_numbers<[1], [0], [0], [1], [0, 0, 1, 1], [], []>} : vector<16x32xf32>, vector<32x128xf32>, vector<16x128xf32> -> vector<16x128xf32>
    %240 = vector.broadcast %8 : vector<1x128xf32> to vector<16x128xf32>
    %241 = arith.addf %239, %240 : vector<16x128xf32>
    %c0_165 = arith.constant 0 : index
    %c0_166 = arith.constant 0 : index
    %242 = vector.load %arg11[%c0_165, %c0_166] : memref<16x128xf32, #tpu.memory_space<vmem>>, vector<16x128xf32>
    tpu.vector_store %arg11[%c0_165, %c0_166], %241 {strides = array<i32>} : memref<16x128xf32, #tpu.memory_space<vmem>>, vector<16x128xf32>,
    return
  }
  func.func @transform_0(%arg0: i32) -> (i32, i32) {
    %c0_i32 = arith.constant 0 : i32
    %c0_i32_0 = arith.constant 0 : i32
    return %arg0, %c0_i32 : i32, i32
  }
  func.func @transform_1(%arg0: i32) -> (i32, i32) {
    %c0_i32 = arith.constant 0 : i32
    %c0_i32_0 = arith.constant 0 : i32
    %c0_i32_1 = arith.constant 0 : i32
    return %c0_i32, %c0_i32_0 : i32, i32
  }
  func.func @transform_2(%arg0: i32) -> (i32, i32, i32) {
    %c0_i32 = arith.constant 0 : i32
    %c0_i32_0 = arith.constant 0 : i32
    %c0_i32_1 = arith.constant 0 : i32
    %c0_i32_2 = arith.constant 0 : i32
    return %c0_i32, %c0_i32_0, %c0_i32_1 : i32, i32, i32
  }
  func.func @transform_3(%arg0: i32) -> (i32, i32, i32) {
    %c0_i32 = arith.constant 0 : i32
    %c0_i32_0 = arith.constant 0 : i32
    %c0_i32_1 = arith.constant 0 : i32
    %c0_i32_2 = arith.constant 0 : i32
    return %c0_i32, %c0_i32_0, %c0_i32_1 : i32, i32, i32
  }
  func.func @transform_4(%arg0: i32) -> (i32, i32, i32) {
    %c0_i32 = arith.constant 0 : i32
    %c0_i32_0 = arith.constant 0 : i32
    %c0_i32_1 = arith.constant 0 : i32
    %c0_i32_2 = arith.constant 0 : i32
    return %c0_i32, %c0_i32_0, %c0_i32_1 : i32, i32, i32
  }
  func.func @transform_5(%arg0: i32) -> (i32, i32, i32) {
    %c0_i32 = arith.constant 0 : i32
    %c0_i32_0 = arith.constant 0 : i32
    %c0_i32_1 = arith.constant 0 : i32
    %c0_i32_2 = arith.constant 0 : i32
    return %c0_i32, %c0_i32_0, %c0_i32_1 : i32, i32, i32
  }
  func.func @transform_6(%arg0: i32) -> (i32, i32, i32) {
    %c0_i32 = arith.constant 0 : i32
    %c0_i32_0 = arith.constant 0 : i32
    %c0_i32_1 = arith.constant 0 : i32
    %c0_i32_2 = arith.constant 0 : i32
    return %c0_i32, %c0_i32_0, %c0_i32_1 : i32, i32, i32
  }
  func.func @transform_7(%arg0: i32) -> (i32, i32) {
    %c0_i32 = arith.constant 0 : i32
    %c0_i32_0 = arith.constant 0 : i32
    %c0_i32_1 = arith.constant 0 : i32
    return %c0_i32, %c0_i32_0 : i32, i32
  }
  func.func @transform_8(%arg0: i32) -> (i32, i32) {
    %c0_i32 = arith.constant 0 : i32
    %c0_i32_0 = arith.constant 0 : i32
    %c0_i32_1 = arith.constant 0 : i32
    return %c0_i32, %c0_i32_0 : i32, i32
  }
  func.func @transform_9(%arg0: i32) -> (i32, i32) {
    %c0_i32 = arith.constant 0 : i32
    %c0_i32_0 = arith.constant 0 : i32
    %c0_i32_1 = arith.constant 0 : i32
    return %c0_i32, %c0_i32_0 : i32, i32
  }
  func.func @transform_10(%arg0: i32) -> (i32, i32) {
    %c0_i32 = arith.constant 0 : i32
    %c0_i32_0 = arith.constant 0 : i32
    return %arg0, %c0_i32 : i32, i32
  }
}

</mosaic_0001>

<bundles_post_ra>
// kernel: tpu_custom_call.1
= control target key start
LH: loop header
LB: loop body
LE: loop exit
PB: predicated region body
PF: predicated region fallthrough
CT: control target
= control target key end

     0   :  { %vm2421_vm0 = vcmask 1041408   ;;  %v817_v2 = vlaneseq  ;;  %vm432_vm1 = vcmask 31744   ;;  %s13473_s0 = inlined_call_operand.vmem [shape: f32[1024,4], index: 0, kind: input, shape index: {}]   ;;  %s13474_s1 = inlined_call_operand.vmem [shape: f32[16,128], index: 1, kind: input, shape index: {}]   ;;  %s13475_s2 = inlined_call_operand.vmem [shape: bf16[3,4,16], index: 2, kind: input, shape index: {}]   ;;  %s13476_s3 = inlined_call_operand.vmem [shape: bf16[3,16,32], index: 3, kind: input, shape index: {}]   ;;  %s13477_s4 = inlined_call_operand.vmem [shape: bf16[3,32,64], index: 4, kind: input, shape index: {}]   ;;  %s13478_s5 = inlined_call_operand.vmem [shape: bf16[3,64,64], index: 5, kind: input, shape index: {}]   ;;  %s13479_s6 = inlined_call_operand.vmem [shape: bf16[3,64,64], index: 6, kind: input, shape index: {}]   ;;  %s13480_s7 = inlined_call_operand.vmem [shape: f32[16,64], index: 7, kind: input, shape index: {}]   ;;  %s13481_s8 = inlined_call_operand.vmem [shape: f32[64,32], index: 8, kind: input, shape index: {}]   ;;  %s13482_s9 = inlined_call_operand.vmem [shape: f32[32,128], index: 9, kind: input, shape index: {}]   ;;  %s13483_s10 = inlined_call_operand.hbm [shape: f32[16,128], index: 10, kind: output, shape index: {}]  }
   0x1   :  { %v9561_v0 = vld [vmem:[%s13475_s2 + $0x2] sm:$0x3]  ;;  %v47_v4 = vld [vmem:[%s13473_s0 + $0x8] sm:$0xff]  ;;  %v10280_v5 = vld [vmem:[%s13474_s1] ss:$0 sm:$0xff] }
   0x2   :  { %v46_v1 = vld [vmem:[%s13473_s0] sm:$0xff]  ;;  %v2423_v3 = vsel %vm2421_vm0, %v9561_v0, 0  ;;  %v171_v8 = vld [vmem:[%s13473_s0 + $0x3e8] sm:$0xff]  ;;  %v176_v10 = vmul.f32 %v10280_v5, %v47_v4  ;;  %v172_v13 = vld [vmem:[%s13473_s0 + $0x3f0] sm:$0xff]  ;;  %v10315_v21 = vshrl.u32 %v817_v2, 7 }
   0x3   :  { %2432 = vmatpush.bf16.msra.mxu0 %v2423_v3  ;;  %10150 = vmatpush.bf16.msra.mxu1 %v2423_v3  ;;  %v10285_v6 = vld [vmem:[%s13474_s1 + $0x1] ss:$0 sm:$0xff]  ;;  %v175_v9 = vmul.f32 %v10280_v5, %v46_v1  ;;  %v300_v12 = vmul.f32 %v10280_v5, %v171_v8  ;;  %v173_v14 = vld [vmem:[%s13473_s0 + $0x3f8] sm:$0xff]  ;;  %v301_v16 = vmul.f32 %v10280_v5, %v172_v13  ;;  %v9690_v19 = vld [vmem:[%s13475_s2 + $0x4] sm:$0x3] }
   0x4   :  { %v170_v7 = vld [vmem:[%s13473_s0 + $0x3e0] sm:$0xff]  ;;  %10151 = vmatpush.bf16.msra.mxu2 %v2423_v3  ;;  %v302_v17 = vmul.f32 %v10280_v5, %v173_v14  ;;  %v48_v20 = vld [vmem:[%s13473_s0 + $0x10] sm:$0xff]  ;;  %v305_v23 = vadd.f32 %v10285_v6, %v176_v10  ;;  %v49_v26 = vld [vmem:[%s13473_s0 + $0x18] sm:$0xff]  ;;  %v3537_v30 = vsel %vm2421_vm0, %v9690_v19, 0 }
   0x5   :  { %v299_v11 = vmul.f32 %v10280_v5, %v170_v7  ;;  %v2162_v15 = vld [vmem:[%s13475_s2] sm:$0x3]  ;;  %v304_v22 = vadd.f32 %v10285_v6, %v175_v9  ;;  %v429_v25 = vadd.f32 %v10285_v6, %v300_v12  ;;  %v430_v28 = vadd.f32 %v10285_v6, %v301_v16  ;;  %v51_v34 = vld [vmem:[%s13473_s0 + $0x28] sm:$0xff] }
   0x6   :  { %v2947_v18 = vsel %vm2421_vm0, %v2162_v15, 0  ;;  %v50_v27 = vld [vmem:[%s13473_s0 + $0x20] sm:$0xff]  ;;  %v431_v29 = vadd.f32 %v10285_v6, %v302_v17  ;;  %v177_v31 = vmul.f32 %v10280_v5, %v48_v20  ;;  %434 = vst.msk [vmem:[#allocation2 + $0x10] sm:$0xff] %vm432_vm1, %v305_v23  ;;  %v178_v36 = vmul.f32 %v10280_v5, %v49_v26 }
   0x7   :  { %v428_v24 = vadd.f32 %v10285_v6, %v299_v11  ;;  %2956 = vmatpush.bf16.msrb.mxu1 %v2947_v18  ;;  %433 = vst.msk [vmem:[#allocation2 + $0x8] sm:$0xff] %vm432_vm1, %v304_v22  ;;  %v2163_v32 = vpack.c.bf16 %v305_v23, %v304_v22  ;;  %v179_v37 = vmul.f32 %v10280_v5, %v50_v27 }
   0x8   :  { %3546 = vmatpush.bf16.msrb.mxu2 %v3537_v30  ;;  %v2226_v35 = vpack.c.bf16 %v431_v29, %v430_v28  ;;  %v306_v38 = vadd.f32 %v10285_v6, %v177_v31 }
   0x9   :  { %v2225_v33 = vpack.c.bf16 %v429_v25, %v428_v24  ;;  %9562 = vmatmul.msk.bf16.vlgmr.msra.gmra.mxu0 %vm432_vm1, %v2163_v32  ;;  %557 = vst.msk [vmem:[#allocation2 + $0x3e8] sm:$0xff] %vm432_vm1, %v428_v24 }
   0xb   :  { %9624 = vmatmul.msk.bf16.vlgmr.msra.gmra.mxu1 %vm432_vm1, %v2225_v33 }
   0xc   :  { %15 = vsyncpa [#allocation4], 0  ;;  %558 = vst.msk [vmem:[#allocation2 + $0x3f0] sm:$0xff] %vm432_vm1, %v429_v25  ;;  %9625 = vmatmul.msk.bf16.vlgmr.msra.gmra.mxu2 %vm432_vm1, %v2226_v35  ;;  %v180_v39 = vmul.f32 %v10280_v5, %v51_v34  ;;  %v52_v40 = vld [vmem:[%s13473_s0 + $0x30] sm:$0xff]  ;;  %v53_v41 = vld [vmem:[%s13473_s0 + $0x38] sm:$0xff]  ;;  %v946_v42 = vand.u32 63, %v10315_v21  ;;  %v308_v43 = vadd.f32 %v10285_v6, %v179_v37  ;;  %v307_v45 = vadd.f32 %v10285_v6, %v178_v36 }
   0xd   :  { %559 = vst.msk [vmem:[#allocation2 + $0x3f8] sm:$0xff] %vm432_vm1, %v430_v28  ;;  %v181_v44 = vmul.f32 %v10280_v5, %v52_v40  ;;  %v182_v46 = vmul.f32 %v10280_v5, %v53_v41  ;;  %v54_v58 = vld [vmem:[%s13473_s0 + $0x40] sm:$0xff]  ;;  %v55_v59 = vld [vmem:[%s13473_s0 + $0x48] sm:$0xff]  ;;  %v56_v9 = vld [vmem:[%s13473_s0 + $0x50] sm:$0xff]  ;;  %v10398_v23 = vadd.s32 56, %v10315_v21  ;;  %vm4253_vm7 = vcmask 130048  }
   0xe   :  { %560 = vst.msk [vmem:[#allocation2 + $0x400] sm:$0xff] %vm432_vm1, %v431_v29  ;;  %v309_v48 = vadd.f32 %v10285_v6, %v180_v39  ;;  %v561_v49 = vld [vmem:[#allocation2 + $0x7] sm:$0xff]  ;;  %vm1074_vm2 = vcmp.eq.s32.totalorder %v946_v42, 0  ;;  %v562_v51 = vld [vmem:[#allocation2 + $0xf] sm:$0xff]  ;;  %v2164_v55 = vpack.c.bf16 %v307_v45, %v306_v38  ;;  %v183_v60 = vmul.f32 %v10280_v5, %v54_v58  ;;  %v57_v10 = vld [vmem:[%s13473_s0 + $0x58] sm:$0xff]  ;;  %s9549_s2 = sshll.u32 %s13483_s10, 4  ;;  %s9550_s2 = int_to_ptr.hbm [resolvable:$true] %s9549_s2 }
   0xf   :  { %435 = vst.msk [vmem:[#allocation2 + $0x18] sm:$0xff] %vm432_vm1, %v306_v38  ;;  %v310_v47 = vadd.f32 %v10285_v6, %v181_v44  ;;  %v311_v50 = vadd.f32 %v10285_v6, %v182_v46  ;;  %v1458_v52 = vsel %vm1074_vm2, 0.0, %v561_v49  ;;  %v689_v53 = vld [vmem:[#allocation2 + $0x9] sm:$0xff]  ;;  %v184_v61 = vmul.f32 %v10280_v5, %v55_v59  ;;  %v58_v24 = vld [vmem:[%s13473_s0 + $0x60] sm:$0xff]  ;;  %v61_v41 = vld [vmem:[%s13473_s0 + $0x78] sm:$0xff]  ;;  %s10210_s19 = smov 128  }
  0x10   :  { %436 = vst.msk [vmem:[#allocation2 + $0x20] sm:$0xff] %vm432_vm1, %v307_v45  ;;  %v2098_v56 = vpack.c.bf16 %v562_v51, %v1458_v52  ;;  %v312_v62 = vadd.f32 %v10285_v6, %v183_v60  ;;  %v2165_v4 = vpack.c.bf16 %v309_v48, %v308_v43  ;;  %v185_v11 = vmul.f32 %v10280_v5, %v56_v9  ;;  %v59_v25 = vld [vmem:[%s13473_s0 + $0x68] sm:$0xff]  ;;  %v60_v40 = vld [vmem:[%s13473_s0 + $0x70] sm:$0xff]  ;;  %s10211_s20 = smov 8  }
  0x11   :  { %437 = vst.msk [vmem:[#allocation2 + $0x28] sm:$0xff] %vm432_vm1, %v308_v43  ;;  %v313_v63 = vadd.f32 %v10285_v6, %v184_v61  ;;  %v186_v12 = vmul.f32 %v10280_v5, %v57_v10  ;;  %v2166_v19 = vpack.c.bf16 %v311_v50, %v310_v47  ;;  %v187_v26 = vmul.f32 %v10280_v5, %v58_v24 }
  0x12   :  { %438 = vst.msk [vmem:[#allocation2 + $0x30] sm:$0xff] %vm432_vm1, %v309_v48  ;;  %v314_v13 = vadd.f32 %v10285_v6, %v185_v11  ;;  %v188_v27 = vmul.f32 %v10280_v5, %v59_v25  ;;  %v953_v28 = vand.u32 63, %v10398_v23  ;;  %v10417_v39 = vadd.s32 64, %v10315_v21 }
  0x13   :  { %439 = vst.msk [vmem:[#allocation2 + $0x38] sm:$0xff] %vm432_vm1, %v310_v47  ;;  %v315_v14 = vadd.f32 %v10285_v6, %v186_v12  ;;  %v316_v29 = vadd.f32 %v10285_v6, %v187_v26  ;;  %v2167_v36 = vpack.c.bf16 %v313_v63, %v312_v62  ;;  %v189_v43 = vmul.f32 %v10280_v5, %v60_v40 }
  0x14   :  { %440 = vst.msk [vmem:[#allocation2 + $0x40] sm:$0xff] %vm432_vm1, %v311_v50  ;;  %v317_v30 = vadd.f32 %v10285_v6, %v188_v27  ;;  %vm1593_vm3 = vcmp.eq.s32.totalorder %v953_v28, 63  ;;  %v954_v42 = vand.u32 63, %v10417_v39  ;;  %v190_v44 = vmul.f32 %v10280_v5, %v61_v41 }
  0x15   :  { %441 = vst.msk [vmem:[#allocation2 + $0x48] sm:$0xff] %vm432_vm1, %v312_v62  ;;  %v318_v45 = vadd.f32 %v10285_v6, %v189_v43  ;;  %v2168_v52 = vpack.c.bf16 %v315_v14, %v314_v13  ;;  %v63_v62 = vld [vmem:[%s13473_s0 + $0x88] sm:$0xff]  ;;  %v10494_v40 = vadd.s32 128, %v10315_v21 }
  0x16   :  { %v690_v54 = vld [vmem:[#allocation2 + $0x11] sm:$0xff]  ;;  %442 = vst.msk [vmem:[#allocation2 + $0x50] sm:$0xff] %vm432_vm1, %v313_v63  ;;  %v319_v46 = vadd.f32 %v10285_v6, %v190_v44  ;;  %vm1082_vm4 = vcmp.eq.s32.totalorder %v954_v42, 0  ;;  %v192_v63 = vmul.f32 %v10280_v5, %v63_v62 }
  0x17   :  { %v3278_v57 = vpack.c.bf16 %v690_v54, %v689_v53  ;;  %v563_v0 = vld [vmem:[#allocation2 + $0x17] sm:$0xff]  ;;  %v564_v1 = vld [vmem:[#allocation2 + $0x1f] sm:$0xff]  ;;  %443 = vst.msk [vmem:[#allocation2 + $0x58] sm:$0xff] %vm432_vm1, %v314_v13  ;;  %v962_v41 = vand.u32 63, %v10494_v40 }
  0x18   :  { %v691_v2 = vld [vmem:[#allocation2 + $0x19] sm:$0xff]  ;;  %v692_v3 = vld [vmem:[#allocation2 + $0x21] sm:$0xff]  ;;  %v2099_v7 = vpack.c.bf16 %v564_v1, %v563_v0  ;;  %444 = vst.msk [vmem:[#allocation2 + $0x60] sm:$0xff] %vm432_vm1, %v315_v14  ;;  %v2169_v0 = vpack.c.bf16 %v317_v30, %v316_v29  ;;  %v68_v42 = vld [vmem:[%s13473_s0 + $0xb0] sm:$0xff] }
  0x19   :  { %9563 = vmatmul.msk.bf16.gmra.mxu0 %vm432_vm1, %v2164_v55  ;;  %v3279_v8 = vpack.c.bf16 %v692_v3, %v691_v2  ;;  %v565_v15 = vld [vmem:[#allocation2 + $0x27] sm:$0xff]  ;;  %v566_v16 = vld [vmem:[#allocation2 + $0x2f] sm:$0xff]  ;;  %13505 = vst [vmem:[#allocation6_spill] sm:$0xff] %v10398_v23  ;;  %v321_v3 = vadd.f32 %v10285_v6, %v192_v63  ;;  %v65_v13 = vld [vmem:[%s13473_s0 + $0x98] sm:$0xff]  ;;  %v197_v43 = vmul.f32 %v10280_v5, %v68_v42  ;;  %vm1090_vm6 = vcmp.eq.s32.totalorder %v962_v41, 0 }
  0x1a   :  { %v693_v17 = vld [vmem:[#allocation2 + $0x29] sm:$0xff]  ;;  %v694_v18 = vld [vmem:[#allocation2 + $0x31] sm:$0xff]  ;;  %v2100_v20 = vpack.c.bf16 %v566_v16, %v565_v15  ;;  %445 = vst.msk [vmem:[#allocation2 + $0x68] sm:$0xff] %vm432_vm1, %v316_v29  ;;  %v62_v55 = vld [vmem:[%s13473_s0 + $0x80] sm:$0xff]  ;;  %v194_v14 = vmul.f32 %v10280_v5, %v65_v13  ;;  %v2170_v15 = vpack.c.bf16 %v319_v46, %v318_v45 }
  0x1b   :  { %9626 = vmatmul.msk.bf16.vlgmr.msrb.gmra.mxu1 %vm432_vm1, %v2098_v56  ;;  %v3280_v22 = vpack.c.bf16 %v694_v18, %v693_v17  ;;  %446 = vst.msk [vmem:[#allocation2 + $0x70] sm:$0xff] %vm432_vm1, %v317_v30  ;;  %v567_v32 = vld [vmem:[#allocation2 + $0x37] sm:$0xff]  ;;  %v568_v33 = vld [vmem:[#allocation2 + $0x3f] sm:$0xff]  ;;  %v191_v56 = vmul.f32 %v10280_v5, %v62_v55 }
  0x1c   :  { %9691 = vmatmul.msk.bf16.vlgmr.msrb.gmra.mxu2 %vm432_vm1, %v3278_v57  ;;  %v696_v31 = vld [vmem:[#allocation2 + $0x41] sm:$0xff]  ;;  %v695_v34 = vld [vmem:[#allocation2 + $0x39] sm:$0xff]  ;;  %v2101_v37 = vpack.c.bf16 %v568_v33, %v567_v32  ;;  %447 = vst.msk [vmem:[#allocation2 + $0x78] sm:$0xff] %vm432_vm1, %v318_v45  ;;  %v323_v18 = vadd.f32 %v10285_v6, %v194_v14 }
  0x1d   :  { %v1977_v35 = vsel %vm1593_vm3, 0.0, %v696_v31  ;;  %v569_v47 = vld [vmem:[#allocation2 + $0x47] sm:$0xff]  ;;  %448 = vst.msk [vmem:[#allocation2 + $0x80] sm:$0xff] %vm432_vm1, %v319_v46  ;;  %v570_v48 = vld [vmem:[#allocation2 + $0x4f] sm:$0xff]  ;;  %v320_v57 = vadd.f32 %v10285_v6, %v191_v56 }
  0x1e   :  { %v3281_v38 = vpack.c.bf16 %v1977_v35, %v695_v34  ;;  %v1466_v49 = vsel %vm1082_vm4, 0.0, %v569_v47  ;;  %v697_v50 = vld [vmem:[#allocation2 + $0x49] sm:$0xff]  ;;  %v698_v51 = vld [vmem:[#allocation2 + $0x51] sm:$0xff]  ;;  %450 = vst.msk [vmem:[#allocation2 + $0x90] sm:$0xff] %vm432_vm1, %v321_v3  ;;  %v10511_v47 = vadd.f32 %v10285_v6, %v197_v43  ;;  %v70_v63 = vld [vmem:[%s13473_s0 + $0xc0] sm:$0xff] }
  0x1f   :  { %v2102_v53 = vpack.c.bf16 %v570_v48, %v1466_v49  ;;  %v3282_v54 = vpack.c.bf16 %v698_v51, %v697_v50  ;;  %449 = vst.msk [vmem:[#allocation2 + $0x88] sm:$0xff] %vm432_vm1, %v320_v57  ;;  %v571_v58 = vld [vmem:[#allocation2 + $0x57] sm:$0xff]  ;;  %v572_v59 = vld [vmem:[#allocation2 + $0x5f] sm:$0xff]  ;;  %v67_v31 = vld [vmem:[%s13473_s0 + $0xa8] sm:$0xff]  ;;  %v2171_v33 = vpack.c.bf16 %v321_v3, %v320_v57 }
  0x20   :  { %v699_v60 = vld [vmem:[#allocation2 + $0x59] sm:$0xff]  ;;  %v2103_v1 = vpack.c.bf16 %v572_v59, %v571_v58  ;;  %452 = vst.msk [vmem:[#allocation2 + $0xa0] sm:$0xff] %vm432_vm1, %v323_v18  ;;  %v196_v32 = vmul.f32 %v10280_v5, %v67_v31 }
  0x21   :  { %v700_v61 = vld [vmem:[#allocation2 + $0x61] sm:$0xff]  ;;  %13507 = vst [vmem:[#allocation8_spill] sm:$0xff] %v10494_v40 }
  0x22   :  { %v3283_v2 = vpack.c.bf16 %v700_v61, %v699_v60  ;;  %v573_v9 = vld [vmem:[#allocation2 + $0x67] sm:$0xff]  ;;  %v574_v10 = vld [vmem:[#allocation2 + $0x6f] sm:$0xff]  ;;  %455 = vst.msk [vmem:[#allocation2 + $0xb8] sm:$0xff] %vm432_vm1, %v10511_v47 }
  0x23   :  { %v701_v11 = vld [vmem:[#allocation2 + $0x69] sm:$0xff]  ;;  %v702_v12 = vld [vmem:[#allocation2 + $0x71] sm:$0xff]  ;;  %v2104_v16 = vpack.c.bf16 %v574_v10, %v573_v9 }
  0x24   :  { %v3284_v17 = vpack.c.bf16 %v702_v12, %v701_v11  ;;  %v575_v27 = vld [vmem:[#allocation2 + $0x77] sm:$0xff]  ;;  %v576_v28 = vld [vmem:[#allocation2 + $0x7f] sm:$0xff] }
  0x25   :  { %v703_v29 = vld [vmem:[#allocation2 + $0x79] sm:$0xff]  ;;  %v2105_v34 = vpack.c.bf16 %v576_v28, %v575_v27 }
  0x26   :  { %v704_v26 = vld [vmem:[#allocation2 + $0x81] sm:$0xff]  ;;  %v578_v49 = vld [vmem:[#allocation2 + $0x8f] sm:$0xff] }
  0x27   :  { %v577_v48 = vld [vmem:[#allocation2 + $0x87] sm:$0xff] }
  0x28   :  { %v1474_v50 = vsel %vm1090_vm6, 0.0, %v577_v48  ;;  %v705_v51 = vld [vmem:[#allocation2 + $0x89] sm:$0xff] }
  0x29   :  { %9564 = vmatmul.msk.bf16.gmra.mxu0 %vm432_vm1, %v2165_v4  ;;  %v64_v4 = vld [vmem:[%s13473_s0 + $0x90] sm:$0xff]  ;;  %v2106_v57 = vpack.c.bf16 %v578_v49, %v1474_v50 }
  0x2b   :  { %9627 = vmatmul.msk.bf16.gmra.mxu1 %vm432_vm1, %v2099_v7  ;;  %v193_v7 = vmul.f32 %v10280_v5, %v64_v4 }
  0x2c   :  { %9692 = vmatmul.msk.bf16.gmra.mxu2 %vm432_vm1, %v3279_v8 }
  0x2d   :  { %v10458_v8 = vadd.f32 %v10285_v6, %v193_v7 }
  0x2f   :  { %451 = vst.msk [vmem:[#allocation2 + $0x98] sm:$0xff] %vm432_vm1, %v10458_v8  ;;  %v2172_v56 = vpack.c.bf16 %v323_v18, %v10458_v8 }
  0x36   :  { %v579_v11 = vld [vmem:[#allocation2 + $0x97] sm:$0xff]  ;;  %v580_v12 = vld [vmem:[#allocation2 + $0x9f] sm:$0xff] }
  0x37   :  { %v707_v13 = vld [vmem:[#allocation2 + $0x99] sm:$0xff] }
  0x39   :  { %9565 = vmatmul.msk.bf16.gmra.mxu0 %vm432_vm1, %v2166_v19  ;;  %v10468_v19 = vadd.s32 120, %v10315_v21 }
  0x3b   :  { %9628 = vmatmul.msk.bf16.gmra.mxu1 %vm432_vm1, %v2100_v20  ;;  %13506 = vst [vmem:[#allocation7_spill] sm:$0xff] %v10468_v19  ;;  %v66_v20 = vld [vmem:[%s13473_s0 + $0xa0] sm:$0xff] }
  0x3c   :  { %9693 = vmatmul.msk.bf16.gmra.mxu2 %vm432_vm1, %v3280_v22  ;;  %v961_v22 = vand.u32 63, %v10468_v19  ;;  %v195_v24 = vmul.f32 %v10280_v5, %v66_v20 }
  0x3e   :  { %v10480_v25 = vadd.f32 %v10285_v6, %v195_v24  ;;  %vm1601_vm5 = vcmp.eq.s32.totalorder %v961_v22, 63  ;;  %v2107_v24 = vpack.c.bf16 %v580_v12, %v579_v11 }
  0x3f   :  { %v1985_v30 = vsel %vm1601_vm5, 0.0, %v704_v26 }
  0x40   :  { %453 = vst.msk [vmem:[#allocation2 + $0xa8] sm:$0xff] %vm432_vm1, %v10480_v25 }
  0x47   :  { %v708_v14 = vld [vmem:[#allocation2 + $0xa1] sm:$0xff] }
  0x48   :  { %v581_v48 = vld [vmem:[#allocation2 + $0xa7] sm:$0xff] }
  0x49   :  { %9566 = vmatmul.msk.bf16.gmra.mxu0 %vm432_vm1, %v2167_v36 }
  0x4b   :  { %9629 = vmatmul.msk.bf16.gmra.mxu1 %vm432_vm1, %v2101_v37  ;;  %v3285_v37 = vpack.c.bf16 %v1985_v30, %v703_v29  ;;  %v3287_v29 = vpack.c.bf16 %v708_v14, %v707_v13 }
  0x4c   :  { %9694 = vmatmul.msk.bf16.gmra.mxu2 %vm432_vm1, %v3281_v38  ;;  %v10491_v38 = vadd.f32 %v10285_v6, %v196_v32 }
  0x4e   :  { %454 = vst.msk [vmem:[#allocation2 + $0xb0] sm:$0xff] %vm432_vm1, %v10491_v38  ;;  %v2173_v22 = vpack.c.bf16 %v10491_v38, %v10480_v25 }
  0x55   :  { %v582_v49 = vld [vmem:[#allocation2 + $0xaf] sm:$0xff] }
  0x56   :  { %v709_v50 = vld [vmem:[#allocation2 + $0xa9] sm:$0xff] }
  0x59   :  { %9567 = vmatmul.msk.bf16.gmra.mxu0 %vm432_vm1, %v2168_v52  ;;  %v706_v52 = vld [vmem:[#allocation2 + $0x91] sm:$0xff] }
  0x5a   :  { %v3286_v60 = vpack.c.bf16 %v706_v52, %v705_v51  ;;  %v710_v51 = vld [vmem:[#allocation2 + $0xb1] sm:$0xff] }
  0x5b   :  { %9630 = vmatmul.msk.bf16.gmra.mxu1 %vm432_vm1, %v2102_v53  ;;  %v69_v53 = vld [vmem:[%s13473_s0 + $0xb8] sm:$0xff] }
  0x5c   :  { %9695 = vmatmul.msk.bf16.gmra.mxu2 %vm432_vm1, %v3282_v54  ;;  %v198_v54 = vmul.f32 %v10280_v5, %v69_v53  ;;  %v73_v52 = vld [vmem:[%s13473_s0 + $0xd8] sm:$0xff] }
  0x5e   :  { %v10523_v61 = vadd.f32 %v10285_v6, %v198_v54  ;;  %v202_v54 = vmul.f32 %v10280_v5, %v73_v52 }
  0x60   :  { %456 = vst.msk [vmem:[#allocation2 + $0xc0] sm:$0xff] %vm432_vm1, %v10523_v61 }
  0x69   :  { %9568 = vmatmul.msk.bf16.gmra.mxu0 %vm432_vm1, %v2169_v0  ;;  %v199_v0 = vmul.f32 %v10280_v5, %v70_v63  ;;  %v3288_v63 = vpack.c.bf16 %v710_v51, %v709_v50 }
  0x6b   :  { %9631 = vmatmul.msk.bf16.gmra.mxu1 %vm432_vm1, %v2103_v1  ;;  %v10537_v1 = vld [vmem:[%s13474_s1 + $0x2] ss:$0 sm:$0xff]  ;;  %v10540_v3 = vadd.f32 %v10285_v6, %v199_v0  ;;  %v10583_v0 = vadd.f32 %v10285_v6, %v202_v54 }
  0x6c   :  { %9696 = vmatmul.msk.bf16.gmra.mxu2 %vm432_vm1, %v3283_v2 }
  0x6d   :  { %457 = vst.msk [vmem:[#allocation2 + $0xc8] sm:$0xff] %vm432_vm1, %v10540_v3 }
  0x6e   :  { %460 = vst.msk [vmem:[#allocation2 + $0xe0] sm:$0xff] %vm432_vm1, %v10583_v0 }
  0x79   :  { %9569 = vmatmul.msk.bf16.gmra.mxu0 %vm432_vm1, %v2170_v15  ;;  %v10118_v15 = vld [vmem:[%s13476_s3 + $0x8] sm:$0xff] }
  0x7a   :  { %6096 = vmatpush.bf16.msra.mxu3 %v10118_v15 }
  0x7b   :  { %9632 = vmatmul.msk.bf16.gmra.mxu1 %vm432_vm1, %v2104_v16  ;;  %v71_v16 = vld [vmem:[%s13473_s0 + $0xc8] sm:$0xff] }
  0x7c   :  { %9697 = vmatmul.msk.bf16.gmra.mxu2 %vm432_vm1, %v3284_v17  ;;  %v200_v18 = vmul.f32 %v10280_v5, %v71_v16  ;;  %v712_v16 = vld [vmem:[#allocation2 + $0xc1] sm:$0xff] }
  0x7e   :  { %v10556_v30 = vadd.f32 %v10285_v6, %v200_v18 }
  0x80   :  { %458 = vst.msk [vmem:[#allocation2 + $0xd0] sm:$0xff] %vm432_vm1, %v10556_v30 }
  0x86   :  { %v2434_v35 = vpop.f32.mrf.mxu0 }
  0x88   :  { %v10488_v36 = vpop.f32.mrf.mxu1 }
  0x89   :  { %9570 = vmatmul.msk.bf16.gmra.mxu0 %vm432_vm1, %v2171_v33  ;;  %v72_v33 = vld [vmem:[%s13473_s0 + $0xd0] sm:$0xff] }
  0x8b   :  { %9633 = vmatmul.msk.bf16.gmra.mxu1 %vm432_vm1, %v2105_v34  ;;  %v201_v34 = vmul.f32 %v10280_v5, %v72_v33 }
  0x8c   :  { %9698 = vmatmul.msk.bf16.gmra.mxu2 %vm432_vm1, %v3285_v37 }
  0x8d   :  { %v10570_v42 = vadd.f32 %v10285_v6, %v201_v34 }
  0x8e   :  { %v2436_v45 = vpop.f32.mrf.mxu0 }
  0x8f   :  { %v10506_v44 = vpop.f32.mrf.mxu2  ;;  %459 = vst.msk [vmem:[#allocation2 + $0xd8] sm:$0xff] %vm432_vm1, %v10570_v42 }
  0x90   :  { %v10508_v46 = vpop.f32.mrf.mxu1 }
  0x96   :  { %v2439_v58 = vpop.f32.mrf.mxu0 }
  0x97   :  { %v10519_v55 = vpop.f32.mrf.mxu2 }
  0x98   :  { %v2958_v59 = vpop.f32.mrf.mxu1 }
  0x99   :  { %9571 = vmatmul.msk.bf16.gmra.mxu0 %vm432_vm1, %v2172_v56  ;;  %v2959_v62 = vadd.f32 %v2958_v59, %v2434_v35 }
  0x9b   :  { %9634 = vmatmul.msk.bf16.gmra.mxu1 %vm432_vm1, %v2106_v57  ;;  %v2174_v57 = vpack.c.bf16 %v10523_v61, %v10511_v47 }
  0x9c   :  { %9699 = vmatmul.msk.bf16.gmra.mxu2 %vm432_vm1, %v3286_v60 }
  0x9e   :  { %v2441_v7 = vpop.f32.mrf.mxu0 }
  0x9f   :  { %v3548_v2 = vpop.f32.mrf.mxu2 }
  0xa0   :  { %v3868_v4 = vadd.f32 %v3548_v2, %v2959_v62  ;;  %v2960_v8 = vpop.f32.mrf.mxu1 }
  0xa1   :  { %v2961_v17 = vadd.f32 %v2960_v8, %v2436_v45 }
  0xa2   :  { %v3997_v9 = vadd.f32 %v10537_v1, %v3868_v4  ;;  %v10587_v4 = vadd.s32 184, %v10315_v21 }
  0xa4   :  { %v4125_v10 = vmax.f32 %v3997_v9, 0.0  ;;  %13508 = vst [vmem:[#allocation9_spill] sm:$0xff] %v10587_v4  ;;  %v969_v8 = vand.u32 63, %v10587_v4 }
  0xa6   :  { %4254 = vst.msk [vmem:[#allocation2 + $0x8] sm:$0xff] %vm4253_vm7, %v4125_v10  ;;  %v2444_v27 = vpop.f32.mrf.mxu0  ;;  %vm10604_vm8 = vcmp.eq.s32.totalorder %v969_v8, 63 }
  0xa7   :  { %v3550_v20 = vpop.f32.mrf.mxu2 }
  0xa8   :  { %v3869_v26 = vadd.f32 %v3550_v20, %v2961_v17  ;;  %v2963_v28 = vpop.f32.mrf.mxu1  ;;  %v2176_v17 = vpack.c.bf16 %v10583_v0, %v10570_v42  ;;  %v78_v42 = vld [vmem:[%s13473_s0 + $0x100] sm:$0xff] }
  0xa9   :  { %9572 = vmatmul.msk.bf16.gmra.mxu0 %vm432_vm1, %v2173_v22  ;;  %v2964_v25 = vadd.f32 %v2963_v28, %v2439_v58  ;;  %v2108_v58 = vpack.c.bf16 %v582_v49, %v581_v48  ;;  %v207_v0 = vmul.f32 %v10280_v5, %v78_v42 }
  0xaa   :  { %v3998_v31 = vadd.f32 %v10537_v1, %v3869_v26  ;;  %v584_v26 = vld [vmem:[#allocation2 + $0xbf] sm:$0xff] }
  0xab   :  { %9635 = vmatmul.msk.bf16.gmra.mxu1 %vm432_vm1, %v2107_v24  ;;  %v583_v24 = vld [vmem:[#allocation2 + $0xb7] sm:$0xff] }
  0xac   :  { %v4126_v32 = vmax.f32 %v3998_v31, 0.0  ;;  %9700 = vmatmul.msk.bf16.gmra.mxu2 %vm432_vm1, %v3287_v29  ;;  %v1993_v31 = vsel %vm10604_vm8, 0.0, %v712_v16 }
  0xae   :  { %4255 = vst.msk [vmem:[#allocation2 + $0x10] sm:$0xff] %vm4253_vm7, %v4126_v32  ;;  %v2446_v38 = vpop.f32.mrf.mxu0  ;;  %v75_v32 = vld [vmem:[%s13473_s0 + $0xe8] sm:$0xff] }
  0xaf   :  { %v3553_v35 = vpop.f32.mrf.mxu2 }
  0xb0   :  { %v3870_v37 = vadd.f32 %v3553_v35, %v2964_v25  ;;  %v2965_v41 = vpop.f32.mrf.mxu1  ;;  %v204_v35 = vmul.f32 %v10280_v5, %v75_v32  ;;  %v10666_v32 = vadd.f32 %v10285_v6, %v207_v0 }
  0xb1   :  { %v2966_v53 = vadd.f32 %v2965_v41, %v2441_v7  ;;  %v74_v7 = vld [vmem:[%s13473_s0 + $0xe0] sm:$0xff]  ;;  %v2175_v41 = vpack.c.bf16 %v10556_v30, %v10540_v3 }
  0xb2   :  { %v3999_v43 = vadd.f32 %v10537_v1, %v3870_v37  ;;  %v203_v9 = vmul.f32 %v10280_v5, %v74_v7  ;;  %v10620_v52 = vadd.f32 %v10285_v6, %v204_v35  ;;  %v586_v7 = vld [vmem:[#allocation2 + $0xcf] sm:$0xff]  ;;  %465 = vst.msk [vmem:[#allocation2 + $0x108] sm:$0xff] %vm432_vm1, %v10666_v32 }
  0xb4   :  { %v4127_v45 = vmax.f32 %v3999_v43, 0.0  ;;  %v10601_v14 = vadd.f32 %v10285_v6, %v203_v9  ;;  %v2109_v43 = vpack.c.bf16 %v584_v26, %v583_v24  ;;  %462 = vst.msk [vmem:[#allocation2 + $0xf0] sm:$0xff] %vm432_vm1, %v10620_v52  ;;  %v713_v9 = vld [vmem:[#allocation2 + $0xc9] sm:$0xff] }
  0xb5   :  { %v4703_v18 = vld [vmem:[#allocation2 + $0x8] ss:$2 sm:$0xff]  ;;  %v4831_v20 = vld [vmem:[#allocation2 + $0x9] ss:$2 sm:$0xff] }
  0xb6   :  { %4256 = vst.msk [vmem:[#allocation2 + $0x18] sm:$0xff] %vm4253_vm7, %v4127_v45  ;;  %v2449_v60 = vpop.f32.mrf.mxu0  ;;  %v4958_v33 = vmax.f32 %v4703_v18, %v4831_v20 }
  0xb7   :  { %v3555_v56 = vpop.f32.mrf.mxu2  ;;  %461 = vst.msk [vmem:[#allocation2 + $0xe8] sm:$0xff] %vm432_vm1, %v10601_v14 }
  0xb8   :  { %v3871_v59 = vadd.f32 %v3555_v56, %v2966_v53  ;;  %v2968_v62 = vpop.f32.mrf.mxu1  ;;  %v10623_v53 = vadd.s32 192, %v10315_v21  ;;  %v76_v56 = vld [vmem:[%s13473_s0 + $0xf0] sm:$0xff] }
  0xb9   :  { %9573 = vmatmul.msk.bf16.gmra.mxu0 %vm432_vm1, %v2174_v57  ;;  %v2969_v61 = vadd.f32 %v2968_v62, %v2444_v27  ;;  %v711_v27 = vld [vmem:[#allocation2 + $0xb9] sm:$0xff]  ;;  %v205_v57 = vmul.f32 %v10280_v5, %v76_v56 }
  0xba   :  { %v4000_v2 = vadd.f32 %v10537_v1, %v3871_v59  ;;  %v3289_v51 = vpack.c.bf16 %v1993_v31, %v711_v27  ;;  %v970_v54 = vand.u32 63, %v10623_v53 }
  0xbb   :  { %9636 = vmatmul.msk.bf16.gmra.mxu1 %vm432_vm1, %v2108_v58 }
  0xbc   :  { %v4128_v47 = vmax.f32 %v4000_v2, 0.0  ;;  %9701 = vmatmul.msk.bf16.gmra.mxu2 %vm432_vm1, %v3288_v63  ;;  %v10639_v2 = vadd.f32 %v10285_v6, %v205_v57  ;;  %vm1098_vm9 = vcmp.eq.s32.totalorder %v970_v54, 0 }
  0xbe   :  { %4257 = vst.msk [vmem:[#allocation2 + $0x20] sm:$0xff] %vm4253_vm7, %v4128_v47  ;;  %v2451_v12 = vpop.f32.mrf.mxu0 }
  0xbf   :  { %v3558_v10 = vpop.f32.mrf.mxu2  ;;  %463 = vst.msk [vmem:[#allocation2 + $0xf8] sm:$0xff] %vm432_vm1, %v10639_v2 }
  0xc0   :  { %v3872_v11 = vadd.f32 %v3558_v10, %v2969_v61  ;;  %v2970_v13 = vpop.f32.mrf.mxu1  ;;  %v714_v10 = vld [vmem:[#allocation2 + $0xd1] sm:$0xff] }
  0xc1   :  { %v2971_v25 = vadd.f32 %v2970_v13, %v2446_v38  ;;  %v3290_v26 = vpack.c.bf16 %v714_v10, %v713_v9 }
  0xc2   :  { %v4001_v15 = vadd.f32 %v10537_v1, %v3872_v11  ;;  %v77_v11 = vld [vmem:[%s13473_s0 + $0xf8] sm:$0xff] }
  0xc4   :  { %v4129_v22 = vmax.f32 %v4001_v15, 0.0  ;;  %v206_v15 = vmul.f32 %v10280_v5, %v77_v11 }
  0xc5   :  { %v4705_v28 = vld [vmem:[#allocation2 + $0x18] ss:$2 sm:$0xff]  ;;  %v4833_v29 = vld [vmem:[#allocation2 + $0x19] ss:$2 sm:$0xff] }
  0xc6   :  { %4258 = vst.msk [vmem:[#allocation2 + $0x28] sm:$0xff] %vm4253_vm7, %v4129_v22  ;;  %v4959_v34 = vmax.f32 %v4705_v28, %v4833_v29  ;;  %v2454_v48 = vpop.f32.mrf.mxu0  ;;  %v10652_v27 = vadd.f32 %v10285_v6, %v206_v15 }
  0xc7   :  { %v3560_v37 = vpop.f32.mrf.mxu2 }
  0xc8   :  { %v3873_v45 = vadd.f32 %v3560_v37, %v2971_v25  ;;  %v2973_v49 = vpop.f32.mrf.mxu1  ;;  %v5952_v50 = vpack.c.bf16 %v4959_v34, %v4958_v33  ;;  %464 = vst.msk [vmem:[#allocation2 + $0x100] sm:$0xff] %vm432_vm1, %v10652_v27 }
  0xc9   :  { %9574 = vmatmul.msk.bf16.gmra.mxu0 %vm432_vm1, %v2175_v41  ;;  %v2974_v30 = vadd.f32 %v2973_v49, %v2449_v60  ;;  %v585_v60 = vld [vmem:[#allocation2 + $0xc7] sm:$0xff]  ;;  %v715_v49 = vld [vmem:[#allocation2 + $0xd9] sm:$0xff] }
  0xca   :  { %v4002_v38 = vadd.f32 %v10537_v1, %v3873_v45  ;;  %9761 = vmatmul.msk.bf16.vlgmr.msra.gmra.mxu3 %vm4253_vm7, %v5952_v50  ;;  %v1482_v8 = vsel %vm1098_vm9, 0.0, %v585_v60  ;;  %v716_v50 = vld [vmem:[#allocation2 + $0xe1] sm:$0xff] }
  0xcb   :  { %9637 = vmatmul.msk.bf16.gmra.mxu1 %vm432_vm1, %v2109_v43  ;;  %v2110_v18 = vpack.c.bf16 %v586_v7, %v1482_v8  ;;  %v587_v43 = vld [vmem:[#allocation2 + $0xd7] sm:$0xff]  ;;  %v3291_v8 = vpack.c.bf16 %v716_v50, %v715_v49  ;;  %v10711_v49 = vadd.s32 248, %v10315_v21 }
  0xcc   :  { %v4130_v3 = vmax.f32 %v4002_v38, 0.0  ;;  %9702 = vmatmul.msk.bf16.gmra.mxu2 %vm432_vm1, %v3289_v51 }
  0xcd   :  { %13511 = vst [vmem:[#allocation10_spill] sm:$0xff] %v10711_v49  ;;  %v977_v50 = vand.u32 63, %v10711_v49 }
  0xce   :  { %4259 = vst.msk [vmem:[#allocation2 + $0x30] sm:$0xff] %vm4253_vm7, %v4130_v3  ;;  %v2456_v62 = vpop.f32.mrf.mxu0  ;;  %v79_v3 = vld [vmem:[%s13473_s0 + $0x108] sm:$0xff] }
  0xcf   :  { %v3563_v58 = vpop.f32.mrf.mxu2  ;;  %v208_v57 = vmul.f32 %v10280_v5, %v79_v3  ;;  %vm10728_vm10 = vcmp.eq.s32.totalorder %v977_v50, 63 }
  0xd0   :  { %v3874_v59 = vadd.f32 %v3563_v58, %v2974_v30  ;;  %v2975_v63 = vpop.f32.mrf.mxu1 }
  0xd1   :  { %v2976_v13 = vadd.f32 %v2975_v63, %v2451_v12  ;;  %v10679_v9 = vadd.f32 %v10285_v6, %v208_v57 }
  0xd2   :  { %v4003_v47 = vadd.f32 %v10537_v1, %v3874_v59  ;;  %v2177_v59 = vpack.c.bf16 %v10620_v52, %v10601_v14 }
  0xd3   :  { %466 = vst.msk [vmem:[#allocation2 + $0x110] sm:$0xff] %vm432_vm1, %v10679_v9 }
  0xd4   :  { %v4131_v61 = vmax.f32 %v4003_v47, 0.0 }
  0xd5   :  { %v4707_v37 = vld [vmem:[#allocation2 + $0x28] ss:$2 sm:$0xff]  ;;  %v4835_v41 = vld [vmem:[#allocation2 + $0x29] ss:$2 sm:$0xff] }
  0xd6   :  { %4260 = vst.msk [vmem:[#allocation2 + $0x38] sm:$0xff] %vm4253_vm7, %v4131_v61  ;;  %v2459_v22 = vpop.f32.mrf.mxu0  ;;  %v4960_v54 = vmax.f32 %v4707_v37, %v4835_v41 }
  0xd7   :  { %v3565_v16 = vpop.f32.mrf.mxu2 }
  0xd8   :  { %v3875_v20 = vadd.f32 %v3565_v16, %v2976_v13  ;;  %v2978_v24 = vpop.f32.mrf.mxu1 }
  0xd9   :  { %9575 = vmatmul.msk.bf16.gmra.mxu0 %vm432_vm1, %v2176_v17  ;;  %v2979_v29 = vadd.f32 %v2978_v24, %v2454_v48  ;;  %v588_v48 = vld [vmem:[#allocation2 + $0xdf] sm:$0xff]  ;;  %v589_v24 = vld [vmem:[#allocation2 + $0xe7] sm:$0xff] }
  0xda   :  { %v4004_v28 = vadd.f32 %v10537_v1, %v3875_v20  ;;  %v2111_v63 = vpack.c.bf16 %v588_v48, %v587_v43 }
  0xdb   :  { %9638 = vmatmul.msk.bf16.gmra.mxu1 %vm432_vm1, %v2110_v18 }
  0xdc   :  { %v4132_v12 = vmax.f32 %v4004_v28, 0.0  ;;  %9703 = vmatmul.msk.bf16.gmra.mxu2 %vm432_vm1, %v3290_v26  ;;  %v590_v26 = vld [vmem:[#allocation2 + $0xef] sm:$0xff] }
  0xdd   :  { %v717_v28 = vld [vmem:[#allocation2 + $0xe9] sm:$0xff] }
  0xde   :  { %4261 = vst.msk [vmem:[#allocation2 + $0x40] sm:$0xff] %vm4253_vm7, %v4132_v12  ;;  %v2461_v33 = vpop.f32.mrf.mxu0  ;;  %v718_v12 = vld [vmem:[#allocation2 + $0xf1] sm:$0xff] }
  0xdf   :  { %v3568_v31 = vpop.f32.mrf.mxu2  ;;  %v3292_v43 = vpack.c.bf16 %v718_v12, %v717_v28 }
  0xe0   :  { %v3876_v25 = vadd.f32 %v3568_v31, %v2979_v29  ;;  %v2980_v34 = vpop.f32.mrf.mxu1  ;;  %v81_v29 = vld [vmem:[%s13473_s0 + $0x118] sm:$0xff] }
  0xe1   :  { %v2981_v30 = vadd.f32 %v2980_v34, %v2456_v62  ;;  %v80_v62 = vld [vmem:[%s13473_s0 + $0x110] sm:$0xff]  ;;  %v210_v0 = vmul.f32 %v10280_v5, %v81_v29  ;;  %v2112_v34 = vpack.c.bf16 %v590_v26, %v589_v24 }
  0xe2   :  { %v4005_v35 = vadd.f32 %v10537_v1, %v3876_v25  ;;  %v209_v11 = vmul.f32 %v10280_v5, %v80_v62  ;;  %v2178_v25 = vpack.c.bf16 %v10652_v27, %v10639_v2 }
  0xe4   :  { %v4133_v45 = vmax.f32 %v4005_v35, 0.0  ;;  %v10694_v18 = vadd.f32 %v10285_v6, %v209_v11 }
  0xe5   :  { %v4709_v51 = vld [vmem:[#allocation2 + $0x38] ss:$2 sm:$0xff]  ;;  %v4837_v38 = vld [vmem:[#allocation2 + $0x39] ss:$2 sm:$0xff] }
  0xe6   :  { %4262 = vst.msk [vmem:[#allocation2 + $0x48] sm:$0xff] %vm4253_vm7, %v4133_v45  ;;  %v4961_v56 = vmax.f32 %v4709_v51, %v4837_v38  ;;  %v2464_v47 = vpop.f32.mrf.mxu0  ;;  %v10707_v45 = vadd.f32 %v10285_v6, %v210_v0  ;;  %v10757_v0 = vadd.s32 256, %v10315_v21 }
  0xe7   :  { %v3570_v58 = vpop.f32.mrf.mxu2  ;;  %467 = vst.msk [vmem:[#allocation2 + $0x118] sm:$0xff] %vm432_vm1, %v10694_v18 }
  0xe8   :  { %v3877_v60 = vadd.f32 %v3570_v58, %v2981_v30  ;;  %v2983_v61 = vpop.f32.mrf.mxu1  ;;  %v5953_v7 = vpack.c.bf16 %v4961_v56, %v4960_v54  ;;  %468 = vst.msk [vmem:[#allocation2 + $0x120] sm:$0xff] %vm432_vm1, %v10707_v45  ;;  %v720_v58 = vld [vmem:[#allocation2 + $0x101] sm:$0xff] }
  0xe9   :  { %9576 = vmatmul.msk.bf16.gmra.mxu0 %vm432_vm1, %v2177_v59  ;;  %v2984_v52 = vadd.f32 %v2983_v61, %v2459_v22  ;;  %v592_v61 = vld [vmem:[#allocation2 + $0xff] sm:$0xff]  ;;  %13514 = vst [vmem:[#allocation11_spill] sm:$0xff] %v10757_v0 }
  0xea   :  { %v4006_v10 = vadd.f32 %v10537_v1, %v3877_v60  ;;  %9762 = vmatmul.msk.bf16.gmra.mxu3 %vm4253_vm7, %v5953_v7  ;;  %v719_v7 = vld [vmem:[#allocation2 + $0xf9] sm:$0xff] }
  0xeb   :  { %9639 = vmatmul.msk.bf16.gmra.mxu1 %vm432_vm1, %v2111_v63 }
  0xec   :  { %v4134_v14 = vmax.f32 %v4006_v10, 0.0  ;;  %9704 = vmatmul.msk.bf16.gmra.mxu2 %vm432_vm1, %v3291_v8 }
  0xee   :  { %4263 = vst.msk [vmem:[#allocation2 + $0x50] sm:$0xff] %vm4253_vm7, %v4134_v14  ;;  %v2466_v16 = vpop.f32.mrf.mxu0  ;;  %v83_v14 = vld [vmem:[%s13473_s0 + $0x128] sm:$0xff] }
  0xef   :  { %v3573_v13 = vpop.f32.mrf.mxu2 }
  0xf0   :  { %v3878_v15 = vadd.f32 %v3573_v13, %v2984_v52  ;;  %v2985_v17 = vpop.f32.mrf.mxu1  ;;  %v10743_v13 = vld [vmem:[%s13474_s1] ss:$0 sm:$0xff] }
  0xf1   :  { %v2986_v42 = vadd.f32 %v2985_v17, %v2461_v33  ;;  %v82_v33 = vld [vmem:[%s13473_s0 + $0x120] sm:$0xff] }
  0xf2   :  { %v4007_v20 = vadd.f32 %v10537_v1, %v3878_v15  ;;  %v211_v51 = vmul.f32 %v10280_v5, %v82_v33  ;;  %v212_v15 = vmul.f32 %v10743_v13, %v83_v14 }
  0xf4   :  { %v4135_v22 = vmax.f32 %v4007_v20, 0.0  ;;  %v10725_v56 = vadd.f32 %v10285_v6, %v211_v51  ;;  %v2001_v6 = vsel %vm10728_vm10, 0.0, %v720_v58  ;;  %v2179_v20 = vpack.c.bf16 %v10679_v9, %v10666_v32  ;;  %v594_v51 = vld [vmem:[#allocation2 + $0x10f] sm:$0xff] }
  0xf5   :  { %v4711_v63 = vld [vmem:[#allocation2 + $0x48] ss:$2 sm:$0xff]  ;;  %v4839_v60 = vld [vmem:[#allocation2 + $0x49] ss:$2 sm:$0xff]  ;;  %v3293_v29 = vpack.c.bf16 %v2001_v6, %v719_v7 }
  0xf6   :  { %4264 = vst.msk [vmem:[#allocation2 + $0x58] sm:$0xff] %vm4253_vm7, %v4135_v22  ;;  %v2469_v37 = vpop.f32.mrf.mxu0  ;;  %v4962_v62 = vmax.f32 %v4711_v63, %v4839_v60  ;;  %v2180_v60 = vpack.c.bf16 %v10707_v45, %v10694_v18  ;;  %v86_v18 = vld [vmem:[%s13473_s0 + $0x140] sm:$0xff] }
  0xf7   :  { %v3575_v31 = vpop.f32.mrf.mxu2  ;;  %469 = vst.msk [vmem:[#allocation2 + $0x128] sm:$0xff] %vm432_vm1, %v10725_v56  ;;  %v215_v45 = vmul.f32 %v10743_v13, %v86_v18 }
  0xf8   :  { %v3879_v35 = vadd.f32 %v3575_v31, %v2986_v42  ;;  %v2988_v41 = vpop.f32.mrf.mxu1 }
  0xf9   :  { %9577 = vmatmul.msk.bf16.gmra.mxu0 %vm432_vm1, %v2178_v25  ;;  %v2989_v27 = vadd.f32 %v2988_v41, %v2464_v47  ;;  %v591_v47 = vld [vmem:[#allocation2 + $0xf7] sm:$0xff]  ;;  %v978_v25 = vand.u32 63, %v10757_v0 }
  0xfa   :  { %v4008_v48 = vadd.f32 %v10537_v1, %v3879_v35  ;;  %v2113_v22 = vpack.c.bf16 %v592_v61, %v591_v47 }
  0xfb   :  { %9640 = vmatmul.msk.bf16.gmra.mxu1 %vm432_vm1, %v2112_v34  ;;  %v84_v34 = vld [vmem:[%s13473_s0 + $0x130] sm:$0xff]  ;;  %vm1106_vm11 = vcmp.eq.s32.totalorder %v978_v25, 0  ;;  %v87_v25 = vld [vmem:[%s13473_s0 + $0x148] sm:$0xff] }
  0xfc   :  { %v4136_v2 = vmax.f32 %v4008_v48, 0.0  ;;  %9705 = vmatmul.msk.bf16.gmra.mxu2 %vm432_vm1, %v3292_v43  ;;  %v213_v35 = vmul.f32 %v10743_v13, %v84_v34 }
  0xfe   :  { %4265 = vst.msk [vmem:[#allocation2 + $0x60] sm:$0xff] %vm4253_vm7, %v4136_v2  ;;  %v2471_v30 = vpop.f32.mrf.mxu0 }
  0xff   :  { %v3578_v38 = vpop.f32.mrf.mxu2 }
 0x100   :  { %v3880_v3 = vadd.f32 %v3578_v38, %v2989_v27  ;;  %v2990_v54 = vpop.f32.mrf.mxu1 }
 0x101   :  { %v2991_v52 = vadd.f32 %v2990_v54, %v2466_v16  ;;  %v10751_v16 = vld [vmem:[%s13474_s1 + $0x1] ss:$0 sm:$0xff]  ;;  %v722_v54 = vld [vmem:[#allocation2 + $0x111] sm:$0xff] }
 0x102   :  { %v4009_v57 = vadd.f32 %v10537_v1, %v3880_v3  ;;  %v10754_v42 = vadd.f32 %v10751_v16, %v212_v15  ;;  %v10773_v27 = vadd.f32 %v10751_v16, %v213_v35  ;;  %v721_v3 = vld [vmem:[#allocation2 + $0x109] sm:$0xff] }
 0x104   :  { %v4137_v5 = vmax.f32 %v4009_v57, 0.0  ;;  %470 = vst.msk [vmem:[#allocation2 + $0x130] sm:$0xff] %vm432_vm1, %v10754_v42  ;;  %v85_v57 = vld [vmem:[%s13473_s0 + $0x138] sm:$0xff] }
 0x105   :  { %v4713_v8 = vld [vmem:[#allocation2 + $0x58] ss:$2 sm:$0xff]  ;;  %v4841_v10 = vld [vmem:[#allocation2 + $0x59] ss:$2 sm:$0xff]  ;;  %471 = vst.msk [vmem:[#allocation2 + $0x138] sm:$0xff] %vm432_vm1, %v10773_v27  ;;  %v214_v59 = vmul.f32 %v10743_v13, %v85_v57 }
 0x106   :  { %4266 = vst.msk [vmem:[#allocation2 + $0x68] sm:$0xff] %vm4253_vm7, %v4137_v5  ;;  %v4963_v11 = vmax.f32 %v4713_v8, %v4841_v10  ;;  %v2474_v26 = vpop.f32.mrf.mxu0  ;;  %v3294_v8 = vpack.c.bf16 %v722_v54, %v721_v3 }
 0x107   :  { %v3580_v17 = vpop.f32.mrf.mxu2  ;;  %v10786_v10 = vadd.f32 %v10751_v16, %v214_v59 }
 0x108   :  { %v3881_v24 = vadd.f32 %v3580_v17, %v2991_v52  ;;  %v2993_v28 = vpop.f32.mrf.mxu1  ;;  %v5954_v12 = vpack.c.bf16 %v4963_v11, %v4962_v62  ;;  %v10800_v62 = vadd.f32 %v10751_v16, %v215_v45  ;;  %v89_v45 = vld [vmem:[%s13473_s0 + $0x158] sm:$0xff] }
 0x109   :  { %9578 = vmatmul.msk.bf16.gmra.mxu0 %vm432_vm1, %v2179_v20  ;;  %v2994_v9 = vadd.f32 %v2993_v28, %v2469_v37  ;;  %v593_v37 = vld [vmem:[#allocation2 + $0x107] sm:$0xff]  ;;  %472 = vst.msk [vmem:[#allocation2 + $0x140] sm:$0xff] %vm432_vm1, %v10786_v10 }
 0x10a   :  { %v4010_v31 = vadd.f32 %v10537_v1, %v3881_v24  ;;  %9763 = vmatmul.msk.bf16.gmra.mxu3 %vm4253_vm7, %v5954_v12  ;;  %v1490_v38 = vsel %vm1106_vm11, 0.0, %v593_v37  ;;  %473 = vst.msk [vmem:[#allocation2 + $0x148] sm:$0xff] %vm432_vm1, %v10800_v62  ;;  %v596_v12 = vld [vmem:[#allocation2 + $0x11f] sm:$0xff]  ;;  %v2181_v37 = vpack.c.bf16 %v10754_v42, %v10725_v56 }
 0x10b   :  { %9641 = vmatmul.msk.bf16.gmra.mxu1 %vm432_vm1, %v2113_v22  ;;  %v2114_v5 = vpack.c.bf16 %v594_v51, %v1490_v38 }
 0x10c   :  { %v4138_v32 = vmax.f32 %v4010_v31, 0.0  ;;  %9706 = vmatmul.msk.bf16.gmra.mxu2 %vm432_vm1, %v3293_v29  ;;  %v723_v29 = vld [vmem:[#allocation2 + $0x119] sm:$0xff]  ;;  %v724_v31 = vld [vmem:[#allocation2 + $0x121] sm:$0xff]  ;;  %v726_v18 = vld [vmem:[#allocation2 + $0x131] sm:$0xff] }
 0x10d   :  { %v3295_v54 = vpack.c.bf16 %v724_v31, %v723_v29 }
 0x10e   :  { %4267 = vst.msk [vmem:[#allocation2 + $0x70] sm:$0xff] %vm4253_vm7, %v4138_v32  ;;  %v2476_v48 = vpop.f32.mrf.mxu0 }
 0x10f   :  { %v3583_v41 = vpop.f32.mrf.mxu2 }
 0x110   :  { %v3882_v43 = vadd.f32 %v3583_v41, %v2994_v9  ;;  %v2995_v2 = vpop.f32.mrf.mxu1 }
 0x111   :  { %v2996_v58 = vadd.f32 %v2995_v2, %v2471_v30 }
 0x112   :  { %v4011_v33 = vadd.f32 %v10537_v1, %v3882_v43  ;;  %v216_v43 = vmul.f32 %v10743_v13, %v87_v25 }
 0x114   :  { %v4139_v50 = vmax.f32 %v4011_v33, 0.0  ;;  %v10813_v57 = vadd.f32 %v10751_v16, %v216_v43 }
 0x115   :  { %v4715_v22 = vld [vmem:[#allocation2 + $0x68] ss:$2 sm:$0xff]  ;;  %v4843_v24 = vld [vmem:[#allocation2 + $0x69] ss:$2 sm:$0xff] }
 0x116   :  { %4268 = vst.msk [vmem:[#allocation2 + $0x78] sm:$0xff] %vm4253_vm7, %v4139_v50  ;;  %v2479_v61 = vpop.f32.mrf.mxu0  ;;  %v4964_v35 = vmax.f32 %v4715_v22, %v4843_v24 }
 0x117   :  { %v3585_v63 = vpop.f32.mrf.mxu2  ;;  %474 = vst.msk [vmem:[#allocation2 + $0x150] sm:$0xff] %vm432_vm1, %v10813_v57 }
 0x118   :  { %v3883_v47 = vadd.f32 %v3585_v63, %v2996_v58  ;;  %v2998_v7 = vpop.f32.mrf.mxu1 }
 0x119   :  { %9579 = vmatmul.msk.bf16.gmra.mxu0 %vm432_vm1, %v2180_v60  ;;  %v2999_v14 = vadd.f32 %v2998_v7, %v2474_v26  ;;  %v595_v26 = vld [vmem:[#allocation2 + $0x117] sm:$0xff] }
 0x11a   :  { %v4012_v6 = vadd.f32 %v10537_v1, %v3883_v47  ;;  %v2115_v33 = vpack.c.bf16 %v596_v12, %v595_v26 }
 0x11b   :  { %9642 = vmatmul.msk.bf16.gmra.mxu1 %vm432_vm1, %v2114_v5 }
 0x11c   :  { %v4140_v30 = vmax.f32 %v4012_v6, 0.0  ;;  %9707 = vmatmul.msk.bf16.gmra.mxu2 %vm432_vm1, %v3294_v8  ;;  %v597_v6 = vld [vmem:[#allocation2 + $0x127] sm:$0xff] }
 0x11e   :  { %4269 = vst.msk [vmem:[#allocation2 + $0x80] sm:$0xff] %vm4253_vm7, %v4140_v30  ;;  %v2481_v15 = vpop.f32.mrf.mxu0  ;;  %v598_v30 = vld [vmem:[#allocation2 + $0x12f] sm:$0xff] }
 0x11f   :  { %v3588_v52 = vpop.f32.mrf.mxu2  ;;  %v2116_v22 = vpack.c.bf16 %v598_v30, %v597_v6  ;;  %v2183_v30 = vpack.c.bf16 %v10813_v57, %v10800_v62 }
 0x120   :  { %v3884_v11 = vadd.f32 %v3588_v52, %v2999_v14  ;;  %v3000_v17 = vpop.f32.mrf.mxu1  ;;  %v725_v14 = vld [vmem:[#allocation2 + $0x129] sm:$0xff] }
 0x121   :  { %v3001_v34 = vadd.f32 %v3000_v17, %v2476_v48  ;;  %v88_v48 = vld [vmem:[%s13473_s0 + $0x150] sm:$0xff]  ;;  %v3296_v12 = vpack.c.bf16 %v726_v18, %v725_v14 }
 0x122   :  { %v4013_v20 = vadd.f32 %v10537_v1, %v3884_v11  ;;  %v217_v59 = vmul.f32 %v10743_v13, %v88_v48  ;;  %v218_v11 = vmul.f32 %v10743_v13, %v89_v45 }
 0x124   :  { %v4141_v28 = vmax.f32 %v4013_v20, 0.0  ;;  %v10828_v7 = vadd.f32 %v10751_v16, %v217_v59  ;;  %v2182_v20 = vpack.c.bf16 %v10786_v10, %v10773_v27  ;;  %v10841_v29 = vadd.f32 %v10751_v16, %v218_v11 }
 0x125   :  { %v4717_v32 = vld [vmem:[#allocation2 + $0x78] ss:$2 sm:$0xff]  ;;  %v4845_v9 = vld [vmem:[#allocation2 + $0x79] ss:$2 sm:$0xff] }
 0x126   :  { %4270 = vst.msk [vmem:[#allocation2 + $0x88] sm:$0xff] %vm4253_vm7, %v4141_v28  ;;  %v4965_v41 = vmax.f32 %v4717_v32, %v4845_v9  ;;  %v2484_v51 = vpop.f32.mrf.mxu0  ;;  %v10845_v32 = vadd.s32 312, %v10315_v21 }
 0x127   :  { %v3590_v2 = vpop.f32.mrf.mxu2  ;;  %475 = vst.msk [vmem:[#allocation2 + $0x158] sm:$0xff] %vm432_vm1, %v10828_v7 }
 0x128   :  { %v3885_v50 = vadd.f32 %v3590_v2, %v3001_v34  ;;  %v3003_v38 = vpop.f32.mrf.mxu1  ;;  %v5955_v3 = vpack.c.bf16 %v4965_v41, %v4964_v35  ;;  %476 = vst.msk [vmem:[#allocation2 + $0x160] sm:$0xff] %vm432_vm1, %v10841_v29  ;;  %v985_v9 = vand.u32 63, %v10845_v32 }
 0x129   :  { %9580 = vmatmul.msk.bf16.gmra.mxu0 %vm432_vm1, %v2181_v37  ;;  %v3004_v42 = vadd.f32 %v3003_v38, %v2479_v61 }
 0x12a   :  { %v4014_v58 = vadd.f32 %v10537_v1, %v3885_v50  ;;  %9764 = vmatmul.msk.bf16.gmra.mxu3 %vm4253_vm7, %v5955_v3  ;;  %vm10862_vm12 = vcmp.eq.s32.totalorder %v985_v9, 63  ;;  %v93_v50 = vld [vmem:[%s13473_s0 + $0x178] sm:$0xff] }
 0x12b   :  { %9643 = vmatmul.msk.bf16.gmra.mxu1 %vm432_vm1, %v2115_v33  ;;  %v728_v33 = vld [vmem:[#allocation2 + $0x141] sm:$0xff] }
 0x12c   :  { %v4142_v56 = vmax.f32 %v4014_v58, 0.0  ;;  %9708 = vmatmul.msk.bf16.gmra.mxu2 %vm432_vm1, %v3295_v54  ;;  %v599_v54 = vld [vmem:[#allocation2 + $0x137] sm:$0xff]  ;;  %v600_v58 = vld [vmem:[#allocation2 + $0x13f] sm:$0xff]  ;;  %v2009_v59 = vsel %vm10862_vm12, 0.0, %v728_v33 }
 0x12d   :  { %v2117_v14 = vpack.c.bf16 %v600_v58, %v599_v54  ;;  %v2184_v58 = vpack.c.bf16 %v10841_v29, %v10828_v7  ;;  %v94_v29 = vld [vmem:[%s13473_s0 + $0x180] sm:$0xff] }
 0x12e   :  { %4271 = vst.msk [vmem:[#allocation2 + $0x90] sm:$0xff] %vm4253_vm7, %v4142_v56  ;;  %v2486_v5 = vpop.f32.mrf.mxu0  ;;  %v727_v56 = vld [vmem:[#allocation2 + $0x139] sm:$0xff]  ;;  %v730_v33 = vld [vmem:[#allocation2 + $0x151] sm:$0xff] }
 0x12f   :  { %v3593_v63 = vpop.f32.mrf.mxu2 }
 0x130   :  { %v3886_v60 = vadd.f32 %v3593_v63, %v3004_v42  ;;  %v3005_v47 = vpop.f32.mrf.mxu1  ;;  %v91_v63 = vld [vmem:[%s13473_s0 + $0x168] sm:$0xff] }
 0x131   :  { %v3006_v52 = vadd.f32 %v3005_v47, %v2481_v15  ;;  %v90_v15 = vld [vmem:[%s13473_s0 + $0x160] sm:$0xff] }
 0x132   :  { %v4015_v8 = vadd.f32 %v10537_v1, %v3886_v60  ;;  %v219_v25 = vmul.f32 %v10743_v13, %v90_v15 }
 0x134   :  { %v4143_v61 = vmax.f32 %v4015_v8, 0.0  ;;  %v10859_v2 = vadd.f32 %v10751_v16, %v219_v25 }
 0x135   :  { %v4847_v38 = vld [vmem:[#allocation2 + $0x89] ss:$2 sm:$0xff] }
 0x136   :  { %4272 = vst.msk [vmem:[#allocation2 + $0x98] sm:$0xff] %vm4253_vm7, %v4143_v61  ;;  %v2489_v26 = vpop.f32.mrf.mxu0  ;;  %v220_v61 = vmul.f32 %v10743_v13, %v91_v63 }
 0x137   :  { %v3595_v17 = vpop.f32.mrf.mxu2  ;;  %477 = vst.msk [vmem:[#allocation2 + $0x168] sm:$0xff] %vm432_vm1, %v10859_v2 }
 0x138   :  { %v3887_v24 = vadd.f32 %v3595_v17, %v3006_v52  ;;  %v3008_v28 = vpop.f32.mrf.mxu1  ;;  %v3297_v17 = vpack.c.bf16 %v2009_v59, %v727_v56 }
 0x139   :  { %9581 = vmatmul.msk.bf16.gmra.mxu0 %vm432_vm1, %v2182_v20  ;;  %v3009_v10 = vadd.f32 %v3008_v28, %v2484_v51  ;;  %v4719_v51 = vld [vmem:[#allocation2 + $0x88] ss:$2 sm:$0xff]  ;;  %v10878_v20 = vadd.f32 %v10751_v16, %v220_v61 }
 0x13a   :  { %v4016_v31 = vadd.f32 %v10537_v1, %v3887_v24  ;;  %v4966_v47 = vmax.f32 %v4719_v51, %v4847_v38  ;;  %v92_v28 = vld [vmem:[%s13473_s0 + $0x170] sm:$0xff] }
 0x13b   :  { %9644 = vmatmul.msk.bf16.gmra.mxu1 %vm432_vm1, %v2116_v22  ;;  %v10881_v22 = vadd.s32 320, %v10315_v21  ;;  %478 = vst.msk [vmem:[#allocation2 + $0x170] sm:$0xff] %vm432_vm1, %v10878_v20  ;;  %v10119_v38 = vld [vmem:[%s13476_s3 + $0x10] sm:$0xff] }
 0x13c   :  { %v4144_v27 = vmax.f32 %v4016_v31, 0.0  ;;  %9709 = vmatmul.msk.bf16.gmra.mxu2 %vm432_vm1, %v3296_v12  ;;  %v221_v12 = vmul.f32 %v10743_v13, %v92_v28  ;;  %6673 = vmatpush.bf16.msrb.mxu0 %v10119_v38 }
 0x13d   :  { %13517 = vst [vmem:[#allocation12_spill] sm:$0xff] %v10881_v22  ;;  %v986_v24 = vand.u32 63, %v10881_v22 }
 0x13e   :  { %4273 = vst.msk [vmem:[#allocation2 + $0xa0] sm:$0xff] %vm4253_vm7, %v4144_v27  ;;  %v2491_v41 = vpop.f32.mrf.mxu0  ;;  %v10897_v9 = vadd.f32 %v10751_v16, %v221_v12 }
 0x13f   :  { %v3598_v34 = vpop.f32.mrf.mxu2  ;;  %vm1114_vm13 = vcmp.eq.s32.totalorder %v986_v24, 0  ;;  %v732_v24 = vld [vmem:[#allocation2 + $0x161] sm:$0xff] }
 0x140   :  { %v3888_v35 = vadd.f32 %v3598_v34, %v3009_v10  ;;  %v3010_v43 = vpop.f32.mrf.mxu1  ;;  %479 = vst.msk [vmem:[#allocation2 + $0x178] sm:$0xff] %vm432_vm1, %v10897_v9 }
 0x141   :  { %v3011_v60 = vadd.f32 %v3010_v43, %v2486_v5 }
 0x142   :  { %v4017_v37 = vadd.f32 %v10537_v1, %v3888_v35  ;;  %v602_v35 = vld [vmem:[#allocation2 + $0x14f] sm:$0xff] }
 0x144   :  { %v4145_v3 = vmax.f32 %v4017_v37, 0.0  ;;  %v729_v37 = vld [vmem:[#allocation2 + $0x149] sm:$0xff] }
 0x145   :  { %v4721_v42 = vld [vmem:[#allocation2 + $0x98] ss:$2 sm:$0xff]  ;;  %v4849_v48 = vld [vmem:[#allocation2 + $0x99] ss:$2 sm:$0xff]  ;;  %v3298_v63 = vpack.c.bf16 %v730_v33, %v729_v37 }
 0x146   :  { %4274 = vst.msk [vmem:[#allocation2 + $0xa8] sm:$0xff] %vm4253_vm7, %v4145_v3  ;;  %v4967_v8 = vmax.f32 %v4721_v42, %v4849_v48  ;;  %v2494_v45 = vpop.f32.mrf.mxu0  ;;  %v222_v3 = vmul.f32 %v10743_v13, %v93_v50 }
 0x147   :  { %v3600_v6 = vpop.f32.mrf.mxu2 }
 0x148   :  { %v3889_v18 = vadd.f32 %v3600_v6, %v3011_v60  ;;  %v3013_v52 = vpop.f32.mrf.mxu1  ;;  %v5956_v11 = vpack.c.bf16 %v4967_v8, %v4966_v47  ;;  %v10913_v60 = vadd.f32 %v10751_v16, %v222_v3  ;;  %v223_v8 = vmul.f32 %v10743_v13, %v94_v29  ;;  %v606_v29 = vld [vmem:[#allocation2 + $0x16f] sm:$0xff] }
 0x149   :  { %9582 = vmatmul.msk.bf16.gmra.mxu0 %vm432_vm1, %v2183_v30  ;;  %v3014_v57 = vadd.f32 %v3013_v52, %v2489_v26  ;;  %v601_v26 = vld [vmem:[#allocation2 + $0x147] sm:$0xff] }
 0x14a   :  { %v4018_v5 = vadd.f32 %v10537_v1, %v3889_v18  ;;  %9765 = vmatmul.msk.bf16.gmra.mxu3 %vm4253_vm7, %v5956_v11  ;;  %v1498_v43 = vsel %vm1114_vm13, 0.0, %v601_v26  ;;  %480 = vst.msk [vmem:[#allocation2 + $0x180] sm:$0xff] %vm432_vm1, %v10913_v60  ;;  %v10927_v6 = vadd.f32 %v10751_v16, %v223_v8  ;;  %v733_v8 = vld [vmem:[#allocation2 + $0x169] sm:$0xff] }
 0x14b   :  { %9645 = vmatmul.msk.bf16.gmra.mxu1 %vm432_vm1, %v2117_v14  ;;  %v2118_v56 = vpack.c.bf16 %v602_v35, %v1498_v43  ;;  %v2185_v35 = vpack.c.bf16 %v10878_v20, %v10859_v2 }
 0x14c   :  { %v4146_v62 = vmax.f32 %v4018_v5, 0.0  ;;  %9710 = vmatmul.msk.bf16.gmra.mxu2 %vm432_vm1, %v3297_v17  ;;  %481 = vst.msk [vmem:[#allocation2 + $0x188] sm:$0xff] %vm432_vm1, %v10927_v6  ;;  %v603_v17 = vld [vmem:[#allocation2 + $0x157] sm:$0xff] }
 0x14e   :  { %4275 = vst.msk [vmem:[#allocation2 + $0xb0] sm:$0xff] %vm4253_vm7, %v4146_v62  ;;  %v2496_v10 = vpop.f32.mrf.mxu0  ;;  %v604_v62 = vld [vmem:[#allocation2 + $0x15f] sm:$0xff] }
 0x14f   :  { %v3603_v31 = vpop.f32.mrf.mxu2  ;;  %v2119_v43 = vpack.c.bf16 %v604_v62, %v603_v17 }
 0x150   :  { %v3890_v27 = vadd.f32 %v3603_v31, %v3014_v57  ;;  %v3015_v15 = vpop.f32.mrf.mxu1  ;;  %v731_v57 = vld [vmem:[#allocation2 + $0x159] sm:$0xff]  ;;  %v95_v31 = vld [vmem:[%s13473_s0 + $0x188] sm:$0xff] }
 0x151   :  { %v3016_v51 = vadd.f32 %v3015_v15, %v2491_v41  ;;  %v3299_v38 = vpack.c.bf16 %v732_v24, %v731_v57 }
 0x152   :  { %v4019_v25 = vadd.f32 %v10537_v1, %v3890_v27 }
 0x154   :  { %v4147_v34 = vmax.f32 %v4019_v25, 0.0  ;;  %v224_v25 = vmul.f32 %v10743_v13, %v95_v31  ;;  %v10977_v31 = vadd.s32 376, %v10315_v21 }
 0x155   :  { %v4723_v52 = vld [vmem:[#allocation2 + $0xa8] ss:$2 sm:$0xff]  ;;  %v4851_v11 = vld [vmem:[#allocation2 + $0xa9] ss:$2 sm:$0xff] }
 0x156   :  { %4276 = vst.msk [vmem:[#allocation2 + $0xb8] sm:$0xff] %vm4253_vm7, %v4147_v34  ;;  %v2499_v48 = vpop.f32.mrf.mxu0  ;;  %v4968_v15 = vmax.f32 %v4723_v52, %v4851_v11  ;;  %v10940_v3 = vadd.f32 %v10751_v16, %v224_v25  ;;  %v2186_v11 = vpack.c.bf16 %v10913_v60, %v10897_v9 }
 0x157   :  { %v3605_v54 = vpop.f32.mrf.mxu2 }
 0x158   :  { %v3891_v42 = vadd.f32 %v3605_v54, %v3016_v51  ;;  %v3018_v59 = vpop.f32.mrf.mxu1  ;;  %482 = vst.msk [vmem:[#allocation2 + $0x190] sm:$0xff] %vm432_vm1, %v10940_v3 }
 0x159   :  { %9583 = vmatmul.msk.bf16.gmra.mxu0 %vm432_vm1, %v2184_v58  ;;  %v3019_v7 = vadd.f32 %v3018_v59, %v2494_v45 }
 0x15a   :  { %v4020_v41 = vadd.f32 %v10537_v1, %v3891_v42 }
 0x15b   :  { %9646 = vmatmul.msk.bf16.gmra.mxu1 %vm432_vm1, %v2118_v56 }
 0x15c   :  { %v4148_v47 = vmax.f32 %v4020_v41, 0.0  ;;  %9711 = vmatmul.msk.bf16.gmra.mxu2 %vm432_vm1, %v3298_v63 }
 0x15e   :  { %4277 = vst.msk [vmem:[#allocation2 + $0xc0] sm:$0xff] %vm4253_vm7, %v4148_v47  ;;  %v2501_v14 = vpop.f32.mrf.mxu0 }
 0x15f   :  { %v3608_v61 = vpop.f32.mrf.mxu2 }
 0x160   :  { %v3892_v30 = vadd.f32 %v3608_v61, %v3019_v7  ;;  %v3020_v18 = vpop.f32.mrf.mxu1  ;;  %v605_v7 = vld [vmem:[#allocation2 + $0x167] sm:$0xff]  ;;  %v734_v61 = vld [vmem:[#allocation2 + $0x171] sm:$0xff] }
 0x161   :  { %v3021_v27 = vadd.f32 %v3020_v18, %v2496_v10  ;;  %v96_v10 = vld [vmem:[%s13473_s0 + $0x190] sm:$0xff]  ;;  %v2120_v17 = vpack.c.bf16 %v606_v29, %v605_v7  ;;  %v3300_v24 = vpack.c.bf16 %v734_v61, %v733_v8  ;;  %v2187_v61 = vpack.c.bf16 %v10940_v3, %v10927_v6 }
 0x162   :  { %v4021_v45 = vadd.f32 %v10537_v1, %v3892_v30  ;;  %v97_v30 = vld [vmem:[%s13473_s0 + $0x198] sm:$0xff] }
 0x164   :  { %v4149_v5 = vmax.f32 %v4021_v45, 0.0  ;;  %v226_v45 = vmul.f32 %v10743_v13, %v97_v30 }
 0x165   :  { %v4725_v28 = vld [vmem:[#allocation2 + $0xb8] ss:$2 sm:$0xff]  ;;  %v4853_v12 = vld [vmem:[#allocation2 + $0xb9] ss:$2 sm:$0xff] }
 0x166   :  { %4278 = vst.msk [vmem:[#allocation2 + $0xc8] sm:$0xff] %vm4253_vm7, %v4149_v5  ;;  %v4969_v26 = vmax.f32 %v4725_v28, %v4853_v12  ;;  %v2504_v33 = vpop.f32.mrf.mxu0  ;;  %v10973_v28 = vadd.f32 %v10751_v16, %v226_v45 }
 0x167   :  { %v3610_v34 = vpop.f32.mrf.mxu2 }
 0x168   :  { %v3893_v37 = vadd.f32 %v3610_v34, %v3021_v27  ;;  %v3023_v50 = vpop.f32.mrf.mxu1  ;;  %v5957_v51 = vpack.c.bf16 %v4969_v26, %v4968_v15  ;;  %484 = vst.msk [vmem:[#allocation2 + $0x1a0] sm:$0xff] %vm432_vm1, %v10973_v28  ;;  %v993_v27 = vand.u32 63, %v10977_v31 }
 0x169   :  { %9584 = vmatmul.msk.bf16.gmra.mxu0 %vm432_vm1, %v2185_v35  ;;  %v3024_v20 = vadd.f32 %v3023_v50, %v2499_v48  ;;  %v10960_v48 = vld [vmem:[%s13474_s1 + $0x2] ss:$0 sm:$0xff]  ;;  %v737_v50 = vld [vmem:[#allocation2 + $0x189] sm:$0xff] }
 0x16a   :  { %v4022_v54 = vadd.f32 %v10537_v1, %v3893_v37  ;;  %9766 = vmatmul.msk.bf16.gmra.mxu3 %vm4253_vm7, %v5957_v51  ;;  %v225_v1 = vmul.f32 %v10743_v13, %v96_v10  ;;  %vm10994_vm14 = vcmp.eq.s32.totalorder %v993_v27, 63  ;;  %v735_v10 = vld [vmem:[#allocation2 + $0x179] sm:$0xff] }
 0x16b   :  { %9647 = vmatmul.msk.bf16.gmra.mxu1 %vm432_vm1, %v2119_v43 }
 0x16c   :  { %v4150_v2 = vmax.f32 %v4022_v54, 0.0  ;;  %9712 = vmatmul.msk.bf16.gmra.mxu2 %vm432_vm1, %v3299_v38  ;;  %v10955_v63 = vadd.f32 %v10751_v16, %v225_v1 }
 0x16e   :  { %4279 = vst.msk [vmem:[#allocation2 + $0xd0] sm:$0xff] %vm4253_vm7, %v4150_v2  ;;  %v2506_v42 = vpop.f32.mrf.mxu0  ;;  %v607_v2 = vld [vmem:[#allocation2 + $0x177] sm:$0xff] }
 0x16f   :  { %v3613_v58 = vpop.f32.mrf.mxu2  ;;  %483 = vst.msk [vmem:[#allocation2 + $0x198] sm:$0xff] %vm432_vm1, %v10955_v63 }
 0x170   :  { %v3894_v56 = vadd.f32 %v3613_v58, %v3024_v20  ;;  %v3025_v59 = vpop.f32.mrf.mxu1  ;;  %v608_v20 = vld [vmem:[#allocation2 + $0x17f] sm:$0xff] }
 0x171   :  { %v3026_v18 = vadd.f32 %v3025_v59, %v2501_v14  ;;  %v98_v14 = vld [vmem:[%s13473_s0 + $0x1a0] sm:$0xff]  ;;  %v99_v59 = vld [vmem:[%s13473_s0 + $0x1a8] sm:$0xff]  ;;  %v2121_v30 = vpack.c.bf16 %v608_v20, %v607_v2 }
 0x172   :  { %v4023_v41 = vadd.f32 %v10960_v48, %v3894_v56  ;;  %v227_v15 = vmul.f32 %v10743_v13, %v98_v14  ;;  %v228_v29 = vmul.f32 %v10743_v13, %v99_v59 }
 0x174   :  { %v4151_v47 = vmax.f32 %v4023_v41, 0.0  ;;  %v10991_v43 = vadd.f32 %v10751_v16, %v227_v15 }
 0x175   :  { %v4727_v51 = vld [vmem:[#allocation2 + $0xc8] ss:$2 sm:$0xff]  ;;  %v4855_v38 = vld [vmem:[#allocation2 + $0xc9] ss:$2 sm:$0xff] }
 0x176   :  { %4280 = vst.msk [vmem:[#allocation2 + $0xd8] sm:$0xff] %vm4253_vm7, %v4151_v47  ;;  %v2509_v62 = vpop.f32.mrf.mxu0  ;;  %v4970_v47 = vmax.f32 %v4727_v51, %v4855_v38  ;;  %v738_v51 = vld [vmem:[#allocation2 + $0x191] sm:$0xff] }
 0x177   :  { %v3615_v52 = vpop.f32.mrf.mxu2  ;;  %485 = vst.msk [vmem:[#allocation2 + $0x1a8] sm:$0xff] %vm432_vm1, %v10991_v43  ;;  %v101_v38 = vld [vmem:[%s13473_s0 + $0x1b8] sm:$0xff] }
 0x178   :  { %v3895_v5 = vadd.f32 %v3615_v52, %v3026_v18  ;;  %v3028_v57 = vpop.f32.mrf.mxu1  ;;  %v230_v2 = vmul.f32 %v10743_v13, %v101_v38 }
 0x179   :  { %9585 = vmatmul.msk.bf16.gmra.mxu0 %vm432_vm1, %v2186_v11  ;;  %v3029_v60 = vadd.f32 %v3028_v57, %v2504_v33  ;;  %v736_v33 = vld [vmem:[#allocation2 + $0x181] sm:$0xff]  ;;  %v11013_v57 = vadd.s32 384, %v10315_v21 }
 0x17a   :  { %v4024_v12 = vadd.f32 %v10960_v48, %v3895_v5  ;;  %v2017_v56 = vsel %vm10994_vm14, 0.0, %v736_v33  ;;  %v11010_v5 = vadd.f32 %v10751_v16, %v228_v29 }
 0x17b   :  { %9648 = vmatmul.msk.bf16.gmra.mxu1 %vm432_vm1, %v2120_v17  ;;  %v3301_v17 = vpack.c.bf16 %v2017_v56, %v735_v10  ;;  %13520 = vst [vmem:[#allocation13_spill] sm:$0xff] %v11013_v57  ;;  %v2188_v10 = vpack.c.bf16 %v10973_v28, %v10955_v63  ;;  %v102_v63 = vld [vmem:[%s13473_s0 + $0x1c0] sm:$0xff] }
 0x17c   :  { %v4152_v9 = vmax.f32 %v4024_v12, 0.0  ;;  %9713 = vmatmul.msk.bf16.gmra.mxu2 %vm432_vm1, %v3300_v24  ;;  %486 = vst.msk [vmem:[#allocation2 + $0x1b0] sm:$0xff] %vm432_vm1, %v11010_v5  ;;  %v994_v24 = vand.u32 63, %v11013_v57  ;;  %v100_v12 = vld [vmem:[%s13473_s0 + $0x1b0] sm:$0xff]  ;;  %v231_v28 = vmul.f32 %v10743_v13, %v102_v63 }
 0x17e   :  { %4281 = vst.msk [vmem:[#allocation2 + $0xe0] sm:$0xff] %vm4253_vm7, %v4152_v9  ;;  %v2511_v34 = vpop.f32.mrf.mxu0  ;;  %v229_v9 = vmul.f32 %v10743_v13, %v100_v12  ;;  %vm1122_vm15 = vcmp.eq.s32.totalorder %v994_v24, 0  ;;  %v739_v24 = vld [vmem:[#allocation2 + $0x199] sm:$0xff]  ;;  %v740_v12 = vld [vmem:[#allocation2 + $0x1a1] sm:$0xff] }
 0x17f   :  { %v3618_v26 = vpop.f32.mrf.mxu2 }
 0x180   :  { %v3896_v25 = vadd.f32 %v3618_v26, %v3029_v60  ;;  %v3030_v35 = vpop.f32.mrf.mxu1  ;;  %v11029_v26 = vadd.f32 %v10751_v16, %v229_v9 }
 0x181   :  { %v3031_v41 = vadd.f32 %v3030_v35, %v2506_v42 }
 0x182   :  { %v4025_v37 = vadd.f32 %v10960_v48, %v3896_v25  ;;  %487 = vst.msk [vmem:[#allocation2 + $0x1b8] sm:$0xff] %vm432_vm1, %v11029_v26 }
 0x184   :  { %v4153_v54 = vmax.f32 %v4025_v37, 0.0  ;;  %v610_v37 = vld [vmem:[#allocation2 + $0x18f] sm:$0xff] }
 0x185   :  { %v4729_v1 = vld [vmem:[#allocation2 + $0xd8] ss:$2 sm:$0xff]  ;;  %v4857_v58 = vld [vmem:[#allocation2 + $0xd9] ss:$2 sm:$0xff] }
 0x186   :  { %4282 = vst.msk [vmem:[#allocation2 + $0xe8] sm:$0xff] %vm4253_vm7, %v4153_v54  ;;  %v4971_v7 = vmax.f32 %v4729_v1, %v4857_v58  ;;  %v2514_v45 = vpop.f32.mrf.mxu0 }
 0x187   :  { %v3620_v8 = vpop.f32.mrf.mxu2 }
 0x188   :  { %v3897_v18 = vadd.f32 %v3620_v8, %v3031_v41  ;;  %v3033_v52 = vpop.f32.mrf.mxu1  ;;  %v5958_v11 = vpack.c.bf16 %v4971_v7, %v4970_v47  ;;  %v3302_v41 = vpack.c.bf16 %v738_v51, %v737_v50  ;;  %v11042_v47 = vadd.f32 %v10751_v16, %v230_v2 }
 0x189   :  { %9586 = vmatmul.msk.bf16.gmra.mxu0 %vm432_vm1, %v2187_v61  ;;  %v3034_v3 = vadd.f32 %v3033_v52, %v2509_v62  ;;  %v609_v62 = vld [vmem:[#allocation2 + $0x187] sm:$0xff]  ;;  %v11056_v61 = vadd.f32 %v10751_v16, %v231_v28 }
 0x18a   :  { %v4026_v42 = vadd.f32 %v10960_v48, %v3897_v18  ;;  %9767 = vmatmul.msk.bf16.gmra.mxu3 %vm4253_vm7, %v5958_v11  ;;  %v1506_v33 = vsel %vm1122_vm15, 0.0, %v609_v62  ;;  %488 = vst.msk [vmem:[#allocation2 + $0x1c0] sm:$0xff] %vm432_vm1, %v11042_v47  ;;  %v613_v28 = vld [vmem:[#allocation2 + $0x1a7] sm:$0xff] }
 0x18b   :  { %9649 = vmatmul.msk.bf16.gmra.mxu1 %vm432_vm1, %v2121_v30  ;;  %v2122_v1 = vpack.c.bf16 %v610_v37, %v1506_v33  ;;  %489 = vst.msk [vmem:[#allocation2 + $0x1c8] sm:$0xff] %vm432_vm1, %v11056_v61  ;;  %v2189_v33 = vpack.c.bf16 %v11010_v5, %v10991_v43 }
 0x18c   :  { %v4154_v6 = vmax.f32 %v4026_v42, 0.0  ;;  %9714 = vmatmul.msk.bf16.gmra.mxu2 %vm432_vm1, %v3301_v17  ;;  %v611_v42 = vld [vmem:[#allocation2 + $0x197] sm:$0xff] }
 0x18e   :  { %4283 = vst.msk [vmem:[#allocation2 + $0xf0] sm:$0xff] %vm4253_vm7, %v4154_v6  ;;  %v2516_v27 = vpop.f32.mrf.mxu0 }
 0x18f   :  { %v3623_v60 = vpop.f32.mrf.mxu2 }
 0x190   :  { %v3898_v14 = vadd.f32 %v3623_v60, %v3034_v3  ;;  %v3035_v15 = vpop.f32.mrf.mxu1  ;;  %v612_v3 = vld [vmem:[#allocation2 + $0x19f] sm:$0xff] }
 0x191   :  { %v3036_v54 = vadd.f32 %v3035_v15, %v2511_v34  ;;  %v2123_v50 = vpack.c.bf16 %v612_v3, %v611_v42 }
 0x192   :  { %v4027_v25 = vadd.f32 %v10960_v48, %v3898_v14  ;;  %v103_v14 = vld [vmem:[%s13473_s0 + $0x1c8] sm:$0xff] }
 0x194   :  { %v4155_v35 = vmax.f32 %v4027_v25, 0.0 }
 0x195   :  { %v4731_v11 = vld [vmem:[#allocation2 + $0xe8] ss:$2 sm:$0xff]  ;;  %v4859_v17 = vld [vmem:[#allocation2 + $0xe9] ss:$2 sm:$0xff] }
 0x196   :  { %4284 = vst.msk [vmem:[#allocation2 + $0xf8] sm:$0xff] %vm4253_vm7, %v4155_v35  ;;  %v2519_v56 = vpop.f32.mrf.mxu0  ;;  %v4972_v62 = vmax.f32 %v4731_v11, %v4859_v17  ;;  %v232_v35 = vmul.f32 %v10743_v13, %v103_v14 }
 0x197   :  { %v3625_v20 = vpop.f32.mrf.mxu2 }
 0x198   :  { %v3899_v58 = vadd.f32 %v3625_v20, %v3036_v54  ;;  %v3038_v59 = vpop.f32.mrf.mxu1  ;;  %v3303_v20 = vpack.c.bf16 %v740_v12, %v739_v24 }
 0x199   :  { %9587 = vmatmul.msk.bf16.gmra.mxu0 %vm432_vm1, %v2188_v10  ;;  %v3039_v29 = vadd.f32 %v3038_v59, %v2514_v45  ;;  %v11069_v10 = vadd.f32 %v10751_v16, %v232_v35 }
 0x19a   :  { %v4028_v7 = vadd.f32 %v10960_v48, %v3899_v58 }
 0x19b   :  { %9650 = vmatmul.msk.bf16.gmra.mxu1 %vm432_vm1, %v2122_v1  ;;  %490 = vst.msk [vmem:[#allocation2 + $0x1d0] sm:$0xff] %vm432_vm1, %v11069_v10 }
 0x19c   :  { %v4156_v34 = vmax.f32 %v4028_v7, 0.0  ;;  %9715 = vmatmul.msk.bf16.gmra.mxu2 %vm432_vm1, %v3302_v41 }
 0x19e   :  { %4285 = vst.msk [vmem:[#allocation2 + $0x100] sm:$0xff] %vm4253_vm7, %v4156_v34  ;;  %v2521_v18 = vpop.f32.mrf.mxu0 }
 0x19f   :  { %v3628_v8 = vpop.f32.mrf.mxu2 }
 0x1a0   :  { %v3900_v30 = vadd.f32 %v3628_v8, %v3039_v29  ;;  %v3040_v52 = vpop.f32.mrf.mxu1  ;;  %v614_v8 = vld [vmem:[#allocation2 + $0x1af] sm:$0xff] }
 0x1a1   :  { %v3041_v15 = vadd.f32 %v3040_v52, %v2516_v27  ;;  %v104_v27 = vld [vmem:[%s13473_s0 + $0x1d0] sm:$0xff]  ;;  %v2124_v3 = vpack.c.bf16 %v614_v8, %v613_v28 }
 0x1a2   :  { %v4029_v45 = vadd.f32 %v10960_v48, %v3900_v30  ;;  %v233_v58 = vmul.f32 %v10743_v13, %v104_v27  ;;  %v741_v30 = vld [vmem:[#allocation2 + $0x1a9] sm:$0xff]  ;;  %v742_v52 = vld [vmem:[#allocation2 + $0x1b1] sm:$0xff] }
 0x1a3   :  { %v615_v27 = vld [vmem:[#allocation2 + $0x1b7] sm:$0xff] }
 0x1a4   :  { %v4157_v6 = vmax.f32 %v4029_v45, 0.0  ;;  %v11084_v29 = vadd.f32 %v10751_v16, %v233_v58  ;;  %v105_v45 = vld [vmem:[%s13473_s0 + $0x1d8] sm:$0xff] }
 0x1a5   :  { %v4733_v9 = vld [vmem:[#allocation2 + $0xf8] ss:$2 sm:$0xff]  ;;  %v4861_v60 = vld [vmem:[#allocation2 + $0xf9] ss:$2 sm:$0xff]  ;;  %v234_v17 = vmul.f32 %v10743_v13, %v105_v45 }
 0x1a6   :  { %4286 = vst.msk [vmem:[#allocation2 + $0x108] sm:$0xff] %vm4253_vm7, %v4157_v6  ;;  %v4973_v25 = vmax.f32 %v4733_v9, %v4861_v60  ;;  %v2524_v38 = vpop.f32.mrf.mxu0  ;;  %v2190_v6 = vpack.c.bf16 %v11042_v47, %v11029_v26  ;;  %v3304_v60 = vpack.c.bf16 %v742_v52, %v741_v30  ;;  %v616_v58 = vld [vmem:[#allocation2 + $0x1bf] sm:$0xff] }
 0x1a7   :  { %v3630_v37 = vpop.f32.mrf.mxu2  ;;  %491 = vst.msk [vmem:[#allocation2 + $0x1d8] sm:$0xff] %vm432_vm1, %v11084_v29  ;;  %v11097_v14 = vadd.f32 %v10751_v16, %v234_v17  ;;  %v2125_v17 = vpack.c.bf16 %v616_v58, %v615_v27  ;;  %v11165_v27 = vld [vmem:[%s13474_s1] ss:$0 sm:$0xff] }
 0x1a8   :  { %v3901_v51 = vadd.f32 %v3630_v37, %v3041_v15  ;;  %v3043_v54 = vpop.f32.mrf.mxu1  ;;  %v5959_v2 = vpack.c.bf16 %v4973_v25, %v4972_v62  ;;  %v11101_v62 = vadd.s32 440, %v10315_v21 }
 0x1a9   :  { %9588 = vmatmul.msk.bf16.gmra.mxu0 %vm432_vm1, %v2189_v33  ;;  %v3044_v5 = vadd.f32 %v3043_v54, %v2519_v56  ;;  %492 = vst.msk [vmem:[#allocation2 + $0x1e0] sm:$0xff] %vm432_vm1, %v11097_v14 }
 0x1aa   :  { %v4030_v1 = vadd.f32 %v10960_v48, %v3901_v51  ;;  %9768 = vmatmul.msk.bf16.gmra.mxu3 %vm4253_vm7, %v5959_v2  ;;  %v1001_v25 = vand.u32 63, %v11101_v62  ;;  %v744_v2 = vld [vmem:[#allocation2 + $0x1c1] sm:$0xff] }
 0x1ab   :  { %9651 = vmatmul.msk.bf16.gmra.mxu1 %vm432_vm1, %v2123_v50 }
 0x1ac   :  { %v4158_v43 = vmax.f32 %v4030_v1, 0.0  ;;  %9716 = vmatmul.msk.bf16.gmra.mxu2 %vm432_vm1, %v3303_v20  ;;  %vm11118_vm0 = vcmp.eq.s32.totalorder %v1001_v25, 63  ;;  %v618_v20 = vld [vmem:[#allocation2 + $0x1cf] sm:$0xff] }
 0x1ae   :  { %4287 = vst.msk [vmem:[#allocation2 + $0x110] sm:$0xff] %vm4253_vm7, %v4158_v43  ;;  %v2526_v7 = vpop.f32.mrf.mxu0 }
 0x1af   :  { %v3633_v59 = vpop.f32.mrf.mxu2 }
 0x1b0   :  { %v3902_v41 = vadd.f32 %v3633_v59, %v3044_v5  ;;  %v3045_v34 = vpop.f32.mrf.mxu1  ;;  %v743_v59 = vld [vmem:[#allocation2 + $0x1b9] sm:$0xff] }
 0x1b1   :  { %v3046_v11 = vadd.f32 %v3045_v34, %v2521_v18  ;;  %v106_v18 = vld [vmem:[%s13473_s0 + $0x1e0] sm:$0xff] }
 0x1b2   :  { %v4031_v63 = vadd.f32 %v10960_v48, %v3902_v41  ;;  %v235_v35 = vmul.f32 %v10743_v13, %v106_v18 }
 0x1b4   :  { %v4159_v56 = vmax.f32 %v4031_v63, 0.0  ;;  %v11115_v54 = vadd.f32 %v10751_v16, %v235_v35  ;;  %v2025_v63 = vsel %vm11118_vm0, 0.0, %v744_v2 }
 0x1b5   :  { %v4735_v1 = vld [vmem:[#allocation2 + $0x108] ss:$2 sm:$0xff]  ;;  %v4863_v43 = vld [vmem:[#allocation2 + $0x109] ss:$2 sm:$0xff] }
 0x1b6   :  { %4288 = vst.msk [vmem:[#allocation2 + $0x118] sm:$0xff] %vm4253_vm7, %v4159_v56  ;;  %v2529_v12 = vpop.f32.mrf.mxu0  ;;  %v107_v56 = vld [vmem:[%s13473_s0 + $0x1e8] sm:$0xff]  ;;  %v4974_v8 = vmax.f32 %v4735_v1, %v4863_v43 }
 0x1b7   :  { %v3635_v42 = vpop.f32.mrf.mxu2  ;;  %493 = vst.msk [vmem:[#allocation2 + $0x1e8] sm:$0xff] %vm432_vm1, %v11115_v54  ;;  %v236_v52 = vmul.f32 %v10743_v13, %v107_v56  ;;  %v745_v43 = vld [vmem:[#allocation2 + $0x1c9] sm:$0xff] }
 0x1b8   :  { %v3903_v24 = vadd.f32 %v3635_v42, %v3046_v11  ;;  %v3048_v9 = vpop.f32.mrf.mxu1  ;;  %v2191_v11 = vpack.c.bf16 %v11069_v10, %v11056_v61 }
 0x1b9   :  { %9589 = vmatmul.msk.bf16.gmra.mxu0 %vm432_vm1, %v2190_v6  ;;  %v3049_v47 = vadd.f32 %v3048_v9, %v2524_v38  ;;  %v3305_v9 = vpack.c.bf16 %v2025_v63, %v743_v59 }
 0x1ba   :  { %v4032_v15 = vadd.f32 %v10960_v48, %v3903_v24 }
 0x1bb   :  { %9652 = vmatmul.msk.bf16.gmra.mxu1 %vm432_vm1, %v2124_v3 }
 0x1bc   :  { %v4160_v26 = vmax.f32 %v4032_v15, 0.0  ;;  %9717 = vmatmul.msk.bf16.gmra.mxu2 %vm432_vm1, %v3304_v60  ;;  %v11134_v60 = vadd.f32 %v10751_v16, %v236_v52  ;;  %v11137_v15 = vadd.s32 448, %v10315_v21 }
 0x1be   :  { %4289 = vst.msk [vmem:[#allocation2 + $0x120] sm:$0xff] %vm4253_vm7, %v4160_v26  ;;  %v2531_v50 = vpop.f32.mrf.mxu0  ;;  %v1002_v26 = vand.u32 63, %v11137_v15 }
 0x1bf   :  { %v3638_v37 = vpop.f32.mrf.mxu2  ;;  %13523 = vst [vmem:[#allocation14_spill] sm:$0xff] %v11137_v15 }
 0x1c0   :  { %v3904_v33 = vadd.f32 %v3638_v37, %v3049_v47  ;;  %v3050_v51 = vpop.f32.mrf.mxu1  ;;  %494 = vst.msk [vmem:[#allocation2 + $0x1f0] sm:$0xff] %vm432_vm1, %v11134_v60  ;;  %v108_v47 = vld [vmem:[%s13473_s0 + $0x1f0] sm:$0xff]  ;;  %vm1130_vm2 = vcmp.eq.s32.totalorder %v1002_v26, 0 }
 0x1c1   :  { %v3051_v28 = vadd.f32 %v3050_v51, %v2526_v7  ;;  %v237_v18 = vmul.f32 %v10743_v13, %v108_v47  ;;  %v109_v13 = vld [vmem:[%s13473_s0 + $0x1f8] sm:$0xff] }
 0x1c2   :  { %v4033_v38 = vadd.f32 %v10960_v48, %v3904_v33  ;;  %v238_v58 = vmul.f32 %v11165_v27, %v109_v13  ;;  %v620_v47 = vld [vmem:[#allocation2 + $0x1df] sm:$0xff] }
 0x1c3   :  { %v11153_v51 = vadd.f32 %v10751_v16, %v237_v18  ;;  %v747_v18 = vld [vmem:[#allocation2 + $0x1d9] sm:$0xff] }
 0x1c4   :  { %v4161_v5 = vmax.f32 %v4033_v38, 0.0 }
 0x1c5   :  { %v4737_v41 = vld [vmem:[#allocation2 + $0x118] ss:$2 sm:$0xff]  ;;  %v4865_v34 = vld [vmem:[#allocation2 + $0x119] ss:$2 sm:$0xff]  ;;  %495 = vst.msk [vmem:[#allocation2 + $0x1f8] sm:$0xff] %vm432_vm1, %v11153_v51 }
 0x1c6   :  { %4290 = vst.msk [vmem:[#allocation2 + $0x128] sm:$0xff] %vm4253_vm7, %v4161_v5  ;;  %v4975_v30 = vmax.f32 %v4737_v41, %v4865_v34  ;;  %v2534_v6 = vpop.f32.mrf.mxu0  ;;  %v746_v5 = vld [vmem:[#allocation2 + $0x1d1] sm:$0xff]  ;;  %v2192_v41 = vpack.c.bf16 %v11097_v14, %v11084_v29 }
 0x1c7   :  { %v3640_v45 = vpop.f32.mrf.mxu2 }
 0x1c8   :  { %v3905_v42 = vadd.f32 %v3640_v45, %v3051_v28  ;;  %v3053_v3 = vpop.f32.mrf.mxu1  ;;  %v5960_v24 = vpack.c.bf16 %v4975_v30, %v4974_v8  ;;  %v3306_v8 = vpack.c.bf16 %v746_v5, %v745_v43  ;;  %v110_v45 = vld [vmem:[%s13473_s0 + $0x200] sm:$0xff]  ;;  %v2193_v5 = vpack.c.bf16 %v11134_v60, %v11115_v54 }
 0x1c9   :  { %9590 = vmatmul.msk.bf16.gmra.mxu0 %vm432_vm1, %v2191_v11  ;;  %v3054_v10 = vadd.f32 %v3053_v3, %v2529_v12  ;;  %v617_v12 = vld [vmem:[#allocation2 + $0x1c7] sm:$0xff]  ;;  %v239_v11 = vmul.f32 %v11165_v27, %v110_v45 }
 0x1ca   :  { %v4034_v7 = vadd.f32 %v10960_v48, %v3905_v42  ;;  %9769 = vmatmul.msk.bf16.gmra.mxu3 %vm4253_vm7, %v5960_v24  ;;  %v1514_v1 = vsel %vm1130_vm2, 0.0, %v617_v12  ;;  %v111_v12 = vld [vmem:[%s13473_s0 + $0x208] sm:$0xff] }
 0x1cb   :  { %9653 = vmatmul.msk.bf16.gmra.mxu1 %vm432_vm1, %v2125_v17  ;;  %v2126_v34 = vpack.c.bf16 %v618_v20, %v1514_v1  ;;  %v240_v1 = vmul.f32 %v11165_v27, %v111_v12 }
 0x1cc   :  { %v4162_v61 = vmax.f32 %v4034_v7, 0.0  ;;  %9718 = vmatmul.msk.bf16.gmra.mxu2 %vm432_vm1, %v3305_v9 }
 0x1ce   :  { %4291 = vst.msk [vmem:[#allocation2 + $0x130] sm:$0xff] %vm4253_vm7, %v4162_v61  ;;  %v2536_v37 = vpop.f32.mrf.mxu0 }
 0x1cf   :  { %v3643_v25 = vpop.f32.mrf.mxu2 }
 0x1d0   :  { %v3906_v35 = vadd.f32 %v3643_v25, %v3054_v10  ;;  %v3055_v33 = vpop.f32.mrf.mxu1  ;;  %v619_v10 = vld [vmem:[#allocation2 + $0x1d7] sm:$0xff]  ;;  %v748_v25 = vld [vmem:[#allocation2 + $0x1e1] sm:$0xff] }
 0x1d1   :  { %v3056_v16 = vadd.f32 %v3055_v33, %v2531_v50  ;;  %v11173_v50 = vld [vmem:[%s13474_s1 + $0x1] ss:$0 sm:$0xff]  ;;  %v2127_v13 = vpack.c.bf16 %v620_v47, %v619_v10 }
 0x1d2   :  { %v4035_v38 = vadd.f32 %v10960_v48, %v3906_v35  ;;  %v11176_v30 = vadd.f32 %v11173_v50, %v238_v58  ;;  %v11190_v42 = vadd.f32 %v11173_v50, %v239_v11 }
 0x1d4   :  { %v4163_v2 = vmax.f32 %v4035_v38, 0.0  ;;  %496 = vst.msk [vmem:[#allocation2 + $0x200] sm:$0xff] %vm432_vm1, %v11176_v30 }
 0x1d5   :  { %497 = vst.msk [vmem:[#allocation2 + $0x208] sm:$0xff] %vm432_vm1, %v11190_v42  ;;  %v4739_v7 = vld [vmem:[#allocation2 + $0x128] ss:$2 sm:$0xff]  ;;  %v4867_v61 = vld [vmem:[#allocation2 + $0x129] ss:$2 sm:$0xff] }
 0x1d6   :  { %4292 = vst.msk [vmem:[#allocation2 + $0x138] sm:$0xff] %vm4253_vm7, %v4163_v2  ;;  %v2539_v56 = vpop.f32.mrf.mxu0  ;;  %v4976_v2 = vmax.f32 %v4739_v7, %v4867_v61  ;;  %v750_v7 = vld [vmem:[#allocation2 + $0x1f1] sm:$0xff] }
 0x1d7   :  { %v3645_v59 = vpop.f32.mrf.mxu2  ;;  %v113_v61 = vld [vmem:[%s13473_s0 + $0x218] sm:$0xff] }
 0x1d8   :  { %v3907_v63 = vadd.f32 %v3645_v59, %v3056_v16  ;;  %v3058_v28 = vpop.f32.mrf.mxu1 }
 0x1d9   :  { %9591 = vmatmul.msk.bf16.gmra.mxu0 %vm432_vm1, %v2192_v41  ;;  %v3059_v14 = vadd.f32 %v3058_v28, %v2534_v6 }
 0x1da   :  { %v4036_v52 = vadd.f32 %v10960_v48, %v3907_v63  ;;  %v11203_v63 = vadd.f32 %v11173_v50, %v240_v1  ;;  %v11235_v1 = vadd.s32 504, %v10315_v21 }
 0x1db   :  { %9654 = vmatmul.msk.bf16.gmra.mxu1 %vm432_vm1, %v2126_v34  ;;  %v3307_v34 = vpack.c.bf16 %v748_v25, %v747_v18  ;;  %v2194_v18 = vpack.c.bf16 %v11176_v30, %v11153_v51 }
 0x1dc   :  { %v4164_v29 = vmax.f32 %v4036_v52, 0.0  ;;  %9719 = vmatmul.msk.bf16.gmra.mxu2 %vm432_vm1, %v3306_v8  ;;  %498 = vst.msk [vmem:[#allocation2 + $0x210] sm:$0xff] %vm432_vm1, %v11203_v63 }
 0x1dd   :  { %13524 = vst [vmem:[#allocation15_spill] sm:$0xff] %v11235_v1 }
 0x1de   :  { %4293 = vst.msk [vmem:[#allocation2 + $0x140] sm:$0xff] %vm4253_vm7, %v4164_v29  ;;  %v2541_v24 = vpop.f32.mrf.mxu0 }
 0x1df   :  { %v3648_v17 = vpop.f32.mrf.mxu2 }
 0x1e0   :  { %v3908_v3 = vadd.f32 %v3648_v17, %v3059_v14  ;;  %v3060_v9 = vpop.f32.mrf.mxu1 }
 0x1e1   :  { %v3061_v38 = vadd.f32 %v3060_v9, %v2536_v37  ;;  %v112_v37 = vld [vmem:[%s13473_s0 + $0x210] sm:$0xff] }
 0x1e2   :  { %v4037_v6 = vadd.f32 %v10960_v48, %v3908_v3  ;;  %v241_v8 = vmul.f32 %v11165_v27, %v112_v37  ;;  %v621_v3 = vld [vmem:[#allocation2 + $0x1e7] sm:$0xff]  ;;  %v622_v9 = vld [vmem:[#allocation2 + $0x1ef] sm:$0xff] }
 0x1e3   :  { %v2128_v25 = vpack.c.bf16 %v622_v9, %v621_v3  ;;  %v115_v9 = vld [vmem:[%s13473_s0 + $0x228] sm:$0xff] }
 0x1e4   :  { %v4165_v26 = vmax.f32 %v4037_v6, 0.0  ;;  %v11218_v11 = vadd.f32 %v11173_v50, %v241_v8  ;;  %v749_v6 = vld [vmem:[#allocation2 + $0x1e9] sm:$0xff] }
 0x1e5   :  { %v4741_v35 = vld [vmem:[#allocation2 + $0x138] ss:$2 sm:$0xff]  ;;  %v4869_v33 = vld [vmem:[#allocation2 + $0x139] ss:$2 sm:$0xff] }
 0x1e6   :  { %4294 = vst.msk [vmem:[#allocation2 + $0x148] sm:$0xff] %vm4253_vm7, %v4165_v26  ;;  %v4977_v20 = vmax.f32 %v4741_v35, %v4869_v33  ;;  %v2544_v58 = vpop.f32.mrf.mxu0  ;;  %v242_v26 = vmul.f32 %v11165_v27, %v113_v61 }
 0x1e7   :  { %v3650_v43 = vpop.f32.mrf.mxu2  ;;  %499 = vst.msk [vmem:[#allocation2 + $0x218] sm:$0xff] %vm432_vm1, %v11218_v11 }
 0x1e8   :  { %v3909_v16 = vadd.f32 %v3650_v43, %v3061_v38  ;;  %v3063_v59 = vpop.f32.mrf.mxu1  ;;  %v5961_v41 = vpack.c.bf16 %v4977_v20, %v4976_v2  ;;  %v3308_v38 = vpack.c.bf16 %v750_v7, %v749_v6  ;;  %v11231_v2 = vadd.f32 %v11173_v50, %v242_v26 }
 0x1e9   :  { %9592 = vmatmul.msk.bf16.gmra.mxu0 %vm432_vm1, %v2193_v5  ;;  %v3064_v60 = vadd.f32 %v3063_v59, %v2539_v56  ;;  %v1009_v43 = vand.u32 63, %v11235_v1 }
 0x1ea   :  { %v4038_v28 = vadd.f32 %v10960_v48, %v3909_v16  ;;  %9770 = vmatmul.msk.bf16.gmra.mxu3 %vm4253_vm7, %v5961_v41  ;;  %500 = vst.msk [vmem:[#allocation2 + $0x220] sm:$0xff] %vm432_vm1, %v11231_v2 }
 0x1eb   :  { %9655 = vmatmul.msk.bf16.gmra.mxu1 %vm432_vm1, %v2127_v13  ;;  %vm11252_vm3 = vcmp.eq.s32.totalorder %v1009_v43, 63  ;;  %v116_v43 = vld [vmem:[%s13473_s0 + $0x230] sm:$0xff] }
 0x1ec   :  { %v4166_v54 = vmax.f32 %v4038_v28, 0.0  ;;  %9720 = vmatmul.msk.bf16.gmra.mxu2 %vm432_vm1, %v3307_v34  ;;  %v752_v28 = vld [vmem:[#allocation2 + $0x201] sm:$0xff] }
 0x1ed   :  { %v2033_v3 = vsel %vm11252_vm3, 0.0, %v752_v28 }
 0x1ee   :  { %4295 = vst.msk [vmem:[#allocation2 + $0x150] sm:$0xff] %vm4253_vm7, %v4166_v54  ;;  %v2546_v14 = vpop.f32.mrf.mxu0  ;;  %v625_v54 = vld [vmem:[#allocation2 + $0x207] sm:$0xff] }
 0x1ef   :  { %v3653_v52 = vpop.f32.mrf.mxu2 }
 0x1f0   :  { %v3910_v29 = vadd.f32 %v3653_v52, %v3064_v60  ;;  %v3065_v45 = vpop.f32.mrf.mxu1  ;;  %v623_v52 = vld [vmem:[#allocation2 + $0x1f7] sm:$0xff] }
 0x1f1   :  { %v3066_v10 = vadd.f32 %v3065_v45, %v2541_v24  ;;  %v114_v24 = vld [vmem:[%s13473_s0 + $0x220] sm:$0xff] }
 0x1f2   :  { %v4039_v17 = vadd.f32 %v10960_v48, %v3910_v29  ;;  %v243_v5 = vmul.f32 %v11165_v27, %v114_v24  ;;  %v624_v29 = vld [vmem:[#allocation2 + $0x1ff] sm:$0xff] }
 0x1f3   :  { %v751_v45 = vld [vmem:[#allocation2 + $0x1f9] sm:$0xff] }
 0x1f4   :  { %v4167_v56 = vmax.f32 %v4039_v17, 0.0  ;;  %v11249_v34 = vadd.f32 %v11173_v50, %v243_v5  ;;  %v245_v5 = vmul.f32 %v11165_v27, %v116_v43 }
 0x1f5   :  { %v4743_v60 = vld [vmem:[#allocation2 + $0x148] ss:$2 sm:$0xff]  ;;  %v4871_v37 = vld [vmem:[#allocation2 + $0x149] ss:$2 sm:$0xff] }
 0x1f6   :  { %4296 = vst.msk [vmem:[#allocation2 + $0x158] sm:$0xff] %vm4253_vm7, %v4167_v56  ;;  %v2549_v33 = vpop.f32.mrf.mxu0  ;;  %v4978_v7 = vmax.f32 %v4743_v60, %v4871_v37  ;;  %v11284_v28 = vadd.f32 %v11173_v50, %v245_v5  ;;  %v626_v37 = vld [vmem:[#allocation2 + $0x20f] sm:$0xff]  ;;  %v628_v5 = vld [vmem:[#allocation2 + $0x21f] sm:$0xff] }
 0x1f7   :  { %v3655_v47 = vpop.f32.mrf.mxu2  ;;  %501 = vst.msk [vmem:[#allocation2 + $0x228] sm:$0xff] %vm432_vm1, %v11249_v34 }
 0x1f8   :  { %v3911_v35 = vadd.f32 %v3655_v47, %v3066_v10  ;;  %v3068_v12 = vpop.f32.mrf.mxu1  ;;  %v244_v10 = vmul.f32 %v11165_v27, %v115_v9  ;;  %v2195_v47 = vpack.c.bf16 %v11203_v63, %v11190_v42  ;;  %503 = vst.msk [vmem:[#allocation2 + $0x238] sm:$0xff] %vm432_vm1, %v11284_v28  ;;  %v2196_v9 = vpack.c.bf16 %v11231_v2, %v11218_v11  ;;  %v118_v11 = vld [vmem:[%s13473_s0 + $0x240] sm:$0xff] }
 0x1f9   :  { %9593 = vmatmul.msk.bf16.gmra.mxu0 %vm432_vm1, %v2194_v18  ;;  %v3069_v30 = vadd.f32 %v3068_v12, %v2544_v58  ;;  %v2129_v18 = vpack.c.bf16 %v624_v29, %v623_v52  ;;  %v753_v52 = vld [vmem:[#allocation2 + $0x209] sm:$0xff]  ;;  %v754_v29 = vld [vmem:[#allocation2 + $0x211] sm:$0xff]  ;;  %v247_v2 = vmul.f32 %v11165_v27, %v118_v11 }
 0x1fa   :  { %v4040_v20 = vadd.f32 %v10960_v48, %v3911_v35 }
 0x1fb   :  { %9656 = vmatmul.msk.bf16.gmra.mxu1 %vm432_vm1, %v2128_v25 }
 0x1fc   :  { %v4168_v51 = vmax.f32 %v4040_v20, 0.0  ;;  %9721 = vmatmul.msk.bf16.gmra.mxu2 %vm432_vm1, %v3308_v38  ;;  %v3309_v20 = vpack.c.bf16 %v2033_v3, %v751_v45  ;;  %v117_v45 = vld [vmem:[%s13473_s0 + $0x238] sm:$0xff] }
 0x1fe   :  { %4297 = vst.msk [vmem:[#allocation2 + $0x160] sm:$0xff] %vm4253_vm7, %v4168_v51  ;;  %v2551_v59 = vpop.f32.mrf.mxu0  ;;  %v11268_v51 = vadd.f32 %v11173_v50, %v244_v10 }
 0x1ff   :  { %v3658_v13 = vpop.f32.mrf.mxu2 }
 0x200   :  { %v3912_v16 = vadd.f32 %v3658_v13, %v3069_v30  ;;  %v3070_v41 = vpop.f32.mrf.mxu1  ;;  %v882_v30 = vadd.s32 512, %v10315_v21  ;;  %502 = vst.msk [vmem:[#allocation2 + $0x230] sm:$0xff] %vm432_vm1, %v11268_v51 }
 0x201   :  { %v3071_v6 = vadd.f32 %v3070_v41, %v2546_v14 }
 0x202   :  { %v4041_v58 = vadd.f32 %v10960_v48, %v3912_v16  ;;  %v1010_v24 = vand.u32 63, %v882_v30 }
 0x204   :  { %v4169_v8 = vmax.f32 %v4041_v58, 0.0  ;;  %vm1138_vm4 = vcmp.eq.s32.totalorder %v1010_v24, 0  ;;  %v627_v24 = vld [vmem:[#allocation2 + $0x217] sm:$0xff] }
 0x205   :  { %v4745_v17 = vld [vmem:[#allocation2 + $0x158] ss:$2 sm:$0xff]  ;;  %v4873_v56 = vld [vmem:[#allocation2 + $0x159] ss:$2 sm:$0xff] }
 0x206   :  { %4298 = vst.msk [vmem:[#allocation2 + $0x168] sm:$0xff] %vm4253_vm7, %v4169_v8  ;;  %v4979_v61 = vmax.f32 %v4745_v17, %v4873_v56  ;;  %v2554_v35 = vpop.f32.mrf.mxu0  ;;  %v1522_v8 = vsel %vm1138_vm4, 0.0, %v625_v54  ;;  %v246_v56 = vmul.f32 %v11165_v27, %v117_v45  ;;  %v2197_v45 = vpack.c.bf16 %v11268_v51, %v11249_v34 }
 0x207   :  { %v3660_v26 = vpop.f32.mrf.mxu2 }
 0x208   :  { %v3913_v25 = vadd.f32 %v3660_v26, %v3071_v6  ;;  %v3073_v12 = vpop.f32.mrf.mxu1  ;;  %v5962_v38 = vpack.c.bf16 %v4979_v61, %v4978_v7  ;;  %v2130_v6 = vpack.c.bf16 %v626_v37, %v1522_v8  ;;  %v3310_v26 = vpack.c.bf16 %v754_v29, %v753_v52 }
 0x209   :  { %9594 = vmatmul.msk.bf16.gmra.mxu0 %vm432_vm1, %v2195_v47  ;;  %v3074_v63 = vadd.f32 %v3073_v12, %v2549_v33  ;;  %v11297_v47 = vadd.f32 %v11173_v50, %v246_v56 }
 0x20a   :  { %v4042_v14 = vadd.f32 %v10960_v48, %v3913_v25  ;;  %9771 = vmatmul.msk.bf16.gmra.mxu3 %vm4253_vm7, %v5962_v38  ;;  %v11311_v38 = vadd.f32 %v11173_v50, %v247_v2 }
 0x20b   :  { %9657 = vmatmul.msk.bf16.gmra.mxu1 %vm432_vm1, %v2129_v18  ;;  %504 = vst.msk [vmem:[#allocation2 + $0x240] sm:$0xff] %vm432_vm1, %v11297_v47 }
 0x20c   :  { %v4170_v42 = vmax.f32 %v4042_v14, 0.0  ;;  %9722 = vmatmul.msk.bf16.gmra.mxu2 %vm432_vm1, %v3309_v20  ;;  %505 = vst.msk [vmem:[#allocation2 + $0x248] sm:$0xff] %vm432_vm1, %v11311_v38 }
 0x20e   :  { %4299 = vst.msk [vmem:[#allocation2 + $0x170] sm:$0xff] %vm4253_vm7, %v4170_v42  ;;  %v2556_v41 = vpop.f32.mrf.mxu0 }
 0x20f   :  { %v3663_v13 = vpop.f32.mrf.mxu2 }
 0x210   :  { %v3914_v16 = vadd.f32 %v3663_v13, %v3074_v63  ;;  %v3075_v58 = vpop.f32.mrf.mxu1  ;;  %v755_v13 = vld [vmem:[#allocation2 + $0x219] sm:$0xff] }
 0x211   :  { %v3076_v17 = vadd.f32 %v3075_v58, %v2551_v59 }
 0x212   :  { %v4043_v33 = vadd.f32 %v10960_v48, %v3914_v16  ;;  %v756_v16 = vld [vmem:[#allocation2 + $0x221] sm:$0xff] }
 0x214   :  { %v4171_v60 = vmax.f32 %v4043_v33, 0.0  ;;  %v119_v33 = vld [vmem:[%s13473_s0 + $0x248] sm:$0xff] }
 0x215   :  { %v4747_v42 = vld [vmem:[#allocation2 + $0x168] ss:$2 sm:$0xff]  ;;  %v4875_v63 = vld [vmem:[#allocation2 + $0x169] ss:$2 sm:$0xff]  ;;  %v248_v52 = vmul.f32 %v11165_v27, %v119_v33 }
 0x216   :  { %4300 = vst.msk [vmem:[#allocation2 + $0x178] sm:$0xff] %vm4253_vm7, %v4171_v60  ;;  %v2559_v61 = vpop.f32.mrf.mxu0  ;;  %v4980_v37 = vmax.f32 %v4747_v42, %v4875_v63  ;;  %v757_v42 = vld [vmem:[#allocation2 + $0x229] sm:$0xff]  ;;  %v758_v63 = vld [vmem:[#allocation2 + $0x231] sm:$0xff] }
 0x217   :  { %v3665_v3 = vpop.f32.mrf.mxu2 }
 0x218   :  { %v3915_v7 = vadd.f32 %v3665_v3, %v3076_v17  ;;  %v3078_v10 = vpop.f32.mrf.mxu1  ;;  %v2131_v17 = vpack.c.bf16 %v628_v5, %v627_v24  ;;  %v121_v24 = vld [vmem:[%s13473_s0 + $0x258] sm:$0xff] }
 0x219   :  { %9595 = vmatmul.msk.bf16.gmra.mxu0 %vm432_vm1, %v2196_v9  ;;  %v3079_v25 = vadd.f32 %v3078_v10, %v2554_v35  ;;  %v11324_v10 = vadd.f32 %v11173_v50, %v248_v52  ;;  %v250_v5 = vmul.f32 %v11165_v27, %v121_v24 }
 0x21a   :  { %v4044_v18 = vadd.f32 %v10960_v48, %v3915_v7  ;;  %v3311_v7 = vpack.c.bf16 %v756_v16, %v755_v13  ;;  %v2198_v16 = vpack.c.bf16 %v11297_v47, %v11284_v28 }
 0x21b   :  { %9658 = vmatmul.msk.bf16.gmra.mxu1 %vm432_vm1, %v2130_v6  ;;  %506 = vst.msk [vmem:[#allocation2 + $0x250] sm:$0xff] %vm432_vm1, %v11324_v10 }
 0x21c   :  { %v4172_v59 = vmax.f32 %v4044_v18, 0.0  ;;  %9723 = vmatmul.msk.bf16.gmra.mxu2 %vm432_vm1, %v3310_v26 }
 0x21e   :  { %4301 = vst.msk [vmem:[#allocation2 + $0x180] sm:$0xff] %vm4253_vm7, %v4172_v59  ;;  %v2561_v30 = vpop.f32.mrf.mxu0 }
 0x21f   :  { %v3668_v12 = vpop.f32.mrf.mxu2 }
 0x220   :  { %v3916_v20 = vadd.f32 %v3668_v12, %v3079_v25  ;;  %v3080_v14 = vpop.f32.mrf.mxu1 }
 0x221   :  { %v3081_v60 = vadd.f32 %v3080_v14, %v2556_v41  ;;  %v120_v41 = vld [vmem:[%s13473_s0 + $0x250] sm:$0xff]  ;;  %v629_v14 = vld [vmem:[#allocation2 + $0x227] sm:$0xff] }
 0x222   :  { %v4045_v35 = vadd.f32 %v10960_v48, %v3916_v20  ;;  %v249_v18 = vmul.f32 %v11165_v27, %v120_v41 }
 0x224   :  { %v4173_v43 = vmax.f32 %v4045_v35, 0.0  ;;  %v11339_v12 = vadd.f32 %v11173_v50, %v249_v18  ;;  %v630_v35 = vld [vmem:[#allocation2 + $0x22f] sm:$0xff] }
 0x225   :  { %v4749_v58 = vld [vmem:[#allocation2 + $0x178] ss:$2 sm:$0xff]  ;;  %v4877_v54 = vld [vmem:[#allocation2 + $0x179] ss:$2 sm:$0xff] }
 0x226   :  { %4302 = vst.msk [vmem:[#allocation2 + $0x188] sm:$0xff] %vm4253_vm7, %v4173_v43  ;;  %v4981_v8 = vmax.f32 %v4749_v58, %v4877_v54  ;;  %v2564_v3 = vpop.f32.mrf.mxu0  ;;  %v2132_v58 = vpack.c.bf16 %v630_v35, %v629_v14 }
 0x227   :  { %v3670_v29 = vpop.f32.mrf.mxu2  ;;  %507 = vst.msk [vmem:[#allocation2 + $0x258] sm:$0xff] %vm432_vm1, %v11339_v12 }
 0x228   :  { %v3917_v56 = vadd.f32 %v3670_v29, %v3081_v60  ;;  %v3083_v9 = vpop.f32.mrf.mxu1  ;;  %v5963_v6 = vpack.c.bf16 %v4981_v8, %v4980_v37  ;;  %v3312_v37 = vpack.c.bf16 %v758_v63, %v757_v42  ;;  %v11352_v8 = vadd.f32 %v11173_v50, %v250_v5  ;;  %v123_v63 = vld [vmem:[%s13473_s0 + $0x268] sm:$0xff] }
 0x229   :  { %9596 = vmatmul.msk.bf16.gmra.mxu0 %vm432_vm1, %v2197_v45  ;;  %v3084_v51 = vadd.f32 %v3083_v9, %v2559_v61  ;;  %v889_v29 = vadd.s32 568, %v10315_v21 }
 0x22a   :  { %v4046_v26 = vadd.f32 %v10960_v48, %v3917_v56  ;;  %9772 = vmatmul.msk.bf16.gmra.mxu3 %vm4253_vm7, %v5963_v6  ;;  %508 = vst.msk [vmem:[#allocation2 + $0x260] sm:$0xff] %vm432_vm1, %v11352_v8 }
 0x22b   :  { %9659 = vmatmul.msk.bf16.gmra.mxu1 %vm432_vm1, %v2131_v17  ;;  %v11366_v17 = vpop.f32.mrf.mxu3 }
 0x22c   :  { %v4174_v34 = vmax.f32 %v4046_v26, 0.0  ;;  %9724 = vmatmul.msk.bf16.gmra.mxu2 %vm432_vm1, %v3311_v7 }
 0x22e   :  { %4303 = vst.msk [vmem:[#allocation2 + $0x190] sm:$0xff] %vm4253_vm7, %v4174_v34  ;;  %v2566_v11 = vpop.f32.mrf.mxu0 }
 0x22f   :  { %v3673_v59 = vpop.f32.mrf.mxu2 }
 0x230   :  { %v3918_v25 = vadd.f32 %v3673_v59, %v3084_v51  ;;  %v3085_v2 = vpop.f32.mrf.mxu1  ;;  %v760_v51 = vld [vmem:[#allocation2 + $0x241] sm:$0xff] }
 0x231   :  { %v3086_v43 = vadd.f32 %v3085_v2, %v2561_v30  ;;  %v122_v30 = vld [vmem:[%s13473_s0 + $0x260] sm:$0xff]  ;;  %v631_v2 = vld [vmem:[#allocation2 + $0x237] sm:$0xff] }
 0x232   :  { %v4047_v20 = vadd.f32 %v10960_v48, %v3918_v25  ;;  %v251_v45 = vmul.f32 %v11165_v27, %v122_v30  ;;  %v890_v30 = vadd.s32 576, %v10315_v21 }
 0x234   :  { %v4175_v61 = vmax.f32 %v4047_v20, 0.0  ;;  %v11369_v26 = vadd.f32 %v11173_v50, %v251_v45  ;;  %v632_v20 = vld [vmem:[#allocation2 + $0x23f] sm:$0xff]  ;;  %v1018_v45 = vand.u32 63, %v890_v30 }
 0x235   :  { %v4751_v18 = vld [vmem:[#allocation2 + $0x188] ss:$2 sm:$0xff]  ;;  %v4879_v59 = vld [vmem:[#allocation2 + $0x189] ss:$2 sm:$0xff] }
 0x236   :  { %4304 = vst.msk [vmem:[#allocation2 + $0x198] sm:$0xff] %vm4253_vm7, %v4175_v61  ;;  %v2569_v33 = vpop.f32.mrf.mxu0  ;;  %v759_v61 = vld [vmem:[#allocation2 + $0x239] sm:$0xff]  ;;  %vm1146_vm6 = vcmp.eq.s32.totalorder %v1018_v45, 0 }
 0x237   :  { %v3675_v13 = vpop.f32.mrf.mxu2  ;;  %509 = vst.msk [vmem:[#allocation2 + $0x268] sm:$0xff] %vm432_vm1, %v11369_v26 }
 0x238   :  { %v3919_v54 = vadd.f32 %v3675_v13, %v3086_v43  ;;  %v3088_v60 = vpop.f32.mrf.mxu1  ;;  %v4982_v43 = vmax.f32 %v4751_v18, %v4879_v59  ;;  %v252_v13 = vmul.f32 %v11165_v27, %v123_v63  ;;  %v633_v59 = vld [vmem:[#allocation2 + $0x247] sm:$0xff] }
 0x239   :  { %9597 = vmatmul.msk.bf16.gmra.mxu0 %vm432_vm1, %v2198_v16  ;;  %v3089_v47 = vadd.f32 %v3088_v60, %v2564_v3  ;;  %v11374_v3 = vld [vmem:[%s13474_s1 + $0x2] ss:$0 sm:$0xff] }
 0x23a   :  { %v4048_v52 = vadd.f32 %v10960_v48, %v3919_v54  ;;  %v1017_v48 = vand.u32 63, %v889_v29  ;;  %v2133_v54 = vpack.c.bf16 %v632_v20, %v631_v2  ;;  %v634_v2 = vld [vmem:[#allocation2 + $0x24f] sm:$0xff]  ;;  %v1530_v20 = vsel %vm1146_vm6, 0.0, %v633_v59  ;;  %v763_v59 = vld [vmem:[#allocation2 + $0x259] sm:$0xff] }
 0x23b   :  { %9660 = vmatmul.msk.bf16.gmra.mxu1 %vm432_vm1, %v2132_v58  ;;  %v2199_v58 = vpack.c.bf16 %v11324_v10, %v11311_v38 }
 0x23c   :  { %v4176_v28 = vmax.f32 %v4048_v52, 0.0  ;;  %9725 = vmatmul.msk.bf16.gmra.mxu2 %vm432_vm1, %v3312_v37  ;;  %vm11377_vm5 = vcmp.eq.s32.totalorder %v1017_v48, 63 }
 0x23d   :  { %v2041_v42 = vsel %vm11377_vm5, 0.0, %v760_v51 }
 0x23e   :  { %4305 = vst.msk [vmem:[#allocation2 + $0x1a0] sm:$0xff] %vm4253_vm7, %v4176_v28  ;;  %v2571_v6 = vpop.f32.mrf.mxu0  ;;  %v3313_v28 = vpack.c.bf16 %v2041_v42, %v759_v61  ;;  %v761_v61 = vld [vmem:[#allocation2 + $0x249] sm:$0xff] }
 0x23f   :  { %v3678_v56 = vpop.f32.mrf.mxu2 }
 0x240   :  { %v3920_v9 = vadd.f32 %v3678_v56, %v3089_v47  ;;  %v3090_v7 = vpop.f32.mrf.mxu1  ;;  %v11393_v47 = vadd.f32 %v11173_v50, %v252_v13  ;;  %v124_v56 = vld [vmem:[%s13473_s0 + $0x270] sm:$0xff] }
 0x241   :  { %v3091_v24 = vadd.f32 %v3090_v7, %v2566_v11  ;;  %v11396_v11 = vpop.f32.mrf.mxu3 }
 0x242   :  { %v4049_v34 = vadd.f32 %v11374_v3, %v3920_v9  ;;  %510 = vst.msk [vmem:[#allocation2 + $0x270] sm:$0xff] %vm432_vm1, %v11393_v47  ;;  %v253_v9 = vmul.f32 %v11165_v27, %v124_v56 }
 0x244   :  { %v4177_v25 = vmax.f32 %v4049_v34, 0.0  ;;  %v11411_v18 = vadd.f32 %v11173_v50, %v253_v9 }
 0x245   :  { %v4753_v14 = vld [vmem:[#allocation2 + $0x198] ss:$2 sm:$0xff]  ;;  %v4881_v35 = vld [vmem:[#allocation2 + $0x199] ss:$2 sm:$0xff] }
 0x246   :  { %4306 = vst.msk [vmem:[#allocation2 + $0x1a8] sm:$0xff] %vm4253_vm7, %v4177_v25  ;;  %v4983_v5 = vmax.f32 %v4753_v14, %v4881_v35  ;;  %v2574_v37 = vpop.f32.mrf.mxu0  ;;  %v762_v14 = vld [vmem:[#allocation2 + $0x251] sm:$0xff] }
 0x247   :  { %v3680_v16 = vpop.f32.mrf.mxu2  ;;  %511 = vst.msk [vmem:[#allocation2 + $0x278] sm:$0xff] %vm432_vm1, %v11411_v18  ;;  %v125_v35 = vld [vmem:[%s13473_s0 + $0x278] sm:$0xff] }
 0x248   :  { %v3921_v60 = vadd.f32 %v3680_v16, %v3091_v24  ;;  %v3093_v52 = vpop.f32.mrf.mxu1  ;;  %v5964_v29 = vpack.c.bf16 %v4983_v5, %v4982_v43  ;;  %v254_v63 = vmul.f32 %v11165_v27, %v125_v35  ;;  %v2200_v43 = vpack.c.bf16 %v11352_v8, %v11339_v12  ;;  %v126_v12 = vld [vmem:[%s13473_s0 + $0x280] sm:$0xff] }
 0x249   :  { %9598 = vmatmul.msk.bf16.gmra.mxu0 %vm432_vm1, %v2199_v58  ;;  %v3094_v10 = vadd.f32 %v3093_v52, %v2569_v33  ;;  %v2134_v5 = vpack.c.bf16 %v634_v2, %v1530_v20  ;;  %v255_v8 = vmul.f32 %v11165_v27, %v126_v12  ;;  %v127_v20 = vld [vmem:[%s13473_s0 + $0x288] sm:$0xff]  ;;  %v128_v12 = vld [vmem:[%s13473_s0 + $0x290] sm:$0xff] }
 0x24a   :  { %v4050_v48 = vadd.f32 %v11374_v3, %v3921_v60  ;;  %9773 = vmatmul.msk.bf16.gmra.mxu3 %vm4253_vm7, %v5964_v29  ;;  %v11424_v60 = vadd.f32 %v11173_v50, %v254_v63 }
 0x24b   :  { %9661 = vmatmul.msk.bf16.gmra.mxu1 %vm432_vm1, %v2133_v54  ;;  %v3314_v54 = vpack.c.bf16 %v762_v14, %v761_v61 }
 0x24c   :  { %v4178_v38 = vmax.f32 %v4050_v48, 0.0  ;;  %9726 = vmatmul.msk.bf16.gmra.mxu2 %vm432_vm1, %v3313_v28  ;;  %512 = vst.msk [vmem:[#allocation2 + $0x280] sm:$0xff] %vm432_vm1, %v11424_v60  ;;  %v11437_v28 = vpop.f32.mrf.mxu3  ;;  %v11440_v48 = vadd.f32 %v11173_v50, %v255_v8  ;;  %v257_v8 = vmul.f32 %v11165_v27, %v128_v12 }
 0x24e   :  { %4307 = vst.msk [vmem:[#allocation2 + $0x1b0] sm:$0xff] %vm4253_vm7, %v4178_v38  ;;  %v2576_v51 = vpop.f32.mrf.mxu0 }
 0x24f   :  { %v3683_v7 = vpop.f32.mrf.mxu2  ;;  %513 = vst.msk [vmem:[#allocation2 + $0x288] sm:$0xff] %vm432_vm1, %v11440_v48 }
 0x250   :  { %v3922_v34 = vadd.f32 %v3683_v7, %v3094_v10  ;;  %v3095_v41 = vpop.f32.mrf.mxu1  ;;  %v635_v7 = vld [vmem:[#allocation2 + $0x257] sm:$0xff] }
 0x251   :  { %v3096_v42 = vadd.f32 %v3095_v41, %v2571_v6  ;;  %v636_v41 = vld [vmem:[#allocation2 + $0x25f] sm:$0xff] }
 0x252   :  { %v4051_v33 = vadd.f32 %v11374_v3, %v3922_v34 }
 0x254   :  { %v4179_v25 = vmax.f32 %v4051_v33, 0.0  ;;  %v764_v33 = vld [vmem:[#allocation2 + $0x261] sm:$0xff] }
 0x255   :  { %v4755_v56 = vld [vmem:[#allocation2 + $0x1a8] ss:$2 sm:$0xff]  ;;  %v4883_v9 = vld [vmem:[#allocation2 + $0x1a9] ss:$2 sm:$0xff] }
 0x256   :  { %4308 = vst.msk [vmem:[#allocation2 + $0x1b8] sm:$0xff] %vm4253_vm7, %v4179_v25  ;;  %v2579_v16 = vpop.f32.mrf.mxu0  ;;  %v4984_v14 = vmax.f32 %v4755_v56, %v4883_v9  ;;  %v11470_v56 = vadd.f32 %v11173_v50, %v257_v8 }
 0x257   :  { %v3685_v24 = vpop.f32.mrf.mxu2 }
 0x258   :  { %v3923_v13 = vadd.f32 %v3685_v24, %v3096_v42  ;;  %v3098_v58 = vpop.f32.mrf.mxu1  ;;  %v256_v42 = vmul.f32 %v11165_v27, %v127_v20  ;;  %v2201_v24 = vpack.c.bf16 %v11393_v47, %v11369_v26  ;;  %515 = vst.msk [vmem:[#allocation2 + $0x298] sm:$0xff] %vm432_vm1, %v11470_v56 }
 0x259   :  { %9599 = vmatmul.msk.bf16.gmra.mxu0 %vm432_vm1, %v2200_v43  ;;  %v3099_v29 = vadd.f32 %v3098_v58, %v2574_v37  ;;  %v2135_v43 = vpack.c.bf16 %v636_v41, %v635_v7  ;;  %v637_v7 = vld [vmem:[#allocation2 + $0x267] sm:$0xff] }
 0x25a   :  { %v4052_v52 = vadd.f32 %v11374_v3, %v3923_v13  ;;  %v765_v41 = vld [vmem:[#allocation2 + $0x269] sm:$0xff] }
 0x25b   :  { %9662 = vmatmul.msk.bf16.gmra.mxu1 %vm432_vm1, %v2134_v5 }
 0x25c   :  { %v4180_v6 = vmax.f32 %v4052_v52, 0.0  ;;  %9727 = vmatmul.msk.bf16.gmra.mxu2 %vm432_vm1, %v3314_v54  ;;  %v3315_v52 = vpack.c.bf16 %v764_v33, %v763_v59  ;;  %v766_v59 = vld [vmem:[#allocation2 + $0x271] sm:$0xff] }
 0x25d   :  { %v129_v33 = vld [vmem:[%s13473_s0 + $0x298] sm:$0xff] }
 0x25e   :  { %4309 = vst.msk [vmem:[#allocation2 + $0x1c0] sm:$0xff] %vm4253_vm7, %v4180_v6  ;;  %v2581_v10 = vpop.f32.mrf.mxu0  ;;  %v11453_v6 = vadd.f32 %v11173_v50, %v256_v42 }
 0x25f   :  { %v3688_v30 = vpop.f32.mrf.mxu2 }
 0x260   :  { %v3924_v38 = vadd.f32 %v3688_v30, %v3099_v29  ;;  %v3100_v45 = vpop.f32.mrf.mxu1  ;;  %v11455_v29 = vpop.f32.mrf.mxu3  ;;  %514 = vst.msk [vmem:[#allocation2 + $0x290] sm:$0xff] %vm432_vm1, %v11453_v6 }
 0x261   :  { %v3101_v61 = vadd.f32 %v3100_v45, %v2576_v51 }
 0x262   :  { %v4053_v37 = vadd.f32 %v11374_v3, %v3924_v38 }
 0x264   :  { %v4181_v34 = vmax.f32 %v4053_v37, 0.0 }
 0x265   :  { %v4757_v25 = vld [vmem:[#allocation2 + $0x1b8] ss:$2 sm:$0xff]  ;;  %v4885_v2 = vld [vmem:[#allocation2 + $0x1b9] ss:$2 sm:$0xff] }
 0x266   :  { %4310 = vst.msk [vmem:[#allocation2 + $0x1c8] sm:$0xff] %vm4253_vm7, %v4181_v34  ;;  %v4985_v35 = vmax.f32 %v4757_v25, %v4885_v2  ;;  %v2584_v13 = vpop.f32.mrf.mxu0  ;;  %v638_v34 = vld [vmem:[#allocation2 + $0x26f] sm:$0xff]  ;;  %v258_v2 = vmul.f32 %v11165_v27, %v129_v33 }
 0x267   :  { %v3690_v63 = vpop.f32.mrf.mxu2 }
 0x268   :  { %v3925_v5 = vadd.f32 %v3690_v63, %v3101_v61  ;;  %v3103_v58 = vpop.f32.mrf.mxu1  ;;  %v5965_v54 = vpack.c.bf16 %v4985_v35, %v4984_v14  ;;  %v2202_v61 = vpack.c.bf16 %v11424_v60, %v11411_v18  ;;  %v2136_v14 = vpack.c.bf16 %v638_v34, %v637_v7  ;;  %v639_v34 = vld [vmem:[#allocation2 + $0x277] sm:$0xff] }
 0x269   :  { %9600 = vmatmul.msk.bf16.gmra.mxu0 %vm432_vm1, %v2201_v24  ;;  %v3104_v47 = vadd.f32 %v3103_v58, %v2579_v16  ;;  %v3316_v24 = vpack.c.bf16 %v766_v59, %v765_v41  ;;  %v897_v58 = vadd.s32 632, %v10315_v21  ;;  %v640_v41 = vld [vmem:[#allocation2 + $0x27f] sm:$0xff] }
 0x26a   :  { %v4054_v51 = vadd.f32 %v11374_v3, %v3925_v5  ;;  %9774 = vmatmul.msk.bf16.gmra.mxu3 %vm4253_vm7, %v5965_v54  ;;  %v767_v59 = vld [vmem:[#allocation2 + $0x279] sm:$0xff] }
 0x26b   :  { %9663 = vmatmul.msk.bf16.gmra.mxu1 %vm432_vm1, %v2135_v43  ;;  %v11483_v43 = vadd.f32 %v11173_v50, %v258_v2  ;;  %v1025_v54 = vand.u32 63, %v897_v58  ;;  %v2137_v58 = vpack.c.bf16 %v640_v41, %v639_v34 }
 0x26c   :  { %v4182_v26 = vmax.f32 %v4054_v51, 0.0  ;;  %9728 = vmatmul.msk.bf16.gmra.mxu2 %vm432_vm1, %v3315_v52  ;;  %v11497_v51 = vpop.f32.mrf.mxu3 }
 0x26d   :  { %516 = vst.msk [vmem:[#allocation2 + $0x2a0] sm:$0xff] %vm432_vm1, %v11483_v43  ;;  %vm11503_vm8 = vcmp.eq.s32.totalorder %v1025_v54, 63 }
 0x26e   :  { %4311 = vst.msk [vmem:[#allocation2 + $0x1d0] sm:$0xff] %vm4253_vm7, %v4182_v26  ;;  %v2586_v45 = vpop.f32.mrf.mxu0 }
 0x26f   :  { %v3693_v30 = vpop.f32.mrf.mxu2 }
 0x270   :  { %v3926_v38 = vadd.f32 %v3693_v30, %v3104_v47  ;;  %v3105_v37 = vpop.f32.mrf.mxu1 }
 0x271   :  { %v3106_v25 = vadd.f32 %v3105_v37, %v2581_v10  ;;  %v130_v10 = vld [vmem:[%s13473_s0 + $0x2a0] sm:$0xff] }
 0x272   :  { %v4055_v9 = vadd.f32 %v11374_v3, %v3926_v38  ;;  %v259_v52 = vmul.f32 %v11165_v27, %v130_v10  ;;  %v768_v38 = vld [vmem:[#allocation2 + $0x281] sm:$0xff] }
 0x273   :  { %v2049_v2 = vsel %vm11503_vm8, 0.0, %v768_v38  ;;  %v132_v38 = vld [vmem:[%s13473_s0 + $0x2b0] sm:$0xff] }
 0x274   :  { %v4183_v16 = vmax.f32 %v4055_v9, 0.0  ;;  %v11500_v30 = vadd.f32 %v11173_v50, %v259_v52  ;;  %v3317_v52 = vpack.c.bf16 %v2049_v2, %v767_v59  ;;  %v261_v37 = vmul.f32 %v11165_v27, %v132_v38  ;;  %v641_v59 = vld [vmem:[#allocation2 + $0x287] sm:$0xff] }
 0x275   :  { %v4759_v9 = vld [vmem:[#allocation2 + $0x1c8] ss:$2 sm:$0xff] }
 0x276   :  { %4312 = vst.msk [vmem:[#allocation2 + $0x1d8] sm:$0xff] %vm4253_vm7, %v4183_v16  ;;  %v2589_v42 = vpop.f32.mrf.mxu0  ;;  %v4887_v16 = vld [vmem:[#allocation2 + $0x1c9] ss:$2 sm:$0xff]  ;;  %v11537_v41 = vadd.f32 %v11173_v50, %v261_v37 }
 0x277   :  { %v3695_v20 = vpop.f32.mrf.mxu2  ;;  %517 = vst.msk [vmem:[#allocation2 + $0x2a8] sm:$0xff] %vm432_vm1, %v11500_v30 }
 0x278   :  { %v3927_v35 = vadd.f32 %v3695_v20, %v3106_v25  ;;  %v3108_v63 = vpop.f32.mrf.mxu1  ;;  %v131_v20 = vld [vmem:[%s13473_s0 + $0x2a8] sm:$0xff]  ;;  %519 = vst.msk [vmem:[#allocation2 + $0x2b8] sm:$0xff] %vm432_vm1, %v11537_v41 }
 0x279   :  { %9601 = vmatmul.msk.bf16.gmra.mxu0 %vm432_vm1, %v2202_v61  ;;  %v3109_v60 = vadd.f32 %v3108_v63, %v2584_v13  ;;  %v260_v63 = vmul.f32 %v11165_v27, %v131_v20  ;;  %v769_v20 = vld [vmem:[#allocation2 + $0x289] sm:$0xff] }
 0x27a   :  { %v4056_v5 = vadd.f32 %v11374_v3, %v3927_v35 }
 0x27b   :  { %9664 = vmatmul.msk.bf16.gmra.mxu1 %vm432_vm1, %v2136_v14  ;;  %v4986_v14 = vmax.f32 %v4759_v9, %v4887_v16 }
 0x27c   :  { %v4184_v18 = vmax.f32 %v4056_v5, 0.0  ;;  %9729 = vmatmul.msk.bf16.gmra.mxu2 %vm432_vm1, %v3316_v24  ;;  %v2203_v5 = vpack.c.bf16 %v11453_v6, %v11440_v48 }
 0x27e   :  { %4313 = vst.msk [vmem:[#allocation2 + $0x1e0] sm:$0xff] %vm4253_vm7, %v4184_v18  ;;  %v2591_v12 = vpop.f32.mrf.mxu0 }
 0x27f   :  { %v3698_v26 = vpop.f32.mrf.mxu2 }
 0x280   :  { %v3928_v47 = vadd.f32 %v3698_v26, %v3109_v60  ;;  %v3110_v8 = vpop.f32.mrf.mxu1  ;;  %v11519_v26 = vadd.f32 %v11173_v50, %v260_v63 }
 0x281   :  { %v3111_v61 = vadd.f32 %v3110_v8, %v2586_v45  ;;  %v11522_v45 = vpop.f32.mrf.mxu3 }
 0x282   :  { %v4057_v13 = vadd.f32 %v11374_v3, %v3928_v47  ;;  %v898_v47 = vadd.s32 640, %v10315_v21  ;;  %518 = vst.msk [vmem:[#allocation2 + $0x2b0] sm:$0xff] %vm432_vm1, %v11519_v26 }
 0x284   :  { %v4185_v7 = vmax.f32 %v4057_v13, 0.0  ;;  %v1026_v13 = vand.u32 63, %v898_v47 }
 0x285   :  { %v4761_v33 = vld [vmem:[#allocation2 + $0x1d8] ss:$2 sm:$0xff]  ;;  %v4889_v25 = vld [vmem:[#allocation2 + $0x1d9] ss:$2 sm:$0xff] }
 0x286   :  { %4314 = vst.msk [vmem:[#allocation2 + $0x1e8] sm:$0xff] %vm4253_vm7, %v4185_v7  ;;  %v4987_v35 = vmax.f32 %v4761_v33, %v4889_v25  ;;  %v2594_v60 = vpop.f32.mrf.mxu0  ;;  %vm1154_vm9 = vcmp.eq.s32.totalorder %v1026_v13, 0  ;;  %v642_v25 = vld [vmem:[#allocation2 + $0x28f] sm:$0xff] }
 0x287   :  { %v3700_v24 = vpop.f32.mrf.mxu2  ;;  %v1538_v2 = vsel %vm1154_vm9, 0.0, %v641_v59 }
 0x288   :  { %v3929_v18 = vadd.f32 %v3700_v24, %v3111_v61  ;;  %v3113_v10 = vpop.f32.mrf.mxu1  ;;  %v5966_v54 = vpack.c.bf16 %v4987_v35, %v4986_v14  ;;  %v770_v61 = vld [vmem:[#allocation2 + $0x291] sm:$0xff] }
 0x289   :  { %9602 = vmatmul.msk.bf16.gmra.mxu0 %vm432_vm1, %v2203_v5  ;;  %v3114_v6 = vadd.f32 %v3113_v10, %v2589_v42  ;;  %v133_v14 = vld [vmem:[%s13473_s0 + $0x2b8] sm:$0xff]  ;;  %v2204_v5 = vpack.c.bf16 %v11483_v43, %v11470_v56  ;;  %v134_v56 = vld [vmem:[%s13473_s0 + $0x2c0] sm:$0xff] }
 0x28a   :  { %v4058_v8 = vadd.f32 %v11374_v3, %v3929_v18  ;;  %9775 = vmatmul.msk.bf16.gmra.mxu3 %vm4253_vm7, %v5966_v54  ;;  %v262_v63 = vmul.f32 %v11165_v27, %v133_v14  ;;  %v263_v43 = vmul.f32 %v11165_v27, %v134_v56 }
 0x28b   :  { %9665 = vmatmul.msk.bf16.gmra.mxu1 %vm432_vm1, %v2137_v58  ;;  %v2138_v58 = vpack.c.bf16 %v642_v25, %v1538_v2  ;;  %v771_v25 = vld [vmem:[#allocation2 + $0x299] sm:$0xff]  ;;  %v772_v2 = vld [vmem:[#allocation2 + $0x2a1] sm:$0xff] }
 0x28c   :  { %v4186_v48 = vmax.f32 %v4058_v8, 0.0  ;;  %9730 = vmatmul.msk.bf16.gmra.mxu2 %vm432_vm1, %v3317_v52  ;;  %v3318_v52 = vpack.c.bf16 %v770_v61, %v769_v20  ;;  %v11550_v47 = vadd.f32 %v11173_v50, %v262_v63  ;;  %v11566_v38 = vadd.f32 %v11173_v50, %v263_v43  ;;  %v135_v50 = vld [vmem:[%s13473_s0 + $0x2c8] sm:$0xff] }
 0x28d   :  { %v3319_v56 = vpack.c.bf16 %v772_v2, %v771_v25  ;;  %v645_v2 = vld [vmem:[#allocation2 + $0x2a7] sm:$0xff] }
 0x28e   :  { %4315 = vst.msk [vmem:[#allocation2 + $0x1f0] sm:$0xff] %vm4253_vm7, %v4186_v48  ;;  %v2596_v7 = vpop.f32.mrf.mxu0 }
 0x28f   :  { %v3703_v9 = vpop.f32.mrf.mxu2  ;;  %520 = vst.msk [vmem:[#allocation2 + $0x2c0] sm:$0xff] %vm432_vm1, %v11550_v47 }
 0x290   :  { %v3930_v16 = vadd.f32 %v3703_v9, %v3114_v6  ;;  %v3115_v34 = vpop.f32.mrf.mxu1  ;;  %v11563_v6 = vpop.f32.mrf.mxu3  ;;  %521 = vst.msk [vmem:[#allocation2 + $0x2c8] sm:$0xff] %vm432_vm1, %v11566_v38 }
 0x291   :  { %v3116_v35 = vadd.f32 %v3115_v34, %v2591_v12 }
 0x292   :  { %v4059_v42 = vadd.f32 %v11374_v3, %v3930_v16 }
 0x294   :  { %v4187_v33 = vmax.f32 %v4059_v42, 0.0  ;;  %v643_v42 = vld [vmem:[#allocation2 + $0x297] sm:$0xff] }
 0x295   :  { %v4763_v34 = vld [vmem:[#allocation2 + $0x1e8] ss:$2 sm:$0xff]  ;;  %v4891_v59 = vld [vmem:[#allocation2 + $0x1e9] ss:$2 sm:$0xff] }
 0x296   :  { %4316 = vst.msk [vmem:[#allocation2 + $0x1f8] sm:$0xff] %vm4253_vm7, %v4187_v33  ;;  %v2599_v10 = vpop.f32.mrf.mxu0  ;;  %v644_v33 = vld [vmem:[#allocation2 + $0x29f] sm:$0xff] }
 0x297   :  { %v3705_v24 = vpop.f32.mrf.mxu2 }
 0x298   :  { %v3931_v18 = vadd.f32 %v3705_v24, %v3116_v35  ;;  %v3118_v54 = vpop.f32.mrf.mxu1  ;;  %v4988_v35 = vmax.f32 %v4763_v34, %v4891_v59  ;;  %v11578_v24 = vld [vmem:[%s13474_s1] ss:$0 sm:$0xff] }
 0x299   :  { %9603 = vmatmul.msk.bf16.gmra.mxu0 %vm432_vm1, %v2204_v5  ;;  %v3119_v48 = vadd.f32 %v3118_v54, %v2594_v60  ;;  %v264_v5 = vmul.f32 %v11578_v24, %v135_v50  ;;  %v2139_v54 = vpack.c.bf16 %v644_v33, %v643_v42  ;;  %v774_v50 = vld [vmem:[#allocation2 + $0x2b1] sm:$0xff] }
 0x29a   :  { %v4060_v8 = vadd.f32 %v11374_v3, %v3931_v18  ;;  %v2205_v18 = vpack.c.bf16 %v11519_v26, %v11500_v30 }
 0x29b   :  { %9666 = vmatmul.msk.bf16.gmra.mxu1 %vm432_vm1, %v2138_v58 }
 0x29c   :  { %v4188_v12 = vmax.f32 %v4060_v8, 0.0  ;;  %9731 = vmatmul.msk.bf16.gmra.mxu2 %vm432_vm1, %v3318_v52 }
 0x29e   :  { %4317 = vst.msk [vmem:[#allocation2 + $0x200] sm:$0xff] %vm4253_vm7, %v4188_v12  ;;  %v2601_v9 = vpop.f32.mrf.mxu0 }
 0x29f   :  { %v3708_v13 = vpop.f32.mrf.mxu2 }
 0x2a0   :  { %v3932_v37 = vadd.f32 %v3708_v13, %v3119_v48  ;;  %v3120_v16 = vpop.f32.mrf.mxu1  ;;  %v11591_v13 = vpop.f32.mrf.mxu3 }
 0x2a1   :  { %v3121_v14 = vadd.f32 %v3120_v16, %v2596_v7  ;;  %v11586_v7 = vld [vmem:[%s13474_s1 + $0x1] ss:$0 sm:$0xff]  ;;  %v136_v16 = vld [vmem:[%s13473_s0 + $0x2d0] sm:$0xff] }
 0x2a2   :  { %v4061_v60 = vadd.f32 %v11374_v3, %v3932_v37  ;;  %v11589_v43 = vadd.f32 %v11586_v7, %v264_v5 }
 0x2a4   :  { %v4189_v27 = vmax.f32 %v4061_v60, 0.0  ;;  %522 = vst.msk [vmem:[#allocation2 + $0x2d0] sm:$0xff] %vm432_vm1, %v11589_v43  ;;  %v265_v60 = vmul.f32 %v11578_v24, %v136_v16 }
 0x2a5   :  { %v4765_v20 = vld [vmem:[#allocation2 + $0x1f8] ss:$2 sm:$0xff]  ;;  %v4893_v61 = vld [vmem:[#allocation2 + $0x1f9] ss:$2 sm:$0xff] }
 0x2a6   :  { %4318 = vst.msk [vmem:[#allocation2 + $0x208] sm:$0xff] %vm4253_vm7, %v4189_v27  ;;  %v4989_v63 = vmax.f32 %v4765_v20, %v4893_v61  ;;  %v2604_v8 = vpop.f32.mrf.mxu0  ;;  %v11606_v33 = vadd.f32 %v11586_v7, %v265_v60  ;;  %v646_v20 = vld [vmem:[#allocation2 + $0x2af] sm:$0xff] }
 0x2a7   :  { %v3710_v58 = vpop.f32.mrf.mxu2  ;;  %v773_v61 = vld [vmem:[#allocation2 + $0x2a9] sm:$0xff] }
 0x2a8   :  { %v3933_v52 = vadd.f32 %v3710_v58, %v3121_v14  ;;  %v3123_v12 = vpop.f32.mrf.mxu1  ;;  %v5967_v48 = vpack.c.bf16 %v4989_v63, %v4988_v35  ;;  %523 = vst.msk [vmem:[#allocation2 + $0x2d8] sm:$0xff] %vm432_vm1, %v11606_v33  ;;  %v137_v14 = vld [vmem:[%s13473_s0 + $0x2d8] sm:$0xff]  ;;  %v2206_v58 = vpack.c.bf16 %v11550_v47, %v11537_v41  ;;  %v11633_v60 = vpop.f32.mrf.mxu3 }
 0x2a9   :  { %9604 = vmatmul.msk.bf16.gmra.mxu0 %vm432_vm1, %v2205_v18  ;;  %v3124_v26 = vadd.f32 %v3123_v12, %v2599_v10  ;;  %v266_v63 = vmul.f32 %v11578_v24, %v137_v14  ;;  %v2140_v18 = vpack.c.bf16 %v646_v20, %v645_v2  ;;  %v776_v2 = vld [vmem:[#allocation2 + $0x2c1] sm:$0xff] }
 0x2aa   :  { %v4062_v37 = vadd.f32 %v11374_v3, %v3933_v52  ;;  %9776 = vmatmul.msk.bf16.gmra.mxu3 %vm4253_vm7, %v5967_v48  ;;  %v3320_v48 = vpack.c.bf16 %v774_v50, %v773_v61 }
 0x2ab   :  { %9667 = vmatmul.msk.bf16.gmra.mxu1 %vm432_vm1, %v2139_v54 }
 0x2ac   :  { %v4190_v30 = vmax.f32 %v4062_v37, 0.0  ;;  %9732 = vmatmul.msk.bf16.gmra.mxu2 %vm432_vm1, %v3319_v56  ;;  %v11619_v56 = vadd.f32 %v11586_v7, %v266_v63  ;;  %v648_v63 = vld [vmem:[#allocation2 + $0x2bf] sm:$0xff] }
 0x2ae   :  { %4319 = vst.msk [vmem:[#allocation2 + $0x210] sm:$0xff] %vm4253_vm7, %v4190_v30  ;;  %v2606_v42 = vpop.f32.mrf.mxu0  ;;  %v905_v30 = vadd.s32 696, %v10315_v21 }
 0x2af   :  { %v3713_v34 = vpop.f32.mrf.mxu2  ;;  %524 = vst.msk [vmem:[#allocation2 + $0x2e0] sm:$0xff] %vm432_vm1, %v11619_v56 }
 0x2b0   :  { %v3934_v59 = vadd.f32 %v3713_v34, %v3124_v26  ;;  %v3125_v27 = vpop.f32.mrf.mxu1  ;;  %v1033_v26 = vand.u32 63, %v905_v30 }
 0x2b1   :  { %v3126_v35 = vadd.f32 %v3125_v27, %v2601_v9  ;;  %v138_v9 = vld [vmem:[%s13473_s0 + $0x2e0] sm:$0xff] }
 0x2b2   :  { %v4063_v25 = vadd.f32 %v11374_v3, %v3934_v59  ;;  %v267_v16 = vmul.f32 %v11578_v24, %v138_v9  ;;  %vm11641_vm10 = vcmp.eq.s32.totalorder %v1033_v26, 63  ;;  %v2207_v9 = vpack.c.bf16 %v11589_v43, %v11566_v38 }
 0x2b4   :  { %v4191_v10 = vmax.f32 %v4063_v25, 0.0 }
 0x2b5   :  { %v4767_v61 = vld [vmem:[#allocation2 + $0x208] ss:$2 sm:$0xff]  ;;  %v4895_v50 = vld [vmem:[#allocation2 + $0x209] ss:$2 sm:$0xff] }
 0x2b6   :  { %4320 = vst.msk [vmem:[#allocation2 + $0x218] sm:$0xff] %vm4253_vm7, %v4191_v10  ;;  %v2609_v52 = vpop.f32.mrf.mxu0 }
 0x2b7   :  { %v3715_v5 = vpop.f32.mrf.mxu2 }
 0x2b8   :  { %v3935_v54 = vadd.f32 %v3715_v5, %v3126_v35  ;;  %v3128_v12 = vpop.f32.mrf.mxu1  ;;  %v647_v35 = vld [vmem:[#allocation2 + $0x2b7] sm:$0xff] }
 0x2b9   :  { %9605 = vmatmul.msk.bf16.gmra.mxu0 %vm432_vm1, %v2206_v58  ;;  %v3129_v47 = vadd.f32 %v3128_v12, %v2604_v8  ;;  %v11638_v8 = vadd.f32 %v11586_v7, %v267_v16  ;;  %v775_v5 = vld [vmem:[#allocation2 + $0x2b9] sm:$0xff]  ;;  %v139_v12 = vld [vmem:[%s13473_s0 + $0x2e8] sm:$0xff]  ;;  %v2141_v26 = vpack.c.bf16 %v648_v63, %v647_v35 }
 0x2ba   :  { %v4064_v37 = vadd.f32 %v11374_v3, %v3935_v54  ;;  %v2057_v54 = vsel %vm11641_vm10, 0.0, %v776_v2  ;;  %v10121_v35 = vld [vmem:[%s13477_s4 + $0x8] sm:$0xff]  ;;  %v10117_v63 = vld [vmem:[%s13476_s3] sm:$0xff] }
 0x2bb   :  { %9668 = vmatmul.msk.bf16.gmra.mxu1 %vm432_vm1, %v2140_v18  ;;  %525 = vst.msk [vmem:[#allocation2 + $0x2e8] sm:$0xff] %vm432_vm1, %v11638_v8  ;;  %v3321_v2 = vpack.c.bf16 %v2057_v54, %v775_v5  ;;  %7925 = vmatpush.bf16.msra.mxu2 %v10121_v35 }
 0x2bc   :  { %v4192_v41 = vmax.f32 %v4064_v37, 0.0  ;;  %9733 = vmatmul.msk.bf16.gmra.mxu2 %vm432_vm1, %v3320_v48  ;;  %v4990_v37 = vmax.f32 %v4767_v61, %v4895_v50  ;;  %v140_v50 = vld [vmem:[%s13473_s0 + $0x2f0] sm:$0xff]  ;;  %6367 = vmatpush.bf16.msrb.mxu3 %v10117_v63 }
 0x2bd   :  { %v269_v5 = vmul.f32 %v11578_v24, %v140_v50 }
 0x2be   :  { %4321 = vst.msk [vmem:[#allocation2 + $0x220] sm:$0xff] %vm4253_vm7, %v4192_v41  ;;  %v11635_v27 = vpop.f32.mrf.mxu0  ;;  %v268_v41 = vmul.f32 %v11578_v24, %v139_v12 }
 0x2bf   :  { %v3718_v34 = vpop.f32.mrf.mxu2  ;;  %v11681_v12 = vadd.f32 %v11586_v7, %v269_v5 }
 0x2c0   :  { %v3936_v59 = vadd.f32 %v3718_v34, %v3129_v47  ;;  %v3130_v25 = vpop.f32.mrf.mxu1  ;;  %v11657_v20 = vadd.f32 %v11586_v7, %v268_v41  ;;  %v650_v41 = vld [vmem:[#allocation2 + $0x2cf] sm:$0xff] }
 0x2c1   :  { %v3131_v48 = vadd.f32 %v3130_v25, %v2606_v42  ;;  %v11660_v42 = vpop.f32.mrf.mxu3  ;;  %527 = vst.msk [vmem:[#allocation2 + $0x2f8] sm:$0xff] %vm432_vm1, %v11681_v12 }
 0x2c2   :  { %v4065_v10 = vadd.f32 %v11374_v3, %v3936_v59  ;;  %526 = vst.msk [vmem:[#allocation2 + $0x2f0] sm:$0xff] %vm432_vm1, %v11657_v20 }
 0x2c4   :  { %v4193_v14 = vmax.f32 %v4065_v10, 0.0 }
 0x2c5   :  { %v4769_v58 = vld [vmem:[#allocation2 + $0x218] ss:$2 sm:$0xff]  ;;  %v4897_v18 = vld [vmem:[#allocation2 + $0x219] ss:$2 sm:$0xff] }
 0x2c6   :  { %4322 = vst.msk [vmem:[#allocation2 + $0x228] sm:$0xff] %vm4253_vm7, %v4193_v14  ;;  %v4991_v30 = vmax.f32 %v4769_v58, %v4897_v18  ;;  %v2614_v34 = vpop.f32.mrf.mxu0  ;;  %v906_v14 = vadd.s32 704, %v10315_v21 }
 0x2c7   :  { %v3720_v47 = vpop.f32.mrf.mxu2 }
 0x2c8   :  { %v3937_v16 = vadd.f32 %v3720_v47, %v3131_v48  ;;  %v3133_v59 = vpop.f32.mrf.mxu1  ;;  %v5968_v10 = vpack.c.bf16 %v4991_v30, %v4990_v37  ;;  %v1034_v61 = vand.u32 63, %v906_v14  ;;  %v649_v48 = vld [vmem:[#allocation2 + $0x2c7] sm:$0xff] }
 0x2c9   :  { %9606 = vmatmul.msk.bf16.gmra.mxu0 %vm432_vm1, %v2207_v9  ;;  %v3134_v43 = vadd.f32 %v3133_v59, %v2609_v52  ;;  %v777_v9 = vld [vmem:[#allocation2 + $0x2c9] sm:$0xff] }
 0x2ca   :  { %v4066_v25 = vadd.f32 %v11374_v3, %v3937_v16  ;;  %9777 = vmatmul.msk.bf16.gmra.mxu3 %vm4253_vm7, %v5968_v10  ;;  %vm1162_vm11 = vcmp.eq.s32.totalorder %v1034_v61, 0  ;;  %v141_v16 = vld [vmem:[%s13473_s0 + $0x2f8] sm:$0xff] }
 0x2cb   :  { %9669 = vmatmul.msk.bf16.gmra.mxu1 %vm432_vm1, %v2141_v26  ;;  %v1546_v47 = vsel %vm1162_vm11, 0.0, %v649_v48  ;;  %v778_v26 = vld [vmem:[#allocation2 + $0x2d1] sm:$0xff] }
 0x2cc   :  { %v4194_v38 = vmax.f32 %v4066_v25, 0.0  ;;  %9734 = vmatmul.msk.bf16.gmra.mxu2 %vm432_vm1, %v3321_v2  ;;  %v10123_v10 = vld [vmem:[%s13477_s4 + $0x18] sm:$0xff]  ;;  %v270_v2 = vmul.f32 %v11578_v24, %v141_v16  ;;  %v2208_v25 = vpack.c.bf16 %v11619_v56, %v11606_v33  ;;  %v3322_v35 = vpack.c.bf16 %v778_v26, %v777_v9  ;;  %v142_v56 = vld [vmem:[%s13473_s0 + $0x300] sm:$0xff] }
 0x2cd   :  { %7776 = vmatpush.bf16.msra.mxu1 %v10123_v10  ;;  %v651_v26 = vld [vmem:[#allocation2 + $0x2d7] sm:$0xff] }
 0x2ce   :  { %4323 = vst.msk [vmem:[#allocation2 + $0x230] sm:$0xff] %vm4253_vm7, %v4194_v38  ;;  %v2616_v18 = vpop.f32.mrf.mxu0  ;;  %v2142_v38 = vpack.c.bf16 %v650_v41, %v1546_v47  ;;  %v11698_v63 = vadd.f32 %v11586_v7, %v270_v2  ;;  %v779_v10 = vld [vmem:[#allocation2 + $0x2d9] sm:$0xff]  ;;  %v780_v2 = vld [vmem:[#allocation2 + $0x2e1] sm:$0xff] }
 0x2cf   :  { %v3723_v52 = vpop.f32.mrf.mxu2  ;;  %v3323_v15 = vpack.c.bf16 %v780_v2, %v779_v10 }
 0x2d0   :  { %v3938_v58 = vadd.f32 %v3723_v52, %v3134_v43  ;;  %v3135_v54 = vpop.f32.mrf.mxu1  ;;  %528 = vst.msk [vmem:[#allocation2 + $0x300] sm:$0xff] %vm432_vm1, %v11698_v63  ;;  %v271_v52 = vmul.f32 %v11578_v24, %v142_v56 }
 0x2d1   :  { %v3136_v59 = vadd.f32 %v3135_v54, %v11635_v27 }
 0x2d2   :  { %v4067_v37 = vadd.f32 %v11374_v3, %v3938_v58  ;;  %v11711_v58 = vpop.f32.mrf.mxu3  ;;  %v11714_v48 = vadd.f32 %v11586_v7, %v271_v52 }
 0x2d4   :  { %v4195_v30 = vmax.f32 %v4067_v37, 0.0  ;;  %529 = vst.msk [vmem:[#allocation2 + $0x308] sm:$0xff] %vm432_vm1, %v11714_v48 }
 0x2d5   :  { %v4771_v47 = vld [vmem:[#allocation2 + $0x228] ss:$2 sm:$0xff]  ;;  %v4899_v9 = vld [vmem:[#allocation2 + $0x229] ss:$2 sm:$0xff] }
 0x2d6   :  { %4324 = vst.msk [vmem:[#allocation2 + $0x238] sm:$0xff] %vm4253_vm7, %v4195_v30  ;;  %v2619_v61 = vpop.f32.mrf.mxu0 }
 0x2d7   :  { %v3725_v14 = vpop.f32.mrf.mxu2 }
 0x2d8   :  { %v3939_v43 = vadd.f32 %v3725_v14, %v3136_v59  ;;  %v3138_v50 = vpop.f32.mrf.mxu1  ;;  %v652_v59 = vld [vmem:[#allocation2 + $0x2df] sm:$0xff] }
 0x2d9   :  { %9607 = vmatmul.msk.bf16.gmra.mxu0 %vm432_vm1, %v2208_v25  ;;  %v3139_v33 = vadd.f32 %v3138_v50, %v2614_v34  ;;  %v4992_v50 = vmax.f32 %v4771_v47, %v4899_v9  ;;  %v2143_v56 = vpack.c.bf16 %v652_v59, %v651_v26 }
 0x2da   :  { %v4068_v27 = vadd.f32 %v11374_v3, %v3939_v43  ;;  %v11729_v22 = vpop.f32.mrf.mxu3 }
 0x2db   :  { %9670 = vmatmul.msk.bf16.gmra.mxu1 %vm432_vm1, %v2142_v38  ;;  %v143_v38 = vld [vmem:[%s13473_s0 + $0x308] sm:$0xff] }
 0x2dc   :  { %v4196_v5 = vmax.f32 %v4068_v27, 0.0  ;;  %9735 = vmatmul.msk.bf16.gmra.mxu2 %vm432_vm1, %v3322_v35  ;;  %v272_v27 = vmul.f32 %v11578_v24, %v143_v38  ;;  %v782_v38 = vld [vmem:[#allocation2 + $0x2f1] sm:$0xff] }
 0x2de   :  { %4325 = vst.msk [vmem:[#allocation2 + $0x240] sm:$0xff] %vm4253_vm7, %v4196_v5  ;;  %v2621_v30 = vpop.f32.mrf.mxu0  ;;  %v11727_v57 = vadd.f32 %v11586_v7, %v272_v27 }
 0x2df   :  { %v3728_v54 = vpop.f32.mrf.mxu2 }
 0x2e0   :  { %v3940_v37 = vadd.f32 %v3728_v54, %v3139_v33  ;;  %v3140_v41 = vpop.f32.mrf.mxu1  ;;  %v2209_v33 = vpack.c.bf16 %v11657_v20, %v11638_v8  ;;  %530 = vst.msk [vmem:[#allocation2 + $0x310] sm:$0xff] %vm432_vm1, %v11727_v57 }
 0x2e1   :  { %v3141_v43 = vadd.f32 %v3140_v41, %v2616_v18  ;;  %v144_v41 = vld [vmem:[%s13473_s0 + $0x310] sm:$0xff] }
 0x2e2   :  { %v4069_v34 = vadd.f32 %v11374_v3, %v3940_v37  ;;  %v273_v47 = vmul.f32 %v11578_v24, %v144_v41 }
 0x2e4   :  { %v4197_v16 = vmax.f32 %v4069_v34, 0.0  ;;  %v11744_v10 = vadd.f32 %v11586_v7, %v273_v47 }
 0x2e5   :  { %v4773_v14 = vld [vmem:[#allocation2 + $0x238] ss:$2 sm:$0xff]  ;;  %v4901_v25 = vld [vmem:[#allocation2 + $0x239] ss:$2 sm:$0xff] }
 0x2e6   :  { %4326 = vst.msk [vmem:[#allocation2 + $0x248] sm:$0xff] %vm4253_vm7, %v4197_v16  ;;  %v4993_v35 = vmax.f32 %v4773_v14, %v4901_v25  ;;  %v2624_v54 = vpop.f32.mrf.mxu0  ;;  %v654_v14 = vld [vmem:[#allocation2 + $0x2ef] sm:$0xff] }
 0x2e7   :  { %v3730_v5 = vpop.f32.mrf.mxu2  ;;  %531 = vst.msk [vmem:[#allocation2 + $0x318] sm:$0xff] %vm432_vm1, %v11744_v10  ;;  %v781_v25 = vld [vmem:[#allocation2 + $0x2e9] sm:$0xff] }
 0x2e8   :  { %v3941_v52 = vadd.f32 %v3730_v5, %v3141_v43  ;;  %v3143_v37 = vpop.f32.mrf.mxu1  ;;  %v5969_v34 = vpack.c.bf16 %v4993_v35, %v4992_v50  ;;  %v145_v43 = vld [vmem:[%s13473_s0 + $0x318] sm:$0xff]  ;;  %v2210_v5 = vpack.c.bf16 %v11698_v63, %v11681_v12 }
 0x2e9   :  { %9608 = vmatmul.msk.bf16.gmra.mxu0 %vm432_vm1, %v2209_v33  ;;  %v3144_v20 = vadd.f32 %v3143_v37, %v2619_v61  ;;  %v653_v61 = vld [vmem:[#allocation2 + $0x2e7] sm:$0xff]  ;;  %v274_v35 = vmul.f32 %v11578_v24, %v145_v43 }
 0x2ea   :  { %v4070_v18 = vadd.f32 %v11374_v3, %v3941_v52  ;;  %9778 = vmatmul.msk.bf16.gmra.mxu3 %vm4253_vm7, %v5969_v34  ;;  %v2144_v33 = vpack.c.bf16 %v654_v14, %v653_v61  ;;  %v3324_v34 = vpack.c.bf16 %v782_v38, %v781_v25  ;;  %v784_v14 = vld [vmem:[#allocation2 + $0x301] sm:$0xff] }
 0x2eb   :  { %9671 = vmatmul.msk.bf16.gmra.mxu1 %vm432_vm1, %v2143_v56 }
 0x2ec   :  { %v4198_v8 = vmax.f32 %v4070_v18, 0.0  ;;  %9736 = vmatmul.msk.bf16.gmra.mxu2 %vm432_vm1, %v3323_v15  ;;  %v11757_v18 = vadd.f32 %v11586_v7, %v274_v35  ;;  %v655_v35 = vld [vmem:[#allocation2 + $0x2f7] sm:$0xff] }
 0x2ee   :  { %4327 = vst.msk [vmem:[#allocation2 + $0x250] sm:$0xff] %vm4253_vm7, %v4198_v8  ;;  %v2626_v16 = vpop.f32.mrf.mxu0 }
 0x2ef   :  { %v3733_v9 = vpop.f32.mrf.mxu2  ;;  %532 = vst.msk [vmem:[#allocation2 + $0x320] sm:$0xff] %vm432_vm1, %v11757_v18 }
 0x2f0   :  { %v3942_v26 = vadd.f32 %v3733_v9, %v3144_v20  ;;  %v3145_v59 = vpop.f32.mrf.mxu1  ;;  %v913_v20 = vadd.s32 760, %v10315_v21  ;;  %v11771_v9 = vpop.f32.mrf.mxu3 }
 0x2f1   :  { %v3146_v50 = vadd.f32 %v3145_v59, %v2621_v30  ;;  %v146_v30 = vld [vmem:[%s13473_s0 + $0x320] sm:$0xff] }
 0x2f2   :  { %v4071_v2 = vadd.f32 %v11374_v3, %v3942_v26  ;;  %v1041_v41 = vand.u32 63, %v913_v20  ;;  %v275_v47 = vmul.f32 %v11578_v24, %v146_v30  ;;  %v2211_v30 = vpack.c.bf16 %v11727_v57, %v11714_v48 }
 0x2f4   :  { %v4199_v15 = vmax.f32 %v4071_v2, 0.0  ;;  %v11774_v61 = vadd.f32 %v11586_v7, %v275_v47  ;;  %vm11777_vm12 = vcmp.eq.s32.totalorder %v1041_v41, 63 }
 0x2f5   :  { %v4775_v38 = vld [vmem:[#allocation2 + $0x248] ss:$2 sm:$0xff]  ;;  %v4903_v43 = vld [vmem:[#allocation2 + $0x249] ss:$2 sm:$0xff] }
 0x2f6   :  { %4328 = vst.msk [vmem:[#allocation2 + $0x258] sm:$0xff] %vm4253_vm7, %v4199_v15  ;;  %v2629_v52 = vpop.f32.mrf.mxu0 }
 0x2f7   :  { %v3735_v27 = vpop.f32.mrf.mxu2  ;;  %533 = vst.msk [vmem:[#allocation2 + $0x328] sm:$0xff] %vm432_vm1, %v11774_v61 }
 0x2f8   :  { %v3943_v56 = vadd.f32 %v3735_v27, %v3146_v50  ;;  %v3148_v37 = vpop.f32.mrf.mxu1  ;;  %v656_v27 = vld [vmem:[#allocation2 + $0x2ff] sm:$0xff] }
 0x2f9   :  { %9609 = vmatmul.msk.bf16.gmra.mxu0 %vm432_vm1, %v2210_v5  ;;  %v3149_v63 = vadd.f32 %v3148_v37, %v2624_v54  ;;  %v783_v5 = vld [vmem:[#allocation2 + $0x2f9] sm:$0xff]  ;;  %v2065_v37 = vsel %vm11777_vm12, 0.0, %v784_v14  ;;  %v2145_v41 = vpack.c.bf16 %v656_v27, %v655_v35  ;;  %v148_v35 = vld [vmem:[%s13473_s0 + $0x330] sm:$0xff] }
 0x2fa   :  { %v4072_v8 = vadd.f32 %v11374_v3, %v3943_v56  ;;  %v3325_v14 = vpack.c.bf16 %v2065_v37, %v783_v5  ;;  %v277_v27 = vmul.f32 %v11578_v24, %v148_v35 }
 0x2fb   :  { %9672 = vmatmul.msk.bf16.gmra.mxu1 %vm432_vm1, %v2144_v33 }
 0x2fc   :  { %v4200_v12 = vmax.f32 %v4072_v8, 0.0  ;;  %9737 = vmatmul.msk.bf16.gmra.mxu2 %vm432_vm1, %v3324_v34  ;;  %v4994_v8 = vmax.f32 %v4775_v38, %v4903_v43 }
 0x2fe   :  { %4329 = vst.msk [vmem:[#allocation2 + $0x260] sm:$0xff] %vm4253_vm7, %v4200_v12  ;;  %v2631_v2 = vpop.f32.mrf.mxu0 }
 0x2ff   :  { %v3738_v26 = vpop.f32.mrf.mxu2 }
 0x300   :  { %v3944_v59 = vadd.f32 %v3738_v26, %v3149_v63  ;;  %v3150_v15 = vpop.f32.mrf.mxu1 }
 0x301   :  { %v3151_v34 = vadd.f32 %v3150_v15, %v2626_v16  ;;  %v11796_v16 = vpop.f32.mrf.mxu3  ;;  %v11801_v15 = vld [vmem:[%s13474_s1 + $0x2] ss:$0 sm:$0xff] }
 0x302   :  { %v4073_v54 = vadd.f32 %v11374_v3, %v3944_v59  ;;  %v147_v3 = vld [vmem:[%s13473_s0 + $0x328] sm:$0xff]  ;;  %13535 = vst [vmem:[#allocation16_spill] sm:$0xff] %v11796_v16 }
 0x303   :  { %v276_v12 = vmul.f32 %v11578_v24, %v147_v3  ;;  %v11816_v3 = vadd.f32 %v11586_v7, %v277_v27 }
 0x304   :  { %v4201_v50 = vmax.f32 %v4073_v54, 0.0 }
 0x305   :  { %v4777_v33 = vld [vmem:[#allocation2 + $0x258] ss:$2 sm:$0xff]  ;;  %v4905_v56 = vld [vmem:[#allocation2 + $0x259] ss:$2 sm:$0xff]  ;;  %v11793_v25 = vadd.f32 %v11586_v7, %v276_v12  ;;  %535 = vst.msk [vmem:[#allocation2 + $0x338] sm:$0xff] %vm432_vm1, %v11816_v3 }
 0x306   :  { %4330 = vst.msk [vmem:[#allocation2 + $0x268] sm:$0xff] %vm4253_vm7, %v4201_v50  ;;  %v4995_v20 = vmax.f32 %v4777_v33, %v4905_v56  ;;  %v2634_v26 = vpop.f32.mrf.mxu0  ;;  %v914_v50 = vadd.s32 768, %v10315_v21 }
 0x307   :  { %v3740_v63 = vpop.f32.mrf.mxu2  ;;  %534 = vst.msk [vmem:[#allocation2 + $0x330] sm:$0xff] %vm432_vm1, %v11793_v25 }
 0x308   :  { %v3945_v47 = vadd.f32 %v3740_v63, %v3151_v34  ;;  %v3153_v59 = vpop.f32.mrf.mxu1  ;;  %v5970_v54 = vpack.c.bf16 %v4995_v20, %v4994_v8  ;;  %v1042_v43 = vand.u32 63, %v914_v50  ;;  %v657_v34 = vld [vmem:[#allocation2 + $0x307] sm:$0xff]  ;;  %v658_v20 = vld [vmem:[#allocation2 + $0x30f] sm:$0xff] }
 0x309   :  { %9610 = vmatmul.msk.bf16.gmra.mxu0 %vm432_vm1, %v2211_v30  ;;  %v3154_v38 = vadd.f32 %v3153_v59, %v2629_v52  ;;  %v785_v63 = vld [vmem:[#allocation2 + $0x309] sm:$0xff]  ;;  %v786_v30 = vld [vmem:[#allocation2 + $0x311] sm:$0xff] }
 0x30a   :  { %v4074_v57 = vadd.f32 %v11801_v15, %v3945_v47  ;;  %9779 = vmatmul.msk.bf16.gmra.mxu3 %vm4253_vm7, %v5970_v54  ;;  %vm1170_vm13 = vcmp.eq.s32.totalorder %v1042_v43, 0  ;;  %v3326_v43 = vpack.c.bf16 %v786_v30, %v785_v63  ;;  %v659_v30 = vld [vmem:[#allocation2 + $0x317] sm:$0xff] }
 0x30b   :  { %9673 = vmatmul.msk.bf16.gmra.mxu1 %vm432_vm1, %v2145_v41  ;;  %v1554_v12 = vsel %vm1170_vm13, 0.0, %v657_v34  ;;  %v149_v41 = vld [vmem:[%s13473_s0 + $0x338] sm:$0xff] }
 0x30c   :  { %v4202_v48 = vmax.f32 %v4074_v57, 0.0  ;;  %9738 = vmatmul.msk.bf16.gmra.mxu2 %vm432_vm1, %v3325_v14  ;;  %v278_v59 = vmul.f32 %v11578_v24, %v149_v41  ;;  %v2212_v14 = vpack.c.bf16 %v11757_v18, %v11744_v10  ;;  %v2146_v50 = vpack.c.bf16 %v658_v20, %v1554_v12  ;;  %v150_v10 = vld [vmem:[%s13473_s0 + $0x340] sm:$0xff] }
 0x30d   :  { %v279_v18 = vmul.f32 %v11578_v24, %v150_v10  ;;  %v2213_v10 = vpack.c.bf16 %v11793_v25, %v11774_v61 }
 0x30e   :  { %4331 = vst.msk [vmem:[#allocation2 + $0x270] sm:$0xff] %vm4253_vm7, %v4202_v48  ;;  %v2636_v56 = vpop.f32.mrf.mxu0  ;;  %v11829_v35 = vadd.f32 %v11586_v7, %v278_v59  ;;  %v787_v59 = vld [vmem:[#allocation2 + $0x319] sm:$0xff] }
 0x30f   :  { %v3743_v5 = vpop.f32.mrf.mxu2  ;;  %v11845_v34 = vadd.f32 %v11586_v7, %v279_v18 }
 0x310   :  { %v3946_v33 = vadd.f32 %v3743_v5, %v3154_v38  ;;  %v3155_v37 = vpop.f32.mrf.mxu1  ;;  %536 = vst.msk [vmem:[#allocation2 + $0x340] sm:$0xff] %vm432_vm1, %v11829_v35 }
 0x311   :  { %v3156_v47 = vadd.f32 %v3155_v37, %v2631_v2  ;;  %537 = vst.msk [vmem:[#allocation2 + $0x348] sm:$0xff] %vm432_vm1, %v11845_v34 }
 0x312   :  { %v4075_v52 = vadd.f32 %v11801_v15, %v3946_v33  ;;  %v11842_v33 = vpop.f32.mrf.mxu3 }
 0x313   :  { %13536 = vst [vmem:[#allocation17_spill] sm:$0xff] %v11842_v33 }
 0x314   :  { %v4203_v8 = vmax.f32 %v4075_v52, 0.0 }
 0x315   :  { %v4779_v12 = vld [vmem:[#allocation2 + $0x268] ss:$2 sm:$0xff]  ;;  %v4907_v63 = vld [vmem:[#allocation2 + $0x269] ss:$2 sm:$0xff] }
 0x316   :  { %4332 = vst.msk [vmem:[#allocation2 + $0x278] sm:$0xff] %vm4253_vm7, %v4203_v8  ;;  %v2639_v48 = vpop.f32.mrf.mxu0 }
 0x317   :  { %v3745_v54 = vpop.f32.mrf.mxu2 }
 0x318   :  { %v3947_v57 = vadd.f32 %v3745_v54, %v3156_v47  ;;  %v3158_v38 = vpop.f32.mrf.mxu1  ;;  %v660_v47 = vld [vmem:[#allocation2 + $0x31f] sm:$0xff] }
 0x319   :  { %9611 = vmatmul.msk.bf16.gmra.mxu0 %vm432_vm1, %v2212_v14  ;;  %v3159_v5 = vadd.f32 %v3158_v38, %v2634_v26  ;;  %v788_v54 = vld [vmem:[#allocation2 + $0x321] sm:$0xff]  ;;  %v2147_v18 = vpack.c.bf16 %v660_v47, %v659_v30 }
 0x31a   :  { %v4076_v27 = vadd.f32 %v11801_v15, %v3947_v57  ;;  %v151_v57 = vld [vmem:[%s13473_s0 + $0x348] sm:$0xff]  ;;  %v3327_v0 = vpack.c.bf16 %v788_v54, %v787_v59  ;;  %v11860_v16 = vpop.f32.mrf.mxu3 }
 0x31b   :  { %9674 = vmatmul.msk.bf16.gmra.mxu1 %vm432_vm1, %v2146_v50  ;;  %13537 = vst [vmem:[#allocation18_spill] sm:$0xff] %v11860_v16  ;;  %v662_v54 = vld [vmem:[#allocation2 + $0x32f] sm:$0xff] }
 0x31c   :  { %v4204_v2 = vmax.f32 %v4076_v27, 0.0  ;;  %9739 = vmatmul.msk.bf16.gmra.mxu2 %vm432_vm1, %v3326_v43  ;;  %v4996_v43 = vmax.f32 %v4779_v12, %v4907_v63 }
 0x31e   :  { %4333 = vst.msk [vmem:[#allocation2 + $0x280] sm:$0xff] %vm4253_vm7, %v4204_v2  ;;  %v2641_v8 = vpop.f32.mrf.mxu0  ;;  %v280_v2 = vmul.f32 %v11578_v24, %v151_v57  ;;  %v153_v57 = vld [vmem:[%s13473_s0 + $0x358] sm:$0xff] }
 0x31f   :  { %v3748_v37 = vpop.f32.mrf.mxu2 }
 0x320   :  { %v3948_v52 = vadd.f32 %v3748_v37, %v3159_v5  ;;  %v3160_v20 = vpop.f32.mrf.mxu1  ;;  %v11858_v33 = vadd.f32 %v11586_v7, %v280_v2  ;;  %v2214_v2 = vpack.c.bf16 %v11829_v35, %v11816_v3 }
 0x321   :  { %v3161_v38 = vadd.f32 %v3160_v20, %v2636_v56  ;;  %v152_v20 = vld [vmem:[%s13473_s0 + $0x350] sm:$0xff] }
 0x322   :  { %v4077_v26 = vadd.f32 %v11801_v15, %v3948_v52  ;;  %538 = vst.msk [vmem:[#allocation2 + $0x350] sm:$0xff] %vm432_vm1, %v11858_v33  ;;  %v281_v12 = vmul.f32 %v11578_v24, %v152_v20 }
 0x324   :  { %v4205_v41 = vmax.f32 %v4077_v26, 0.0  ;;  %v11875_v47 = vadd.f32 %v11586_v7, %v281_v12 }
 0x325   :  { %v4781_v14 = vld [vmem:[#allocation2 + $0x278] ss:$2 sm:$0xff]  ;;  %v4909_v50 = vld [vmem:[#allocation2 + $0x279] ss:$2 sm:$0xff] }
 0x326   :  { %4334 = vst.msk [vmem:[#allocation2 + $0x288] sm:$0xff] %vm4253_vm7, %v4205_v41  ;;  %v4997_v27 = vmax.f32 %v4781_v14, %v4909_v50  ;;  %v2644_v52 = vpop.f32.mrf.mxu0  ;;  %v789_v14 = vld [vmem:[#allocation2 + $0x329] sm:$0xff]  ;;  %v790_v50 = vld [vmem:[#allocation2 + $0x331] sm:$0xff] }
 0x327   :  { %v3750_v5 = vpop.f32.mrf.mxu2  ;;  %539 = vst.msk [vmem:[#allocation2 + $0x358] sm:$0xff] %vm432_vm1, %v11875_v47 }
 0x328   :  { %v3949_v37 = vadd.f32 %v3750_v5, %v3161_v38  ;;  %v3163_v26 = vpop.f32.mrf.mxu1  ;;  %v5971_v1 = vpack.c.bf16 %v4997_v27, %v4996_v43  ;;  %v282_v43 = vmul.f32 %v11578_v24, %v153_v57 }
 0x329   :  { %9612 = vmatmul.msk.bf16.gmra.mxu0 %vm432_vm1, %v2213_v10  ;;  %v3164_v25 = vadd.f32 %v3163_v26, %v2639_v48  ;;  %v661_v48 = vld [vmem:[#allocation2 + $0x327] sm:$0xff]  ;;  %v3328_v26 = vpack.c.bf16 %v790_v50, %v789_v14 }
 0x32a   :  { %v4078_v56 = vadd.f32 %v11801_v15, %v3949_v37  ;;  %9780 = vmatmul.msk.bf16.gmra.mxu3 %vm4253_vm7, %v5971_v1  ;;  %v2148_v5 = vpack.c.bf16 %v662_v54, %v661_v48  ;;  %v792_v54 = vld [vmem:[#allocation2 + $0x341] sm:$0xff] }
 0x32b   :  { %9675 = vmatmul.msk.bf16.gmra.mxu1 %vm432_vm1, %v2147_v18 }
 0x32c   :  { %v4206_v61 = vmax.f32 %v4078_v56, 0.0  ;;  %9740 = vmatmul.msk.bf16.gmra.mxu2 %vm432_vm1, %v3327_v0  ;;  %v11888_v56 = vadd.f32 %v11586_v7, %v282_v43  ;;  %v663_v43 = vld [vmem:[#allocation2 + $0x337] sm:$0xff] }
 0x32e   :  { %4335 = vst.msk [vmem:[#allocation2 + $0x290] sm:$0xff] %vm4253_vm7, %v4206_v61  ;;  %v2646_v30 = vpop.f32.mrf.mxu0 }
 0x32f   :  { %v3753_v1 = vpop.f32.mrf.mxu2  ;;  %540 = vst.msk [vmem:[#allocation2 + $0x360] sm:$0xff] %vm432_vm1, %v11888_v56 }
 0x330   :  { %v3950_v63 = vadd.f32 %v3753_v1, %v3164_v25  ;;  %v3165_v41 = vpop.f32.mrf.mxu1  ;;  %v921_v25 = vadd.s32 824, %v10315_v21  ;;  %v11902_v1 = vpop.f32.mrf.mxu3 }
 0x331   :  { %v3166_v38 = vadd.f32 %v3165_v41, %v2641_v8  ;;  %v154_v8 = vld [vmem:[%s13473_s0 + $0x360] sm:$0xff]  ;;  %13538 = vst [vmem:[#allocation19_spill] sm:$0xff] %v11902_v1 }
 0x332   :  { %v4079_v59 = vadd.f32 %v11801_v15, %v3950_v63  ;;  %v1049_v20 = vand.u32 63, %v921_v25  ;;  %v283_v12 = vmul.f32 %v11578_v24, %v154_v8 }
 0x334   :  { %v4207_v0 = vmax.f32 %v4079_v59, 0.0  ;;  %v11905_v48 = vadd.f32 %v11586_v7, %v283_v12  ;;  %vm11908_vm14 = vcmp.eq.s32.totalorder %v1049_v20, 63  ;;  %v2215_v20 = vpack.c.bf16 %v11858_v33, %v11845_v34 }
 0x335   :  { %v4783_v50 = vld [vmem:[#allocation2 + $0x288] ss:$2 sm:$0xff]  ;;  %v4911_v57 = vld [vmem:[#allocation2 + $0x289] ss:$2 sm:$0xff] }
 0x336   :  { %4336 = vst.msk [vmem:[#allocation2 + $0x298] sm:$0xff] %vm4253_vm7, %v4207_v0  ;;  %v2649_v18 = vpop.f32.mrf.mxu0  ;;  %v4998_v25 = vmax.f32 %v4783_v50, %v4911_v57  ;;  %v156_v57 = vld [vmem:[%s13473_s0 + $0x370] sm:$0xff] }
 0x337   :  { %v3755_v27 = vpop.f32.mrf.mxu2  ;;  %541 = vst.msk [vmem:[#allocation2 + $0x368] sm:$0xff] %vm432_vm1, %v11905_v48 }
 0x338   :  { %v3951_v10 = vadd.f32 %v3755_v27, %v3166_v38  ;;  %v3168_v37 = vpop.f32.mrf.mxu1  ;;  %v664_v27 = vld [vmem:[#allocation2 + $0x33f] sm:$0xff] }
 0x339   :  { %9613 = vmatmul.msk.bf16.gmra.mxu0 %vm432_vm1, %v2214_v2  ;;  %v3169_v35 = vadd.f32 %v3168_v37, %v2644_v52  ;;  %v791_v2 = vld [vmem:[#allocation2 + $0x339] sm:$0xff]  ;;  %v2073_v37 = vsel %vm11908_vm14, 0.0, %v792_v54  ;;  %v2149_v12 = vpack.c.bf16 %v664_v27, %v663_v43  ;;  %v285_v43 = vmul.f32 %v11578_v24, %v156_v57 }
 0x33a   :  { %v4080_v61 = vadd.f32 %v11801_v15, %v3951_v10  ;;  %v3329_v14 = vpack.c.bf16 %v2073_v37, %v791_v2 }
 0x33b   :  { %9676 = vmatmul.msk.bf16.gmra.mxu1 %vm432_vm1, %v2148_v5  ;;  %v11942_v37 = vadd.f32 %v11586_v7, %v285_v43 }
 0x33c   :  { %v4208_v3 = vmax.f32 %v4080_v61, 0.0  ;;  %9741 = vmatmul.msk.bf16.gmra.mxu2 %vm432_vm1, %v3328_v26  ;;  %v155_v26 = vld [vmem:[%s13473_s0 + $0x368] sm:$0xff] }
 0x33d   :  { %543 = vst.msk [vmem:[#allocation2 + $0x378] sm:$0xff] %vm432_vm1, %v11942_v37 }
 0x33e   :  { %4337 = vst.msk [vmem:[#allocation2 + $0x2a0] sm:$0xff] %vm4253_vm7, %v4208_v3  ;;  %v2651_v59 = vpop.f32.mrf.mxu0 }
 0x33f   :  { %v3758_v63 = vpop.f32.mrf.mxu2 }
 0x340   :  { %v3952_v41 = vadd.f32 %v3758_v63, %v3169_v35  ;;  %v3170_v0 = vpop.f32.mrf.mxu1  ;;  %v284_v35 = vmul.f32 %v11578_v24, %v155_v26  ;;  %v665_v26 = vld [vmem:[#allocation2 + $0x347] sm:$0xff] }
 0x341   :  { %v3171_v61 = vadd.f32 %v3170_v0, %v2646_v30  ;;  %v11927_v30 = vpop.f32.mrf.mxu3 }
 0x342   :  { %v4081_v52 = vadd.f32 %v11801_v15, %v3952_v41  ;;  %v11924_v1 = vadd.f32 %v11586_v7, %v284_v35  ;;  %13541 = vst [vmem:[#allocation20_spill] sm:$0xff] %v11927_v30  ;;  %v793_v35 = vld [vmem:[#allocation2 + $0x349] sm:$0xff] }
 0x344   :  { %v4209_v38 = vmax.f32 %v4081_v52, 0.0  ;;  %542 = vst.msk [vmem:[#allocation2 + $0x370] sm:$0xff] %vm432_vm1, %v11924_v1 }
 0x345   :  { %v4785_v5 = vld [vmem:[#allocation2 + $0x298] ss:$2 sm:$0xff]  ;;  %v4913_v10 = vld [vmem:[#allocation2 + $0x299] ss:$2 sm:$0xff] }
 0x346   :  { %4338 = vst.msk [vmem:[#allocation2 + $0x2a8] sm:$0xff] %vm4253_vm7, %v4209_v38  ;;  %v4999_v3 = vmax.f32 %v4785_v5, %v4913_v10  ;;  %v2654_v41 = vpop.f32.mrf.mxu0  ;;  %v922_v38 = vadd.s32 832, %v10315_v21 }
 0x347   :  { %v3760_v8 = vpop.f32.mrf.mxu2 }
 0x348   :  { %v3953_v63 = vadd.f32 %v3760_v8, %v3171_v61  ;;  %v3173_v52 = vpop.f32.mrf.mxu1  ;;  %v5972_v54 = vpack.c.bf16 %v4999_v3, %v4998_v25  ;;  %v1050_v50 = vand.u32 63, %v922_v38  ;;  %v666_v25 = vld [vmem:[#allocation2 + $0x34f] sm:$0xff] }
 0x349   :  { %9614 = vmatmul.msk.bf16.gmra.mxu0 %vm432_vm1, %v2215_v20  ;;  %v3174_v34 = vadd.f32 %v3173_v52, %v2649_v18  ;;  %v794_v8 = vld [vmem:[#allocation2 + $0x351] sm:$0xff] }
 0x34a   :  { %v4082_v0 = vadd.f32 %v11801_v15, %v3953_v63  ;;  %9781 = vmatmul.msk.bf16.gmra.mxu3 %vm4253_vm7, %v5972_v54  ;;  %vm1178_vm15 = vcmp.eq.s32.totalorder %v1050_v50, 0  ;;  %v157_v20 = vld [vmem:[%s13473_s0 + $0x378] sm:$0xff]  ;;  %v2216_v54 = vpack.c.bf16 %v11888_v56, %v11875_v47  ;;  %v158_v47 = vld [vmem:[%s13473_s0 + $0x380] sm:$0xff] }
 0x34b   :  { %9677 = vmatmul.msk.bf16.gmra.mxu1 %vm432_vm1, %v2149_v12  ;;  %v1562_v3 = vsel %vm1178_vm15, 0.0, %v665_v26  ;;  %v286_v63 = vmul.f32 %v11578_v24, %v157_v20  ;;  %v287_v56 = vmul.f32 %v11578_v24, %v158_v47  ;;  %v668_v20 = vld [vmem:[#allocation2 + $0x35f] sm:$0xff] }
 0x34c   :  { %v4210_v33 = vmax.f32 %v4082_v0, 0.0  ;;  %9742 = vmatmul.msk.bf16.gmra.mxu2 %vm432_vm1, %v3329_v14  ;;  %v2150_v14 = vpack.c.bf16 %v666_v25, %v1562_v3 }
 0x34d   :  { %v11955_v50 = vadd.f32 %v11586_v7, %v286_v63  ;;  %v796_v63 = vld [vmem:[#allocation2 + $0x361] sm:$0xff] }
 0x34e   :  { %4339 = vst.msk [vmem:[#allocation2 + $0x2b0] sm:$0xff] %vm4253_vm7, %v4210_v33  ;;  %v2656_v5 = vpop.f32.mrf.mxu0 }
 0x34f   :  { %v3763_v27 = vpop.f32.mrf.mxu2  ;;  %544 = vst.msk [vmem:[#allocation2 + $0x380] sm:$0xff] %vm432_vm1, %v11955_v50 }
 0x350   :  { %v3954_v2 = vadd.f32 %v3763_v27, %v3174_v34  ;;  %v3175_v10 = vpop.f32.mrf.mxu1  ;;  %v3330_v34 = vpack.c.bf16 %v794_v8, %v793_v35  ;;  %v11968_v27 = vpop.f32.mrf.mxu3  ;;  %v667_v35 = vld [vmem:[#allocation2 + $0x357] sm:$0xff] }
 0x351   :  { %v3176_v12 = vadd.f32 %v3175_v10, %v2651_v59  ;;  %13542 = vst [vmem:[#allocation21_spill] sm:$0xff] %v11968_v27  ;;  %v11971_v10 = vadd.f32 %v11586_v7, %v287_v56  ;;  %v2151_v47 = vpack.c.bf16 %v668_v20, %v667_v35 }
 0x352   :  { %v4083_v18 = vadd.f32 %v11801_v15, %v3954_v2 }
 0x353   :  { %545 = vst.msk [vmem:[#allocation2 + $0x388] sm:$0xff] %vm432_vm1, %v11971_v10 }
 0x354   :  { %v4211_v61 = vmax.f32 %v4083_v18, 0.0 }
 0x355   :  { %v4787_v25 = vld [vmem:[#allocation2 + $0x2a8] ss:$2 sm:$0xff]  ;;  %v4915_v3 = vld [vmem:[#allocation2 + $0x2a9] ss:$2 sm:$0xff] }
 0x356   :  { %4340 = vst.msk [vmem:[#allocation2 + $0x2b8] sm:$0xff] %vm4253_vm7, %v4211_v61  ;;  %v2659_v0 = vpop.f32.mrf.mxu0 }
 0x357   :  { %v3765_v52 = vpop.f32.mrf.mxu2 }
 0x358   :  { %v3955_v38 = vadd.f32 %v3765_v52, %v3176_v12  ;;  %v3178_v33 = vpop.f32.mrf.mxu1  ;;  %v795_v12 = vld [vmem:[#allocation2 + $0x359] sm:$0xff]  ;;  %v11986_v16 = vpop.f32.mrf.mxu3 }
 0x359   :  { %9615 = vmatmul.msk.bf16.gmra.mxu0 %vm432_vm1, %v2216_v54  ;;  %v3179_v43 = vadd.f32 %v3178_v33, %v2654_v41  ;;  %v5000_v33 = vmax.f32 %v4787_v25, %v4915_v3  ;;  %v3331_v27 = vpack.c.bf16 %v796_v63, %v795_v12  ;;  %13543 = vst [vmem:[#allocation22_spill] sm:$0xff] %v11986_v16  ;;  %v669_v63 = vld [vmem:[#allocation2 + $0x367] sm:$0xff] }
 0x35a   :  { %v4084_v57 = vadd.f32 %v11801_v15, %v3955_v38 }
 0x35b   :  { %9678 = vmatmul.msk.bf16.gmra.mxu1 %vm432_vm1, %v2150_v14  ;;  %v159_v14 = vld [vmem:[%s13473_s0 + $0x388] sm:$0xff] }
 0x35c   :  { %v4212_v59 = vmax.f32 %v4084_v57, 0.0  ;;  %9743 = vmatmul.msk.bf16.gmra.mxu2 %vm432_vm1, %v3330_v34  ;;  %v288_v57 = vmul.f32 %v11578_v24, %v159_v14  ;;  %v798_v14 = vld [vmem:[#allocation2 + $0x371] sm:$0xff] }
 0x35e   :  { %4341 = vst.msk [vmem:[#allocation2 + $0x2c0] sm:$0xff] %vm4253_vm7, %v4212_v59  ;;  %v2661_v18 = vpop.f32.mrf.mxu0  ;;  %v11984_v30 = vadd.f32 %v11586_v7, %v288_v57  ;;  %v160_v7 = vld [vmem:[%s13473_s0 + $0x390] sm:$0xff] }
 0x35f   :  { %v3768_v2 = vpop.f32.mrf.mxu2 }
 0x360   :  { %v3956_v26 = vadd.f32 %v3768_v2, %v3179_v43  ;;  %v3180_v61 = vpop.f32.mrf.mxu1  ;;  %v2217_v43 = vpack.c.bf16 %v11924_v1, %v11905_v48  ;;  %546 = vst.msk [vmem:[#allocation2 + $0x390] sm:$0xff] %vm432_vm1, %v11984_v30  ;;  %v12002_v48 = vld [vmem:[%s13474_s1] ss:$0 sm:$0xff] }
 0x361   :  { %v3181_v38 = vadd.f32 %v3180_v61, %v2656_v5  ;;  %v289_v61 = vmul.f32 %v12002_v48, %v160_v7 }
 0x362   :  { %v4085_v41 = vadd.f32 %v11801_v15, %v3956_v26 }
 0x364   :  { %v4213_v8 = vmax.f32 %v4085_v41, 0.0 }
 0x365   :  { %v4789_v52 = vld [vmem:[#allocation2 + $0x2b8] ss:$2 sm:$0xff]  ;;  %v4917_v54 = vld [vmem:[#allocation2 + $0x2b9] ss:$2 sm:$0xff] }
 0x366   :  { %4342 = vst.msk [vmem:[#allocation2 + $0x2c8] sm:$0xff] %vm4253_vm7, %v4213_v8  ;;  %v5001_v34 = vmax.f32 %v4789_v52, %v4917_v54  ;;  %v2664_v2 = vpop.f32.mrf.mxu0  ;;  %v670_v52 = vld [vmem:[#allocation2 + $0x36f] sm:$0xff] }
 0x367   :  { %v3770_v59 = vpop.f32.mrf.mxu2  ;;  %v797_v54 = vld [vmem:[#allocation2 + $0x369] sm:$0xff] }
 0x368   :  { %v3957_v56 = vadd.f32 %v3770_v59, %v3181_v38  ;;  %v3183_v26 = vpop.f32.mrf.mxu1  ;;  %v5973_v41 = vpack.c.bf16 %v5001_v34, %v5000_v33  ;;  %v161_v38 = vld [vmem:[%s13473_s0 + $0x398] sm:$0xff]  ;;  %v2218_v59 = vpack.c.bf16 %v11955_v50, %v11942_v37 }
 0x369   :  { %9616 = vmatmul.msk.bf16.gmra.mxu0 %vm432_vm1, %v2217_v43  ;;  %v3184_v1 = vadd.f32 %v3183_v26, %v2659_v0  ;;  %v12008_v0 = vld [vmem:[%s13474_s1 + $0x1] ss:$0 sm:$0xff]  ;;  %v290_v34 = vmul.f32 %v12002_v48, %v161_v38  ;;  %v2152_v43 = vpack.c.bf16 %v670_v52, %v669_v63 }
 0x36a   :  { %v4086_v5 = vadd.f32 %v11801_v15, %v3957_v56  ;;  %9782 = vmatmul.msk.bf16.gmra.mxu3 %vm4253_vm7, %v5973_v41  ;;  %v3332_v41 = vpack.c.bf16 %v798_v14, %v797_v54  ;;  %v800_v52 = vld [vmem:[#allocation2 + $0x381] sm:$0xff] }
 0x36b   :  { %9679 = vmatmul.msk.bf16.gmra.mxu1 %vm432_vm1, %v2151_v47 }
 0x36c   :  { %v4214_v24 = vmax.f32 %v4086_v5, 0.0  ;;  %9744 = vmatmul.msk.bf16.gmra.mxu2 %vm432_vm1, %v3331_v27  ;;  %v12011_v27 = vadd.f32 %v12008_v0, %v289_v61  ;;  %v12024_v5 = vadd.f32 %v12008_v0, %v290_v34  ;;  %v671_v34 = vld [vmem:[#allocation2 + $0x377] sm:$0xff] }
 0x36e   :  { %4343 = vst.msk [vmem:[#allocation2 + $0x2d0] sm:$0xff] %vm4253_vm7, %v4214_v24  ;;  %v2666_v35 = vpop.f32.mrf.mxu0 }
 0x36f   :  { %v3773_v25 = vpop.f32.mrf.mxu2  ;;  %547 = vst.msk [vmem:[#allocation2 + $0x398] sm:$0xff] %vm432_vm1, %v12011_v27 }
 0x370   :  { %v3958_v3 = vadd.f32 %v3773_v25, %v3184_v1  ;;  %v3185_v8 = vpop.f32.mrf.mxu1  ;;  %v929_v1 = vadd.s32 888, %v10315_v21  ;;  %548 = vst.msk [vmem:[#allocation2 + $0x3a0] sm:$0xff] %vm432_vm1, %v12024_v5  ;;  %v12038_v25 = vpop.f32.mrf.mxu3 }
 0x371   :  { %v3186_v33 = vadd.f32 %v3185_v8, %v2661_v18  ;;  %v162_v18 = vld [vmem:[%s13473_s0 + $0x3a0] sm:$0xff]  ;;  %13544 = vst [vmem:[#allocation23_spill] sm:$0xff] %v12038_v25 }
 0x372   :  { %v4087_v20 = vadd.f32 %v11801_v15, %v3958_v3  ;;  %v1057_v7 = vand.u32 63, %v929_v1  ;;  %v291_v61 = vmul.f32 %v12002_v48, %v162_v18 }
 0x374   :  { %v4215_v12 = vmax.f32 %v4087_v20, 0.0  ;;  %v12041_v63 = vadd.f32 %v12008_v0, %v291_v61  ;;  %vm12044_vm0 = vcmp.eq.s32.totalorder %v1057_v7, 63  ;;  %v2219_v7 = vpack.c.bf16 %v11984_v30, %v11971_v10 }
 0x375   :  { %v4791_v14 = vld [vmem:[#allocation2 + $0x2c8] ss:$2 sm:$0xff]  ;;  %v4919_v38 = vld [vmem:[#allocation2 + $0x2c9] ss:$2 sm:$0xff] }
 0x376   :  { %4344 = vst.msk [vmem:[#allocation2 + $0x2d8] sm:$0xff] %vm4253_vm7, %v4215_v12  ;;  %v2669_v56 = vpop.f32.mrf.mxu0  ;;  %v5002_v1 = vmax.f32 %v4791_v14, %v4919_v38  ;;  %v164_v38 = vld [vmem:[%s13473_s0 + $0x3b0] sm:$0xff] }
 0x377   :  { %v3775_v57 = vpop.f32.mrf.mxu2  ;;  %549 = vst.msk [vmem:[#allocation2 + $0x3a8] sm:$0xff] %vm432_vm1, %v12041_v63 }
 0x378   :  { %v3959_v47 = vadd.f32 %v3775_v57, %v3186_v33  ;;  %v3188_v26 = vpop.f32.mrf.mxu1  ;;  %v672_v57 = vld [vmem:[#allocation2 + $0x37f] sm:$0xff] }
 0x379   :  { %9617 = vmatmul.msk.bf16.gmra.mxu0 %vm432_vm1, %v2218_v59  ;;  %v3189_v50 = vadd.f32 %v3188_v26, %v2664_v2  ;;  %v799_v59 = vld [vmem:[#allocation2 + $0x379] sm:$0xff]  ;;  %v2081_v26 = vsel %vm12044_vm0, 0.0, %v800_v52  ;;  %v2153_v61 = vpack.c.bf16 %v672_v57, %v671_v34  ;;  %v293_v34 = vmul.f32 %v12002_v48, %v164_v38 }
 0x37a   :  { %v4088_v24 = vadd.f32 %v11801_v15, %v3959_v47  ;;  %v3333_v54 = vpack.c.bf16 %v2081_v26, %v799_v59 }
 0x37b   :  { %9680 = vmatmul.msk.bf16.gmra.mxu1 %vm432_vm1, %v2152_v43  ;;  %v12078_v26 = vadd.f32 %v12008_v0, %v293_v34 }
 0x37c   :  { %v4216_v37 = vmax.f32 %v4088_v24, 0.0  ;;  %9745 = vmatmul.msk.bf16.gmra.mxu2 %vm432_vm1, %v3332_v41  ;;  %v163_v41 = vld [vmem:[%s13473_s0 + $0x3a8] sm:$0xff] }
 0x37d   :  { %551 = vst.msk [vmem:[#allocation2 + $0x3b8] sm:$0xff] %vm432_vm1, %v12078_v26 }
 0x37e   :  { %4345 = vst.msk [vmem:[#allocation2 + $0x2e0] sm:$0xff] %vm4253_vm7, %v4216_v37  ;;  %v2671_v20 = vpop.f32.mrf.mxu0 }
 0x37f   :  { %v3778_v3 = vpop.f32.mrf.mxu2 }
 0x380   :  { %v3960_v8 = vadd.f32 %v3778_v3, %v3189_v50  ;;  %v3190_v12 = vpop.f32.mrf.mxu1  ;;  %v292_v50 = vmul.f32 %v12002_v48, %v163_v41  ;;  %v673_v41 = vld [vmem:[#allocation2 + $0x387] sm:$0xff] }
 0x381   :  { %v3191_v24 = vadd.f32 %v3190_v12, %v2666_v35  ;;  %v12063_v35 = vpop.f32.mrf.mxu3 }
 0x382   :  { %v4089_v2 = vadd.f32 %v11801_v15, %v3960_v8  ;;  %v12060_v25 = vadd.f32 %v12008_v0, %v292_v50  ;;  %13547 = vst [vmem:[#allocation24_spill] sm:$0xff] %v12063_v35  ;;  %v801_v50 = vld [vmem:[#allocation2 + $0x389] sm:$0xff] }
 0x384   :  { %v4217_v33 = vmax.f32 %v4089_v2, 0.0  ;;  %550 = vst.msk [vmem:[#allocation2 + $0x3b0] sm:$0xff] %vm432_vm1, %v12060_v25 }
 0x385   :  { %v4793_v43 = vld [vmem:[#allocation2 + $0x2d8] ss:$2 sm:$0xff]  ;;  %v4921_v47 = vld [vmem:[#allocation2 + $0x2d9] ss:$2 sm:$0xff] }
 0x386   :  { %4346 = vst.msk [vmem:[#allocation2 + $0x2e8] sm:$0xff] %vm4253_vm7, %v4217_v33  ;;  %v5003_v37 = vmax.f32 %v4793_v43, %v4921_v47  ;;  %v2674_v8 = vpop.f32.mrf.mxu0  ;;  %v930_v33 = vadd.s32 896, %v10315_v21 }
 0x387   :  { %v3780_v18 = vpop.f32.mrf.mxu2 }
 0x388   :  { %v3961_v3 = vadd.f32 %v3780_v18, %v3191_v24  ;;  %v3193_v2 = vpop.f32.mrf.mxu1  ;;  %v5974_v52 = vpack.c.bf16 %v5003_v37, %v5002_v1  ;;  %v1058_v14 = vand.u32 63, %v930_v33  ;;  %v674_v1 = vld [vmem:[#allocation2 + $0x38f] sm:$0xff] }
 0x389   :  { %9618 = vmatmul.msk.bf16.gmra.mxu0 %vm432_vm1, %v2219_v7  ;;  %v3194_v10 = vadd.f32 %v3193_v2, %v2669_v56  ;;  %v802_v18 = vld [vmem:[#allocation2 + $0x391] sm:$0xff] }
 0x38a   :  { %v4090_v12 = vadd.f32 %v11801_v15, %v3961_v3  ;;  %9783 = vmatmul.msk.bf16.gmra.mxu3 %vm4253_vm7, %v5974_v52  ;;  %vm1186_vm2 = vcmp.eq.s32.totalorder %v1058_v14, 0  ;;  %v165_v7 = vld [vmem:[%s13473_s0 + $0x3b8] sm:$0xff]  ;;  %v2220_v52 = vpack.c.bf16 %v12024_v5, %v12011_v27  ;;  %v166_v27 = vld [vmem:[%s13473_s0 + $0x3c0] sm:$0xff] }
 0x38b   :  { %9681 = vmatmul.msk.bf16.gmra.mxu1 %vm432_vm1, %v2153_v61  ;;  %v1570_v37 = vsel %vm1186_vm2, 0.0, %v673_v41  ;;  %v294_v3 = vmul.f32 %v12002_v48, %v165_v7  ;;  %v295_v5 = vmul.f32 %v12002_v48, %v166_v27  ;;  %v676_v7 = vld [vmem:[#allocation2 + $0x39f] sm:$0xff] }
 0x38c   :  { %v4218_v30 = vmax.f32 %v4090_v12, 0.0  ;;  %9746 = vmatmul.msk.bf16.gmra.mxu2 %vm432_vm1, %v3333_v54  ;;  %v2154_v54 = vpack.c.bf16 %v674_v1, %v1570_v37 }
 0x38d   :  { %v12091_v14 = vadd.f32 %v12008_v0, %v294_v3  ;;  %v804_v3 = vld [vmem:[#allocation2 + $0x3a1] sm:$0xff] }
 0x38e   :  { %4347 = vst.msk [vmem:[#allocation2 + $0x2f0] sm:$0xff] %vm4253_vm7, %v4218_v30  ;;  %v2676_v43 = vpop.f32.mrf.mxu0 }
 0x38f   :  { %v3783_v57 = vpop.f32.mrf.mxu2  ;;  %552 = vst.msk [vmem:[#allocation2 + $0x3c0] sm:$0xff] %vm432_vm1, %v12091_v14 }
 0x390   :  { %v3962_v59 = vadd.f32 %v3783_v57, %v3194_v10  ;;  %v3195_v47 = vpop.f32.mrf.mxu1  ;;  %v3334_v10 = vpack.c.bf16 %v802_v18, %v801_v50  ;;  %v12104_v57 = vpop.f32.mrf.mxu3  ;;  %v675_v50 = vld [vmem:[#allocation2 + $0x397] sm:$0xff] }
 0x391   :  { %v3196_v61 = vadd.f32 %v3195_v47, %v2671_v20  ;;  %13548 = vst [vmem:[#allocation25_spill] sm:$0xff] %v12104_v57  ;;  %v12107_v47 = vadd.f32 %v12008_v0, %v295_v5  ;;  %v2155_v27 = vpack.c.bf16 %v676_v7, %v675_v50 }
 0x392   :  { %v4091_v56 = vadd.f32 %v11801_v15, %v3962_v59 }
 0x393   :  { %553 = vst.msk [vmem:[#allocation2 + $0x3c8] sm:$0xff] %vm432_vm1, %v12107_v47 }
 0x394   :  { %v4219_v24 = vmax.f32 %v4091_v56, 0.0 }
 0x395   :  { %v4795_v1 = vld [vmem:[#allocation2 + $0x2e8] ss:$2 sm:$0xff]  ;;  %v4923_v37 = vld [vmem:[#allocation2 + $0x2e9] ss:$2 sm:$0xff] }
 0x396   :  { %4348 = vst.msk [vmem:[#allocation2 + $0x2f8] sm:$0xff] %vm4253_vm7, %v4219_v24  ;;  %v2679_v12 = vpop.f32.mrf.mxu0 }
 0x397   :  { %v3785_v2 = vpop.f32.mrf.mxu2 }
 0x398   :  { %v3963_v33 = vadd.f32 %v3785_v2, %v3196_v61  ;;  %v3198_v30 = vpop.f32.mrf.mxu1  ;;  %v803_v61 = vld [vmem:[#allocation2 + $0x399] sm:$0xff]  ;;  %v12122_v16 = vpop.f32.mrf.mxu3 }
 0x399   :  { %9619 = vmatmul.msk.bf16.gmra.mxu0 %vm432_vm1, %v2220_v52  ;;  %v3199_v34 = vadd.f32 %v3198_v30, %v2674_v8  ;;  %v5004_v30 = vmax.f32 %v4795_v1, %v4923_v37  ;;  %v3335_v57 = vpack.c.bf16 %v804_v3, %v803_v61 }
 0x39a   :  { %v4092_v38 = vadd.f32 %v11801_v15, %v3963_v33 }
 0x39b   :  { %9682 = vmatmul.msk.bf16.gmra.mxu1 %vm432_vm1, %v2154_v54  ;;  %v167_v54 = vld [vmem:[%s13473_s0 + $0x3c8] sm:$0xff] }
 0x39c   :  { %v4220_v20 = vmax.f32 %v4092_v38, 0.0  ;;  %9747 = vmatmul.msk.bf16.gmra.mxu2 %vm432_vm1, %v3334_v10  ;;  %v296_v38 = vmul.f32 %v12002_v48, %v167_v54  ;;  %v806_v54 = vld [vmem:[#allocation2 + $0x3b1] sm:$0xff] }
 0x39e   :  { %4349 = vst.msk [vmem:[#allocation2 + $0x300] sm:$0xff] %vm4253_vm7, %v4220_v20  ;;  %v2681_v56 = vpop.f32.mrf.mxu0  ;;  %v12120_v35 = vadd.f32 %v12008_v0, %v296_v38 }
 0x39f   :  { %v3788_v59 = vpop.f32.mrf.mxu2 }
 0x3a0   :  { %v3964_v41 = vadd.f32 %v3788_v59, %v3199_v34  ;;  %v3200_v24 = vpop.f32.mrf.mxu1  ;;  %v2221_v34 = vpack.c.bf16 %v12060_v25, %v12041_v63  ;;  %554 = vst.msk [vmem:[#allocation2 + $0x3d0] sm:$0xff] %vm432_vm1, %v12120_v35 }
 0x3a1   :  { %v3201_v33 = vadd.f32 %v3200_v24, %v2676_v43  ;;  %v168_v24 = vld [vmem:[%s13473_s0 + $0x3d0] sm:$0xff] }
 0x3a2   :  { %v4093_v8 = vadd.f32 %v11801_v15, %v3964_v41  ;;  %v297_v1 = vmul.f32 %v12002_v48, %v168_v24 }
 0x3a4   :  { %v4221_v18 = vmax.f32 %v4093_v8, 0.0  ;;  %v12137_v61 = vadd.f32 %v12008_v0, %v297_v1 }
 0x3a5   :  { %v4797_v2 = vld [vmem:[#allocation2 + $0x2f8] ss:$2 sm:$0xff]  ;;  %v4925_v52 = vld [vmem:[#allocation2 + $0x2f9] ss:$2 sm:$0xff] }
 0x3a6   :  { %4350 = vst.msk [vmem:[#allocation2 + $0x308] sm:$0xff] %vm4253_vm7, %v4221_v18  ;;  %v5005_v10 = vmax.f32 %v4797_v2, %v4925_v52  ;;  %v2684_v59 = vpop.f32.mrf.mxu0  ;;  %v678_v2 = vld [vmem:[#allocation2 + $0x3af] sm:$0xff] }
 0x3a7   :  { %v3790_v20 = vpop.f32.mrf.mxu2  ;;  %555 = vst.msk [vmem:[#allocation2 + $0x3d8] sm:$0xff] %vm432_vm1, %v12137_v61  ;;  %v805_v52 = vld [vmem:[#allocation2 + $0x3a9] sm:$0xff] }
 0x3a8   :  { %v3965_v5 = vadd.f32 %v3790_v20, %v3201_v33  ;;  %v3203_v41 = vpop.f32.mrf.mxu1  ;;  %v5975_v8 = vpack.c.bf16 %v5005_v10, %v5004_v30  ;;  %v169_v33 = vld [vmem:[%s13473_s0 + $0x3d8] sm:$0xff]  ;;  %v2222_v20 = vpack.c.bf16 %v12091_v14, %v12078_v26  ;;  %s10209_s0 = smov [#allocation3]  }
 0x3a9   :  { %9620 = vmatmul.msk.bf16.gmra.mxu0 %vm432_vm1, %v2221_v34  ;;  %v3204_v63 = vadd.f32 %v3203_v41, %v2679_v12  ;;  %v298_v10 = vmul.f32 %v12002_v48, %v169_v33  ;;  %s9547_s3 = sshll.u32 %s10209_s0, 4  ;;  %s9548_s3 = int_to_ptr.vmem [resolvable:$true] %s9547_s3 }
 0x3aa   :  { %v4094_v43 = vadd.f32 %v11801_v15, %v3965_v5  ;;  %9784 = vmatmul.msk.bf16.gmra.mxu3 %vm4253_vm7, %v5975_v8  ;;  %v3336_v8 = vpack.c.bf16 %v806_v54, %v805_v52  ;;  %v680_v52 = vld [vmem:[#allocation2 + $0x3bf] sm:$0xff] }
 0x3ab   :  { %9683 = vmatmul.msk.bf16.gmra.mxu1 %vm432_vm1, %v2155_v27 }
 0x3ac   :  { %v4222_v25 = vmax.f32 %v4094_v43, 0.0  ;;  %9748 = vmatmul.msk.bf16.gmra.mxu2 %vm432_vm1, %v3335_v57  ;;  %v677_v57 = vld [vmem:[#allocation2 + $0x3a7] sm:$0xff]  ;;  %v12150_v43 = vadd.f32 %v12008_v0, %v298_v10  ;;  %v12160_v0 = vpop.f32.mrf.mxu3 }
 0x3ad   :  { %v2156_v34 = vpack.c.bf16 %v678_v2, %v677_v57  ;;  %13549 = vst [vmem:[#allocation26_spill] sm:$0xff] %v12160_v0  ;;  %v679_v2 = vld [vmem:[#allocation2 + $0x3b7] sm:$0xff] }
 0x3ae   :  { %4351 = vst.msk [vmem:[#allocation2 + $0x310] sm:$0xff] %vm4253_vm7, %v4222_v25  ;;  %v2686_v18 = vpop.f32.mrf.mxu0 }
 0x3af   :  { %v3793_v37 = vpop.f32.mrf.mxu2  ;;  %556 = vst.msk [vmem:[#allocation2 + $0x3e0] sm:$0xff] %vm432_vm1, %v12150_v43 }
 0x3b0   :  { %v3966_v50 = vadd.f32 %v3793_v37, %v3204_v63  ;;  %v3205_v7 = vpop.f32.mrf.mxu1  ;;  %v937_v63 = vadd.s32 952, %v10315_v21 }
 0x3b1   :  { %v3206_v30 = vadd.f32 %v3205_v7, %v2681_v56  ;;  %v808_v7 = vld [vmem:[#allocation2 + $0x3c1] sm:$0xff] }
 0x3b2   :  { %v4095_v3 = vadd.f32 %v11801_v15, %v3966_v50  ;;  %v1065_v14 = vand.u32 63, %v937_v63 }
 0x3b4   :  { %v4223_v12 = vmax.f32 %v4095_v3, 0.0  ;;  %vm12163_vm3 = vcmp.eq.s32.totalorder %v1065_v14, 63 }
 0x3b5   :  { %v2089_v10 = vsel %vm12163_vm3, 0.0, %v808_v7 }
 0x3b6   :  { %4352 = vst.msk [vmem:[#allocation2 + $0x318] sm:$0xff] %vm4253_vm7, %v4223_v12  ;;  %v2689_v5 = vpop.f32.mrf.mxu0  ;;  %v4799_v12 = vld [vmem:[#allocation2 + $0x308] ss:$2 sm:$0xff] }
 0x3b7   :  { %v3795_v38 = vpop.f32.mrf.mxu2 }
 0x3b8   :  { %v3967_v27 = vadd.f32 %v3795_v38, %v3206_v30  ;;  %v3208_v41 = vpop.f32.mrf.mxu1  ;;  %v807_v30 = vld [vmem:[#allocation2 + $0x3b9] sm:$0xff] }
 0x3b9   :  { %9621 = vmatmul.msk.bf16.gmra.mxu0 %vm432_vm1, %v2222_v20  ;;  %v3209_v26 = vadd.f32 %v3208_v41, %v2684_v59  ;;  %v4927_v59 = vld [vmem:[#allocation2 + $0x309] ss:$2 sm:$0xff]  ;;  %v2223_v41 = vpack.c.bf16 %v12120_v35, %v12107_v47  ;;  %v3337_v14 = vpack.c.bf16 %v2089_v10, %v807_v30 }
 0x3ba   :  { %v4096_v25 = vadd.f32 %v11801_v15, %v3967_v27  ;;  %v5006_v20 = vmax.f32 %v4799_v12, %v4927_v59  ;;  %v681_v59 = vld [vmem:[#allocation2 + $0x3c7] sm:$0xff]  ;;  %v810_v30 = vld [vmem:[#allocation2 + $0x3d1] sm:$0xff] }
 0x3bb   :  { %9684 = vmatmul.msk.bf16.gmra.mxu1 %vm432_vm1, %v2156_v34 }
 0x3bc   :  { %v4224_v48 = vmax.f32 %v4096_v25, 0.0  ;;  %9749 = vmatmul.msk.bf16.gmra.mxu2 %vm432_vm1, %v3336_v8  ;;  %v2157_v8 = vpack.c.bf16 %v680_v52, %v679_v2  ;;  %v682_v52 = vld [vmem:[#allocation2 + $0x3cf] sm:$0xff] }
 0x3be   :  { %4353 = vst.msk [vmem:[#allocation2 + $0x320] sm:$0xff] %vm4253_vm7, %v4224_v48  ;;  %v2691_v1 = vpop.f32.mrf.mxu0 }
 0x3bf   :  { %v3798_v56 = vpop.f32.mrf.mxu2 }
 0x3c0   :  { %v3968_v24 = vadd.f32 %v3798_v56, %v3209_v26  ;;  %v3210_v37 = vpop.f32.mrf.mxu1  ;;  %v938_v56 = vadd.s32 960, %v10315_v21 }
 0x3c1   :  { %v3211_v38 = vadd.f32 %v3210_v37, %v2686_v18 }
 0x3c2   :  { %v4097_v50 = vadd.f32 %v11801_v15, %v3968_v24  ;;  %v12173_v24 = vpop.f32.mrf.mxu3  ;;  %v1066_v47 = vand.u32 63, %v938_v56 }
 0x3c3   :  { %13552 = vst [vmem:[#allocation27_spill] sm:$0xff] %v12173_v24 }
 0x3c4   :  { %v4225_v57 = vmax.f32 %v4097_v50, 0.0  ;;  %vm1194_vm4 = vcmp.eq.s32.totalorder %v1066_v47, 0  ;;  %v5153_v47 = vld [vmem:[#allocation2 + $0x1b] ss:$2 sm:$0xff] }
 0x3c5   :  { %v4801_v54 = vld [vmem:[#allocation2 + $0x318] ss:$2 sm:$0xff]  ;;  %v4929_v33 = vld [vmem:[#allocation2 + $0x319] ss:$2 sm:$0xff] }
 0x3c6   :  { %4354 = vst.msk [vmem:[#allocation2 + $0x328] sm:$0xff] %vm4253_vm7, %v4225_v57  ;;  %v5007_v34 = vmax.f32 %v4801_v54, %v4929_v33  ;;  %v2694_v63 = vpop.f32.mrf.mxu0  ;;  %v1578_v54 = vsel %vm1194_vm4, 0.0, %v681_v59  ;;  %v809_v33 = vld [vmem:[#allocation2 + $0x3c9] sm:$0xff] }
 0x3c7   :  { %v3800_v27 = vpop.f32.mrf.mxu2 }
 0x3c8   :  { %v3969_v25 = vadd.f32 %v3800_v27, %v3211_v38  ;;  %v3213_v48 = vpop.f32.mrf.mxu1  ;;  %v5976_v26 = vpack.c.bf16 %v5007_v34, %v5006_v20  ;;  %v2224_v38 = vpack.c.bf16 %v12150_v43, %v12137_v61  ;;  %v2158_v20 = vpack.c.bf16 %v682_v52, %v1578_v54 }
 0x3c9   :  { %9622 = vmatmul.msk.bf16.gmra.mxu0 %vm432_vm1, %v2223_v41  ;;  %v3214_v35 = vadd.f32 %v3213_v48, %v2689_v5 }
 0x3ca   :  { %v4098_v50 = vadd.f32 %v11801_v15, %v3969_v25  ;;  %9785 = vmatmul.msk.bf16.gmra.mxu3 %vm4253_vm7, %v5976_v26  ;;  %v12195_v61 = vpop.f32.mrf.mxu3 }
 0x3cb   :  { %9685 = vmatmul.msk.bf16.gmra.mxu1 %vm432_vm1, %v2157_v8  ;;  %v3338_v8 = vpack.c.bf16 %v810_v30, %v809_v33  ;;  %13553 = vst [vmem:[#allocation28_spill] sm:$0xff] %v12195_v61  ;;  %v812_v33 = vld [vmem:[#allocation2 + $0x3e1] sm:$0xff] }
 0x3cc   :  { %v4226_v18 = vmax.f32 %v4098_v50, 0.0  ;;  %9750 = vmatmul.msk.bf16.gmra.mxu2 %vm432_vm1, %v3337_v14 }
 0x3ce   :  { %4355 = vst.msk [vmem:[#allocation2 + $0x330] sm:$0xff] %vm4253_vm7, %v4226_v18  ;;  %v2696_v3 = vpop.f32.mrf.mxu0  ;;  %v5023_v18 = vld [vmem:[#allocation2 + $0xa] ss:$2 sm:$0xff] }
 0x3cf   :  { %v3803_v37 = vpop.f32.mrf.mxu2 }
 0x3d0   :  { %v3970_v7 = vadd.f32 %v3803_v37, %v3214_v35  ;;  %v3215_v12 = vpop.f32.mrf.mxu1  ;;  %v5025_v35 = vld [vmem:[#allocation2 + $0x1a] ss:$2 sm:$0xff] }
 0x3d1   :  { %v3216_v5 = vadd.f32 %v3215_v12, %v2691_v1  ;;  %v5151_v12 = vld [vmem:[#allocation2 + $0xb] ss:$2 sm:$0xff]  ;;  %v5279_v30 = vmax.f32 %v5025_v35, %v5153_v47  ;;  %v5029_v47 = vld [vmem:[#allocation2 + $0x3a] ss:$2 sm:$0xff] }
 0x3d2   :  { %v4099_v57 = vadd.f32 %v11801_v15, %v3970_v7  ;;  %v12188_v15 = vld [vmem:[%s13474_s1 + $0x2] ss:$0 sm:$0xff] }
 0x3d4   :  { %v4227_v2 = vmax.f32 %v4099_v57, 0.0  ;;  %v684_v57 = vld [vmem:[#allocation2 + $0x3df] sm:$0xff] }
 0x3d5   :  { %v4803_v37 = vld [vmem:[#allocation2 + $0x328] ss:$2 sm:$0xff]  ;;  %v4931_v7 = vld [vmem:[#allocation2 + $0x329] ss:$2 sm:$0xff] }
 0x3d6   :  { %4356 = vst.msk [vmem:[#allocation2 + $0x338] sm:$0xff] %vm4253_vm7, %v4227_v2  ;;  %v2699_v27 = vpop.f32.mrf.mxu0  ;;  %v811_v2 = vld [vmem:[#allocation2 + $0x3d9] sm:$0xff] }
 0x3d7   :  { %v3805_v10 = vpop.f32.mrf.mxu2 }
 0x3d8   :  { %v3971_v34 = vadd.f32 %v3805_v10, %v3216_v5  ;;  %v3218_v41 = vpop.f32.mrf.mxu1  ;;  %v5008_v10 = vmax.f32 %v4803_v37, %v4931_v7  ;;  %v5157_v37 = vld [vmem:[#allocation2 + $0x3b] ss:$2 sm:$0xff] }
 0x3d9   :  { %9623 = vmatmul.msk.bf16.gmra.mxu0 %vm432_vm1, %v2224_v38  ;;  %v3219_v48 = vadd.f32 %v3218_v41, %v2694_v63  ;;  %v683_v63 = vld [vmem:[#allocation2 + $0x3d7] sm:$0xff]  ;;  %v5278_v41 = vmax.f32 %v5023_v18, %v5151_v12 }
 0x3da   :  { %v4100_v25 = vadd.f32 %v12188_v15, %v3971_v34  ;;  %v2159_v34 = vpack.c.bf16 %v684_v57, %v683_v63 }
 0x3db   :  { %9686 = vmatmul.msk.bf16.gmra.mxu1 %vm432_vm1, %v2158_v20 }
 0x3dc   :  { %v4228_v1 = vmax.f32 %v4100_v25, 0.0  ;;  %9751 = vmatmul.msk.bf16.gmra.mxu2 %vm432_vm1, %v3338_v8 }
 0x3de   :  { %4357 = vst.msk [vmem:[#allocation2 + $0x340] sm:$0xff] %vm4253_vm7, %v4228_v1  ;;  %v2701_v14 = vpop.f32.mrf.mxu0 }
 0x3df   :  { %v3808_v43 = vpop.f32.mrf.mxu2 }
 0x3e0   :  { %v3972_v26 = vadd.f32 %v3808_v43, %v3219_v48  ;;  %v3220_v56 = vpop.f32.mrf.mxu1  ;;  %v3339_v43 = vpack.c.bf16 %v812_v33, %v811_v2  ;;  %v5281_v2 = vmax.f32 %v5029_v47, %v5157_v37  ;;  %v5155_v33 = vld [vmem:[#allocation2 + $0x2b] ss:$2 sm:$0xff] }
 0x3e1   :  { %v3221_v5 = vadd.f32 %v3220_v56, %v2696_v3  ;;  %v12206_v3 = vadd.s32 24, %v10315_v21 }
 0x3e2   :  { %v4101_v50 = vadd.f32 %v12188_v15, %v3972_v26  ;;  %v6529_v26 = vpack.c.bf16 %v5279_v30, %v5278_v41  ;;  %v813_v30 = vld [vmem:[#allocation2 + $0x3e9] sm:$0xff] }
 0x3e3   :  { %13555 = vst [vmem:[#allocation30_spill] sm:$0xff] %v12206_v3  ;;  %v5345_v7 = vand.u32 31, %v12206_v3 }
 0x3e4   :  { %v4229_v59 = vmax.f32 %v4101_v50, 0.0  ;;  %v12199_v50 = vpop.f32.mrf.mxu3 }
 0x3e5   :  { %v4805_v52 = vld [vmem:[#allocation2 + $0x338] ss:$2 sm:$0xff]  ;;  %v4933_v54 = vld [vmem:[#allocation2 + $0x339] ss:$2 sm:$0xff]  ;;  %13554 = vst [vmem:[#allocation29_spill] sm:$0xff] %v12199_v50  ;;  %vm5665_vm5 = vcmp.eq.s32.totalorder %v5345_v7, 31 }
 0x3e6   :  { %4358 = vst.msk [vmem:[#allocation2 + $0x348] sm:$0xff] %vm4253_vm7, %v4229_v59  ;;  %v5009_v38 = vmax.f32 %v4805_v52, %v4933_v54  ;;  %v2704_v25 = vpop.f32.mrf.mxu0  ;;  %v5027_v52 = vld [vmem:[#allocation2 + $0x2a] ss:$2 sm:$0xff] }
 0x3e7   :  { %v3810_v20 = vpop.f32.mrf.mxu2  ;;  %v5280_v41 = vmax.f32 %v5027_v52, %v5155_v33  ;;  %v816_v52 = vld [vmem:[#allocation2 + $0x401] sm:$0xff] }
 0x3e8   :  { %v3973_v8 = vadd.f32 %v3810_v20, %v3221_v5  ;;  %v3223_v1 = vpop.f32.mrf.mxu1  ;;  %v5977_v48 = vpack.c.bf16 %v5009_v38, %v5008_v10  ;;  %v814_v5 = vld [vmem:[#allocation2 + $0x3f1] sm:$0xff]  ;;  %v5857_v38 = vsel %vm5665_vm5, 0.0, %v5281_v2 }
 0x3e9   :  { %9835 = vmatmul.msk.bf16.vlgmr.msrb.gmra.mxu0 %vm4253_vm7, %v6529_v26  ;;  %v3224_v18 = vadd.f32 %v3223_v1, %v2699_v27  ;;  %v686_v27 = vld [vmem:[#allocation2 + $0x3ef] sm:$0xff]  ;;  %v6530_v26 = vpack.c.bf16 %v5857_v38, %v5280_v41  ;;  %v688_v38 = vld [vmem:[#allocation2 + $0x3ff] sm:$0xff] }
 0x3ea   :  { %v4102_v61 = vadd.f32 %v12188_v15, %v3973_v8  ;;  %9786 = vmatmul.msk.bf16.gmra.mxu3 %vm4253_vm7, %v5977_v48 }
 0x3eb   :  { %9687 = vmatmul.msk.bf16.gmra.mxu1 %vm432_vm1, %v2159_v34 }
 0x3ec   :  { %v4230_v56 = vmax.f32 %v4102_v61, 0.0  ;;  %9752 = vmatmul.msk.bf16.gmra.mxu2 %vm432_vm1, %v3339_v43  ;;  %v685_v61 = vld [vmem:[#allocation2 + $0x3e7] sm:$0xff]  ;;  %v3340_v43 = vpack.c.bf16 %v814_v5, %v813_v30 }
 0x3ed   :  { %v2160_v34 = vpack.c.bf16 %v686_v27, %v685_v61  ;;  %v5033_v61 = vld [vmem:[#allocation2 + $0x5a] ss:$2 sm:$0xff]  ;;  %v5161_v27 = vld [vmem:[#allocation2 + $0x5b] ss:$2 sm:$0xff]  ;;  %v5031_v30 = vld [vmem:[#allocation2 + $0x4a] ss:$2 sm:$0xff] }
 0x3ee   :  { %4359 = vst.msk [vmem:[#allocation2 + $0x350] sm:$0xff] %vm4253_vm7, %v4230_v56  ;;  %v2706_v59 = vpop.f32.mrf.mxu0 }
 0x3ef   :  { %v3813_v35 = vpop.f32.mrf.mxu2 }
 0x3f0   :  { %v3974_v12 = vadd.f32 %v3813_v35, %v3224_v18  ;;  %v3225_v63 = vpop.f32.mrf.mxu1  ;;  %v945_v18 = vadd.s32 1016, %v10315_v21  ;;  %v12215_v35 = vpop.f32.mrf.mxu3 }
 0x3f1   :  { %v3226_v10 = vadd.f32 %v3225_v63, %v2701_v14  ;;  %13556 = vst [vmem:[#allocation31_spill] sm:$0xff] %v12215_v35 }
 0x3f2   :  { %v4103_v57 = vadd.f32 %v12188_v15, %v3974_v12  ;;  %v1073_v37 = vand.u32 63, %v945_v18 }
 0x3f4   :  { %v4231_v54 = vmax.f32 %v4103_v57, 0.0  ;;  %vm12222_vm6 = vcmp.eq.s32.totalorder %v1073_v37, 63 }
 0x3f5   :  { %v4807_v33 = vld [vmem:[#allocation2 + $0x348] ss:$2 sm:$0xff] }
 0x3f6   :  { %4360 = vst.msk [vmem:[#allocation2 + $0x358] sm:$0xff] %vm4253_vm7, %v4231_v54  ;;  %v2709_v1 = vpop.f32.mrf.mxu0 }
 0x3f7   :  { %v3815_v20 = vpop.f32.mrf.mxu2 }
 0x3f8   :  { %v3975_v8 = vadd.f32 %v3815_v20, %v3226_v10  ;;  %v3228_v48 = vpop.f32.mrf.mxu1  ;;  %v687_v10 = vld [vmem:[#allocation2 + $0x3f7] sm:$0xff] }
 0x3f9   :  { %9836 = vmatmul.msk.bf16.gmra.mxu0 %vm4253_vm7, %v6530_v26  ;;  %v3229_v47 = vadd.f32 %v3228_v48, %v2704_v25  ;;  %v4935_v25 = vld [vmem:[#allocation2 + $0x349] ss:$2 sm:$0xff]  ;;  %v815_v48 = vld [vmem:[#allocation2 + $0x3f9] sm:$0xff]  ;;  %v5283_v26 = vmax.f32 %v5033_v61, %v5161_v27  ;;  %v2161_v37 = vpack.c.bf16 %v688_v38, %v687_v10 }
 0x3fa   :  { %v4104_v56 = vadd.f32 %v12188_v15, %v3975_v8  ;;  %v5159_v20 = vld [vmem:[#allocation2 + $0x4b] ss:$2 sm:$0xff]  ;;  %v5010_v18 = vmax.f32 %v4807_v33, %v4935_v25  ;;  %v5037_v61 = vld [vmem:[#allocation2 + $0x7a] ss:$2 sm:$0xff]  ;;  %v5165_v27 = vld [vmem:[#allocation2 + $0x7b] ss:$2 sm:$0xff] }
 0x3fb   :  { %9688 = vmatmul.msk.bf16.gmra.mxu1 %vm432_vm1, %v2160_v34  ;;  %v12226_v34 = vpop.f32.mrf.mxu3  ;;  %v5349_v33 = vand.u32 31, %v10398_v23  ;;  %v5285_v10 = vmax.f32 %v5037_v61, %v5165_v27 }
 0x3fc   :  { %v4232_v14 = vmax.f32 %v4104_v56, 0.0  ;;  %9753 = vmatmul.msk.bf16.gmra.mxu2 %vm432_vm1, %v3340_v43  ;;  %13559 = vst [vmem:[#allocation32_spill] sm:$0xff] %v12226_v34  ;;  %v2097_v43 = vsel %vm12222_vm6, 0.0, %v816_v52 }
 0x3fd   :  { %v3341_v34 = vpack.c.bf16 %v2097_v43, %v815_v48  ;;  %vm5669_vm8 = vcmp.eq.s32.totalorder %v5349_v33, 31 }
 0x3fe   :  { %4361 = vst.msk [vmem:[#allocation2 + $0x360] sm:$0xff] %vm4253_vm7, %v4232_v14  ;;  %v2711_v63 = vpop.f32.mrf.mxu0  ;;  %v5861_v38 = vsel %vm5669_vm8, 0.0, %v5285_v10  ;;  %vm7028_vm8 = vcmask 261120  }
 0x3ff   :  { %v3818_v7 = vpop.f32.mrf.mxu2 }
 0x400   :  { %v3976_v12 = vadd.f32 %v3818_v7, %v3229_v47  ;;  %v3230_v57 = vpop.f32.mrf.mxu1  ;;  %v5282_v7 = vmax.f32 %v5031_v30, %v5159_v20 }
 0x401   :  { %v3231_v56 = vadd.f32 %v3230_v57, %v2706_v59 }
 0x402   :  { %v4105_v2 = vadd.f32 %v12188_v15, %v3976_v12  ;;  %v6531_v50 = vpack.c.bf16 %v5283_v26, %v5282_v7 }
 0x403   :  { %v12236_v52 = vpop.f32.mrf.mxu3 }
 0x404   :  { %v4233_v5 = vmax.f32 %v4105_v2, 0.0  ;;  %13560 = vst [vmem:[#allocation33_spill] sm:$0xff] %v12236_v52  ;;  %v4415_v52 = vld [vmem:[#allocation2 + $0x106] ss:$2 sm:$0xff] }
 0x405   :  { %v4809_v41 = vld [vmem:[#allocation2 + $0x358] ss:$2 sm:$0xff]  ;;  %v4937_v8 = vld [vmem:[#allocation2 + $0x359] ss:$2 sm:$0xff] }
 0x406   :  { %4362 = vst.msk [vmem:[#allocation2 + $0x368] sm:$0xff] %vm4253_vm7, %v4233_v5  ;;  %v5011_v14 = vmax.f32 %v4809_v41, %v4937_v8  ;;  %v2714_v2 = vpop.f32.mrf.mxu0 }
 0x407   :  { %v3820_v47 = vpop.f32.mrf.mxu2 }
 0x408   :  { %v3977_v12 = vadd.f32 %v3820_v47, %v3231_v56  ;;  %v3233_v3 = vpop.f32.mrf.mxu1  ;;  %v5978_v35 = vpack.c.bf16 %v5011_v14, %v5010_v18 }
 0x409   :  { %9837 = vmatmul.msk.bf16.gmra.mxu0 %vm4253_vm7, %v6531_v50  ;;  %v3234_v57 = vadd.f32 %v3233_v3, %v2709_v1  ;;  %v5035_v50 = vld [vmem:[#allocation2 + $0x6a] ss:$2 sm:$0xff]  ;;  %v5163_v3 = vld [vmem:[#allocation2 + $0x6b] ss:$2 sm:$0xff] }
 0x40a   :  { %v4106_v24 = vadd.f32 %v12188_v15, %v3977_v12  ;;  %9787 = vmatmul.msk.bf16.gmra.mxu3 %vm4253_vm7, %v5978_v35  ;;  %v5284_v41 = vmax.f32 %v5035_v50, %v5163_v3 }
 0x40b   :  { %9689 = vmatmul.msk.bf16.gmra.mxu1 %vm432_vm1, %v2161_v37  ;;  %v12242_v20 = vpop.f32.mrf.mxu3 }
 0x40c   :  { %v4234_v59 = vmax.f32 %v4106_v24, 0.0  ;;  %9754 = vmatmul.msk.bf16.gmra.mxu2 %vm432_vm1, %v3341_v34  ;;  %13561 = vst [vmem:[#allocation34_spill] sm:$0xff] %v12242_v20  ;;  %v6532_v26 = vpack.c.bf16 %v5861_v38, %v5284_v41 }
 0x40e   :  { %4363 = vst.msk [vmem:[#allocation2 + $0x370] sm:$0xff] %vm4253_vm7, %v4234_v59  ;;  %v2716_v30 = vpop.f32.mrf.mxu0 }
 0x40f   :  { %v3823_v54 = vpop.f32.mrf.mxu2 }
 0x410   :  { %v3978_v25 = vadd.f32 %v3823_v54, %v3234_v57  ;;  %v3235_v35 = vpop.f32.mrf.mxu1  ;;  %v5041_v57 = vld [vmem:[#allocation2 + $0x9a] ss:$2 sm:$0xff]  ;;  %v5169_v54 = vld [vmem:[#allocation2 + $0x9b] ss:$2 sm:$0xff] }
 0x411   :  { %v3236_v1 = vadd.f32 %v3235_v35, %v2711_v63  ;;  %v5167_v35 = vld [vmem:[#allocation2 + $0x8b] ss:$2 sm:$0xff] }
 0x412   :  { %v4107_v5 = vadd.f32 %v12188_v15, %v3978_v25  ;;  %v5039_v25 = vld [vmem:[#allocation2 + $0x8a] ss:$2 sm:$0xff] }
 0x413   :  { %v12247_v47 = vpop.f32.mrf.mxu3  ;;  %v5286_v38 = vmax.f32 %v5039_v25, %v5167_v35 }
 0x414   :  { %v4235_v24 = vmax.f32 %v4107_v5, 0.0  ;;  %13562 = vst [vmem:[#allocation35_spill] sm:$0xff] %v12247_v47 }
 0x415   :  { %v4811_v61 = vld [vmem:[#allocation2 + $0x368] ss:$2 sm:$0xff]  ;;  %v4939_v27 = vld [vmem:[#allocation2 + $0x369] ss:$2 sm:$0xff] }
 0x416   :  { %4364 = vst.msk [vmem:[#allocation2 + $0x378] sm:$0xff] %vm4253_vm7, %v4235_v24  ;;  %v2719_v48 = vpop.f32.mrf.mxu0  ;;  %v5012_v50 = vmax.f32 %v4811_v61, %v4939_v27 }
 0x417   :  { %v3825_v34 = vpop.f32.mrf.mxu2 }
 0x418   :  { %v3979_v8 = vadd.f32 %v3825_v34, %v3236_v1  ;;  %v3238_v43 = vpop.f32.mrf.mxu1 }
 0x419   :  { %9838 = vmatmul.msk.bf16.gmra.mxu0 %vm4253_vm7, %v6532_v26  ;;  %v3239_v14 = vadd.f32 %v3238_v43, %v2714_v2  ;;  %v5287_v2 = vmax.f32 %v5041_v57, %v5169_v54 }
 0x41a   :  { %v4108_v56 = vadd.f32 %v12188_v15, %v3979_v8 }
 0x41b   :  { %v12251_v26 = vpop.f32.mrf.mxu3 }
 0x41c   :  { %v4236_v18 = vmax.f32 %v4108_v56, 0.0  ;;  %13563 = vst [vmem:[#allocation36_spill] sm:$0xff] %v12251_v26  ;;  %v6533_v56 = vpack.c.bf16 %v5287_v2, %v5286_v38  ;;  %v5171_v2 = vld [vmem:[#allocation2 + $0xab] ss:$2 sm:$0xff] }
 0x41e   :  { %4365 = vst.msk [vmem:[#allocation2 + $0x380] sm:$0xff] %vm4253_vm7, %v4236_v18  ;;  %v2721_v7 = vpop.f32.mrf.mxu0 }
 0x41f   :  { %v3828_v63 = vpop.f32.mrf.mxu2 }
 0x420   :  { %v3980_v37 = vadd.f32 %v3828_v63, %v3239_v14  ;;  %v3240_v12 = vpop.f32.mrf.mxu1  ;;  %v12257_v14 = vadd.s32 88, %v10315_v21 }
 0x421   :  { %v3241_v24 = vadd.f32 %v3240_v12, %v2716_v30  ;;  %v5045_v12 = vld [vmem:[#allocation2 + $0xba] ss:$2 sm:$0xff] }
 0x422   :  { %v4109_v59 = vadd.f32 %v12188_v15, %v3980_v37  ;;  %13564 = vst [vmem:[#allocation37_spill] sm:$0xff] %v12257_v14  ;;  %v5353_v57 = vand.u32 31, %v12257_v14 }
 0x424   :  { %v4237_v33 = vmax.f32 %v4109_v59, 0.0  ;;  %v5173_v59 = vld [vmem:[#allocation2 + $0xbb] ss:$2 sm:$0xff]  ;;  %vm5673_vm1 = vcmp.eq.s32.totalorder %v5353_v57, 31  ;;  %v5049_v57 = vld [vmem:[#allocation2 + $0xda] ss:$2 sm:$0xff] }
 0x425   :  { %v4813_v5 = vld [vmem:[#allocation2 + $0x378] ss:$2 sm:$0xff]  ;;  %v4941_v10 = vld [vmem:[#allocation2 + $0x379] ss:$2 sm:$0xff]  ;;  %v5289_v35 = vmax.f32 %v5045_v12, %v5173_v59 }
 0x426   :  { %4366 = vst.msk [vmem:[#allocation2 + $0x388] sm:$0xff] %vm4253_vm7, %v4237_v33  ;;  %v5013_v3 = vmax.f32 %v4813_v5, %v4941_v10  ;;  %v2724_v41 = vpop.f32.mrf.mxu0  ;;  %v12261_v33 = vpop.f32.mrf.mxu3  ;;  %v5043_v10 = vld [vmem:[#allocation2 + $0xaa] ss:$2 sm:$0xff] }
 0x427   :  { %v3830_v1 = vpop.f32.mrf.mxu2  ;;  %13565 = vst [vmem:[#allocation38_spill] sm:$0xff] %v12261_v33 }
 0x428   :  { %v3981_v34 = vadd.f32 %v3830_v1, %v3241_v24  ;;  %v3243_v8 = vpop.f32.mrf.mxu1  ;;  %v5979_v43 = vpack.c.bf16 %v5013_v3, %v5012_v50  ;;  %v5865_v24 = vsel %vm5673_vm1, 0.0, %v5289_v35  ;;  %v5288_v3 = vmax.f32 %v5043_v10, %v5171_v2  ;;  %v5047_v10 = vld [vmem:[#allocation2 + $0xca] ss:$2 sm:$0xff]  ;;  %v5175_v2 = vld [vmem:[#allocation2 + $0xcb] ss:$2 sm:$0xff] }
 0x429   :  { %9839 = vmatmul.msk.bf16.gmra.mxu0 %vm4253_vm7, %v6533_v56  ;;  %v3244_v63 = vadd.f32 %v3243_v8, %v2719_v48 }
 0x42a   :  { %v4110_v18 = vadd.f32 %v12188_v15, %v3981_v34  ;;  %9788 = vmatmul.msk.bf16.gmra.mxu3 %vm4253_vm7, %v5979_v43  ;;  %v6534_v8 = vpack.c.bf16 %v5865_v24, %v5288_v3 }
 0x42c   :  { %v4238_v30 = vmax.f32 %v4110_v18, 0.0 }
 0x42e   :  { %4367 = vst.msk [vmem:[#allocation2 + $0x390] sm:$0xff] %vm4253_vm7, %v4238_v30  ;;  %v2726_v61 = vpop.f32.mrf.mxu0  ;;  %v12266_v56 = vpop.f32.mrf.mxu3 }
 0x42f   :  { %v3833_v37 = vpop.f32.mrf.mxu2  ;;  %13566 = vst [vmem:[#allocation39_spill] sm:$0xff] %v12266_v56 }
 0x430   :  { %v3982_v54 = vadd.f32 %v3833_v37, %v3244_v63  ;;  %v3245_v27 = vpop.f32.mrf.mxu1 }
 0x431   :  { %v3246_v48 = vadd.f32 %v3245_v27, %v2721_v7 }
 0x432   :  { %v4111_v25 = vadd.f32 %v12188_v15, %v3982_v54  ;;  %v5177_v54 = vld [vmem:[#allocation2 + $0xdb] ss:$2 sm:$0xff] }
 0x434   :  { %v4239_v5 = vmax.f32 %v4111_v25, 0.0 }
 0x435   :  { %v4815_v25 = vld [vmem:[#allocation2 + $0x388] ss:$2 sm:$0xff]  ;;  %v4943_v35 = vld [vmem:[#allocation2 + $0x389] ss:$2 sm:$0xff] }
 0x436   :  { %4368 = vst.msk [vmem:[#allocation2 + $0x398] sm:$0xff] %vm4253_vm7, %v4239_v5  ;;  %v2729_v38 = vpop.f32.mrf.mxu0  ;;  %v12271_v27 = vpop.f32.mrf.mxu3  ;;  %v5014_v3 = vmax.f32 %v4815_v25, %v4943_v35  ;;  %v5181_v25 = vld [vmem:[#allocation2 + $0xfb] ss:$2 sm:$0xff]  ;;  %v5357_v35 = vand.u32 31, %v10468_v19 }
 0x437   :  { %v3835_v50 = vpop.f32.mrf.mxu2  ;;  %13567 = vst [vmem:[#allocation40_spill] sm:$0xff] %v12271_v27  ;;  %v4399_v27 = vld [vmem:[#allocation2 + $0x86] ss:$2 sm:$0xff] }
 0x438   :  { %v3983_v1 = vadd.f32 %v3835_v50, %v3246_v48  ;;  %v3248_v34 = vpop.f32.mrf.mxu1  ;;  %vm5677_vm9 = vcmp.eq.s32.totalorder %v5357_v35, 31 }
 0x439   :  { %9840 = vmatmul.msk.bf16.gmra.mxu0 %vm4253_vm7, %v6534_v8  ;;  %v3249_v30 = vadd.f32 %v3248_v34, %v2724_v41  ;;  %v5291_v41 = vmax.f32 %v5049_v57, %v5177_v54  ;;  %v5290_v8 = vmax.f32 %v5047_v10, %v5175_v2 }
 0x43a   :  { %v4112_v43 = vadd.f32 %v12188_v15, %v3983_v1 }
 0x43c   :  { %v4240_v18 = vmax.f32 %v4112_v43, 0.0 }
 0x43e   :  { %4369 = vst.msk [vmem:[#allocation2 + $0x3a0] sm:$0xff] %vm4253_vm7, %v4240_v18  ;;  %v2731_v7 = vpop.f32.mrf.mxu0  ;;  %v12277_v54 = vpop.f32.mrf.mxu3 }
 0x43f   :  { %v3838_v63 = vpop.f32.mrf.mxu2  ;;  %13568 = vst [vmem:[#allocation41_spill] sm:$0xff] %v12277_v54 }
 0x440   :  { %v3984_v37 = vadd.f32 %v3838_v63, %v3249_v30  ;;  %v3250_v12 = vpop.f32.mrf.mxu1 }
 0x441   :  { %v3251_v50 = vadd.f32 %v3250_v12, %v2726_v61  ;;  %v5053_v12 = vld [vmem:[#allocation2 + $0xfa] ss:$2 sm:$0xff] }
 0x442   :  { %v4113_v59 = vadd.f32 %v12188_v15, %v3984_v37  ;;  %v6535_v37 = vpack.c.bf16 %v5291_v41, %v5290_v8 }
 0x444   :  { %v4241_v5 = vmax.f32 %v4113_v59, 0.0 }
 0x445   :  { %v4817_v48 = vld [vmem:[#allocation2 + $0x398] ss:$2 sm:$0xff]  ;;  %v4945_v24 = vld [vmem:[#allocation2 + $0x399] ss:$2 sm:$0xff] }
 0x446   :  { %4370 = vst.msk [vmem:[#allocation2 + $0x3a8] sm:$0xff] %vm4253_vm7, %v4241_v5  ;;  %v5015_v1 = vmax.f32 %v4817_v48, %v4945_v24  ;;  %v2734_v18 = vpop.f32.mrf.mxu0  ;;  %v5293_v24 = vmax.f32 %v5053_v12, %v5181_v25 }
 0x447   :  { %v3840_v34 = vpop.f32.mrf.mxu2 }
 0x448   :  { %v3985_v43 = vadd.f32 %v3840_v34, %v3251_v50  ;;  %v3253_v30 = vpop.f32.mrf.mxu1  ;;  %v5980_v63 = vpack.c.bf16 %v5015_v1, %v5014_v3  ;;  %v5051_v50 = vld [vmem:[#allocation2 + $0xea] ss:$2 sm:$0xff]  ;;  %v5869_v1 = vsel %vm5677_vm9, 0.0, %v5293_v24  ;;  %v5185_v24 = vld [vmem:[#allocation2 + $0x11b] ss:$2 sm:$0xff] }
 0x449   :  { %9841 = vmatmul.msk.bf16.gmra.mxu0 %vm4253_vm7, %v6535_v37  ;;  %v3254_v57 = vadd.f32 %v3253_v30, %v2729_v38  ;;  %v12282_v38 = vpop.f32.mrf.mxu3 }
 0x44a   :  { %v4114_v14 = vadd.f32 %v12188_v15, %v3985_v43  ;;  %9789 = vmatmul.msk.bf16.gmra.mxu3 %vm4253_vm7, %v5980_v63  ;;  %13569 = vst [vmem:[#allocation42_spill] sm:$0xff] %v12282_v38 }
 0x44c   :  { %v4242_v59 = vmax.f32 %v4114_v14, 0.0  ;;  %v5179_v14 = vld [vmem:[#allocation2 + $0xeb] ss:$2 sm:$0xff] }
 0x44d   :  { %v5292_v8 = vmax.f32 %v5051_v50, %v5179_v14 }
 0x44e   :  { %4371 = vst.msk [vmem:[#allocation2 + $0x3b0] sm:$0xff] %vm4253_vm7, %v4242_v59  ;;  %v2736_v10 = vpop.f32.mrf.mxu0 }
 0x44f   :  { %v3843_v61 = vpop.f32.mrf.mxu2  ;;  %v6536_v37 = vpack.c.bf16 %v5869_v1, %v5292_v8  ;;  %v5183_v1 = vld [vmem:[#allocation2 + $0x10b] ss:$2 sm:$0xff] }
 0x450   :  { %v3986_v5 = vadd.f32 %v3843_v61, %v3254_v57  ;;  %v3255_v2 = vpop.f32.mrf.mxu1 }
 0x451   :  { %v3256_v3 = vadd.f32 %v3255_v2, %v2731_v7  ;;  %v12288_v12 = vpop.f32.mrf.mxu3 }
 0x452   :  { %v4115_v48 = vadd.f32 %v12188_v15, %v3986_v5  ;;  %13570 = vst [vmem:[#allocation43_spill] sm:$0xff] %v12288_v12 }
 0x454   :  { %v4243_v41 = vmax.f32 %v4115_v48, 0.0  ;;  %v5057_v48 = vld [vmem:[#allocation2 + $0x11a] ss:$2 sm:$0xff] }
 0x455   :  { %v4947_v50 = vld [vmem:[#allocation2 + $0x3a9] ss:$2 sm:$0xff] }
 0x456   :  { %4372 = vst.msk [vmem:[#allocation2 + $0x3b8] sm:$0xff] %vm4253_vm7, %v4243_v41  ;;  %v2739_v30 = vpop.f32.mrf.mxu0  ;;  %v4819_v41 = vld [vmem:[#allocation2 + $0x3a8] ss:$2 sm:$0xff] }
 0x457   :  { %v3845_v34 = vpop.f32.mrf.mxu2 }
 0x458   :  { %v3987_v43 = vadd.f32 %v3845_v34, %v3256_v3  ;;  %v3258_v63 = vpop.f32.mrf.mxu1  ;;  %v5055_v3 = vld [vmem:[#allocation2 + $0x10a] ss:$2 sm:$0xff] }
 0x459   :  { %9842 = vmatmul.msk.bf16.gmra.mxu0 %vm4253_vm7, %v6536_v37  ;;  %v3259_v61 = vadd.f32 %v3258_v63, %v2734_v18  ;;  %v5295_v18 = vmax.f32 %v5057_v48, %v5185_v24  ;;  %v5016_v63 = vmax.f32 %v4819_v41, %v4947_v50  ;;  %v5061_v41 = vld [vmem:[#allocation2 + $0x13a] ss:$2 sm:$0xff]  ;;  %v5189_v50 = vld [vmem:[#allocation2 + $0x13b] ss:$2 sm:$0xff] }
 0x45a   :  { %v4116_v59 = vadd.f32 %v12188_v15, %v3987_v43 }
 0x45c   :  { %v4244_v57 = vmax.f32 %v4116_v59, 0.0  ;;  %v12292_v59 = vpop.f32.mrf.mxu3 }
 0x45d   :  { %13571 = vst [vmem:[#allocation44_spill] sm:$0xff] %v12292_v59 }
 0x45e   :  { %4373 = vst.msk [vmem:[#allocation2 + $0x3c0] sm:$0xff] %vm4253_vm7, %v4244_v57  ;;  %v2741_v7 = vpop.f32.mrf.mxu0 }
 0x45f   :  { %v3848_v25 = vpop.f32.mrf.mxu2 }
 0x460   :  { %v3988_v35 = vadd.f32 %v3848_v25, %v3259_v61  ;;  %v3260_v5 = vpop.f32.mrf.mxu1  ;;  %v5294_v61 = vmax.f32 %v5055_v3, %v5183_v1 }
 0x461   :  { %v3261_v43 = vadd.f32 %v3260_v5, %v2736_v10  ;;  %v12300_v10 = vadd.s32 152, %v10315_v21 }
 0x462   :  { %v4117_v2 = vadd.f32 %v12188_v15, %v3988_v35 }
 0x463   :  { %13572 = vst [vmem:[#allocation45_spill] sm:$0xff] %v12300_v10 }
 0x464   :  { %v4245_v14 = vmax.f32 %v4117_v2, 0.0  ;;  %v6537_v2 = vpack.c.bf16 %v5295_v18, %v5294_v61  ;;  %v5297_v18 = vmax.f32 %v5061_v41, %v5189_v50 }
 0x465   :  { %v4821_v34 = vld [vmem:[#allocation2 + $0x3b8] ss:$2 sm:$0xff]  ;;  %v4949_v8 = vld [vmem:[#allocation2 + $0x3b9] ss:$2 sm:$0xff] }
 0x466   :  { %4374 = vst.msk [vmem:[#allocation2 + $0x3c8] sm:$0xff] %vm4253_vm7, %v4245_v14  ;;  %v5017_v37 = vmax.f32 %v4821_v34, %v4949_v8  ;;  %v12294_v19 = vpop.f32.mrf.mxu0  ;;  %v5361_v14 = vand.u32 31, %v12300_v10  ;;  %v12306_v8 = vpop.f32.mrf.mxu3 }
 0x467   :  { %v3850_v57 = vpop.f32.mrf.mxu2  ;;  %13573 = vst [vmem:[#allocation46_spill] sm:$0xff] %v12306_v8 }
 0x468   :  { %v3989_v25 = vadd.f32 %v3850_v57, %v3261_v43  ;;  %v3263_v35 = vpop.f32.mrf.mxu1  ;;  %v5981_v23 = vpack.c.bf16 %v5017_v37, %v5016_v63  ;;  %vm5681_vm10 = vcmp.eq.s32.totalorder %v5361_v14, 31 }
 0x469   :  { %9843 = vmatmul.msk.bf16.gmra.mxu0 %vm4253_vm7, %v6537_v2  ;;  %v3264_v48 = vadd.f32 %v3263_v35, %v2739_v30  ;;  %v5187_v30 = vld [vmem:[#allocation2 + $0x12b] ss:$2 sm:$0xff]  ;;  %v5873_v37 = vsel %vm5681_vm10, 0.0, %v5297_v18  ;;  %v5065_v18 = vld [vmem:[#allocation2 + $0x15a] ss:$2 sm:$0xff] }
 0x46a   :  { %v4118_v12 = vadd.f32 %v12188_v15, %v3989_v25  ;;  %9790 = vmatmul.msk.bf16.gmra.mxu3 %vm4253_vm7, %v5981_v23 }
 0x46c   :  { %v4246_v5 = vmax.f32 %v4118_v12, 0.0  ;;  %v5059_v12 = vld [vmem:[#allocation2 + $0x12a] ss:$2 sm:$0xff] }
 0x46d   :  { %v5296_v61 = vmax.f32 %v5059_v12, %v5187_v30 }
 0x46e   :  { %4375 = vst.msk [vmem:[#allocation2 + $0x3d0] sm:$0xff] %vm4253_vm7, %v4246_v5  ;;  %v12304_v34 = vpop.f32.mrf.mxu0  ;;  %v12312_v5 = vpop.f32.mrf.mxu3 }
 0x46f   :  { %v3853_v24 = vpop.f32.mrf.mxu2  ;;  %13574 = vst [vmem:[#allocation47_spill] sm:$0xff] %v12312_v5 }
 0x470   :  { %v3990_v3 = vadd.f32 %v3853_v24, %v3264_v48  ;;  %v3265_v1 = vpop.f32.mrf.mxu1  ;;  %v6538_v48 = vpack.c.bf16 %v5873_v37, %v5296_v61  ;;  %v5191_v61 = vld [vmem:[#allocation2 + $0x14b] ss:$2 sm:$0xff] }
 0x471   :  { %v3266_v63 = vadd.f32 %v3265_v1, %v2741_v7 }
 0x472   :  { %v4119_v23 = vadd.f32 %v12188_v15, %v3990_v3 }
 0x474   :  { %v4247_v43 = vmax.f32 %v4119_v23, 0.0 }
 0x475   :  { %v4823_v30 = vld [vmem:[#allocation2 + $0x3c8] ss:$2 sm:$0xff] }
 0x476   :  { %4376 = vst.msk [vmem:[#allocation2 + $0x3d8] sm:$0xff] %vm4253_vm7, %v4247_v43  ;;  %v12310_v2 = vpop.f32.mrf.mxu0  ;;  %v5193_v43 = vld [vmem:[#allocation2 + $0x15b] ss:$2 sm:$0xff]  ;;  %v12321_v12 = vpop.f32.mrf.mxu3 }
 0x477   :  { %v3855_v57 = vpop.f32.mrf.mxu2  ;;  %13575 = vst [vmem:[#allocation48_spill] sm:$0xff] %v12321_v12 }
 0x478   :  { %v3991_v25 = vadd.f32 %v3855_v57, %v3266_v63  ;;  %v3268_v35 = vpop.f32.mrf.mxu1  ;;  %v4951_v63 = vld [vmem:[#allocation2 + $0x3c9] ss:$2 sm:$0xff]  ;;  %v5063_v57 = vld [vmem:[#allocation2 + $0x14a] ss:$2 sm:$0xff] }
 0x479   :  { %9844 = vmatmul.msk.bf16.gmra.mxu0 %vm4253_vm7, %v6538_v48  ;;  %v3269_v50 = vadd.f32 %v3268_v35, %v10488_v36  ;;  %v5018_v35 = vmax.f32 %v4823_v30, %v4951_v63  ;;  %v5197_v30 = vld [vmem:[#allocation2 + $0x17b] ss:$2 sm:$0xff]  ;;  %v5365_v63 = vand.u32 31, %v10587_v4 }
 0x47a   :  { %v4120_v24 = vadd.f32 %v12188_v15, %v3991_v25 }
 0x47b   :  { %vm5685_vm11 = vcmp.eq.s32.totalorder %v5365_v63, 31 }
 0x47c   :  { %v4248_v41 = vmax.f32 %v4120_v24, 0.0  ;;  %v5299_v24 = vmax.f32 %v5065_v18, %v5193_v43  ;;  %v5069_v43 = vld [vmem:[#allocation2 + $0x17a] ss:$2 sm:$0xff] }
 0x47e   :  { %4377 = vst.msk [vmem:[#allocation2 + $0x3e0] sm:$0xff] %vm4253_vm7, %v4248_v41  ;;  %v12318_v1 = vpop.f32.mrf.mxu0  ;;  %v12329_v59 = vpop.f32.mrf.mxu3 }
 0x47f   :  { %v3858_v7 = vpop.f32.mrf.mxu2  ;;  %13576 = vst [vmem:[#allocation49_spill] sm:$0xff] %v12329_v59 }
 0x480   :  { %v3992_v14 = vadd.f32 %v3858_v7, %v3269_v50  ;;  %v3270_v3 = vpop.f32.mrf.mxu1  ;;  %v5298_v7 = vmax.f32 %v5063_v57, %v5191_v61 }
 0x481   :  { %v3271_v36 = vadd.f32 %v3270_v3, %v10508_v46 }
 0x482   :  { %v4121_v23 = vadd.f32 %v12188_v15, %v3992_v14  ;;  %v6539_v8 = vpack.c.bf16 %v5299_v24, %v5298_v7  ;;  %v5195_v24 = vld [vmem:[#allocation2 + $0x16b] ss:$2 sm:$0xff] }
 0x484   :  { %v4249_v37 = vmax.f32 %v4121_v23, 0.0 }
 0x485   :  { %v4825_v25 = vld [vmem:[#allocation2 + $0x3d8] ss:$2 sm:$0xff]  ;;  %v4953_v48 = vld [vmem:[#allocation2 + $0x3d9] ss:$2 sm:$0xff] }
 0x486   :  { %4378 = vst.msk [vmem:[#allocation2 + $0x3e8] sm:$0xff] %vm4253_vm7, %v4249_v37  ;;  %v5019_v41 = vmax.f32 %v4825_v25, %v4953_v48  ;;  %v12325_v10 = vpop.f32.mrf.mxu0 }
 0x487   :  { %v3860_v50 = vpop.f32.mrf.mxu2 }
 0x488   :  { %v3993_v14 = vadd.f32 %v3860_v50, %v3271_v36  ;;  %v5982_v12 = vpack.c.bf16 %v5019_v41, %v5018_v35  ;;  %v3273_v5 = vpop.f32.mrf.mxu1  ;;  %v12338_v36 = vpop.f32.mrf.mxu3 }
 0x489   :  { %9845 = vmatmul.msk.bf16.gmra.mxu0 %vm4253_vm7, %v6539_v8  ;;  %v3274_v46 = vadd.f32 %v3273_v5, %v10506_v44  ;;  %v5067_v8 = vld [vmem:[#allocation2 + $0x16a] ss:$2 sm:$0xff]  ;;  %13577 = vst [vmem:[#allocation50_spill] sm:$0xff] %v12338_v36 }
 0x48a   :  { %v4122_v23 = vadd.f32 %v12188_v15, %v3993_v14  ;;  %9791 = vmatmul.msk.bf16.gmra.mxu3 %vm4253_vm7, %v5982_v12  ;;  %v5301_v12 = vmax.f32 %v5069_v43, %v5197_v30  ;;  %v5300_v41 = vmax.f32 %v5067_v8, %v5195_v24  ;;  %v5073_v43 = vld [vmem:[#allocation2 + $0x19a] ss:$2 sm:$0xff] }
 0x48c   :  { %v4250_v18 = vmax.f32 %v4122_v23, 0.0  ;;  %v5877_v5 = vsel %vm5685_vm11, 0.0, %v5301_v12 }
 0x48d   :  { %v6540_v14 = vpack.c.bf16 %v5877_v5, %v5300_v41 }
 0x48e   :  { %4379 = vst.msk [vmem:[#allocation2 + $0x3f0] sm:$0xff] %vm4253_vm7, %v4250_v18  ;;  %v12335_v57 = vpop.f32.mrf.mxu0 }
 0x48f   :  { %v3863_v3 = vpop.f32.mrf.mxu2 }
 0x490   :  { %v3994_v37 = vadd.f32 %v3863_v3, %v3274_v46  ;;  %v3275_v25 = vpop.f32.mrf.mxu1  ;;  %v12346_v46 = vpop.f32.mrf.mxu3 }
 0x491   :  { %v3276_v44 = vadd.f32 %v3275_v25, %v10519_v55  ;;  %13578 = vst [vmem:[#allocation51_spill] sm:$0xff] %v12346_v46  ;;  %v5201_v55 = vld [vmem:[#allocation2 + $0x19b] ss:$2 sm:$0xff] }
 0x492   :  { %v4123_v61 = vadd.f32 %v12188_v15, %v3994_v37  ;;  %v5071_v37 = vld [vmem:[#allocation2 + $0x18a] ss:$2 sm:$0xff] }
 0x494   :  { %v4251_v48 = vmax.f32 %v4123_v61, 0.0  ;;  %v5199_v61 = vld [vmem:[#allocation2 + $0x18b] ss:$2 sm:$0xff] }
 0x495   :  { %v4827_v30 = vld [vmem:[#allocation2 + $0x3e8] ss:$2 sm:$0xff]  ;;  %v4955_v63 = vld [vmem:[#allocation2 + $0x3e9] ss:$2 sm:$0xff] }
 0x496   :  { %4380 = vst.msk [vmem:[#allocation2 + $0x3f8] sm:$0xff] %vm4253_vm7, %v4251_v48  ;;  %v12342_v7 = vpop.f32.mrf.mxu0  ;;  %v5303_v48 = vmax.f32 %v5073_v43, %v5201_v55  ;;  %v5020_v8 = vmax.f32 %v4827_v30, %v4955_v63  ;;  %v4383_v30 = vld [vmem:[#allocation2 + $0x6] ss:$2 sm:$0xff]  ;;  %v4511_v63 = vld [vmem:[#allocation2 + $0x7] ss:$2 sm:$0xff] }
 0x497   :  { %v3865_v35 = vpop.f32.mrf.mxu2 }
 0x498   :  { %v3995_v50 = vadd.f32 %v3865_v35, %v3276_v44  ;;  %v12351_v24 = vpop.f32.mrf.mxu3  ;;  %v5302_v44 = vmax.f32 %v5071_v37, %v5199_v61  ;;  %v5342_v37 = vand.u32 31, %v10315_v21  ;;  %v4385_v61 = vld [vmem:[#allocation2 + $0x16] ss:$2 sm:$0xff] }
 0x499   :  { %9846 = vmatmul.msk.bf16.gmra.mxu0 %vm4253_vm7, %v6540_v14  ;;  %13579 = vst [vmem:[#allocation52_spill] sm:$0xff] %v12351_v24 }
 0x49a   :  { %v4124_v23 = vadd.f32 %v12188_v15, %v3995_v50  ;;  %v6541_v41 = vpack.c.bf16 %v5303_v48, %v5302_v44  ;;  %v12358_v50 = vadd.s32 216, %v10315_v21  ;;  %v4638_v48 = vmax.f32 %v4383_v30, %v4511_v63  ;;  %v5203_v44 = vld [vmem:[#allocation2 + $0x1ab] ss:$2 sm:$0xff]  ;;  %v5081_v30 = vld [vmem:[#allocation2 + $0x1da] ss:$2 sm:$0xff] }
 0x49b   :  { %vm5406_vm13 = vcmp.eq.s32.totalorder %v5342_v37, 0  ;;  %v5209_v63 = vld [vmem:[#allocation2 + $0x1db] ss:$2 sm:$0xff] }
 0x49c   :  { %v4252_v18 = vmax.f32 %v4124_v23, 0.0  ;;  %13580 = vst [vmem:[#allocation53_spill] sm:$0xff] %v12358_v50  ;;  %v5077_v23 = vld [vmem:[#allocation2 + $0x1ba] ss:$2 sm:$0xff]  ;;  %v5369_v43 = vand.u32 31, %v12358_v50 }
 0x49e   :  { %4381 = vst.msk [vmem:[#allocation2 + $0x400] sm:$0xff] %vm4253_vm7, %v4252_v18  ;;  %v12349_v3 = vpop.f32.mrf.mxu0  ;;  %v5205_v18 = vld [vmem:[#allocation2 + $0x1bb] ss:$2 sm:$0xff]  ;;  %vm5689_vm12 = vcmp.eq.s32.totalorder %v5369_v43, 31 }
 0x49f   :  { %v4517_v43 = vld [vmem:[#allocation2 + $0x37] ss:$2 sm:$0xff] }
 0x4a0   :  { %v12360_v14 = vpop.f32.mrf.mxu3 }
 0x4a1   :  { %13581 = vst [vmem:[#allocation54_spill] sm:$0xff] %v12360_v14 }
 0x4a5   :  { %v4829_v12 = vld [vmem:[#allocation2 + $0x3f8] ss:$2 sm:$0xff]  ;;  %v4957_v25 = vld [vmem:[#allocation2 + $0x3f9] ss:$2 sm:$0xff] }
 0x4a6   :  { %v5021_v15 = vmax.f32 %v4829_v12, %v4957_v25  ;;  %v12353_v5 = vpop.f32.mrf.mxu0  ;;  %v4513_v12 = vld [vmem:[#allocation2 + $0x17] ss:$2 sm:$0xff]  ;;  %v5305_v25 = vmax.f32 %v5077_v23, %v5205_v18  ;;  %v4389_v18 = vld [vmem:[#allocation2 + $0x36] ss:$2 sm:$0xff] }
 0x4a8   :  { %v5983_v35 = vpack.c.bf16 %v5021_v15, %v5020_v8  ;;  %v4639_v8 = vmax.f32 %v4385_v61, %v4513_v12  ;;  %v5075_v15 = vld [vmem:[#allocation2 + $0x1aa] ss:$2 sm:$0xff]  ;;  %v12366_v50 = vpop.f32.mrf.mxu3  ;;  %v4515_v12 = vld [vmem:[#allocation2 + $0x27] ss:$2 sm:$0xff] }
 0x4a9   :  { %9847 = vmatmul.msk.bf16.gmra.mxu0 %vm4253_vm7, %v6541_v41  ;;  %v5598_v41 = vsel %vm5406_vm13, 0.0, %v4638_v48  ;;  %v5304_v4 = vmax.f32 %v5075_v15, %v5203_v44  ;;  %13582 = vst [vmem:[#allocation55_spill] sm:$0xff] %v12366_v50  ;;  %v4387_v61 = vld [vmem:[#allocation2 + $0x26] ss:$2 sm:$0xff]  ;;  %v5307_v15 = vmax.f32 %v5081_v30, %v5209_v63 }
 0x4aa   :  { %9792 = vmatmul.msk.bf16.gmra.mxu3 %vm4253_vm7, %v5983_v35  ;;  %v5881_v35 = vsel %vm5689_vm12, 0.0, %v5305_v25  ;;  %v5918_v14 = vpack.c.bf16 %v4639_v8, %v5598_v41  ;;  %v4641_v25 = vmax.f32 %v4389_v18, %v4517_v43  ;;  %v5079_v48 = vld [vmem:[#allocation2 + $0x1ca] ss:$2 sm:$0xff]  ;;  %v5207_v8 = vld [vmem:[#allocation2 + $0x1cb] ss:$2 sm:$0xff]  ;;  %v4640_v44 = vmax.f32 %v4387_v61, %v4515_v12 }
 0x4ab   :  { %v6542_v46 = vpack.c.bf16 %v5881_v35, %v5304_v4  ;;  %v5306_v4 = vmax.f32 %v5079_v48, %v5207_v8  ;;  %v10125_v41 = vld [vmem:[%s13477_s4 + $0x28] sm:$0xff]  ;;  %v12387_v18 = vadd.s32 32, %v10315_v21  ;;  %v10122_v30 = vld [vmem:[%s13477_s4 + $0x10] sm:$0xff]  ;;  %v5373_v12 = vand.u32 31, %v10711_v49 }
 0x4ac   :  { %v5919_v35 = vpack.c.bf16 %v4641_v25, %v4640_v44  ;;  %8095 = vmatpush.bf16.msra.mxu3 %v10125_v41  ;;  %v5085_v63 = vld [vmem:[#allocation2 + $0x1fa] ss:$2 sm:$0xff]  ;;  %v5213_v61 = vld [vmem:[#allocation2 + $0x1fb] ss:$2 sm:$0xff]  ;;  %7777 = vmatpush.bf16.msra.mxu1 %v10122_v30  ;;  %v5083_v41 = vld [vmem:[#allocation2 + $0x1ea] ss:$2 sm:$0xff] }
 0x4ad   :  { %v4391_v25 = vld [vmem:[#allocation2 + $0x46] ss:$2 sm:$0xff]  ;;  %v4519_v48 = vld [vmem:[#allocation2 + $0x47] ss:$2 sm:$0xff]  ;;  %v5346_v8 = vand.u32 31, %v12387_v18  ;;  %vm5693_vm14 = vcmp.eq.s32.totalorder %v5373_v12, 31 }
 0x4ae   :  { %v12363_v55 = vpop.f32.mrf.mxu0  ;;  %v4521_v44 = vld [vmem:[#allocation2 + $0x57] ss:$2 sm:$0xff]  ;;  %v4397_v12 = vld [vmem:[#allocation2 + $0x76] ss:$2 sm:$0xff] }
 0x4af   :  { %vm5410_vm15 = vcmp.eq.s32.totalorder %v5346_v8, 0  ;;  %v5217_v8 = vld [vmem:[#allocation2 + $0x21b] ss:$2 sm:$0xff] }
 0x4b0   :  { %v12372_v23 = vpop.f32.mrf.mxu3 }
 0x4b1   :  { %13583 = vst [vmem:[#allocation56_spill] sm:$0xff] %v12372_v23 }
 0x4b6   :  { %v12368_v24 = vpop.f32.mrf.mxu0 }
 0x4b8   :  { %v12383_v23 = vpop.f32.mrf.mxu3 }
 0x4b9   :  { %9848 = vmatmul.msk.bf16.gmra.mxu0 %vm4253_vm7, %v6542_v46  ;;  %v10120_v46 = vld [vmem:[%s13477_s4] sm:$0xff]  ;;  %13584 = vst [vmem:[#allocation57_spill] sm:$0xff] %v12383_v23  ;;  %v5211_v23 = vld [vmem:[#allocation2 + $0x1eb] ss:$2 sm:$0xff] }
 0x4ba   :  { %9797 = vmatmul.msk.bf16.vlgmr.msrb.gmra.mxu3 %vm4253_vm7, %v5918_v14  ;;  %v6543_v14 = vpack.c.bf16 %v5307_v15, %v5306_v4  ;;  %7926 = vmatpush.bf16.msra.mxu2 %v10120_v46  ;;  %v4393_v15 = vld [vmem:[#allocation2 + $0x56] ss:$2 sm:$0xff]  ;;  %v5309_v4 = vmax.f32 %v5085_v63, %v5213_v61  ;;  %v4642_v46 = vmax.f32 %v4391_v25, %v4519_v48  ;;  %v4525_v25 = vld [vmem:[#allocation2 + $0x77] ss:$2 sm:$0xff] }
 0x4bb   :  { %v5308_v30 = vmax.f32 %v5083_v41, %v5211_v23  ;;  %v5089_v48 = vld [vmem:[#allocation2 + $0x21a] ss:$2 sm:$0xff] }
 0x4bc   :  { %v5885_v50 = vsel %vm5693_vm14, 0.0, %v5309_v4  ;;  %v5602_v49 = vsel %vm5410_vm15, 0.0, %v4642_v46  ;;  %v4645_v4 = vmax.f32 %v4397_v12, %v4525_v25  ;;  %v5215_v46 = vld [vmem:[#allocation2 + $0x20b] ss:$2 sm:$0xff]  ;;  %v5093_v12 = vld [vmem:[#allocation2 + $0x23a] ss:$2 sm:$0xff] }
 0x4bd   :  { %v6544_v38 = vpack.c.bf16 %v5885_v50, %v5308_v30  ;;  %v853_v30 = vadd.s32 280, %v10315_v21  ;;  %v5221_v25 = vld [vmem:[#allocation2 + $0x23b] ss:$2 sm:$0xff] }
 0x4be   :  { %v12374_v37 = vpop.f32.mrf.mxu0 }
 0x4bf   :  { %v5377_v54 = vand.u32 31, %v853_v30 }
 0x4c1   :  { %vm5697_vm0 = vcmp.eq.s32.totalorder %v5377_v54, 31  ;;  %v4405_v54 = vld [vmem:[#allocation2 + $0xb6] ss:$2 sm:$0xff] }
 0x4c6   :  { %v12389_v43 = vpop.f32.mrf.mxu0 }
 0x4c9   :  { %9849 = vmatmul.msk.bf16.gmra.mxu0 %vm4253_vm7, %v6543_v14  ;;  %v4643_v14 = vmax.f32 %v4393_v15, %v4521_v44  ;;  %v4395_v15 = vld [vmem:[#allocation2 + $0x66] ss:$2 sm:$0xff]  ;;  %v4523_v44 = vld [vmem:[#allocation2 + $0x67] ss:$2 sm:$0xff] }
 0x4ca   :  { %9798 = vmatmul.msk.bf16.gmra.mxu3 %vm4253_vm7, %v5919_v35  ;;  %v12396_v35 = vpop.f32.mrf.mxu3  ;;  %v4644_v50 = vmax.f32 %v4395_v15, %v4523_v44  ;;  %v5313_v15 = vmax.f32 %v5093_v12, %v5221_v25  ;;  %v5097_v25 = vld [vmem:[#allocation2 + $0x25a] ss:$2 sm:$0xff] }
 0x4cb   :  { %13585 = vst [vmem:[#allocation58_spill] sm:$0xff] %v12396_v35  ;;  %v5920_v59 = vpack.c.bf16 %v4643_v14, %v5602_v49  ;;  %v5087_v35 = vld [vmem:[#allocation2 + $0x20a] ss:$2 sm:$0xff]  ;;  %v5311_v49 = vmax.f32 %v5089_v48, %v5217_v8  ;;  %v5350_v48 = vand.u32 31, %v10417_v39  ;;  %v4529_v8 = vld [vmem:[#allocation2 + $0x97] ss:$2 sm:$0xff] }
 0x4cc   :  { %v5921_v14 = vpack.c.bf16 %v4645_v4, %v4644_v50 }
 0x4cd   :  { %vm5414_vm2 = vcmp.eq.s32.totalorder %v5350_v48, 0  ;;  %v5225_v48 = vld [vmem:[#allocation2 + $0x25b] ss:$2 sm:$0xff] }
 0x4ce   :  { %v12398_v36 = vpop.f32.mrf.mxu0 }
 0x4d2   :  { %v12402_v63 = vpop.f32.mrf.mxu3 }
 0x4d3   :  { %13586 = vst [vmem:[#allocation59_spill] sm:$0xff] %v12402_v63 }
 0x4d6   :  { %v12404_v61 = vpop.f32.mrf.mxu0 }
 0x4d9   :  { %9850 = vmatmul.msk.bf16.gmra.mxu0 %vm4253_vm7, %v6544_v38 }
 0x4da   :  { %9799 = vmatmul.msk.bf16.gmra.mxu3 %vm4253_vm7, %v5920_v59  ;;  %v12406_v23 = vpop.f32.mrf.mxu3  ;;  %v5310_v59 = vmax.f32 %v5087_v35, %v5215_v46  ;;  %v4401_v35 = vld [vmem:[#allocation2 + $0x96] ss:$2 sm:$0xff] }
 0x4db   :  { %13587 = vst [vmem:[#allocation60_spill] sm:$0xff] %v12406_v23  ;;  %v4527_v23 = vld [vmem:[#allocation2 + $0x87] ss:$2 sm:$0xff]  ;;  %v4647_v4 = vmax.f32 %v4401_v35, %v4529_v8  ;;  %v5091_v46 = vld [vmem:[#allocation2 + $0x22a] ss:$2 sm:$0xff] }
 0x4dc   :  { %v6545_v38 = vpack.c.bf16 %v5311_v49, %v5310_v59  ;;  %v4646_v44 = vmax.f32 %v4399_v27, %v4527_v23  ;;  %v5219_v49 = vld [vmem:[#allocation2 + $0x22b] ss:$2 sm:$0xff]  ;;  %v5889_v59 = vsel %vm5697_vm0, 0.0, %v5313_v15  ;;  %v4403_v35 = vld [vmem:[#allocation2 + $0xa6] ss:$2 sm:$0xff] }
 0x4dd   :  { %v5312_v30 = vmax.f32 %v5091_v46, %v5219_v49  ;;  %v4533_v23 = vld [vmem:[#allocation2 + $0xb7] ss:$2 sm:$0xff]  ;;  %v4531_v8 = vld [vmem:[#allocation2 + $0xa7] ss:$2 sm:$0xff]  ;;  %v5315_v46 = vmax.f32 %v5097_v25, %v5225_v48  ;;  %v4407_v25 = vld [vmem:[#allocation2 + $0xc6] ss:$2 sm:$0xff] }
 0x4de   :  { %v12409_v41 = vpop.f32.mrf.mxu0  ;;  %v4649_v15 = vmax.f32 %v4405_v54, %v4533_v23  ;;  %v5229_v54 = vld [vmem:[#allocation2 + $0x27b] ss:$2 sm:$0xff]  ;;  %v5381_v23 = vand.u32 31, %v10845_v32 }
 0x4df   :  { %v6546_v56 = vpack.c.bf16 %v5889_v59, %v5312_v30  ;;  %v12433_v30 = vadd.s32 96, %v10315_v21  ;;  %v4535_v48 = vld [vmem:[#allocation2 + $0xc7] ss:$2 sm:$0xff] }
 0x4e0   :  { %vm5701_vm3 = vcmp.eq.s32.totalorder %v5381_v23, 31  ;;  %v5105_v23 = vld [vmem:[#allocation2 + $0x29a] ss:$2 sm:$0xff] }
 0x4e1   :  { %13592 = vst [vmem:[#allocation65_spill] sm:$0xff] %v12433_v30 }
 0x4e2   :  { %v12413_v63 = vpop.f32.mrf.mxu3 }
 0x4e3   :  { %13588 = vst [vmem:[#allocation61_spill] sm:$0xff] %v12413_v63 }
 0x4e6   :  { %v12416_v50 = vpop.f32.mrf.mxu0 }
 0x4e9   :  { %9851 = vmatmul.msk.bf16.gmra.mxu0 %vm4253_vm7, %v6545_v38  ;;  %v5606_v38 = vsel %vm5414_vm2, 0.0, %v4646_v44  ;;  %v5223_v44 = vld [vmem:[#allocation2 + $0x24b] ss:$2 sm:$0xff] }
 0x4ea   :  { %9800 = vmatmul.msk.bf16.gmra.mxu3 %vm4253_vm7, %v5921_v14  ;;  %v12418_v14 = vpop.f32.mrf.mxu3  ;;  %v5922_v63 = vpack.c.bf16 %v4647_v4, %v5606_v38  ;;  %v4648_v4 = vmax.f32 %v4403_v35, %v4531_v8  ;;  %v4409_v35 = vld [vmem:[#allocation2 + $0xd6] ss:$2 sm:$0xff]  ;;  %v4537_v8 = vld [vmem:[#allocation2 + $0xd7] ss:$2 sm:$0xff] }
 0x4eb   :  { %13589 = vst [vmem:[#allocation62_spill] sm:$0xff] %v12418_v14  ;;  %v5095_v14 = vld [vmem:[#allocation2 + $0x24a] ss:$2 sm:$0xff] }
 0x4ec   :  { %v5314_v49 = vmax.f32 %v5095_v14, %v5223_v44  ;;  %v5923_v59 = vpack.c.bf16 %v4649_v15, %v4648_v4  ;;  %v5354_v14 = vand.u32 31, %v12433_v30  ;;  %v4650_v4 = vmax.f32 %v4407_v25, %v4535_v48  ;;  %v4541_v25 = vld [vmem:[#allocation2 + $0xf7] ss:$2 sm:$0xff] }
 0x4ed   :  { %v5233_v48 = vld [vmem:[#allocation2 + $0x29b] ss:$2 sm:$0xff] }
 0x4ee   :  { %v12422_v12 = vpop.f32.mrf.mxu0  ;;  %v6547_v38 = vpack.c.bf16 %v5315_v46, %v5314_v49  ;;  %v4651_v49 = vmax.f32 %v4409_v35, %v4537_v8  ;;  %vm5418_vm4 = vcmp.eq.s32.totalorder %v5354_v14, 0  ;;  %v4411_v14 = vld [vmem:[#allocation2 + $0xe6] ss:$2 sm:$0xff]  ;;  %v4539_v35 = vld [vmem:[#allocation2 + $0xe7] ss:$2 sm:$0xff] }
 0x4ef   :  { %v5610_v33 = vsel %vm5418_vm4, 0.0, %v4650_v4  ;;  %v5231_v4 = vld [vmem:[#allocation2 + $0x28b] ss:$2 sm:$0xff] }
 0x4f0   :  { %v5924_v26 = vpack.c.bf16 %v4651_v49, %v5610_v33  ;;  %v5319_v33 = vmax.f32 %v5105_v23, %v5233_v48  ;;  %v5358_v23 = vand.u32 31, %v10494_v40 }
 0x4f2   :  { %v12424_v27 = vpop.f32.mrf.mxu3  ;;  %vm5422_vm6 = vcmp.eq.s32.totalorder %v5358_v23, 0  ;;  %v4549_v23 = vld [vmem:[#allocation2 + $0x137] ss:$2 sm:$0xff] }
 0x4f3   :  { %13590 = vst [vmem:[#allocation63_spill] sm:$0xff] %v12424_v27  ;;  %v5101_v27 = vld [vmem:[#allocation2 + $0x27a] ss:$2 sm:$0xff] }
 0x4f4   :  { %v5317_v15 = vmax.f32 %v5101_v27, %v5229_v54  ;;  %v4413_v54 = vld [vmem:[#allocation2 + $0xf6] ss:$2 sm:$0xff] }
 0x4f5   :  { %v4653_v8 = vmax.f32 %v4413_v54, %v4541_v25  ;;  %v5109_v54 = vld [vmem:[#allocation2 + $0x2ba] ss:$2 sm:$0xff]  ;;  %v5237_v25 = vld [vmem:[#allocation2 + $0x2bb] ss:$2 sm:$0xff] }
 0x4f9   :  { %9852 = vmatmul.msk.bf16.gmra.mxu0 %vm4253_vm7, %v6546_v56  ;;  %v12428_v56 = vpop.f32.mrf.mxu0 }
 0x4fa   :  { %9801 = vmatmul.msk.bf16.gmra.mxu3 %vm4253_vm7, %v5922_v63  ;;  %v12426_v63 = vpop.f32.mrf.mxu3 }
 0x4fb   :  { %13591 = vst [vmem:[#allocation64_spill] sm:$0xff] %v12426_v63  ;;  %v5893_v63 = vsel %vm5701_vm3, 0.0, %v5317_v15  ;;  %v5103_v15 = vld [vmem:[#allocation2 + $0x28a] ss:$2 sm:$0xff] }
 0x4fc   :  { %v5318_v49 = vmax.f32 %v5103_v15, %v5231_v4 }
 0x501   :  { %v12439_v46 = vpop.f32.mrf.mxu0 }
 0x502   :  { %v12437_v44 = vpop.f32.mrf.mxu3 }
 0x503   :  { %13593 = vst [vmem:[#allocation66_spill] sm:$0xff] %v12437_v44 }
 0x509   :  { %9853 = vmatmul.msk.bf16.gmra.mxu0 %vm4253_vm7, %v6547_v38  ;;  %v5227_v38 = vld [vmem:[#allocation2 + $0x26b] ss:$2 sm:$0xff]  ;;  %v12445_v27 = vpop.f32.mrf.mxu0 }
 0x50a   :  { %9802 = vmatmul.msk.bf16.gmra.mxu3 %vm4253_vm7, %v5923_v59  ;;  %v5099_v59 = vld [vmem:[#allocation2 + $0x26a] ss:$2 sm:$0xff] }
 0x50b   :  { %v5316_v32 = vmax.f32 %v5099_v59, %v5227_v38 }
 0x50d   :  { %v6548_v47 = vpack.c.bf16 %v5893_v63, %v5316_v32  ;;  %v12442_v20 = vpop.f32.mrf.mxu3  ;;  %v4652_v63 = vmax.f32 %v4411_v14, %v4539_v35  ;;  %v861_v32 = vadd.s32 344, %v10315_v21  ;;  %v4417_v14 = vld [vmem:[#allocation2 + $0x116] ss:$2 sm:$0xff]  ;;  %v4545_v35 = vld [vmem:[#allocation2 + $0x117] ss:$2 sm:$0xff] }
 0x50e   :  { %13594 = vst [vmem:[#allocation67_spill] sm:$0xff] %v12442_v20  ;;  %v4655_v4 = vmax.f32 %v4417_v14, %v4545_v35  ;;  %v5113_v35 = vld [vmem:[#allocation2 + $0x2da] ss:$2 sm:$0xff] }
 0x50f   :  { %v5925_v38 = vpack.c.bf16 %v4653_v8, %v4652_v63  ;;  %v5385_v44 = vand.u32 31, %v861_v32  ;;  %v5321_v8 = vmax.f32 %v5109_v54, %v5237_v25  ;;  %v5235_v63 = vld [vmem:[#allocation2 + $0x2ab] ss:$2 sm:$0xff]  ;;  %v4421_v25 = vld [vmem:[#allocation2 + $0x136] ss:$2 sm:$0xff] }
 0x511   :  { %vm5705_vm5 = vcmp.eq.s32.totalorder %v5385_v44, 31  ;;  %v12469_v44 = vld [vmem:[%s13474_s1 + $0x3] ss:$0 sm:$0xff] }
 0x515   :  { %v12447_v59 = vpop.f32.mrf.mxu3 }
 0x516   :  { %13595 = vst [vmem:[#allocation68_spill] sm:$0xff] %v12447_v59  ;;  %v4543_v59 = vld [vmem:[#allocation2 + $0x107] ss:$2 sm:$0xff] }
 0x517   :  { %v4654_v15 = vmax.f32 %v4415_v52, %v4543_v59 }
 0x519   :  { %9854 = vmatmul.msk.bf16.gmra.mxu0 %vm4253_vm7, %v6548_v47  ;;  %v6549_v47 = vpack.c.bf16 %v5319_v33, %v5318_v49  ;;  %v5107_v33 = vld [vmem:[#allocation2 + $0x2aa] ss:$2 sm:$0xff] }
 0x51a   :  { %9803 = vmatmul.msk.bf16.gmra.mxu3 %vm4253_vm7, %v5924_v26  ;;  %v12449_v26 = vpop.f32.mrf.mxu0  ;;  %v5320_v32 = vmax.f32 %v5107_v33, %v5235_v63  ;;  %v5111_v33 = vld [vmem:[#allocation2 + $0x2ca] ss:$2 sm:$0xff] }
 0x522   :  { %v12457_v48 = vpop.f32.mrf.mxu0 }
 0x529   :  { %9855 = vmatmul.msk.bf16.gmra.mxu0 %vm4253_vm7, %v6549_v47  ;;  %v5614_v47 = vsel %vm5422_vm6, 0.0, %v4654_v15  ;;  %v4547_v15 = vld [vmem:[#allocation2 + $0x127] ss:$2 sm:$0xff] }
 0x52a   :  { %9804 = vmatmul.msk.bf16.gmra.mxu3 %vm4253_vm7, %v5925_v38  ;;  %v5897_v38 = vsel %vm5705_vm5, 0.0, %v5321_v8  ;;  %v12462_v40 = vpop.f32.mrf.mxu0  ;;  %v4419_v8 = vld [vmem:[#allocation2 + $0x126] ss:$2 sm:$0xff] }
 0x52b   :  { %v6550_v30 = vpack.c.bf16 %v5897_v38, %v5320_v32 }
 0x52d   :  { %v12454_v20 = vpop.f32.mrf.mxu3 }
 0x52e   :  { %13596 = vst [vmem:[#allocation69_spill] sm:$0xff] %v12454_v20  ;;  %v5926_v20 = vpack.c.bf16 %v4655_v4, %v5614_v47  ;;  %v4657_v4 = vmax.f32 %v4421_v25, %v4549_v23  ;;  %v12482_v23 = vadd.s32 160, %v10315_v21 }
 0x530   :  { %13599 = vst [vmem:[#allocation72_spill] sm:$0xff] %v12482_v23 }
 0x532   :  { %v12473_v63 = vpop.f32.mrf.mxu0 }
 0x533   :  { %13598 = vst [vmem:[#allocation71_spill] sm:$0xff] %v12473_v63 }
 0x535   :  { %v12459_v49 = vpop.f32.mrf.mxu3 }
 0x536   :  { %13597 = vst [vmem:[#allocation70_spill] sm:$0xff] %v12459_v49 }
 0x539   :  { %9856 = vmatmul.msk.bf16.gmra.mxu0 %vm4253_vm7, %v6550_v30 }
 0x53a   :  { %9805 = vmatmul.msk.bf16.gmra.mxu3 %vm4253_vm7, %v5926_v20  ;;  %v5241_v20 = vld [vmem:[#allocation2 + $0x2db] ss:$2 sm:$0xff] }
 0x53b   :  { %v5323_v47 = vmax.f32 %v5113_v35, %v5241_v20  ;;  %v12486_v35 = vpop.f32.mrf.mxu0  ;;  %v5245_v20 = vld [vmem:[#allocation2 + $0x2fb] ss:$2 sm:$0xff] }
 0x53c   :  { %13600 = vst [vmem:[#allocation73_spill] sm:$0xff] %v12486_v35 }
 0x53d   :  { %v6369_v54 = vpop.f32.mrf.mxu3 }
 0x53e   :  { %v6370_v52 = vadd.f32 %v6369_v54, %v11366_v17  ;;  %v5239_v17 = vld [vmem:[#allocation2 + $0x2cb] ss:$2 sm:$0xff] }
 0x53f   :  { %v5322_v54 = vmax.f32 %v5111_v33, %v5239_v17  ;;  %v4553_v33 = vld [vmem:[#allocation2 + $0x157] ss:$2 sm:$0xff] }
 0x540   :  { %v6835_v59 = vadd.f32 %v12294_v19, %v6370_v52  ;;  %v4656_v19 = vmax.f32 %v4419_v8, %v4547_v15  ;;  %v5389_v8 = vand.u32 31, %v10977_v31 }
 0x541   :  { %v6551_v49 = vpack.c.bf16 %v5323_v47, %v5322_v54  ;;  %v5243_v54 = vld [vmem:[#allocation2 + $0x2eb] ss:$2 sm:$0xff] }
 0x542   :  { %v6900_v14 = vadd.f32 %v12469_v44, %v6835_v59  ;;  %v5927_v59 = vpack.c.bf16 %v4657_v4, %v4656_v19  ;;  %v4551_v4 = vld [vmem:[#allocation2 + $0x147] ss:$2 sm:$0xff]  ;;  %vm5709_vm1 = vcmp.eq.s32.totalorder %v5389_v8, 31  ;;  %v5115_v19 = vld [vmem:[#allocation2 + $0x2ea] ss:$2 sm:$0xff] }
 0x544   :  { %v6964_v30 = vmax.f32 %v6900_v14, 0.0 }
 0x545   :  { %v6371_v38 = vpop.f32.mrf.mxu3 }
 0x546   :  { %v6372_v32 = vadd.f32 %v6371_v38, %v11396_v11  ;;  %7029 = vst.msk [vmem:[#allocation2 + $0x8] sm:$0xff] %vm7028_vm8, %v6964_v30  ;;  %v4423_v30 = vld [vmem:[#allocation2 + $0x146] ss:$2 sm:$0xff] }
 0x548   :  { %v6836_v52 = vadd.f32 %v12304_v34, %v6372_v32  ;;  %v5117_v34 = vld [vmem:[#allocation2 + $0x2fa] ss:$2 sm:$0xff] }
 0x549   :  { %9857 = vmatmul.msk.bf16.gmra.mxu0 %vm4253_vm7, %v6551_v49  ;;  %v4425_v49 = vld [vmem:[#allocation2 + $0x156] ss:$2 sm:$0xff]  ;;  %v5325_v38 = vmax.f32 %v5117_v34, %v5245_v20 }
 0x54a   :  { %v6901_v0 = vadd.f32 %v12469_v44, %v6836_v52  ;;  %9806 = vmatmul.msk.bf16.gmra.mxu3 %vm4253_vm7, %v5927_v59  ;;  %v4659_v32 = vmax.f32 %v4425_v49, %v4553_v33  ;;  %v4557_v49 = vld [vmem:[#allocation2 + $0x177] ss:$2 sm:$0xff] }
 0x54c   :  { %v6965_v25 = vmax.f32 %v6901_v0, 0.0  ;;  %v5362_v0 = vand.u32 31, %v12482_v23 }
 0x54d   :  { %v6374_v14 = vpop.f32.mrf.mxu3 }
 0x54e   :  { %v6375_v11 = vadd.f32 %v6374_v14, %v11437_v28  ;;  %7030 = vst.msk [vmem:[#allocation2 + $0x10] sm:$0xff] %vm7028_vm8, %v6965_v25  ;;  %v4658_v28 = vmax.f32 %v4423_v30, %v4551_v4  ;;  %vm5426_vm9 = vcmp.eq.s32.totalorder %v5362_v0, 0  ;;  %v5324_v25 = vmax.f32 %v5115_v19, %v5243_v54  ;;  %v4429_v0 = vld [vmem:[#allocation2 + $0x176] ss:$2 sm:$0xff]  ;;  %v4555_v54 = vld [vmem:[#allocation2 + $0x167] ss:$2 sm:$0xff] }
 0x550   :  { %v6837_v15 = vadd.f32 %v12310_v2, %v6375_v11  ;;  %v5901_v2 = vsel %vm5709_vm1, 0.0, %v5325_v38  ;;  %v5618_v59 = vsel %vm5426_vm9, 0.0, %v4658_v28  ;;  %v4427_v28 = vld [vmem:[#allocation2 + $0x166] ss:$2 sm:$0xff] }
 0x551   :  { %v5928_v11 = vpack.c.bf16 %v4659_v32, %v5618_v59  ;;  %v6552_v34 = vpack.c.bf16 %v5901_v2, %v5324_v25  ;;  %v5249_v32 = vld [vmem:[#allocation2 + $0x31b] ss:$2 sm:$0xff]  ;;  %v4661_v2 = vmax.f32 %v4429_v0, %v4557_v49  ;;  %v5119_v25 = vld [vmem:[#allocation2 + $0x30a] ss:$2 sm:$0xff] }
 0x552   :  { %v6902_v17 = vadd.f32 %v12469_v44, %v6837_v15  ;;  %v12495_v15 = vpop.f32.mrf.mxu0 }
 0x553   :  { %13601 = vst [vmem:[#allocation74_spill] sm:$0xff] %v12495_v15 }
 0x554   :  { %v6966_v47 = vmax.f32 %v6902_v17, 0.0 }
 0x555   :  { %v6376_v52 = vpop.f32.mrf.mxu3  ;;  %v7093_v33 = vld [vmem:[#allocation2 + $0x6] ss:$2 sm:$0xff]  ;;  %v7125_v17 = vld [vmem:[#allocation2 + $0x7] ss:$2 sm:$0xff] }
 0x556   :  { %v6377_v31 = vadd.f32 %v6376_v52, %v11455_v29  ;;  %7031 = vst.msk [vmem:[#allocation2 + $0x18] sm:$0xff] %vm7028_vm8, %v6966_v47  ;;  %v5121_v47 = vld [vmem:[#allocation2 + $0x31a] ss:$2 sm:$0xff]  ;;  %v7157_v59 = vmax.f32 %v7093_v33, %v7125_v17 }
 0x557   :  { %v7189_v52 = vld [vmem:[#allocation2 + $0x8] ss:$2 sm:$0xff] }
 0x558   :  { %v6838_v14 = vadd.f32 %v12318_v1, %v6377_v31  ;;  %v7381_v1 = vand.u32 15, %v10315_v21 }
 0x559   :  { %9858 = vmatmul.msk.bf16.gmra.mxu0 %vm4253_vm7, %v6552_v34 }
 0x55a   :  { %v6903_v20 = vadd.f32 %v12469_v44, %v6838_v14  ;;  %9807 = vmatmul.msk.bf16.gmra.mxu3 %vm4253_vm7, %v5928_v11  ;;  %v12505_v19 = vpop.f32.mrf.mxu0  ;;  %vm12507_vm10 = vcmp.eq.s32.totalorder %v7381_v1, 0  ;;  %v5247_v14 = vld [vmem:[#allocation2 + $0x30b] ss:$2 sm:$0xff] }
 0x55b   :  { %13602 = vst [vmem:[#allocation75_spill] sm:$0xff] %v12505_v19  ;;  %v5326_v1 = vmax.f32 %v5119_v25, %v5247_v14  ;;  %v7509_v15 = vsel %vm12507_vm10, 0.0, %v7157_v59 }
 0x55c   :  { %v6967_v8 = vmax.f32 %v6903_v20, 0.0 }
 0x55d   :  { %v6379_v30 = vpop.f32.mrf.mxu3 }
 0x55e   :  { %v6380_v29 = vadd.f32 %v6379_v30, %v11497_v51  ;;  %7032 = vst.msk [vmem:[#allocation2 + $0x20] sm:$0xff] %vm7028_vm8, %v6967_v8  ;;  %v7221_v51 = vld [vmem:[#allocation2 + $0x9] ss:$2 sm:$0xff]  ;;  %v5327_v30 = vmax.f32 %v5121_v47, %v5249_v32  ;;  %v5125_v32 = vld [vmem:[#allocation2 + $0x33a] ss:$2 sm:$0xff] }
 0x55f   :  { %v7253_v23 = vmax.f32 %v7189_v52, %v7221_v51  ;;  %v4431_v51 = vld [vmem:[#allocation2 + $0x186] ss:$2 sm:$0xff] }
 0x560   :  { %v6839_v4 = vadd.f32 %v12325_v10, %v6380_v29  ;;  %v6553_v63 = vpack.c.bf16 %v5327_v30, %v5326_v1 }
 0x562   :  { %v6904_v38 = vadd.f32 %v12469_v44, %v6839_v4  ;;  %v4660_v4 = vmax.f32 %v4427_v28, %v4555_v54  ;;  %v12522_v28 = vpop.f32.mrf.mxu0 }
 0x564   :  { %v6968_v31 = vmax.f32 %v6904_v38, 0.0  ;;  %v5929_v17 = vpack.c.bf16 %v4661_v2, %v4660_v4  ;;  %v4561_v2 = vld [vmem:[#allocation2 + $0x197] ss:$2 sm:$0xff] }
 0x565   :  { %v6381_v11 = vpop.f32.mrf.mxu3  ;;  %v7190_v34 = vld [vmem:[#allocation2 + $0x18] ss:$2 sm:$0xff]  ;;  %v7222_v20 = vld [vmem:[#allocation2 + $0x19] ss:$2 sm:$0xff] }
 0x566   :  { %v7094_v8 = vld [vmem:[#allocation2 + $0x16] ss:$2 sm:$0xff]  ;;  %v6382_v29 = vadd.f32 %v6381_v11, %v11522_v45  ;;  %v7254_v19 = vmax.f32 %v7190_v34, %v7222_v20  ;;  %7033 = vst.msk [vmem:[#allocation2 + $0x28] sm:$0xff] %vm7028_vm8, %v6968_v31  ;;  %v7126_v0 = vld [vmem:[#allocation2 + $0x17] ss:$2 sm:$0xff]  ;;  %v869_v45 = vadd.s32 408, %v10315_v21 }
 0x567   :  { %v7158_v49 = vmax.f32 %v7094_v8, %v7126_v0  ;;  %v4559_v31 = vld [vmem:[#allocation2 + $0x187] ss:$2 sm:$0xff] }
 0x568   :  { %v6840_v33 = vadd.f32 %v12335_v57, %v6382_v29  ;;  %v7689_v38 = vpack.c.bf16 %v7254_v19, %v7253_v23  ;;  %v5253_v19 = vld [vmem:[#allocation2 + $0x33b] ss:$2 sm:$0xff]  ;;  %v5393_v54 = vand.u32 31, %v869_v45  ;;  %v4662_v25 = vmax.f32 %v4431_v51, %v4559_v31  ;;  %v5251_v34 = vld [vmem:[#allocation2 + $0x32b] ss:$2 sm:$0xff] }
 0x569   :  { %v7669_v35 = vpack.c.bf16 %v7158_v49, %v7509_v15  ;;  %9859 = vmatmul.msk.bf16.gmra.mxu0 %vm4253_vm7, %v6553_v63  ;;  %v4433_v63 = vld [vmem:[#allocation2 + $0x196] ss:$2 sm:$0xff]  ;;  %v5329_v10 = vmax.f32 %v5125_v32, %v5253_v19  ;;  %v5257_v31 = vld [vmem:[#allocation2 + $0x35b] ss:$2 sm:$0xff] }
 0x56a   :  { %v6905_v47 = vadd.f32 %v12469_v44, %v6840_v33  ;;  %9808 = vmatmul.msk.bf16.gmra.mxu3 %vm4253_vm7, %v5929_v17  ;;  %9879 = vmatmul.msk.bf16.vlgmr.msra.gmra.mxu1 %vm7028_vm8, %v7689_v38  ;;  %vm5713_vm11 = vcmp.eq.s32.totalorder %v5393_v54, 31  ;;  %v4663_v11 = vmax.f32 %v4433_v63, %v4561_v2  ;;  %v12531_v30 = vpop.f32.mrf.mxu0  ;;  %v12538_v38 = vadd.s32 16, %v10315_v21  ;;  %v5129_v51 = vld [vmem:[#allocation2 + $0x35a] ss:$2 sm:$0xff] }
 0x56b   :  { %9903 = vmatmul.msk.bf16.vlgmr.msra.gmra.mxu2 %vm7028_vm8, %v7669_v35  ;;  %v5366_v35 = vand.u32 31, %v10623_v53  ;;  %v5905_v8 = vsel %vm5713_vm11, 0.0, %v5329_v10 }
 0x56c   :  { %v6969_v57 = vmax.f32 %v6905_v47, 0.0 }
 0x56d   :  { %v6384_v23 = vpop.f32.mrf.mxu3  ;;  %vm5430_vm12 = vcmp.eq.s32.totalorder %v5366_v35, 0  ;;  %v4563_v35 = vld [vmem:[#allocation2 + $0x1a7] ss:$2 sm:$0xff] }
 0x56e   :  { %7034 = vst.msk [vmem:[#allocation2 + $0x30] sm:$0xff] %vm7028_vm8, %v6969_v57  ;;  %v6385_v15 = vadd.f32 %v6384_v23, %v11563_v6  ;;  %v5123_v6 = vld [vmem:[#allocation2 + $0x32a] ss:$2 sm:$0xff]  ;;  %v5622_v29 = vsel %vm5430_vm12, 0.0, %v4662_v25  ;;  %v7383_v57 = vand.u32 15, %v12538_v38 }
 0x56f   :  { %v5328_v4 = vmax.f32 %v5123_v6, %v5251_v34  ;;  %v5930_v49 = vpack.c.bf16 %v4663_v11, %v5622_v29  ;;  %v5127_v25 = vld [vmem:[#allocation2 + $0x34a] ss:$2 sm:$0xff] }
 0x570   :  { %v6841_v52 = vadd.f32 %v12342_v7, %v6385_v15  ;;  %v4565_v15 = vld [vmem:[#allocation2 + $0x1b7] ss:$2 sm:$0xff]  ;;  %vm12547_vm13 = vcmp.eq.s32.totalorder %v7383_v57, 0 }
 0x571   :  { %v6554_v1 = vpack.c.bf16 %v5905_v8, %v5328_v4 }
 0x572   :  { %v6906_v59 = vadd.f32 %v12469_v44, %v6841_v52  ;;  %v12544_v23 = vpop.f32.mrf.mxu0  ;;  %v4435_v52 = vld [vmem:[#allocation2 + $0x1a6] ss:$2 sm:$0xff] }
 0x573   :  { %v4664_v29 = vmax.f32 %v4435_v52, %v4563_v35  ;;  %v5133_v52 = vld [vmem:[#allocation2 + $0x37a] ss:$2 sm:$0xff] }
 0x574   :  { %v6970_v14 = vmax.f32 %v6906_v59, 0.0 }
 0x575   :  { %v6386_v20 = vpop.f32.mrf.mxu3  ;;  %v7095_v32 = vld [vmem:[#allocation2 + $0x26] ss:$2 sm:$0xff]  ;;  %v7127_v19 = vld [vmem:[#allocation2 + $0x27] ss:$2 sm:$0xff] }
 0x576   :  { %7035 = vst.msk [vmem:[#allocation2 + $0x38] sm:$0xff] %vm7028_vm8, %v6970_v14  ;;  %v6387_v7 = vadd.f32 %v6386_v20, %v11591_v13  ;;  %v7191_v63 = vld [vmem:[#allocation2 + $0x28] ss:$2 sm:$0xff]  ;;  %v7223_v2 = vld [vmem:[#allocation2 + $0x29] ss:$2 sm:$0xff]  ;;  %v7159_v10 = vmax.f32 %v7095_v32, %v7127_v19  ;;  %v12564_v32 = vadd.s32 224, %v10315_v21 }
 0x577   :  { %v5255_v14 = vld [vmem:[#allocation2 + $0x34b] ss:$2 sm:$0xff]  ;;  %v7255_v4 = vmax.f32 %v7191_v63, %v7223_v2  ;;  %v4439_v63 = vld [vmem:[#allocation2 + $0x1c6] ss:$2 sm:$0xff] }
 0x578   :  { %v6842_v0 = vadd.f32 %v12349_v3, %v6387_v7  ;;  %v4437_v3 = vld [vmem:[#allocation2 + $0x1b6] ss:$2 sm:$0xff]  ;;  %v5331_v7 = vmax.f32 %v5129_v51, %v5257_v31  ;;  %v5261_v51 = vld [vmem:[#allocation2 + $0x37b] ss:$2 sm:$0xff]  ;;  %v5397_v31 = vand.u32 31, %v11101_v62 }
 0x579   :  { %9860 = vmatmul.msk.bf16.gmra.mxu0 %vm4253_vm7, %v6554_v1  ;;  %v4567_v2 = vld [vmem:[#allocation2 + $0x1c7] ss:$2 sm:$0xff] }
 0x57a   :  { %v6907_v33 = vadd.f32 %v12469_v44, %v6842_v0  ;;  %9809 = vmatmul.msk.bf16.gmra.mxu3 %vm4253_vm7, %v5930_v49  ;;  %vm5717_vm14 = vcmp.eq.s32.totalorder %v5397_v31, 31 }
 0x57c   :  { %v6971_v17 = vmax.f32 %v6907_v33, 0.0  ;;  %v5330_v33 = vmax.f32 %v5127_v25, %v5255_v14  ;;  %v5333_v25 = vmax.f32 %v5133_v52, %v5261_v51  ;;  %v4666_v14 = vmax.f32 %v4439_v63, %v4567_v2  ;;  %v5265_v52 = vld [vmem:[#allocation2 + $0x39b] ss:$2 sm:$0xff] }
 0x57d   :  { %v6389_v13 = vpop.f32.mrf.mxu3  ;;  %v4571_v51 = vld [vmem:[#allocation2 + $0x1e7] ss:$2 sm:$0xff] }
 0x57e   :  { %7036 = vst.msk [vmem:[#allocation2 + $0x40] sm:$0xff] %vm7028_vm8, %v6971_v17  ;;  %v6390_v47 = vadd.f32 %v6389_v13, %v11633_v60  ;;  %v4665_v60 = vmax.f32 %v4437_v3, %v4565_v15  ;;  %v6555_v57 = vpack.c.bf16 %v5331_v7, %v5330_v33  ;;  %v5909_v7 = vsel %vm5717_vm14, 0.0, %v5333_v25 }
 0x580   :  { %v6843_v45 = vadd.f32 %v12353_v5, %v6390_v47  ;;  %v5931_v13 = vpack.c.bf16 %v4665_v60, %v4664_v29  ;;  %v4441_v60 = vld [vmem:[#allocation2 + $0x1d6] ss:$2 sm:$0xff] }
 0x582   :  { %v6908_v54 = vadd.f32 %v12469_v44, %v6843_v45  ;;  %v7511_v45 = vsel %vm12547_vm13, 0.0, %v7159_v10  ;;  %v4569_v10 = vld [vmem:[#allocation2 + $0x1d7] ss:$2 sm:$0xff] }
 0x584   :  { %v6972_v59 = vmax.f32 %v6908_v54, 0.0 }
 0x585   :  { %v6391_v11 = vpop.f32.mrf.mxu3  ;;  %v7192_v6 = vld [vmem:[#allocation2 + $0x38] ss:$2 sm:$0xff]  ;;  %v7224_v34 = vld [vmem:[#allocation2 + $0x39] ss:$2 sm:$0xff] }
 0x586   :  { %v7096_v20 = vld [vmem:[#allocation2 + $0x36] ss:$2 sm:$0xff]  ;;  %7037 = vst.msk [vmem:[#allocation2 + $0x48] sm:$0xff] %vm7028_vm8, %v6972_v59  ;;  %v6392_v8 = vadd.f32 %v6391_v11, %v11660_v42  ;;  %v7256_v0 = vmax.f32 %v7192_v6, %v7224_v34  ;;  %v7128_v49 = vld [vmem:[#allocation2 + $0x37] ss:$2 sm:$0xff]  ;;  %v12559_v42 = vpop.f32.mrf.mxu0  ;;  %v5370_v59 = vand.u32 31, %v12564_v32  ;;  %v4667_v6 = vmax.f32 %v4441_v60, %v4569_v10 }
 0x587   :  { %v7160_v1 = vmax.f32 %v7096_v20, %v7128_v49  ;;  %v5259_v34 = vld [vmem:[#allocation2 + $0x36b] ss:$2 sm:$0xff] }
 0x588   :  { %v6844_v17 = vadd.f32 %v12363_v55, %v6392_v8  ;;  %v7690_v47 = vpack.c.bf16 %v7256_v0, %v7255_v4  ;;  %vm5434_vm15 = vcmp.eq.s32.totalorder %v5370_v59, 0  ;;  %v5263_v60 = vld [vmem:[#allocation2 + $0x38b] ss:$2 sm:$0xff] }
 0x589   :  { %v7670_v3 = vpack.c.bf16 %v7160_v1, %v7511_v45  ;;  %9861 = vmatmul.msk.bf16.gmra.mxu0 %vm4253_vm7, %v6555_v57  ;;  %v5626_v8 = vsel %vm5434_vm15, 0.0, %v4666_v14  ;;  %v4445_v45 = vld [vmem:[#allocation2 + $0x1f6] ss:$2 sm:$0xff] }
 0x58a   :  { %v6909_v15 = vadd.f32 %v12469_v44, %v6844_v17  ;;  %9810 = vmatmul.msk.bf16.gmra.mxu3 %vm4253_vm7, %v5931_v13  ;;  %9880 = vmatmul.msk.bf16.gmra.mxu1 %vm7028_vm8, %v7690_v47  ;;  %v5932_v0 = vpack.c.bf16 %v4667_v6, %v5626_v8  ;;  %v13609_v6 = vld [vmem:[#allocation16_spill] sm:$0xff] }
 0x58b   :  { %9904 = vmatmul.msk.bf16.gmra.mxu2 %vm7028_vm8, %v7670_v3  ;;  %v4573_v3 = vld [vmem:[#allocation2 + $0x1f7] ss:$2 sm:$0xff] }
 0x58c   :  { %v6973_v55 = vmax.f32 %v6909_v15, 0.0 }
 0x58d   :  { %v6394_v19 = vpop.f32.mrf.mxu3 }
 0x58e   :  { %7038 = vst.msk [vmem:[#allocation2 + $0x50] sm:$0xff] %vm7028_vm8, %v6973_v55  ;;  %v6395_v54 = vadd.f32 %v6394_v19, %v11711_v58  ;;  %v5131_v58 = vld [vmem:[#allocation2 + $0x36a] ss:$2 sm:$0xff]  ;;  %v12572_v20 = vpop.f32.mrf.mxu0 }
 0x58f   :  { %v5332_v29 = vmax.f32 %v5131_v58, %v5259_v34  ;;  %v4443_v19 = vld [vmem:[#allocation2 + $0x1e6] ss:$2 sm:$0xff] }
 0x590   :  { %v6845_v35 = vadd.f32 %v12368_v24, %v6395_v54  ;;  %v5137_v54 = vld [vmem:[#allocation2 + $0x39a] ss:$2 sm:$0xff]  ;;  %v4668_v34 = vmax.f32 %v4443_v19, %v4571_v51  ;;  %v4575_v51 = vld [vmem:[#allocation2 + $0x207] ss:$2 sm:$0xff] }
 0x591   :  { %v6556_v49 = vpack.c.bf16 %v5909_v7, %v5332_v29 }
 0x592   :  { %v6910_v5 = vadd.f32 %v12469_v44, %v6845_v35 }
 0x594   :  { %v6974_v11 = vmax.f32 %v6910_v5, 0.0 }
 0x595   :  { %v6396_v62 = vpop.f32.mrf.mxu3  ;;  %v7097_v57 = vld [vmem:[#allocation2 + $0x46] ss:$2 sm:$0xff]  ;;  %v7129_v15 = vld [vmem:[#allocation2 + $0x47] ss:$2 sm:$0xff] }
 0x596   :  { %7039 = vst.msk [vmem:[#allocation2 + $0x58] sm:$0xff] %vm7028_vm8, %v6974_v11  ;;  %v6397_v24 = vadd.f32 %v6396_v62, %v11729_v22  ;;  %v12582_v22 = vpop.f32.mrf.mxu0  ;;  %v7193_v31 = vld [vmem:[#allocation2 + $0x48] ss:$2 sm:$0xff]  ;;  %v7225_v35 = vld [vmem:[#allocation2 + $0x49] ss:$2 sm:$0xff]  ;;  %v7161_v2 = vmax.f32 %v7097_v57, %v7129_v15  ;;  %v5335_v11 = vmax.f32 %v5137_v54, %v5265_v52 }
 0x597   :  { %v7257_v62 = vmax.f32 %v7193_v31, %v7225_v35  ;;  %v5141_v15 = vld [vmem:[#allocation2 + $0x3ba] ss:$2 sm:$0xff] }
 0x598   :  { %v6846_v4 = vadd.f32 %v12374_v37, %v6397_v24  ;;  %v7385_v37 = vand.u32 15, %v12387_v18  ;;  %v4447_v52 = vld [vmem:[#allocation2 + $0x206] ss:$2 sm:$0xff] }
 0x599   :  { %9862 = vmatmul.msk.bf16.gmra.mxu0 %vm4253_vm7, %v6556_v49  ;;  %v13611_v31 = vld [vmem:[#allocation11_spill] sm:$0xff] }
 0x59a   :  { %v6911_v1 = vadd.f32 %v12469_v44, %v6846_v4  ;;  %9811 = vmatmul.msk.bf16.gmra.mxu3 %vm4253_vm7, %v5932_v0  ;;  %vm12587_vm0 = vcmp.eq.s32.totalorder %v7385_v37, 0  ;;  %v5374_v35 = vand.u32 31, %v13611_v31 }
 0x59c   :  { %v6975_v33 = vmax.f32 %v6911_v1, 0.0  ;;  %v7513_v1 = vsel %vm12587_vm0, 0.0, %v7161_v2  ;;  %vm5438_vm3 = vcmp.eq.s32.totalorder %v5374_v35, 0 }
 0x59d   :  { %v6399_v17 = vpop.f32.mrf.mxu3 }
 0x59e   :  { %7040 = vst.msk [vmem:[#allocation2 + $0x60] sm:$0xff] %vm7028_vm8, %v6975_v33  ;;  %v6400_v13 = vadd.f32 %v6399_v17, %v11771_v9  ;;  %v4669_v9 = vmax.f32 %v4445_v45, %v4573_v3  ;;  %v12596_v33 = vpop.f32.mrf.mxu0  ;;  %v13610_v3 = vld [vmem:[#allocation17_spill] sm:$0xff] }
 0x5a0   :  { %v6847_v47 = vadd.f32 %v12389_v43, %v6400_v13  ;;  %v5135_v43 = vld [vmem:[#allocation2 + $0x38a] ss:$2 sm:$0xff]  ;;  %v5933_v0 = vpack.c.bf16 %v4669_v9, %v4668_v34  ;;  %v4577_v9 = vld [vmem:[#allocation2 + $0x217] ss:$2 sm:$0xff] }
 0x5a1   :  { %v5334_v29 = vmax.f32 %v5135_v43, %v5263_v60  ;;  %v4670_v60 = vmax.f32 %v4447_v52, %v4575_v51 }
 0x5a2   :  { %v6912_v55 = vadd.f32 %v12469_v44, %v6847_v47 }
 0x5a3   :  { %v6557_v13 = vpack.c.bf16 %v5335_v11, %v5334_v29  ;;  %v5630_v34 = vsel %vm5438_vm3, 0.0, %v4670_v60 }
 0x5a4   :  { %v6976_v63 = vmax.f32 %v6912_v55, 0.0  ;;  %v5269_v55 = vld [vmem:[#allocation2 + $0x3bb] ss:$2 sm:$0xff] }
 0x5a5   :  { %v6401_v10 = vpop.f32.mrf.mxu3  ;;  %v7194_v5 = vld [vmem:[#allocation2 + $0x58] ss:$2 sm:$0xff]  ;;  %v7226_v25 = vld [vmem:[#allocation2 + $0x59] ss:$2 sm:$0xff]  ;;  %v5337_v59 = vmax.f32 %v5141_v15, %v5269_v55 }
 0x5a6   :  { %v7098_v14 = vld [vmem:[#allocation2 + $0x56] ss:$2 sm:$0xff]  ;;  %7041 = vst.msk [vmem:[#allocation2 + $0x68] sm:$0xff] %vm7028_vm8, %v6976_v63  ;;  %v6402_v58 = vadd.f32 %v6401_v10, %v13609_v6  ;;  %v7258_v24 = vmax.f32 %v7194_v5, %v7226_v25  ;;  %v7130_v7 = vld [vmem:[#allocation2 + $0x57] ss:$2 sm:$0xff]  ;;  %v12609_v43 = vpop.f32.mrf.mxu0 }
 0x5a7   :  { %v7162_v8 = vmax.f32 %v7098_v14, %v7130_v7  ;;  %v4449_v63 = vld [vmem:[#allocation2 + $0x216] ss:$2 sm:$0xff]  ;;  %v5267_v14 = vld [vmem:[#allocation2 + $0x3ab] ss:$2 sm:$0xff]  ;;  %v4451_v15 = vld [vmem:[#allocation2 + $0x226] ss:$2 sm:$0xff] }
 0x5a8   :  { %v6848_v4 = vadd.f32 %v12398_v36, %v6402_v58  ;;  %v7691_v49 = vpack.c.bf16 %v7258_v24, %v7257_v62  ;;  %v877_v36 = vadd.s32 472, %v10315_v21  ;;  %v4671_v5 = vmax.f32 %v4449_v63, %v4577_v9  ;;  %v5139_v25 = vld [vmem:[#allocation2 + $0x3aa] ss:$2 sm:$0xff]  ;;  %v5145_v55 = vld [vmem:[#allocation2 + $0x3da] ss:$2 sm:$0xff] }
 0x5a9   :  { %v7671_v17 = vpack.c.bf16 %v7162_v8, %v7513_v1  ;;  %9863 = vmatmul.msk.bf16.gmra.mxu0 %vm4253_vm7, %v6557_v13  ;;  %v5336_v62 = vmax.f32 %v5139_v25, %v5267_v14  ;;  %v13616_v14 = vld [vmem:[#allocation20_spill] sm:$0xff] }
 0x5aa   :  { %v6913_v47 = vadd.f32 %v12469_v44, %v6848_v4  ;;  %9812 = vmatmul.msk.bf16.gmra.mxu3 %vm4253_vm7, %v5933_v0  ;;  %9881 = vmatmul.msk.bf16.gmra.mxu1 %vm7028_vm8, %v7691_v49  ;;  %v5401_v19 = vand.u32 31, %v877_v36  ;;  %v5934_v7 = vpack.c.bf16 %v4671_v5, %v5630_v34  ;;  %v12618_v0 = vadd.s32 48, %v10315_v21  ;;  %v4585_v9 = vld [vmem:[#allocation2 + $0x257] ss:$2 sm:$0xff] }
 0x5ab   :  { %9905 = vmatmul.msk.bf16.gmra.mxu2 %vm7028_vm8, %v7671_v17  ;;  %v13613_v17 = vld [vmem:[#allocation19_spill] sm:$0xff] }
 0x5ac   :  { %v6977_v45 = vmax.f32 %v6913_v47, 0.0  ;;  %vm5721_vm2 = vcmp.eq.s32.totalorder %v5401_v19, 31  ;;  %v4453_v47 = vld [vmem:[#allocation2 + $0x236] ss:$2 sm:$0xff]  ;;  %v7387_v36 = vand.u32 15, %v12618_v0 }
 0x5ad   :  { %v6404_v37 = vpop.f32.mrf.mxu3  ;;  %v5913_v58 = vsel %vm5721_vm2, 0.0, %v5337_v59  ;;  %v5273_v19 = vld [vmem:[#allocation2 + $0x3db] ss:$2 sm:$0xff] }
 0x5ae   :  { %7042 = vst.msk [vmem:[#allocation2 + $0x70] sm:$0xff] %vm7028_vm8, %v6977_v45  ;;  %v6405_v57 = vadd.f32 %v6404_v37, %v13610_v3  ;;  %v6558_v8 = vpack.c.bf16 %v5913_v58, %v5336_v62  ;;  %v12620_v49 = vpop.f32.mrf.mxu0  ;;  %v4581_v45 = vld [vmem:[#allocation2 + $0x237] ss:$2 sm:$0xff]  ;;  %vm12627_vm4 = vcmp.eq.s32.totalorder %v7387_v36, 0  ;;  %v5339_v25 = vmax.f32 %v5145_v55, %v5273_v19  ;;  %v13618_v55 = vld [vmem:[#allocation15_spill] sm:$0xff] }
 0x5af   :  { %v4673_v35 = vmax.f32 %v4453_v47, %v4581_v45  ;;  %v13617_v45 = vld [vmem:[#allocation21_spill] sm:$0xff]  ;;  %v5405_v19 = vand.u32 31, %v13618_v55 }
 0x5b0   :  { %v6849_v54 = vadd.f32 %v12404_v61, %v6405_v57  ;;  %v13612_v61 = vld [vmem:[#allocation18_spill] sm:$0xff] }
 0x5b1   :  { %vm5725_vm5 = vcmp.eq.s32.totalorder %v5405_v19, 31 }
 0x5b2   :  { %v6914_v2 = vadd.f32 %v12469_v44, %v6849_v54  ;;  %v4579_v54 = vld [vmem:[#allocation2 + $0x227] ss:$2 sm:$0xff] }
 0x5b4   :  { %v6978_v10 = vmax.f32 %v6914_v2, 0.0  ;;  %v5271_v2 = vld [vmem:[#allocation2 + $0x3cb] ss:$2 sm:$0xff] }
 0x5b5   :  { %v6406_v11 = vpop.f32.mrf.mxu3  ;;  %v7099_v37 = vld [vmem:[#allocation2 + $0x66] ss:$2 sm:$0xff]  ;;  %v7131_v3 = vld [vmem:[#allocation2 + $0x67] ss:$2 sm:$0xff] }
 0x5b6   :  { %7043 = vst.msk [vmem:[#allocation2 + $0x78] sm:$0xff] %vm7028_vm8, %v6978_v10  ;;  %v6407_v6 = vadd.f32 %v6406_v11, %v13612_v61  ;;  %v7195_v52 = vld [vmem:[#allocation2 + $0x68] ss:$2 sm:$0xff]  ;;  %v7227_v51 = vld [vmem:[#allocation2 + $0x69] ss:$2 sm:$0xff]  ;;  %v7163_v63 = vmax.f32 %v7099_v37, %v7131_v3  ;;  %v4672_v61 = vmax.f32 %v4451_v15, %v4579_v54  ;;  %v12633_v62 = vpop.f32.mrf.mxu0  ;;  %v10124_v3 = vld [vmem:[%s13477_s4 + $0x20] sm:$0xff] }
 0x5b7   :  { %v5277_v15 = vld [vmem:[#allocation2 + $0x3fb] ss:$2 sm:$0xff]  ;;  %8096 = vmatpush.bf16.msra.mxu3 %v10124_v3  ;;  %v4459_v3 = vld [vmem:[#allocation2 + $0x266] ss:$2 sm:$0xff] }
 0x5b8   :  { %v6850_v24 = vadd.f32 %v12409_v41, %v6407_v6  ;;  %v7259_v6 = vmax.f32 %v7195_v52, %v7227_v51  ;;  %v4455_v52 = vld [vmem:[#allocation2 + $0x246] ss:$2 sm:$0xff]  ;;  %v4583_v51 = vld [vmem:[#allocation2 + $0x247] ss:$2 sm:$0xff] }
 0x5b9   :  { %9864 = vmatmul.msk.bf16.gmra.mxu0 %vm4253_vm7, %v6558_v8 }
 0x5ba   :  { %v6915_v29 = vadd.f32 %v12469_v44, %v6850_v24  ;;  %9813 = vmatmul.msk.bf16.gmra.mxu3 %vm4253_vm7, %v5934_v7 }
 0x5bc   :  { %v6979_v4 = vmax.f32 %v6915_v29, 0.0  ;;  %v5935_v29 = vpack.c.bf16 %v4673_v35, %v4672_v61 }
 0x5bd   :  { %v6409_v1 = vpop.f32.mrf.mxu3 }
 0x5be   :  { %7044 = vst.msk [vmem:[#allocation2 + $0x80] sm:$0xff] %vm7028_vm8, %v6979_v4  ;;  %v6410_v13 = vadd.f32 %v6409_v1, %v13613_v17  ;;  %v7515_v1 = vsel %vm12627_vm4, 0.0, %v7163_v63  ;;  %v12651_v35 = vpop.f32.mrf.mxu0  ;;  %v4457_v63 = vld [vmem:[#allocation2 + $0x256] ss:$2 sm:$0xff] }
 0x5c0   :  { %v6851_v41 = vadd.f32 %v12416_v50, %v6410_v13  ;;  %v5143_v50 = vld [vmem:[#allocation2 + $0x3ca] ss:$2 sm:$0xff] }
 0x5c1   :  { %v5338_v7 = vmax.f32 %v5143_v50, %v5271_v2 }
 0x5c2   :  { %v6916_v57 = vadd.f32 %v12469_v44, %v6851_v41 }
 0x5c3   :  { %v6559_v13 = vpack.c.bf16 %v5339_v25, %v5338_v7  ;;  %v5275_v25 = vld [vmem:[#allocation2 + $0x3eb] ss:$2 sm:$0xff] }
 0x5c4   :  { %v6980_v31 = vmax.f32 %v6916_v57, 0.0  ;;  %v5149_v57 = vld [vmem:[#allocation2 + $0x3fa] ss:$2 sm:$0xff] }
 0x5c5   :  { %v6411_v59 = vpop.f32.mrf.mxu3  ;;  %v7196_v60 = vld [vmem:[#allocation2 + $0x78] ss:$2 sm:$0xff]  ;;  %v7228_v10 = vld [vmem:[#allocation2 + $0x79] ss:$2 sm:$0xff]  ;;  %v5341_v2 = vmax.f32 %v5149_v57, %v5277_v15 }
 0x5c6   :  { %v7100_v5 = vld [vmem:[#allocation2 + $0x76] ss:$2 sm:$0xff]  ;;  %7045 = vst.msk [vmem:[#allocation2 + $0x88] sm:$0xff] %vm7028_vm8, %v6980_v31  ;;  %v6412_v11 = vadd.f32 %v6411_v59, %v13616_v14  ;;  %v7260_v58 = vmax.f32 %v7196_v60, %v7228_v10  ;;  %v7132_v34 = vld [vmem:[#allocation2 + $0x77] ss:$2 sm:$0xff]  ;;  %v4674_v59 = vmax.f32 %v4455_v52, %v4583_v51  ;;  %v4675_v10 = vmax.f32 %v4457_v63, %v4585_v9 }
 0x5c7   :  { %v7164_v24 = vmax.f32 %v7100_v5, %v7132_v34  ;;  %v5147_v5 = vld [vmem:[#allocation2 + $0x3ea] ss:$2 sm:$0xff]  ;;  %v5917_v61 = vsel %vm5725_vm5, 0.0, %v5341_v2  ;;  %v4587_v57 = vld [vmem:[#allocation2 + $0x267] ss:$2 sm:$0xff] }
 0x5c8   :  { %v6852_v8 = vadd.f32 %v12422_v12, %v6412_v11  ;;  %v7692_v4 = vpack.c.bf16 %v7260_v58, %v7259_v6  ;;  %v854_v12 = vadd.s32 288, %v10315_v21  ;;  %v5340_v58 = vmax.f32 %v5147_v5, %v5275_v25  ;;  %v13621_v9 = vld [vmem:[#allocation24_spill] sm:$0xff] }
 0x5c9   :  { %v7672_v17 = vpack.c.bf16 %v7164_v24, %v7515_v1  ;;  %9865 = vmatmul.msk.bf16.gmra.mxu0 %vm4253_vm7, %v6559_v13  ;;  %v4676_v2 = vmax.f32 %v4459_v3, %v4587_v57 }
 0x5ca   :  { %v6917_v41 = vadd.f32 %v12469_v44, %v6852_v8  ;;  %9814 = vmatmul.msk.bf16.gmra.mxu3 %vm4253_vm7, %v5935_v29  ;;  %9882 = vmatmul.msk.bf16.gmra.mxu1 %vm7028_vm8, %v7692_v4  ;;  %v5378_v31 = vand.u32 31, %v854_v12  ;;  %v6560_v7 = vpack.c.bf16 %v5917_v61, %v5340_v58  ;;  %v12659_v29 = vpop.f32.mrf.mxu0  ;;  %v4589_v12 = vld [vmem:[#allocation2 + $0x277] ss:$2 sm:$0xff] }
 0x5cb   :  { %9906 = vmatmul.msk.bf16.gmra.mxu2 %vm7028_vm8, %v7672_v17  ;;  %v13620_v17 = vld [vmem:[#allocation23_spill] sm:$0xff] }
 0x5cc   :  { %v6981_v47 = vmax.f32 %v6917_v41, 0.0  ;;  %vm5442_vm6 = vcmp.eq.s32.totalorder %v5378_v31, 0 }
 0x5cd   :  { %v6414_v36 = vpop.f32.mrf.mxu3  ;;  %v5634_v6 = vsel %vm5442_vm6, 0.0, %v4674_v59 }
 0x5ce   :  { %7046 = vst.msk [vmem:[#allocation2 + $0x90] sm:$0xff] %vm7028_vm8, %v6981_v47  ;;  %v6415_v37 = vadd.f32 %v6414_v36, %v13617_v45  ;;  %v5936_v24 = vpack.c.bf16 %v4675_v10, %v5634_v6  ;;  %v4461_v47 = vld [vmem:[#allocation2 + $0x276] ss:$2 sm:$0xff] }
 0x5d0   :  { %v6853_v54 = vadd.f32 %v12428_v56, %v6415_v37  ;;  %v13619_v56 = vld [vmem:[#allocation22_spill] sm:$0xff] }
 0x5d2   :  { %v6918_v50 = vadd.f32 %v12469_v44, %v6853_v54  ;;  %v4677_v54 = vmax.f32 %v4461_v47, %v4589_v12  ;;  %v4593_v12 = vld [vmem:[#allocation2 + $0x297] ss:$2 sm:$0xff] }
 0x5d4   :  { %v6982_v60 = vmax.f32 %v6918_v50, 0.0 }
 0x5d5   :  { %v6416_v14 = vpop.f32.mrf.mxu3  ;;  %v7101_v36 = vld [vmem:[#allocation2 + $0x86] ss:$2 sm:$0xff]  ;;  %v7133_v45 = vld [vmem:[#allocation2 + $0x87] ss:$2 sm:$0xff] }
 0x5d6   :  { %7047 = vst.msk [vmem:[#allocation2 + $0x98] sm:$0xff] %vm7028_vm8, %v6982_v60  ;;  %v6417_v11 = vadd.f32 %v6416_v14, %v13619_v56  ;;  %v7197_v15 = vld [vmem:[#allocation2 + $0x88] ss:$2 sm:$0xff]  ;;  %v7229_v55 = vld [vmem:[#allocation2 + $0x89] ss:$2 sm:$0xff]  ;;  %v7165_v52 = vmax.f32 %v7101_v36, %v7133_v45  ;;  %v5937_v14 = vpack.c.bf16 %v4677_v54, %v4676_v2 }
 0x5d7   :  { %v7261_v59 = vmax.f32 %v7197_v15, %v7229_v55 }
 0x5d8   :  { %v6854_v34 = vadd.f32 %v12439_v46, %v6417_v11  ;;  %v7389_v46 = vand.u32 15, %v10417_v39 }
 0x5d9   :  { %9866 = vmatmul.msk.bf16.gmra.mxu0 %vm4253_vm7, %v6560_v7  ;;  %v13622_v7 = vld [vmem:[#allocation25_spill] sm:$0xff] }
 0x5da   :  { %v6919_v8 = vadd.f32 %v12469_v44, %v6854_v34  ;;  %9815 = vmatmul.msk.bf16.gmra.mxu3 %vm4253_vm7, %v5936_v24  ;;  %vm7421_vm1 = vcmp.eq.s32.totalorder %v7389_v46, 0  ;;  %v4465_v46 = vld [vmem:[#allocation2 + $0x296] ss:$2 sm:$0xff] }
 0x5db   :  { %v7517_v11 = vsel %vm7421_vm1, 0.0, %v7165_v52  ;;  %v4679_v3 = vmax.f32 %v4465_v46, %v4593_v12 }
 0x5dc   :  { %v6983_v4 = vmax.f32 %v6919_v8, 0.0 }
 0x5dd   :  { %v6419_v1 = vpop.f32.mrf.mxu3 }
 0x5de   :  { %7048 = vst.msk [vmem:[#allocation2 + $0xa0] sm:$0xff] %vm7028_vm8, %v6983_v4  ;;  %v6420_v13 = vadd.f32 %v6419_v1, %v13620_v17  ;;  %v4463_v17 = vld [vmem:[#allocation2 + $0x286] ss:$2 sm:$0xff] }
 0x5e0   :  { %v6855_v41 = vadd.f32 %v12445_v27, %v6420_v13  ;;  %v4591_v13 = vld [vmem:[#allocation2 + $0x287] ss:$2 sm:$0xff] }
 0x5e1   :  { %v4678_v45 = vmax.f32 %v4463_v17, %v4591_v13 }
 0x5e2   :  { %v6920_v37 = vadd.f32 %v12469_v44, %v6855_v41  ;;  %v13623_v41 = vld [vmem:[#allocation12_spill] sm:$0xff] }
 0x5e3   :  { %v5382_v47 = vand.u32 31, %v13623_v41 }
 0x5e4   :  { %v6984_v19 = vmax.f32 %v6920_v37, 0.0 }
 0x5e5   :  { %v6421_v51 = vpop.f32.mrf.mxu3  ;;  %v7198_v31 = vld [vmem:[#allocation2 + $0x98] ss:$2 sm:$0xff]  ;;  %v7230_v63 = vld [vmem:[#allocation2 + $0x99] ss:$2 sm:$0xff]  ;;  %vm5446_vm9 = vcmp.eq.s32.totalorder %v5382_v47, 0 }
 0x5e6   :  { %v7102_v27 = vld [vmem:[#allocation2 + $0x96] ss:$2 sm:$0xff]  ;;  %7049 = vst.msk [vmem:[#allocation2 + $0xa8] sm:$0xff] %vm7028_vm8, %v6984_v19  ;;  %v6422_v50 = vadd.f32 %v6421_v51, %v13621_v9  ;;  %v7262_v60 = vmax.f32 %v7198_v31, %v7230_v63  ;;  %v7134_v10 = vld [vmem:[#allocation2 + $0x97] ss:$2 sm:$0xff]  ;;  %v5638_v55 = vsel %vm5446_vm9, 0.0, %v4678_v45 }
 0x5e7   :  { %v7166_v5 = vmax.f32 %v7102_v27, %v7134_v10  ;;  %v7779_v24 = vpop.f32.mrf.mxu1  ;;  %v5938_v19 = vpack.c.bf16 %v4679_v3, %v5638_v55  ;;  %v12687_v51 = vadd.s32 80, %v10315_v21  ;;  %v13624_v63 = vld [vmem:[#allocation26_spill] sm:$0xff]  ;;  %v13625_v9 = vld [vmem:[#allocation71_spill] sm:$0xff] }
 0x5e8   :  { %v6856_v25 = vadd.f32 %v12449_v26, %v6422_v50  ;;  %v7693_v56 = vpack.c.bf16 %v7262_v60, %v7261_v59  ;;  %v12710_v55 = vld [vmem:[%s13474_s1 + $0x3] ss:$0 sm:$0xff] }
 0x5e9   :  { %v7673_v61 = vpack.c.bf16 %v7166_v5, %v7517_v11  ;;  %v7391_v2 = vand.u32 15, %v12687_v51  ;;  %v4467_v5 = vld [vmem:[#allocation2 + $0x2a6] ss:$2 sm:$0xff] }
 0x5ea   :  { %v6921_v6 = vadd.f32 %v12469_v44, %v6856_v25  ;;  %9816 = vmatmul.msk.bf16.gmra.mxu3 %vm4253_vm7, %v5937_v14  ;;  %9883 = vmatmul.msk.bf16.gmra.mxu1 %vm7028_vm8, %v7693_v56  ;;  %v4595_v25 = vld [vmem:[#allocation2 + $0x2a7] ss:$2 sm:$0xff] }
 0x5eb   :  { %9907 = vmatmul.msk.bf16.gmra.mxu2 %vm7028_vm8, %v7673_v61  ;;  %vm12694_vm10 = vcmp.eq.s32.totalorder %v7391_v2, 0  ;;  %v4680_v13 = vmax.f32 %v4467_v5, %v4595_v25  ;;  %v4601_v5 = vld [vmem:[#allocation2 + $0x2d7] ss:$2 sm:$0xff] }
 0x5ec   :  { %v6985_v58 = vmax.f32 %v6921_v6, 0.0 }
 0x5ed   :  { %v6424_v34 = vpop.f32.mrf.mxu3 }
 0x5ee   :  { %7050 = vst.msk [vmem:[#allocation2 + $0xb0] sm:$0xff] %vm7028_vm8, %v6985_v58  ;;  %v6425_v8 = vadd.f32 %v6424_v34, %v13622_v7  ;;  %v7928_v26 = vpop.f32.mrf.mxu2 }
 0x5ef   :  { %v12676_v4 = vadd.f32 %v7928_v26, %v7779_v24  ;;  %v12698_v26 = vpop.f32.mrf.mxu1 }
 0x5f0   :  { %v6857_v1 = vadd.f32 %v12457_v48, %v6425_v8 }
 0x5f2   :  { %v6922_v36 = vadd.f32 %v12469_v44, %v6857_v1 }
 0x5f4   :  { %v6986_v37 = vmax.f32 %v6922_v36, 0.0  ;;  %v13629_v36 = vld [vmem:[#allocation73_spill] sm:$0xff] }
 0x5f5   :  { %v6426_v57 = vpop.f32.mrf.mxu3  ;;  %v7103_v59 = vld [vmem:[#allocation2 + $0xa6] ss:$2 sm:$0xff]  ;;  %v7135_v60 = vld [vmem:[#allocation2 + $0xa7] ss:$2 sm:$0xff] }
 0x5f6   :  { %7051 = vst.msk [vmem:[#allocation2 + $0xb8] sm:$0xff] %vm7028_vm8, %v6986_v37  ;;  %v6427_v15 = vadd.f32 %v6426_v57, %v12122_v16  ;;  %v4469_v16 = vld [vmem:[#allocation2 + $0x2b6] ss:$2 sm:$0xff]  ;;  %v7231_v56 = vld [vmem:[#allocation2 + $0xa9] ss:$2 sm:$0xff]  ;;  %v7167_v6 = vmax.f32 %v7103_v59, %v7135_v60  ;;  %v12700_v1 = vpop.f32.mrf.mxu2 }
 0x5f7   :  { %v7199_v14 = vld [vmem:[#allocation2 + $0xa8] ss:$2 sm:$0xff]  ;;  %v4599_v59 = vld [vmem:[#allocation2 + $0x2c7] ss:$2 sm:$0xff] }
 0x5f8   :  { %v6858_v48 = vadd.f32 %v12462_v40, %v6427_v15  ;;  %v4597_v40 = vld [vmem:[#allocation2 + $0x2b7] ss:$2 sm:$0xff]  ;;  %v7263_v41 = vmax.f32 %v7199_v14, %v7231_v56  ;;  %v7519_v57 = vsel %vm12694_vm10, 0.0, %v7167_v6 }
 0x5f9   :  { %v4681_v61 = vmax.f32 %v4469_v16, %v4597_v40  ;;  %v13631_v16 = vld [vmem:[#allocation74_spill] sm:$0xff]  ;;  %v13632_v6 = vld [vmem:[#allocation29_spill] sm:$0xff] }
 0x5fa   :  { %v6923_v54 = vadd.f32 %v12469_v44, %v6858_v48  ;;  %9817 = vmatmul.msk.bf16.gmra.mxu3 %vm4253_vm7, %v5938_v19  ;;  %v4471_v40 = vld [vmem:[#allocation2 + $0x2c6] ss:$2 sm:$0xff] }
 0x5fb   :  { %v5939_v37 = vpack.c.bf16 %v4681_v61, %v4680_v13  ;;  %v4682_v14 = vmax.f32 %v4471_v40, %v4599_v59  ;;  %v13636_v40 = vld [vmem:[#allocation32_spill] sm:$0xff] }
 0x5fc   :  { %v6987_v52 = vmax.f32 %v6923_v54, 0.0  ;;  %v862_v54 = vadd.s32 352, %v10315_v21 }
 0x5fd   :  { %v6429_v31 = vpop.f32.mrf.mxu3 }
 0x5fe   :  { %7052 = vst.msk [vmem:[#allocation2 + $0xc0] sm:$0xff] %vm7028_vm8, %v6987_v52  ;;  %v6430_v27 = vadd.f32 %v6429_v31, %v13624_v63  ;;  %v13630_v63 = vld [vmem:[#allocation28_spill] sm:$0xff]  ;;  %v5386_v60 = vand.u32 31, %v862_v54 }
 0x600   :  { %v6859_v50 = vadd.f32 %v13625_v9, %v6430_v27  ;;  %vm5450_vm11 = vcmp.eq.s32.totalorder %v5386_v60, 0 }
 0x602   :  { %v6924_v10 = vadd.f32 %v12469_v44, %v6859_v50  ;;  %v13628_v44 = vld [vmem:[#allocation27_spill] sm:$0xff] }
 0x604   :  { %v6988_v11 = vmax.f32 %v6924_v10, 0.0  ;;  %v4473_v10 = vld [vmem:[#allocation2 + $0x2d6] ss:$2 sm:$0xff] }
 0x605   :  { %v6431_v34 = vpop.f32.mrf.mxu3  ;;  %v7200_v24 = vld [vmem:[#allocation2 + $0xb8] ss:$2 sm:$0xff]  ;;  %v7232_v7 = vld [vmem:[#allocation2 + $0xb9] ss:$2 sm:$0xff] }
 0x606   :  { %v7104_v8 = vld [vmem:[#allocation2 + $0xb6] ss:$2 sm:$0xff]  ;;  %7053 = vst.msk [vmem:[#allocation2 + $0xc8] sm:$0xff] %vm7028_vm8, %v6988_v11  ;;  %v6432_v17 = vadd.f32 %v6431_v34, %v13628_v44  ;;  %v7264_v47 = vmax.f32 %v7200_v24, %v7232_v7  ;;  %v7136_v46 = vld [vmem:[#allocation2 + $0xb7] ss:$2 sm:$0xff]  ;;  %v4683_v11 = vmax.f32 %v4473_v10, %v4601_v5  ;;  %v5642_v34 = vsel %vm5450_vm11, 0.0, %v4682_v14 }
 0x607   :  { %v7168_v12 = vmax.f32 %v7104_v8, %v7136_v46  ;;  %v7784_v31 = vpop.f32.mrf.mxu1  ;;  %v13633_v24 = vld [vmem:[#allocation75_spill] sm:$0xff] }
 0x608   :  { %v6860_v45 = vadd.f32 %v13629_v36, %v6432_v17  ;;  %v7694_v3 = vpack.c.bf16 %v7264_v47, %v7263_v41  ;;  %v5940_v8 = vpack.c.bf16 %v4683_v11, %v5642_v34  ;;  %v13634_v41 = vld [vmem:[#allocation31_spill] sm:$0xff]  ;;  %v13635_v36 = vld [vmem:[#allocation65_spill] sm:$0xff] }
 0x609   :  { %v7674_v15 = vpack.c.bf16 %v7168_v12, %v7519_v57  ;;  %v4477_v12 = vld [vmem:[#allocation2 + $0x2f6] ss:$2 sm:$0xff] }
 0x60a   :  { %v6925_v48 = vadd.f32 %v12710_v55, %v6860_v45  ;;  %9818 = vmatmul.msk.bf16.gmra.mxu3 %vm4253_vm7, %v5939_v37  ;;  %9884 = vmatmul.msk.bf16.gmra.mxu1 %vm7028_vm8, %v7694_v3  ;;  %v7393_v45 = vand.u32 15, %v13635_v36  ;;  %v4605_v37 = vld [vmem:[#allocation2 + $0x2f7] ss:$2 sm:$0xff] }
 0x60b   :  { %9908 = vmatmul.msk.bf16.gmra.mxu2 %vm7028_vm8, %v7674_v15 }
 0x60c   :  { %v6989_v19 = vmax.f32 %v6925_v48, 0.0  ;;  %v4475_v48 = vld [vmem:[#allocation2 + $0x2e6] ss:$2 sm:$0xff]  ;;  %vm7425_vm12 = vcmp.eq.s32.totalorder %v7393_v45, 0 }
 0x60d   :  { %v6434_v52 = vpop.f32.mrf.mxu3 }
 0x60e   :  { %7054 = vst.msk [vmem:[#allocation2 + $0xd0] sm:$0xff] %vm7028_vm8, %v6989_v19  ;;  %v6435_v27 = vadd.f32 %v6434_v52, %v13630_v63  ;;  %v7933_v9 = vpop.f32.mrf.mxu2  ;;  %v4603_v19 = vld [vmem:[#allocation2 + $0x2e7] ss:$2 sm:$0xff]  ;;  %v4685_v63 = vmax.f32 %v4477_v12, %v4605_v37  ;;  %v4609_v12 = vld [vmem:[#allocation2 + $0x317] ss:$2 sm:$0xff] }
 0x60f   :  { %v12719_v50 = vadd.f32 %v7933_v9, %v7784_v31  ;;  %v4684_v60 = vmax.f32 %v4475_v48, %v4603_v19  ;;  %v13639_v48 = vld [vmem:[#allocation34_spill] sm:$0xff] }
 0x610   :  { %v6861_v2 = vadd.f32 %v13631_v16, %v6435_v27 }
 0x611   :  { %v5941_v11 = vpack.c.bf16 %v4685_v63, %v4684_v60 }
 0x612   :  { %v6926_v25 = vadd.f32 %v12710_v55, %v6861_v2 }
 0x614   :  { %v6990_v56 = vmax.f32 %v6926_v25, 0.0 }
 0x615   :  { %v6436_v61 = vpop.f32.mrf.mxu3  ;;  %v7105_v3 = vld [vmem:[#allocation2 + $0xc6] ss:$2 sm:$0xff]  ;;  %v7137_v57 = vld [vmem:[#allocation2 + $0xc7] ss:$2 sm:$0xff] }
 0x616   :  { %7055 = vst.msk [vmem:[#allocation2 + $0xd8] sm:$0xff] %vm7028_vm8, %v6990_v56  ;;  %v6437_v58 = vadd.f32 %v6436_v61, %v13632_v6  ;;  %v7201_v54 = vld [vmem:[#allocation2 + $0xc8] ss:$2 sm:$0xff]  ;;  %v7233_v52 = vld [vmem:[#allocation2 + $0xc9] ss:$2 sm:$0xff]  ;;  %v7169_v27 = vmax.f32 %v7105_v3, %v7137_v57 }
 0x617   :  { %v7265_v10 = vmax.f32 %v7201_v54, %v7233_v52 }
 0x618   :  { %v6862_v7 = vadd.f32 %v13633_v24, %v6437_v58  ;;  %v7521_v6 = vsel %vm7425_vm12, 0.0, %v7169_v27  ;;  %v12751_v27 = vadd.s32 112, %v10315_v21 }
 0x61a   :  { %v6927_v44 = vadd.f32 %v12710_v55, %v6862_v7  ;;  %9819 = vmatmul.msk.bf16.gmra.mxu3 %vm4253_vm7, %v5940_v8  ;;  %v13637_v8 = vld [vmem:[#allocation33_spill] sm:$0xff] }
 0x61c   :  { %v6991_v17 = vmax.f32 %v6927_v44, 0.0 }
 0x61d   :  { %v6439_v13 = vpop.f32.mrf.mxu3 }
 0x61e   :  { %7056 = vst.msk [vmem:[#allocation2 + $0xe0] sm:$0xff] %vm7028_vm8, %v6991_v17  ;;  %v6440_v47 = vadd.f32 %v6439_v13, %v13634_v41  ;;  %v4479_v17 = vld [vmem:[#allocation2 + $0x306] ss:$2 sm:$0xff]  ;;  %v4607_v13 = vld [vmem:[#allocation2 + $0x307] ss:$2 sm:$0xff]  ;;  %v13638_v41 = vld [vmem:[#allocation13_spill] sm:$0xff] }
 0x61f   :  { %v4686_v37 = vmax.f32 %v4479_v17, %v4607_v13 }
 0x620   :  { %v6863_v46 = vadd.f32 %v12522_v28, %v6440_v47  ;;  %v5390_v47 = vand.u32 31, %v13638_v41 }
 0x622   :  { %v6928_v15 = vadd.f32 %v12710_v55, %v6863_v46  ;;  %v4481_v46 = vld [vmem:[#allocation2 + $0x316] ss:$2 sm:$0xff]  ;;  %vm5454_vm13 = vcmp.eq.s32.totalorder %v5390_v47, 0 }
 0x623   :  { %v4687_v57 = vmax.f32 %v4481_v46, %v4609_v12  ;;  %v5646_v54 = vsel %vm5454_vm13, 0.0, %v4686_v37 }
 0x624   :  { %v6992_v31 = vmax.f32 %v6928_v15, 0.0 }
 0x625   :  { %v6441_v9 = vpop.f32.mrf.mxu3  ;;  %v7202_v16 = vld [vmem:[#allocation2 + $0xd8] ss:$2 sm:$0xff]  ;;  %v7234_v2 = vld [vmem:[#allocation2 + $0xd9] ss:$2 sm:$0xff]  ;;  %v5942_v52 = vpack.c.bf16 %v4687_v57, %v5646_v54 }
 0x626   :  { %v7106_v28 = vld [vmem:[#allocation2 + $0xd6] ss:$2 sm:$0xff]  ;;  %7057 = vst.msk [vmem:[#allocation2 + $0xe8] sm:$0xff] %vm7028_vm8, %v6992_v31  ;;  %v6442_v59 = vadd.f32 %v6441_v9, %v13636_v40  ;;  %v7266_v5 = vmax.f32 %v7202_v16, %v7234_v2  ;;  %v7138_v25 = vld [vmem:[#allocation2 + $0xd7] ss:$2 sm:$0xff]  ;;  %v13640_v16 = vld [vmem:[#allocation35_spill] sm:$0xff] }
 0x627   :  { %v7170_v14 = vmax.f32 %v7106_v28, %v7138_v25  ;;  %v4485_v40 = vld [vmem:[#allocation2 + $0x336] ss:$2 sm:$0xff]  ;;  %v4483_v25 = vld [vmem:[#allocation2 + $0x326] ss:$2 sm:$0xff] }
 0x628   :  { %v6864_v56 = vadd.f32 %v12531_v30, %v6442_v59  ;;  %v7695_v61 = vpack.c.bf16 %v7266_v5, %v7265_v10  ;;  %v7395_v59 = vand.u32 15, %v12751_v27  ;;  %v13642_v54 = vld [vmem:[#allocation38_spill] sm:$0xff] }
 0x629   :  { %v7675_v58 = vpack.c.bf16 %v7170_v14, %v7521_v6  ;;  %v4611_v14 = vld [vmem:[#allocation2 + $0x327] ss:$2 sm:$0xff] }
 0x62a   :  { %v6929_v34 = vadd.f32 %v12710_v55, %v6864_v56  ;;  %9820 = vmatmul.msk.bf16.gmra.mxu3 %vm4253_vm7, %v5941_v11  ;;  %9885 = vmatmul.msk.bf16.gmra.mxu1 %vm7028_vm8, %v7695_v61  ;;  %vm7427_vm14 = vcmp.eq.s32.totalorder %v7395_v59, 0 }
 0x62b   :  { %9909 = vmatmul.msk.bf16.gmra.mxu2 %vm7028_vm8, %v7675_v58 }
 0x62c   :  { %v6993_v24 = vmax.f32 %v6929_v34, 0.0 }
 0x62d   :  { %v6444_v7 = vpop.f32.mrf.mxu3 }
 0x62e   :  { %7058 = vst.msk [vmem:[#allocation2 + $0xf0] sm:$0xff] %vm7028_vm8, %v6993_v24  ;;  %v6445_v44 = vadd.f32 %v6444_v7, %v13637_v8  ;;  %v13641_v8 = vld [vmem:[#allocation36_spill] sm:$0xff] }
 0x630   :  { %v6865_v30 = vadd.f32 %v12544_v23, %v6445_v44 }
 0x632   :  { %v6930_v45 = vadd.f32 %v12710_v55, %v6865_v30  ;;  %v4688_v30 = vmax.f32 %v4483_v25, %v4611_v14 }
 0x634   :  { %v6994_v3 = vmax.f32 %v6930_v45, 0.0 }
 0x635   :  { %v6446_v15 = vpop.f32.mrf.mxu3  ;;  %v7107_v60 = vld [vmem:[#allocation2 + $0xe6] ss:$2 sm:$0xff]  ;;  %v7139_v10 = vld [vmem:[#allocation2 + $0xe7] ss:$2 sm:$0xff] }
 0x636   :  { %7059 = vst.msk [vmem:[#allocation2 + $0xf8] sm:$0xff] %vm7028_vm8, %v6994_v3  ;;  %v6447_v19 = vadd.f32 %v6446_v15, %v13639_v48  ;;  %v7203_v56 = vld [vmem:[#allocation2 + $0xe8] ss:$2 sm:$0xff]  ;;  %v7235_v11 = vld [vmem:[#allocation2 + $0xe9] ss:$2 sm:$0xff]  ;;  %v7171_v58 = vmax.f32 %v7107_v60, %v7139_v10  ;;  %v870_v48 = vadd.s32 416, %v10315_v21 }
 0x637   :  { %v7267_v17 = vmax.f32 %v7203_v56, %v7235_v11  ;;  %v13643_v10 = vld [vmem:[#allocation39_spill] sm:$0xff] }
 0x638   :  { %v6866_v23 = vadd.f32 %v12559_v42, %v6447_v19  ;;  %v4613_v42 = vld [vmem:[#allocation2 + $0x337] ss:$2 sm:$0xff]  ;;  %v7523_v37 = vsel %vm7427_vm14, 0.0, %v7171_v58 }
 0x639   :  { %v4689_v6 = vmax.f32 %v4485_v40, %v4613_v42  ;;  %v13644_v58 = vld [vmem:[#allocation40_spill] sm:$0xff] }
 0x63a   :  { %v6931_v31 = vadd.f32 %v12710_v55, %v6866_v23  ;;  %9821 = vmatmul.msk.bf16.gmra.mxu3 %vm4253_vm7, %v5942_v52  ;;  %v4487_v52 = vld [vmem:[#allocation2 + $0x346] ss:$2 sm:$0xff] }
 0x63b   :  { %v5943_v12 = vpack.c.bf16 %v4689_v6, %v4688_v30 }
 0x63c   :  { %v6995_v63 = vmax.f32 %v6931_v31, 0.0  ;;  %v4615_v31 = vld [vmem:[#allocation2 + $0x347] ss:$2 sm:$0xff] }
 0x63d   :  { %v6449_v9 = vpop.f32.mrf.mxu3  ;;  %v4690_v40 = vmax.f32 %v4487_v52, %v4615_v31 }
 0x63e   :  { %7060 = vst.msk [vmem:[#allocation2 + $0x100] sm:$0xff] %vm7028_vm8, %v6995_v63  ;;  %v6450_v2 = vadd.f32 %v6449_v9, %v13640_v16  ;;  %v5394_v63 = vand.u32 31, %v870_v48  ;;  %v12769_v9 = vpop.f32.mrf.mxu0  ;;  %v4489_v16 = vld [vmem:[#allocation2 + $0x356] ss:$2 sm:$0xff] }
 0x640   :  { %v6867_v28 = vadd.f32 %v12572_v20, %v6450_v2  ;;  %v4617_v2 = vld [vmem:[#allocation2 + $0x357] ss:$2 sm:$0xff]  ;;  %vm5458_vm15 = vcmp.eq.s32.totalorder %v5394_v63, 0 }
 0x641   :  { %v4691_v42 = vmax.f32 %v4489_v16, %v4617_v2  ;;  %v5650_v25 = vsel %vm5458_vm15, 0.0, %v4690_v40 }
 0x642   :  { %v6932_v5 = vadd.f32 %v12710_v55, %v6867_v28 }
 0x643   :  { %v5944_v14 = vpack.c.bf16 %v4691_v42, %v5650_v25  ;;  %v13649_v25 = vld [vmem:[#allocation42_spill] sm:$0xff] }
 0x644   :  { %v6996_v61 = vmax.f32 %v6932_v5, 0.0 }
 0x645   :  { %v6451_v34 = vpop.f32.mrf.mxu3  ;;  %v7204_v24 = vld [vmem:[#allocation2 + $0xf8] ss:$2 sm:$0xff]  ;;  %v7236_v7 = vld [vmem:[#allocation2 + $0xf9] ss:$2 sm:$0xff] }
 0x646   :  { %v7108_v20 = vld [vmem:[#allocation2 + $0xf6] ss:$2 sm:$0xff]  ;;  %7061 = vst.msk [vmem:[#allocation2 + $0x108] sm:$0xff] %vm7028_vm8, %v6996_v61  ;;  %v6452_v44 = vadd.f32 %v6451_v34, %v13641_v8  ;;  %v7268_v13 = vmax.f32 %v7204_v24, %v7236_v7  ;;  %v7140_v41 = vld [vmem:[#allocation2 + $0xf7] ss:$2 sm:$0xff]  ;;  %v12777_v11 = vpop.f32.mrf.mxu0 }
 0x647   :  { %v7172_v47 = vmax.f32 %v7108_v20, %v7140_v41  ;;  %v4493_v7 = vld [vmem:[#allocation2 + $0x376] ss:$2 sm:$0xff]  ;;  %v4619_v41 = vld [vmem:[#allocation2 + $0x367] ss:$2 sm:$0xff] }
 0x648   :  { %v6868_v46 = vadd.f32 %v12582_v22, %v6452_v44  ;;  %v7696_v45 = vpack.c.bf16 %v7268_v13, %v7267_v17  ;;  %v13645_v20 = vld [vmem:[#allocation8_spill] sm:$0xff] }
 0x649   :  { %v7676_v3 = vpack.c.bf16 %v7172_v47, %v7523_v37  ;;  %v7397_v8 = vand.u32 15, %v13645_v20  ;;  %v4621_v44 = vld [vmem:[#allocation2 + $0x377] ss:$2 sm:$0xff]  ;;  %v4491_v13 = vld [vmem:[#allocation2 + $0x366] ss:$2 sm:$0xff] }
 0x64a   :  { %v6933_v57 = vadd.f32 %v12710_v55, %v6868_v46  ;;  %9822 = vmatmul.msk.bf16.gmra.mxu3 %vm4253_vm7, %v5943_v12  ;;  %9886 = vmatmul.msk.bf16.gmra.mxu1 %vm7028_vm8, %v7696_v45  ;;  %v4693_v45 = vmax.f32 %v4493_v7, %v4621_v44 }
 0x64b   :  { %9910 = vmatmul.msk.bf16.gmra.mxu2 %vm7028_vm8, %v7676_v3  ;;  %vm12784_vm0 = vcmp.eq.s32.totalorder %v7397_v8, 0  ;;  %v13652_v3 = vld [vmem:[#allocation44_spill] sm:$0xff] }
 0x64c   :  { %v6997_v15 = vmax.f32 %v6933_v57, 0.0 }
 0x64d   :  { %v6454_v19 = vpop.f32.mrf.mxu3 }
 0x64e   :  { %7062 = vst.msk [vmem:[#allocation2 + $0x110] sm:$0xff] %vm7028_vm8, %v6997_v15  ;;  %v6455_v22 = vadd.f32 %v6454_v19, %v13642_v54  ;;  %v13648_v54 = vld [vmem:[#allocation41_spill] sm:$0xff] }
 0x650   :  { %v6869_v23 = vadd.f32 %v12596_v33, %v6455_v22 }
 0x652   :  { %v6934_v28 = vadd.f32 %v12710_v55, %v6869_v23  ;;  %v4692_v23 = vmax.f32 %v4491_v13, %v4619_v41 }
 0x654   :  { %v6998_v59 = vmax.f32 %v6934_v28, 0.0  ;;  %v5945_v28 = vpack.c.bf16 %v4693_v45, %v4692_v23  ;;  %v836_v45 = vadd.s32 144, %v10315_v21 }
 0x655   :  { %v6456_v60 = vpop.f32.mrf.mxu3  ;;  %v7141_v30 = vld [vmem:[#allocation2 + $0x107] ss:$2 sm:$0xff]  ;;  %v7205_v47 = vld [vmem:[#allocation2 + $0x108] ss:$2 sm:$0xff] }
 0x656   :  { %7063 = vst.msk [vmem:[#allocation2 + $0x118] sm:$0xff] %vm7028_vm8, %v6998_v59  ;;  %v6457_v5 = vadd.f32 %v6456_v60, %v13643_v10  ;;  %v7237_v46 = vld [vmem:[#allocation2 + $0x109] ss:$2 sm:$0xff] }
 0x657   :  { %v7269_v52 = vmax.f32 %v7205_v47, %v7237_v46 }
 0x658   :  { %v6870_v33 = vadd.f32 %v12609_v43, %v6457_v5  ;;  %v7109_v43 = vld [vmem:[#allocation2 + $0x106] ss:$2 sm:$0xff] }
 0x659   :  { %v7173_v37 = vmax.f32 %v7109_v43, %v7141_v30  ;;  %v13651_v30 = vld [vmem:[#allocation43_spill] sm:$0xff] }
 0x65a   :  { %v6935_v56 = vadd.f32 %v12710_v55, %v6870_v33  ;;  %9823 = vmatmul.msk.bf16.gmra.mxu3 %vm4253_vm7, %v5944_v14 }
 0x65b   :  { %v7525_v59 = vsel %vm12784_vm0, 0.0, %v7173_v37 }
 0x65c   :  { %v6999_v61 = vmax.f32 %v6935_v56, 0.0  ;;  %v4495_v56 = vld [vmem:[#allocation2 + $0x386] ss:$2 sm:$0xff] }
 0x65d   :  { %v6459_v6 = vpop.f32.mrf.mxu3 }
 0x65e   :  { %7064 = vst.msk [vmem:[#allocation2 + $0x120] sm:$0xff] %vm7028_vm8, %v6999_v61  ;;  %v6460_v34 = vadd.f32 %v6459_v6, %v13644_v58  ;;  %v4623_v61 = vld [vmem:[#allocation2 + $0x387] ss:$2 sm:$0xff] }
 0x65f   :  { %v13650_v6 = vld [vmem:[#allocation14_spill] sm:$0xff]  ;;  %v4694_v20 = vmax.f32 %v4495_v56, %v4623_v61 }
 0x660   :  { %v6871_v24 = vadd.f32 %v12620_v49, %v6460_v34  ;;  %v12788_v49 = vpop.f32.mrf.mxu0  ;;  %v5398_v58 = vand.u32 31, %v13650_v6  ;;  %v4497_v34 = vld [vmem:[#allocation2 + $0x396] ss:$2 sm:$0xff] }
 0x662   :  { %v6936_v17 = vadd.f32 %v12710_v55, %v6871_v24  ;;  %v4625_v24 = vld [vmem:[#allocation2 + $0x397] ss:$2 sm:$0xff]  ;;  %vm5462_vm2 = vcmp.eq.s32.totalorder %v5398_v58, 0 }
 0x663   :  { %v4695_v44 = vmax.f32 %v4497_v34, %v4625_v24  ;;  %v5654_v13 = vsel %vm5462_vm2, 0.0, %v4694_v20 }
 0x664   :  { %v7000_v12 = vmax.f32 %v6936_v17, 0.0 }
 0x665   :  { %v6461_v57 = vpop.f32.mrf.mxu3  ;;  %v7206_v15 = vld [vmem:[#allocation2 + $0x118] ss:$2 sm:$0xff]  ;;  %v7238_v48 = vld [vmem:[#allocation2 + $0x119] ss:$2 sm:$0xff]  ;;  %v5946_v41 = vpack.c.bf16 %v4695_v44, %v5654_v13 }
 0x666   :  { %v7110_v19 = vld [vmem:[#allocation2 + $0x116] ss:$2 sm:$0xff]  ;;  %7065 = vst.msk [vmem:[#allocation2 + $0x128] sm:$0xff] %vm7028_vm8, %v7000_v12  ;;  %v6462_v22 = vadd.f32 %v6461_v57, %v13648_v54  ;;  %v7270_v31 = vmax.f32 %v7206_v15, %v7238_v48  ;;  %v7142_v63 = vld [vmem:[#allocation2 + $0x117] ss:$2 sm:$0xff] }
 0x667   :  { %v7174_v16 = vmax.f32 %v7110_v19, %v7142_v63  ;;  %v4501_v48 = vld [vmem:[#allocation2 + $0x3b6] ss:$2 sm:$0xff]  ;;  %v7399_v19 = vand.u32 15, %v836_v45  ;;  %v4627_v63 = vld [vmem:[#allocation2 + $0x3a7] ss:$2 sm:$0xff] }
 0x668   :  { %v6872_v2 = vadd.f32 %v12633_v62, %v6462_v22  ;;  %v7697_v40 = vpack.c.bf16 %v7270_v31, %v7269_v52  ;;  %v12801_v33 = vpop.f32.mrf.mxu0  ;;  %v4499_v52 = vld [vmem:[#allocation2 + $0x3a6] ss:$2 sm:$0xff]  ;;  %v4505_v45 = vld [vmem:[#allocation2 + $0x3d6] ss:$2 sm:$0xff] }
 0x669   :  { %v7677_v42 = vpack.c.bf16 %v7174_v16, %v7525_v59  ;;  %vm7431_vm3 = vcmp.eq.s32.totalorder %v7399_v19, 0 }
 0x66a   :  { %v6937_v60 = vadd.f32 %v12710_v55, %v6872_v2  ;;  %9824 = vmatmul.msk.bf16.gmra.mxu3 %vm4253_vm7, %v5945_v28  ;;  %9887 = vmatmul.msk.bf16.gmra.mxu1 %vm7028_vm8, %v7697_v40 }
 0x66b   :  { %9911 = vmatmul.msk.bf16.gmra.mxu2 %vm7028_vm8, %v7677_v42 }
 0x66c   :  { %v7001_v10 = vmax.f32 %v6937_v60, 0.0 }
 0x66d   :  { %v6464_v5 = vpop.f32.mrf.mxu3 }
 0x66e   :  { %7066 = vst.msk [vmem:[#allocation2 + $0x130] sm:$0xff] %vm7028_vm8, %v7001_v10  ;;  %v6465_v62 = vadd.f32 %v6464_v5, %v13649_v25  ;;  %v13653_v5 = vld [vmem:[#allocation46_spill] sm:$0xff] }
 0x670   :  { %v6873_v14 = vadd.f32 %v12651_v35, %v6465_v62  ;;  %v12809_v47 = vpop.f32.mrf.mxu0  ;;  %v4696_v62 = vmax.f32 %v4499_v52, %v4627_v63 }
 0x672   :  { %v6938_v7 = vadd.f32 %v12710_v55, %v6873_v14 }
 0x674   :  { %v7002_v8 = vmax.f32 %v6938_v7, 0.0 }
 0x675   :  { %v6466_v43 = vpop.f32.mrf.mxu3  ;;  %v7111_v54 = vld [vmem:[#allocation2 + $0x126] ss:$2 sm:$0xff]  ;;  %v7143_v22 = vld [vmem:[#allocation2 + $0x127] ss:$2 sm:$0xff] }
 0x676   :  { %7067 = vst.msk [vmem:[#allocation2 + $0x138] sm:$0xff] %vm7028_vm8, %v7002_v8  ;;  %v6467_v17 = vadd.f32 %v6466_v43, %v13651_v30  ;;  %v7207_v16 = vld [vmem:[#allocation2 + $0x128] ss:$2 sm:$0xff]  ;;  %v7239_v2 = vld [vmem:[#allocation2 + $0x129] ss:$2 sm:$0xff]  ;;  %v7175_v59 = vmax.f32 %v7111_v54, %v7143_v22  ;;  %v878_v43 = vadd.s32 480, %v10315_v21 }
 0x677   :  { %v7271_v14 = vmax.f32 %v7207_v16, %v7239_v2 }
 0x678   :  { %v6874_v35 = vadd.f32 %v12659_v29, %v6467_v17  ;;  %v4629_v29 = vld [vmem:[#allocation2 + $0x3b7] ss:$2 sm:$0xff]  ;;  %v12818_v31 = vpop.f32.mrf.mxu0  ;;  %v7527_v7 = vsel %vm7431_vm3, 0.0, %v7175_v59 }
 0x679   :  { %v4697_v40 = vmax.f32 %v4501_v48, %v4629_v29  ;;  %v13655_v29 = vld [vmem:[#allocation48_spill] sm:$0xff] }
 0x67a   :  { %v6939_v46 = vadd.f32 %v12710_v55, %v6874_v35  ;;  %9825 = vmatmul.msk.bf16.gmra.mxu3 %vm4253_vm7, %v5946_v41  ;;  %v4503_v41 = vld [vmem:[#allocation2 + $0x3c6] ss:$2 sm:$0xff] }
 0x67b   :  { %v5947_v34 = vpack.c.bf16 %v4697_v40, %v4696_v62 }
 0x67c   :  { %v7003_v12 = vmax.f32 %v6939_v46, 0.0  ;;  %v4631_v46 = vld [vmem:[#allocation2 + $0x3c7] ss:$2 sm:$0xff] }
 0x67d   :  { %v6469_v37 = vpop.f32.mrf.mxu3 }
 0x67e   :  { %7068 = vst.msk [vmem:[#allocation2 + $0x140] sm:$0xff] %vm7028_vm8, %v7003_v12  ;;  %v6470_v57 = vadd.f32 %v6469_v37, %v13652_v3  ;;  %v5402_v12 = vand.u32 31, %v878_v43  ;;  %v4633_v37 = vld [vmem:[#allocation2 + $0x3d7] ss:$2 sm:$0xff] }
 0x67f   :  { %v4699_v48 = vmax.f32 %v4505_v45, %v4633_v37 }
 0x680   :  { %v6875_v15 = vadd.f32 %v12769_v9, %v6470_v57  ;;  %v12828_v30 = vpop.f32.mrf.mxu0  ;;  %v4698_v57 = vmax.f32 %v4503_v41, %v4631_v46  ;;  %vm5466_vm4 = vcmp.eq.s32.totalorder %v5402_v12, 0 }
 0x682   :  { %v6940_v23 = vadd.f32 %v12710_v55, %v6875_v15 }
 0x684   :  { %v7004_v28 = vmax.f32 %v6940_v23, 0.0  ;;  %v5658_v23 = vsel %vm5466_vm4, 0.0, %v4698_v57 }
 0x685   :  { %v6471_v42 = vpop.f32.mrf.mxu3  ;;  %v7208_v60 = vld [vmem:[#allocation2 + $0x138] ss:$2 sm:$0xff]  ;;  %v7240_v9 = vld [vmem:[#allocation2 + $0x139] ss:$2 sm:$0xff]  ;;  %v5948_v52 = vpack.c.bf16 %v4699_v48, %v5658_v23 }
 0x686   :  { %v7112_v10 = vld [vmem:[#allocation2 + $0x136] ss:$2 sm:$0xff]  ;;  %7069 = vst.msk [vmem:[#allocation2 + $0x148] sm:$0xff] %vm7028_vm8, %v7004_v28  ;;  %v6472_v25 = vadd.f32 %v6471_v42, %v13653_v5  ;;  %v7272_v56 = vmax.f32 %v7208_v60, %v7240_v9  ;;  %v7144_v61 = vld [vmem:[#allocation2 + $0x137] ss:$2 sm:$0xff] }
 0x687   :  { %v7176_v6 = vmax.f32 %v7112_v10, %v7144_v61  ;;  %v13656_v28 = vld [vmem:[#allocation49_spill] sm:$0xff]  ;;  %v13657_v60 = vld [vmem:[#allocation72_spill] sm:$0xff] }
 0x688   :  { %v6876_v58 = vadd.f32 %v12777_v11, %v6472_v25  ;;  %v7698_v24 = vpack.c.bf16 %v7272_v56, %v7271_v14  ;;  %v13654_v11 = vld [vmem:[#allocation47_spill] sm:$0xff]  ;;  %v12836_v22 = vpop.f32.mrf.mxu0  ;;  %v4509_v42 = vld [vmem:[#allocation2 + $0x3f6] ss:$2 sm:$0xff]  ;;  %v7401_v9 = vand.u32 15, %v13657_v60  ;;  %v4637_v5 = vld [vmem:[#allocation2 + $0x3f7] ss:$2 sm:$0xff] }
 0x689   :  { %v7678_v20 = vpack.c.bf16 %v7176_v6, %v7527_v7  ;;  %v4507_v14 = vld [vmem:[#allocation2 + $0x3e6] ss:$2 sm:$0xff]  ;;  %v4635_v56 = vld [vmem:[#allocation2 + $0x3e7] ss:$2 sm:$0xff] }
 0x68a   :  { %v6941_v8 = vadd.f32 %v12710_v55, %v6876_v58  ;;  %9826 = vmatmul.msk.bf16.gmra.mxu3 %vm4253_vm7, %v5947_v34  ;;  %9888 = vmatmul.msk.bf16.gmra.mxu1 %vm7028_vm8, %v7698_v24  ;;  %v4701_v34 = vmax.f32 %v4509_v42, %v4637_v5  ;;  %vm7433_vm5 = vcmp.eq.s32.totalorder %v7401_v9, 0  ;;  %v7286_v23 = vld [vmem:[#allocation2 + $0x1a] ss:$2 sm:$0xff]  ;;  %v13660_v5 = vld [vmem:[#allocation52_spill] sm:$0xff] }
 0x68b   :  { %9912 = vmatmul.msk.bf16.gmra.mxu2 %vm7028_vm8, %v7678_v20 }
 0x68c   :  { %v7005_v44 = vmax.f32 %v6941_v8, 0.0 }
 0x68d   :  { %v6474_v17 = vpop.f32.mrf.mxu3 }
 0x68e   :  { %7070 = vst.msk [vmem:[#allocation2 + $0x150] sm:$0xff] %vm7028_vm8, %v7005_v44  ;;  %v6475_v13 = vadd.f32 %v6474_v17, %v13654_v11  ;;  %v13658_v44 = vld [vmem:[#allocation50_spill] sm:$0xff]  ;;  %v4700_v17 = vmax.f32 %v4507_v14, %v4635_v56 }
 0x690   :  { %v6877_v35 = vadd.f32 %v12788_v49, %v6475_v13  ;;  %v12845_v10 = vpop.f32.mrf.mxu0  ;;  %v5949_v12 = vpack.c.bf16 %v4701_v34, %v4700_v17  ;;  %v7320_v34 = vld [vmem:[#allocation2 + $0x3b] ss:$2 sm:$0xff] }
 0x692   :  { %v6942_v3 = vadd.f32 %v12710_v55, %v6877_v35 }
 0x694   :  { %v7006_v15 = vmax.f32 %v6942_v3, 0.0 }
 0x695   :  { %v6476_v19 = vpop.f32.mrf.mxu3  ;;  %v7145_v25 = vld [vmem:[#allocation2 + $0x147] ss:$2 sm:$0xff]  ;;  %v7209_v61 = vld [vmem:[#allocation2 + $0x148] ss:$2 sm:$0xff] }
 0x696   :  { %7071 = vst.msk [vmem:[#allocation2 + $0x158] sm:$0xff] %vm7028_vm8, %v7006_v15  ;;  %v6477_v54 = vadd.f32 %v6476_v19, %v13655_v29  ;;  %v7241_v6 = vld [vmem:[#allocation2 + $0x149] ss:$2 sm:$0xff]  ;;  %v12855_v15 = vadd.s32 8, %v10315_v21 }
 0x697   :  { %v7273_v11 = vmax.f32 %v7209_v61, %v7241_v6  ;;  %v840_v61 = vadd.s32 176, %v10315_v21 }
 0x698   :  { %v6878_v49 = vadd.f32 %v12801_v33, %v6477_v54  ;;  %v7113_v33 = vld [vmem:[#allocation2 + $0x146] ss:$2 sm:$0xff]  ;;  %v6797_v48 = vpop.f32.mrf.mxu0 }
 0x699   :  { %v7177_v24 = vmax.f32 %v7113_v33, %v7145_v25 }
 0x69a   :  { %v6943_v63 = vadd.f32 %v12710_v55, %v6878_v49  ;;  %9827 = vmatmul.msk.bf16.gmra.mxu3 %vm4253_vm7, %v5948_v52  ;;  %v7318_v49 = vld [vmem:[#allocation2 + $0x1b] ss:$2 sm:$0xff]  ;;  %v7382_v52 = vand.u32 15, %v12855_v15 }
 0x69b   :  { %v7529_v37 = vsel %vm7433_vm5, 0.0, %v7177_v24  ;;  %v13661_v24 = vld [vmem:[#allocation30_spill] sm:$0xff]  ;;  %vm8275_vm5 = vcmask 523264  }
 0x69c   :  { %v7007_v16 = vmax.f32 %v6943_v63, 0.0 }
 0x69d   :  { %v6479_v2 = vpop.f32.mrf.mxu3 }
 0x69e   :  { %7072 = vst.msk [vmem:[#allocation2 + $0x160] sm:$0xff] %vm7028_vm8, %v7007_v16  ;;  %v6480_v40 = vadd.f32 %v6479_v2, %v13656_v28  ;;  %v7350_v16 = vmax.f32 %v7286_v23, %v7318_v49  ;;  %v7285_v28 = vld [vmem:[#allocation2 + $0xa] ss:$2 sm:$0xff] }
 0x6a0   :  { %v6879_v59 = vadd.f32 %v12809_v47, %v6480_v40  ;;  %v7317_v40 = vld [vmem:[#allocation2 + $0xb] ss:$2 sm:$0xff]  ;;  %v12863_v42 = vpop.f32.mrf.mxu0 }
 0x6a1   :  { %v7349_v25 = vmax.f32 %v7285_v28, %v7317_v40 }
 0x6a2   :  { %v6944_v62 = vadd.f32 %v12710_v55, %v6879_v59 }
 0x6a4   :  { %v7008_v58 = vmax.f32 %v6944_v62, 0.0 }
 0x6a5   :  { %v6481_v7 = vpop.f32.mrf.mxu3  ;;  %v7210_v47 = vld [vmem:[#allocation2 + $0x158] ss:$2 sm:$0xff]  ;;  %v7242_v20 = vld [vmem:[#allocation2 + $0x159] ss:$2 sm:$0xff] }
 0x6a6   :  { %v7114_v8 = vld [vmem:[#allocation2 + $0x156] ss:$2 sm:$0xff]  ;;  %7073 = vst.msk [vmem:[#allocation2 + $0x168] sm:$0xff] %vm7028_vm8, %v7008_v58  ;;  %v6482_v43 = vadd.f32 %v6481_v7, %v13658_v44  ;;  %v7274_v13 = vmax.f32 %v7210_v47, %v7242_v20  ;;  %v7146_v35 = vld [vmem:[#allocation2 + $0x157] ss:$2 sm:$0xff]  ;;  %v7384_v7 = vand.u32 15, %v13661_v24 }
 0x6a7   :  { %v7178_v41 = vmax.f32 %v7114_v8, %v7146_v35  ;;  %v7288_v58 = vld [vmem:[#allocation2 + $0x3a] ss:$2 sm:$0xff]  ;;  %v7403_v44 = vand.u32 15, %v840_v61  ;;  %v7287_v35 = vld [vmem:[#allocation2 + $0x2a] ss:$2 sm:$0xff] }
 0x6a8   :  { %v6880_v46 = vadd.f32 %v12818_v31, %v6482_v43  ;;  %v7699_v45 = vpack.c.bf16 %v7274_v13, %v7273_v11  ;;  %v13659_v31 = vld [vmem:[#allocation51_spill] sm:$0xff]  ;;  %v13662_v47 = vld [vmem:[#allocation54_spill] sm:$0xff]  ;;  %v6802_v8 = vpop.f32.mrf.mxu0  ;;  %v7352_v43 = vmax.f32 %v7288_v58, %v7320_v34  ;;  %vm7544_vm6 = vcmp.eq.s32.totalorder %v7384_v7, 15 }
 0x6a9   :  { %v7679_v3 = vpack.c.bf16 %v7178_v41, %v7529_v37  ;;  %vm7435_vm1 = vcmp.eq.s32.totalorder %v7403_v44, 0 }
 0x6aa   :  { %v6945_v57 = vadd.f32 %v12710_v55, %v6880_v46  ;;  %9828 = vmatmul.msk.bf16.gmra.mxu3 %vm4253_vm7, %v5949_v12  ;;  %9889 = vmatmul.msk.bf16.gmra.mxu1 %vm7028_vm8, %v7699_v45  ;;  %vm7542_vm7 = vcmp.eq.s32.totalorder %v7382_v52, 15  ;;  %v7319_v12 = vld [vmem:[#allocation2 + $0x2b] ss:$2 sm:$0xff] }
 0x6ab   :  { %9913 = vmatmul.msk.bf16.gmra.mxu2 %vm7028_vm8, %v7679_v3  ;;  %v7638_v9 = vsel %vm7542_vm7, 0.0, %v7350_v16  ;;  %v7640_v3 = vsel %vm7544_vm6, 0.0, %v7352_v43 }
 0x6ac   :  { %v7009_v19 = vmax.f32 %v6945_v57, 0.0  ;;  %v8008_v14 = vpack.c.bf16 %v7638_v9, %v7349_v25 }
 0x6ad   :  { %v6484_v29 = vpop.f32.mrf.mxu3 }
 0x6ae   :  { %7074 = vst.msk [vmem:[#allocation2 + $0x170] sm:$0xff] %vm7028_vm8, %v7009_v19  ;;  %v6485_v54 = vadd.f32 %v6484_v29, %v13659_v31 }
 0x6b0   :  { %v6881_v63 = vadd.f32 %v12828_v30, %v6485_v54 }
 0x6b2   :  { %v6946_v2 = vadd.f32 %v12710_v55, %v6881_v63  ;;  %v7351_v63 = vmax.f32 %v7287_v35, %v7319_v12 }
 0x6b4   :  { %v7010_v59 = vmax.f32 %v6946_v2, 0.0 }
 0x6b5   :  { %v6486_v60 = vpop.f32.mrf.mxu3  ;;  %v7115_v17 = vld [vmem:[#allocation2 + $0x166] ss:$2 sm:$0xff]  ;;  %v7147_v11 = vld [vmem:[#allocation2 + $0x167] ss:$2 sm:$0xff] }
 0x6b6   :  { %7075 = vst.msk [vmem:[#allocation2 + $0x178] sm:$0xff] %vm7028_vm8, %v7010_v59  ;;  %v6487_v33 = vadd.f32 %v6486_v60, %v13660_v5  ;;  %v7211_v41 = vld [vmem:[#allocation2 + $0x168] ss:$2 sm:$0xff]  ;;  %v7243_v46 = vld [vmem:[#allocation2 + $0x169] ss:$2 sm:$0xff]  ;;  %v7179_v37 = vmax.f32 %v7115_v17, %v7147_v11  ;;  %v8009_v59 = vpack.c.bf16 %v7640_v3, %v7351_v63  ;;  %v6805_v60 = vpop.f32.mrf.mxu0  ;;  %v13665_v17 = vld [vmem:[#allocation57_spill] sm:$0xff] }
 0x6b7   :  { %v7275_v23 = vmax.f32 %v7211_v41, %v7243_v46  ;;  %v7324_v3 = vld [vmem:[#allocation2 + $0x7b] ss:$2 sm:$0xff]  ;;  %v7291_v63 = vld [vmem:[#allocation2 + $0x6a] ss:$2 sm:$0xff] }
 0x6b8   :  { %v6882_v62 = vadd.f32 %v12836_v22, %v6487_v33  ;;  %v7531_v40 = vsel %vm7435_vm1, 0.0, %v7179_v37  ;;  %v12882_v33 = vadd.s32 40, %v10315_v21  ;;  %v7292_v37 = vld [vmem:[#allocation2 + $0x7a] ss:$2 sm:$0xff] }
 0x6ba   :  { %v6947_v30 = vadd.f32 %v12710_v55, %v6882_v62  ;;  %9931 = vmatmul.msk.bf16.vlgmr.msra.gmra.mxu3 %vm7028_vm8, %v8008_v14  ;;  %v7386_v61 = vand.u32 15, %v12882_v33 }
 0x6bc   :  { %v7011_v56 = vmax.f32 %v6947_v30, 0.0  ;;  %v7290_v30 = vld [vmem:[#allocation2 + $0x5a] ss:$2 sm:$0xff]  ;;  %vm7546_vm9 = vcmp.eq.s32.totalorder %v7386_v61, 15 }
 0x6bd   :  { %v6489_v6 = vpop.f32.mrf.mxu3 }
 0x6be   :  { %7076 = vst.msk [vmem:[#allocation2 + $0x180] sm:$0xff] %vm7028_vm8, %v7011_v56  ;;  %v6490_v20 = vadd.f32 %v6489_v6, %v13662_v47  ;;  %v7322_v56 = vld [vmem:[#allocation2 + $0x5b] ss:$2 sm:$0xff]  ;;  %v6807_v7 = vpop.f32.mrf.mxu0  ;;  %v7289_v47 = vld [vmem:[#allocation2 + $0x4a] ss:$2 sm:$0xff] }
 0x6bf   :  { %v7354_v58 = vmax.f32 %v7290_v30, %v7322_v56 }
 0x6c0   :  { %v6883_v22 = vadd.f32 %v12845_v10, %v6490_v20  ;;  %v13663_v10 = vld [vmem:[#allocation55_spill] sm:$0xff] }
 0x6c1   :  { %v7321_v20 = vld [vmem:[#allocation2 + $0x4b] ss:$2 sm:$0xff]  ;;  %v7642_v43 = vsel %vm7546_vm9, 0.0, %v7354_v58 }
 0x6c2   :  { %v6948_v13 = vadd.f32 %v12710_v55, %v6883_v22 }
 0x6c4   :  { %v7012_v45 = vmax.f32 %v6948_v13, 0.0  ;;  %v7353_v13 = vmax.f32 %v7289_v47, %v7321_v20 }
 0x6c5   :  { %v6491_v57 = vpop.f32.mrf.mxu3  ;;  %v7212_v19 = vld [vmem:[#allocation2 + $0x178] ss:$2 sm:$0xff]  ;;  %v7244_v29 = vld [vmem:[#allocation2 + $0x179] ss:$2 sm:$0xff] }
 0x6c6   :  { %v7116_v31 = vld [vmem:[#allocation2 + $0x176] ss:$2 sm:$0xff]  ;;  %7077 = vst.msk [vmem:[#allocation2 + $0x188] sm:$0xff] %vm7028_vm8, %v7012_v45  ;;  %v6492_v54 = vadd.f32 %v6491_v57, %v13663_v10  ;;  %v7276_v49 = vmax.f32 %v7212_v19, %v7244_v29  ;;  %v7148_v52 = vld [vmem:[#allocation2 + $0x177] ss:$2 sm:$0xff]  ;;  %v8010_v41 = vpack.c.bf16 %v7642_v43, %v7353_v13  ;;  %v6810_v12 = vpop.f32.mrf.mxu0 }
 0x6c7   :  { %v7180_v16 = vmax.f32 %v7116_v31, %v7148_v52  ;;  %v13666_v57 = vld [vmem:[#allocation6_spill] sm:$0xff] }
 0x6c8   :  { %v6884_v2 = vadd.f32 %v6797_v48, %v6492_v54  ;;  %v7700_v28 = vpack.c.bf16 %v7276_v49, %v7275_v23  ;;  %v13664_v48 = vld [vmem:[#allocation56_spill] sm:$0xff]  ;;  %v7388_v19 = vand.u32 15, %v13666_v57  ;;  %v13667_v29 = vld [vmem:[#allocation58_spill] sm:$0xff]  ;;  %v7405_v54 = vand.u32 15, %v10623_v53 }
 0x6c9   :  { %v7680_v9 = vpack.c.bf16 %v7180_v16, %v7531_v40 }
 0x6ca   :  { %v6949_v5 = vadd.f32 %v12710_v55, %v6884_v2  ;;  %9890 = vmatmul.msk.bf16.gmra.mxu1 %vm7028_vm8, %v7700_v28  ;;  %9932 = vmatmul.msk.bf16.gmra.mxu3 %vm7028_vm8, %v8009_v59  ;;  %vm7548_vm10 = vcmp.eq.s32.totalorder %v7388_v19, 15  ;;  %v7323_v28 = vld [vmem:[#allocation2 + $0x6b] ss:$2 sm:$0xff]  ;;  %vm12899_vm11 = vcmp.eq.s32.totalorder %v7405_v54, 0  ;;  %v7293_v54 = vld [vmem:[#allocation2 + $0x8a] ss:$2 sm:$0xff] }
 0x6cb   :  { %9914 = vmatmul.msk.bf16.gmra.mxu2 %vm7028_vm8, %v7680_v9 }
 0x6cc   :  { %v7013_v25 = vmax.f32 %v6949_v5, 0.0 }
 0x6cd   :  { %v6494_v62 = vpop.f32.mrf.mxu3 }
 0x6ce   :  { %7078 = vst.msk [vmem:[#allocation2 + $0x190] sm:$0xff] %vm7028_vm8, %v7013_v25  ;;  %v6495_v14 = vadd.f32 %v6494_v62, %v13664_v48  ;;  %v13670_v48 = vld [vmem:[#allocation59_spill] sm:$0xff]  ;;  %v6812_v58 = vpop.f32.mrf.mxu0 }
 0x6d0   :  { %v6885_v6 = vadd.f32 %v12863_v42, %v6495_v14 }
 0x6d2   :  { %v6950_v34 = vadd.f32 %v12710_v55, %v6885_v6  ;;  %v7355_v6 = vmax.f32 %v7291_v63, %v7323_v28  ;;  %v13672_v63 = vld [vmem:[#allocation61_spill] sm:$0xff] }
 0x6d4   :  { %v7014_v22 = vmax.f32 %v6950_v34, 0.0 }
 0x6d5   :  { %v6496_v44 = vpop.f32.mrf.mxu3  ;;  %v7117_v23 = vld [vmem:[#allocation2 + $0x186] ss:$2 sm:$0xff]  ;;  %v7149_v49 = vld [vmem:[#allocation2 + $0x187] ss:$2 sm:$0xff] }
 0x6d6   :  { %7079 = vst.msk [vmem:[#allocation2 + $0x198] sm:$0xff] %vm7028_vm8, %v7014_v22  ;;  %v6497_v11 = vadd.f32 %v6496_v44, %v13665_v17  ;;  %v7213_v16 = vld [vmem:[#allocation2 + $0x188] ss:$2 sm:$0xff]  ;;  %v7245_v2 = vld [vmem:[#allocation2 + $0x189] ss:$2 sm:$0xff]  ;;  %v7181_v59 = vmax.f32 %v7117_v23, %v7149_v49 }
 0x6d7   :  { %v7277_v30 = vmax.f32 %v7213_v16, %v7245_v2 }
 0x6d8   :  { %v6886_v35 = vadd.f32 %v6802_v8, %v6497_v11  ;;  %v7356_v8 = vmax.f32 %v7292_v37, %v7324_v3  ;;  %v7533_v22 = vsel %vm12899_vm11, 0.0, %v7181_v59  ;;  %v12911_v11 = vadd.s32 72, %v10315_v21  ;;  %v10129_v37 = vld [vmem:[%s13478_s5 + $0x18] sm:$0xff] }
 0x6d9   :  { %v10137_v3 = vld [vmem:[%s13478_s5 + $0x58] sm:$0xff]  ;;  %8778 = vmatpush.bf16.msrb.mxu2 %v10129_v37 }
 0x6da   :  { %v6951_v46 = vadd.f32 %v12710_v55, %v6886_v35  ;;  %9933 = vmatmul.msk.bf16.gmra.mxu3 %vm7028_vm8, %v8010_v41  ;;  %v7644_v5 = vsel %vm7548_vm10, 0.0, %v7356_v8  ;;  %v13671_v41 = vld [vmem:[#allocation60_spill] sm:$0xff] }
 0x6db   :  { %v8011_v44 = vpack.c.bf16 %v7644_v5, %v7355_v6  ;;  %8892 = vmatpush.bf16.msrb.mxu3 %v10137_v3  ;;  %v7325_v8 = vld [vmem:[#allocation2 + $0x8b] ss:$2 sm:$0xff] }
 0x6dc   :  { %v7015_v42 = vmax.f32 %v6951_v46, 0.0  ;;  %v7357_v2 = vmax.f32 %v7293_v54, %v7325_v8 }
 0x6dd   :  { %v6499_v45 = vpop.f32.mrf.mxu3 }
 0x6de   :  { %7080 = vst.msk [vmem:[#allocation2 + $0x1a0] sm:$0xff] %vm7028_vm8, %v7015_v42  ;;  %v6500_v31 = vadd.f32 %v6499_v45, %v13667_v29  ;;  %v7326_v42 = vld [vmem:[#allocation2 + $0x9b] ss:$2 sm:$0xff]  ;;  %v7390_v45 = vand.u32 15, %v12911_v11  ;;  %v6815_v29 = vpop.f32.mrf.mxu0 }
 0x6e0   :  { %v6887_v10 = vadd.f32 %v6805_v60, %v6500_v31  ;;  %vm7550_vm12 = vcmp.eq.s32.totalorder %v7390_v45, 15 }
 0x6e2   :  { %v6952_v52 = vadd.f32 %v12710_v55, %v6887_v10 }
 0x6e4   :  { %v7016_v40 = vmax.f32 %v6952_v52, 0.0 }
 0x6e5   :  { %v6501_v60 = vpop.f32.mrf.mxu3  ;;  %v7214_v25 = vld [vmem:[#allocation2 + $0x198] ss:$2 sm:$0xff]  ;;  %v7246_v53 = vld [vmem:[#allocation2 + $0x199] ss:$2 sm:$0xff] }
 0x6e6   :  { %v7118_v62 = vld [vmem:[#allocation2 + $0x196] ss:$2 sm:$0xff]  ;;  %7081 = vst.msk [vmem:[#allocation2 + $0x1a8] sm:$0xff] %vm7028_vm8, %v7016_v40  ;;  %v6502_v14 = vadd.f32 %v6501_v60, %v13670_v48  ;;  %v7278_v56 = vmax.f32 %v7214_v25, %v7246_v53  ;;  %v7150_v61 = vld [vmem:[#allocation2 + $0x197] ss:$2 sm:$0xff]  ;;  %v6817_v9 = vpop.f32.mrf.mxu0  ;;  %v844_v60 = vadd.s32 208, %v10315_v21 }
 0x6e7   :  { %v7182_v34 = vmax.f32 %v7118_v62, %v7150_v61  ;;  %v7296_v53 = vld [vmem:[#allocation2 + $0xba] ss:$2 sm:$0xff]  ;;  %v7328_v62 = vld [vmem:[#allocation2 + $0xbb] ss:$2 sm:$0xff] }
 0x6e8   :  { %v6888_v47 = vadd.f32 %v6807_v7, %v6502_v14  ;;  %v7701_v20 = vpack.c.bf16 %v7278_v56, %v7277_v30  ;;  %v7294_v7 = vld [vmem:[#allocation2 + $0x9a] ss:$2 sm:$0xff]  ;;  %v7407_v6 = vand.u32 15, %v844_v60  ;;  %v13678_v60 = vld [vmem:[#allocation64_spill] sm:$0xff] }
 0x6e9   :  { %v7681_v43 = vpack.c.bf16 %v7182_v34, %v7533_v22  ;;  %v7358_v31 = vmax.f32 %v7294_v7, %v7326_v42  ;;  %v13673_v48 = vld [vmem:[#allocation37_spill] sm:$0xff]  ;;  %v13674_v30 = vld [vmem:[#allocation62_spill] sm:$0xff] }
 0x6ea   :  { %v6953_v17 = vadd.f32 %v12710_v55, %v6888_v47  ;;  %9891 = vmatmul.msk.bf16.gmra.mxu1 %vm7028_vm8, %v7701_v20  ;;  %9934 = vmatmul.msk.bf16.gmra.mxu3 %vm7028_vm8, %v8011_v44  ;;  %v7392_v14 = vand.u32 15, %v13673_v48  ;;  %v12938_v47 = vld [vmem:[%s13474_s1 + $0x3] ss:$0 sm:$0xff]  ;;  %v7295_v22 = vld [vmem:[#allocation2 + $0xaa] ss:$2 sm:$0xff]  ;;  %vm12941_vm14 = vcmp.eq.s32.totalorder %v7407_v6, 0 }
 0x6eb   :  { %9915 = vmatmul.msk.bf16.gmra.mxu2 %vm7028_vm8, %v7681_v43  ;;  %v7646_v52 = vsel %vm7550_vm12, 0.0, %v7358_v31 }
 0x6ec   :  { %v7017_v13 = vmax.f32 %v6953_v17, 0.0  ;;  %v8012_v40 = vpack.c.bf16 %v7646_v52, %v7357_v2  ;;  %vm7552_vm13 = vcmp.eq.s32.totalorder %v7392_v14, 15  ;;  %v7327_v17 = vld [vmem:[#allocation2 + $0xab] ss:$2 sm:$0xff] }
 0x6ed   :  { %v6504_v35 = vpop.f32.mrf.mxu3  ;;  %v7359_v8 = vmax.f32 %v7295_v22, %v7327_v17 }
 0x6ee   :  { %7082 = vst.msk [vmem:[#allocation2 + $0x1b0] sm:$0xff] %vm7028_vm8, %v7017_v13  ;;  %v6505_v46 = vadd.f32 %v6504_v35, %v13671_v41 }
 0x6f0   :  { %v6889_v19 = vadd.f32 %v6810_v12, %v6505_v46  ;;  %v10133_v12 = vld [vmem:[%s13478_s5 + $0x38] sm:$0xff]  ;;  %v6820_v46 = vpop.f32.mrf.mxu0 }
 0x6f1   :  { %8681 = vmatpush.bf16.msrb.mxu1 %v10133_v12  ;;  %v12949_v12 = vpop.f32.mrf.mxu1 }
 0x6f2   :  { %v6954_v10 = vadd.f32 %v12710_v55, %v6889_v19  ;;  %v13677_v19 = vld [vmem:[#allocation63_spill] sm:$0xff] }
 0x6f4   :  { %v7018_v23 = vmax.f32 %v6954_v10, 0.0 }
 0x6f5   :  { %v6506_v49 = vpop.f32.mrf.mxu3  ;;  %v7119_v34 = vld [vmem:[#allocation2 + $0x1a6] ss:$2 sm:$0xff]  ;;  %v7247_v43 = vld [vmem:[#allocation2 + $0x1a9] ss:$2 sm:$0xff] }
 0x6f6   :  { %7083 = vst.msk [vmem:[#allocation2 + $0x1b8] sm:$0xff] %vm7028_vm8, %v7018_v23  ;;  %v6507_v16 = vadd.f32 %v6506_v49, %v13672_v63  ;;  %v7215_v44 = vld [vmem:[#allocation2 + $0x1a8] ss:$2 sm:$0xff] }
 0x6f7   :  { %v7279_v31 = vmax.f32 %v7215_v44, %v7247_v43  ;;  %v13679_v44 = vld [vmem:[#allocation66_spill] sm:$0xff] }
 0x6f8   :  { %v6890_v28 = vadd.f32 %v6812_v58, %v6507_v16  ;;  %v7360_v58 = vmax.f32 %v7296_v53, %v7328_v62  ;;  %v7298_v53 = vld [vmem:[#allocation2 + $0xda] ss:$2 sm:$0xff]  ;;  %v7330_v62 = vld [vmem:[#allocation2 + $0xdb] ss:$2 sm:$0xff] }
 0x6fa   :  { %v6955_v59 = vadd.f32 %v12710_v55, %v6890_v28  ;;  %9935 = vmatmul.msk.bf16.gmra.mxu3 %vm7028_vm8, %v8012_v40  ;;  %v7151_v55 = vld [vmem:[#allocation2 + $0x1a7] ss:$2 sm:$0xff]  ;;  %v7648_v41 = vsel %vm7552_vm13, 0.0, %v7360_v58  ;;  %v12955_v40 = vadd.s32 104, %v10315_v21  ;;  %v7297_v58 = vld [vmem:[#allocation2 + $0xca] ss:$2 sm:$0xff] }
 0x6fb   :  { %v7183_v35 = vmax.f32 %v7119_v34, %v7151_v55  ;;  %v8013_v16 = vpack.c.bf16 %v7648_v41, %v7359_v8  ;;  %v7329_v34 = vld [vmem:[#allocation2 + $0xcb] ss:$2 sm:$0xff]  ;;  %v7409_v8 = vand.u32 15, %v12564_v32 }
 0x6fc   :  { %v7019_v5 = vmax.f32 %v6955_v59, 0.0  ;;  %v12957_v59 = vpop.f32.mrf.mxu2  ;;  %v7394_v14 = vand.u32 15, %v12955_v40  ;;  %v7361_v17 = vmax.f32 %v7297_v58, %v7329_v34 }
 0x6fd   :  { %v6509_v25 = vpop.f32.mrf.mxu3  ;;  %v7535_v63 = vsel %vm12941_vm14, 0.0, %v7183_v35  ;;  %vm7441_vm2 = vcmp.eq.s32.totalorder %v7409_v8, 0 }
 0x6fe   :  { %7084 = vst.msk [vmem:[#allocation2 + $0x1c0] sm:$0xff] %vm7028_vm8, %v7019_v5  ;;  %v6510_v56 = vadd.f32 %v6509_v25, %v13674_v30  ;;  %v6822_v30 = vpop.f32.mrf.mxu0  ;;  %vm7554_vm15 = vcmp.eq.s32.totalorder %v7394_v14, 15 }
 0x700   :  { %v6891_v61 = vadd.f32 %v6815_v29, %v6510_v56 }
 0x702   :  { %v6956_v20 = vadd.f32 %v12938_v47, %v6891_v61  ;;  %v7362_v61 = vmax.f32 %v7298_v53, %v7330_v62 }
 0x704   :  { %v7020_v13 = vmax.f32 %v6956_v20, 0.0  ;;  %v7650_v22 = vsel %vm7554_vm15, 0.0, %v7362_v61  ;;  %v13682_v61 = vld [vmem:[#allocation68_spill] sm:$0xff] }
 0x705   :  { %v6511_v42 = vpop.f32.mrf.mxu3  ;;  %v7216_v45 = vld [vmem:[#allocation2 + $0x1b8] ss:$2 sm:$0xff]  ;;  %v7248_v37 = vld [vmem:[#allocation2 + $0x1b9] ss:$2 sm:$0xff]  ;;  %v8014_v35 = vpack.c.bf16 %v7650_v22, %v7361_v17 }
 0x706   :  { %v7120_v3 = vld [vmem:[#allocation2 + $0x1b6] ss:$2 sm:$0xff]  ;;  %7085 = vst.msk [vmem:[#allocation2 + $0x1c8] sm:$0xff] %vm7028_vm8, %v7020_v13  ;;  %v6512_v29 = vadd.f32 %v6511_v42, %v13677_v19  ;;  %v7280_v10 = vmax.f32 %v7216_v45, %v7248_v37  ;;  %v7152_v54 = vld [vmem:[#allocation2 + $0x1b7] ss:$2 sm:$0xff]  ;;  %v6825_v7 = vpop.f32.mrf.mxu0 }
 0x707   :  { %v7184_v23 = vmax.f32 %v7120_v3, %v7152_v54  ;;  %v7300_v45 = vld [vmem:[#allocation2 + $0xfa] ss:$2 sm:$0xff]  ;;  %v7332_v37 = vld [vmem:[#allocation2 + $0xfb] ss:$2 sm:$0xff] }
 0x708   :  { %v6892_v49 = vadd.f32 %v6817_v9, %v6512_v29  ;;  %v7702_v52 = vpack.c.bf16 %v7280_v10, %v7279_v31  ;;  %v13680_v3 = vld [vmem:[#allocation7_spill] sm:$0xff]  ;;  %v12971_v10 = vpop.f32.mrf.mxu1 }
 0x709   :  { %v7682_v2 = vpack.c.bf16 %v7184_v23, %v7535_v63  ;;  %v7396_v19 = vand.u32 15, %v13680_v3  ;;  %v13681_v29 = vld [vmem:[#allocation67_spill] sm:$0xff]  ;;  %v7364_v23 = vmax.f32 %v7300_v45, %v7332_v37  ;;  %v10128_v45 = vld [vmem:[%s13478_s5 + $0x10] sm:$0xff] }
 0x70a   :  { %v6957_v28 = vadd.f32 %v12938_v47, %v6892_v49  ;;  %9892 = vmatmul.msk.bf16.gmra.mxu1 %vm7028_vm8, %v7702_v52  ;;  %9936 = vmatmul.msk.bf16.gmra.mxu3 %vm7028_vm8, %v8013_v16  ;;  %v12974_v49 = vpop.f32.mrf.mxu2  ;;  %v10136_v37 = vld [vmem:[%s13478_s5 + $0x50] sm:$0xff] }
 0x70b   :  { %9916 = vmatmul.msk.bf16.gmra.mxu2 %vm7028_vm8, %v7682_v2  ;;  %vm7556_vm0 = vcmp.eq.s32.totalorder %v7396_v19, 15  ;;  %v7299_v2 = vld [vmem:[#allocation2 + $0xea] ss:$2 sm:$0xff]  ;;  %8893 = vmatpush.bf16.msrb.mxu3 %v10136_v37  ;;  %v7338_v37 = vld [vmem:[#allocation2 + $0x15b] ss:$2 sm:$0xff] }
 0x70c   :  { %v7021_v9 = vmax.f32 %v6957_v28, 0.0  ;;  %v7652_v62 = vsel %vm7556_vm0, 0.0, %v7364_v23  ;;  %8779 = vmatpush.bf16.msrb.mxu2 %v10128_v45  ;;  %v7302_v23 = vld [vmem:[#allocation2 + $0x11a] ss:$2 sm:$0xff] }
 0x70d   :  { %v6514_v5 = vpop.f32.mrf.mxu3 }
 0x70e   :  { %7086 = vst.msk [vmem:[#allocation2 + $0x1d0] sm:$0xff] %vm7028_vm8, %v7021_v9  ;;  %v6515_v25 = vadd.f32 %v6514_v5, %v13678_v60  ;;  %v6827_v28 = vpop.f32.mrf.mxu0  ;;  %v7331_v60 = vld [vmem:[#allocation2 + $0xeb] ss:$2 sm:$0xff] }
 0x710   :  { %v6893_v56 = vadd.f32 %v6820_v46, %v6515_v25 }
 0x712   :  { %v6958_v6 = vadd.f32 %v12938_v47, %v6893_v56 }
 0x714   :  { %v7022_v55 = vmax.f32 %v6958_v6, 0.0 }
 0x715   :  { %v6516_v20 = vpop.f32.mrf.mxu3  ;;  %v7121_v52 = vld [vmem:[#allocation2 + $0x1c6] ss:$2 sm:$0xff]  ;;  %v7153_v63 = vld [vmem:[#allocation2 + $0x1c7] ss:$2 sm:$0xff] }
 0x716   :  { %7087 = vst.msk [vmem:[#allocation2 + $0x1d8] sm:$0xff] %vm7028_vm8, %v7022_v55  ;;  %v6517_v43 = vadd.f32 %v6516_v20, %v13679_v44  ;;  %v7217_v9 = vld [vmem:[#allocation2 + $0x1c8] ss:$2 sm:$0xff]  ;;  %v7249_v5 = vld [vmem:[#allocation2 + $0x1c9] ss:$2 sm:$0xff]  ;;  %v7185_v53 = vmax.f32 %v7121_v52, %v7153_v63  ;;  %v7363_v20 = vmax.f32 %v7299_v2, %v7331_v60 }
 0x717   :  { %v7281_v58 = vmax.f32 %v7217_v9, %v7249_v5  ;;  %v7334_v52 = vld [vmem:[#allocation2 + $0x11b] ss:$2 sm:$0xff]  ;;  %v10132_v9 = vld [vmem:[%s13478_s5 + $0x30] sm:$0xff] }
 0x718   :  { %v6894_v13 = vadd.f32 %v6822_v30, %v6517_v43  ;;  %v7537_v17 = vsel %vm7441_vm2, 0.0, %v7185_v53  ;;  %v7366_v2 = vmax.f32 %v7302_v23, %v7334_v52  ;;  %v7301_v5 = vld [vmem:[#allocation2 + $0x10a] ss:$2 sm:$0xff]  ;;  %v7333_v60 = vld [vmem:[#allocation2 + $0x10b] ss:$2 sm:$0xff]  ;;  %8682 = vmatpush.bf16.msrb.mxu1 %v10132_v9 }
 0x719   :  { %v7303_v23 = vld [vmem:[#allocation2 + $0x12a] ss:$2 sm:$0xff] }
 0x71a   :  { %v6959_v41 = vadd.f32 %v12938_v47, %v6894_v13  ;;  %9937 = vmatmul.msk.bf16.gmra.mxu3 %vm7028_vm8, %v8014_v35  ;;  %v8015_v13 = vpack.c.bf16 %v7652_v62, %v7363_v20  ;;  %v848_v20 = vadd.s32 240, %v10315_v21 }
 0x71c   :  { %v7023_v46 = vmax.f32 %v6959_v41, 0.0 }
 0x71d   :  { %v6519_v42 = vpop.f32.mrf.mxu3 }
 0x71e   :  { %7088 = vst.msk [vmem:[#allocation2 + $0x1e0] sm:$0xff] %vm7028_vm8, %v7023_v46  ;;  %v6520_v31 = vadd.f32 %v6519_v42, %v13681_v29  ;;  %v835_v46 = vadd.s32 136, %v10315_v21  ;;  %v12985_v42 = vpop.f32.mrf.mxu2  ;;  %v6830_v29 = vpop.f32.mrf.mxu0 }
 0x720   :  { %v6895_v54 = vadd.f32 %v6825_v7, %v6520_v31  ;;  %v12979_v7 = vpop.f32.mrf.mxu1  ;;  %v7398_v63 = vand.u32 15, %v835_v46  ;;  %v7411_v46 = vand.u32 15, %v848_v20 }
 0x722   :  { %v6960_v16 = vadd.f32 %v12938_v47, %v6895_v54  ;;  %v13683_v54 = vld [vmem:[#allocation69_spill] sm:$0xff]  ;;  %vm7558_vm3 = vcmp.eq.s32.totalorder %v7398_v63, 15  ;;  %vm13030_vm7 = vcmp.eq.s32.totalorder %v7411_v46, 0 }
 0x723   :  { %v7654_v62 = vsel %vm7558_vm3, 0.0, %v7366_v2  ;;  %v7931_v2 = vadd.f32 %v12700_v1, %v12698_v26 }
 0x724   :  { %v7024_v25 = vmax.f32 %v6960_v16, 0.0 }
 0x725   :  { %v6521_v14 = vpop.f32.mrf.mxu3  ;;  %v7218_v30 = vld [vmem:[#allocation2 + $0x1d8] ss:$2 sm:$0xff]  ;;  %v7250_v32 = vld [vmem:[#allocation2 + $0x1d9] ss:$2 sm:$0xff] }
 0x726   :  { %v7122_v56 = vld [vmem:[#allocation2 + $0x1d6] ss:$2 sm:$0xff]  ;;  %7089 = vst.msk [vmem:[#allocation2 + $0x1e8] sm:$0xff] %vm7028_vm8, %v7024_v25  ;;  %v6522_v6 = vadd.f32 %v6521_v14, %v13682_v61  ;;  %v7282_v34 = vmax.f32 %v7218_v30, %v7250_v32  ;;  %v7154_v55 = vld [vmem:[#allocation2 + $0x1d7] ss:$2 sm:$0xff]  ;;  %v7365_v32 = vmax.f32 %v7301_v5, %v7333_v60 }
 0x727   :  { %v7186_v22 = vmax.f32 %v7122_v56, %v7154_v55  ;;  %v13684_v14 = vld [vmem:[#allocation70_spill] sm:$0xff]  ;;  %v6832_v56 = vpop.f32.mrf.mxu0 }
 0x728   :  { %v6896_v44 = vadd.f32 %v6827_v28, %v6522_v6  ;;  %v7703_v43 = vpack.c.bf16 %v7282_v34, %v7281_v58  ;;  %v8016_v6 = vpack.c.bf16 %v7654_v62, %v7365_v32  ;;  %v13007_v55 = vld [vmem:[%s13474_s1 + $0x4] ss:$0 sm:$0xff] }
 0x729   :  { %v7683_v35 = vpack.c.bf16 %v7186_v22, %v7537_v17  ;;  %v13685_v22 = vld [vmem:[#allocation45_spill] sm:$0xff]  ;;  %v10130_v60 = vld [vmem:[%s13478_s5 + $0x20] sm:$0xff] }
 0x72a   :  { %v6961_v41 = vadd.f32 %v12938_v47, %v6896_v44  ;;  %9893 = vmatmul.msk.bf16.gmra.mxu1 %vm7028_vm8, %v7703_v43  ;;  %9938 = vmatmul.msk.bf16.gmra.mxu3 %vm7028_vm8, %v8015_v13  ;;  %v7400_v44 = vand.u32 15, %v13685_v22  ;;  %v7304_v17 = vld [vmem:[#allocation2 + $0x13a] ss:$2 sm:$0xff]  ;;  %v7336_v13 = vld [vmem:[#allocation2 + $0x13b] ss:$2 sm:$0xff] }
 0x72b   :  { %9917 = vmatmul.msk.bf16.gmra.mxu2 %vm7028_vm8, %v7683_v35  ;;  %v7368_v45 = vmax.f32 %v7304_v17, %v7336_v13  ;;  %v839_v13 = vadd.s32 168, %v10315_v21 }
 0x72c   :  { %v7025_v19 = vmax.f32 %v6961_v41, 0.0  ;;  %vm13016_vm4 = vcmp.eq.s32.totalorder %v7400_v44, 15 }
 0x72d   :  { %v6524_v31 = vpop.f32.mrf.mxu3  ;;  %v7656_v5 = vsel %vm13016_vm4, 0.0, %v7368_v45  ;;  %v7306_v45 = vld [vmem:[#allocation2 + $0x15a] ss:$2 sm:$0xff] }
 0x72e   :  { %7090 = vst.msk [vmem:[#allocation2 + $0x1f0] sm:$0xff] %vm7028_vm8, %v7025_v19  ;;  %v6525_v8 = vadd.f32 %v6524_v31, %v13683_v54  ;;  %v10131_v19 = vld [vmem:[%s13478_s5 + $0x28] sm:$0xff] }
 0x72f   :  { %8683 = vmatpush.bf16.msrb.mxu1 %v10131_v19  ;;  %v7402_v19 = vand.u32 15, %v839_v13 }
 0x730   :  { %v6897_v16 = vadd.f32 %v6830_v29, %v6525_v8  ;;  %v13023_v29 = vpop.f32.mrf.mxu2 }
 0x731   :  { %vm7562_vm6 = vcmp.eq.s32.totalorder %v7402_v19, 15 }
 0x732   :  { %v6962_v28 = vadd.f32 %v12938_v47, %v6897_v16  ;;  %v7335_v16 = vld [vmem:[#allocation2 + $0x12b] ss:$2 sm:$0xff] }
 0x733   :  { %8684 = vmatpush.bf16.msrb.mxu1 %v10130_v60 }
 0x734   :  { %v7026_v25 = vmax.f32 %v6962_v28, 0.0 }
 0x735   :  { %v6526_v53 = vpop.f32.mrf.mxu3  ;;  %v7123_v31 = vld [vmem:[#allocation2 + $0x1e6] ss:$2 sm:$0xff]  ;;  %v7155_v54 = vld [vmem:[#allocation2 + $0x1e7] ss:$2 sm:$0xff] }
 0x736   :  { %7091 = vst.msk [vmem:[#allocation2 + $0x1f8] sm:$0xff] %vm7028_vm8, %v7026_v25  ;;  %v6527_v30 = vadd.f32 %v6526_v53, %v13684_v14  ;;  %v7219_v52 = vld [vmem:[#allocation2 + $0x1e8] ss:$2 sm:$0xff]  ;;  %v7251_v63 = vld [vmem:[#allocation2 + $0x1e9] ss:$2 sm:$0xff]  ;;  %v7187_v28 = vmax.f32 %v7123_v31, %v7155_v54  ;;  %v7370_v54 = vmax.f32 %v7306_v45, %v7338_v37 }
 0x737   :  { %v7283_v26 = vmax.f32 %v7219_v52, %v7251_v63  ;;  %v7936_v52 = vadd.f32 %v12957_v59, %v12949_v12 }
 0x738   :  { %v6898_v61 = vadd.f32 %v6832_v56, %v6527_v30  ;;  %v7367_v56 = vmax.f32 %v7303_v23, %v7335_v16  ;;  %v7539_v20 = vsel %vm13030_vm7, 0.0, %v7187_v28  ;;  %v7337_v23 = vld [vmem:[#allocation2 + $0x14b] ss:$2 sm:$0xff]  ;;  %v7658_v16 = vsel %vm7562_vm6, 0.0, %v7370_v54 }
 0x73a   :  { %v6963_v58 = vadd.f32 %v12938_v47, %v6898_v61  ;;  %9939 = vmatmul.msk.bf16.gmra.mxu3 %vm7028_vm8, %v8016_v6  ;;  %v13013_v47 = vpop.f32.mrf.mxu1  ;;  %v10126_v61 = vld [vmem:[%s13478_s5] sm:$0xff]  ;;  %v8017_v22 = vpack.c.bf16 %v7656_v5, %v7367_v56 }
 0x73c   :  { %v7027_v34 = vmax.f32 %v6963_v58, 0.0 }
 0x73d   :  { %v8098_v43 = vpop.f32.mrf.mxu3 }
 0x73e   :  { %7092 = vst.msk [vmem:[#allocation2 + $0x200] sm:$0xff] %vm7028_vm8, %v7027_v34  ;;  %v8178_v35 = vadd.f32 %v8098_v43, %v12676_v4  ;;  %v10127_v4 = vld [vmem:[%s13478_s5 + $0x8] sm:$0xff] }
 0x73f   :  { %8780 = vmatpush.bf16.msrb.mxu2 %v10127_v4 }
 0x740   :  { %v8211_v41 = vadd.f32 %v13007_v55, %v8178_v35  ;;  %v13051_v35 = vpop.f32.mrf.mxu2 }
 0x742   :  { %v8243_v8 = vmax.f32 %v8211_v41, 0.0  ;;  %v13046_v43 = vpop.f32.mrf.mxu1 }
 0x743   :  { %8781 = vmatpush.bf16.msrb.mxu2 %v10126_v61  ;;  %v8452_v61 = vand.u32 7, %v10315_v21 }
 0x744   :  { %8276 = vst.msk [vmem:[#allocation2 + $0x8] sm:$0xff] %vm8275_vm5, %v8243_v8  ;;  %v7305_v8 = vld [vmem:[#allocation2 + $0x14a] ss:$2 sm:$0xff] }
 0x745   :  { %v8100_v25 = vpop.f32.mrf.mxu3  ;;  %v7220_v53 = vld [vmem:[#allocation2 + $0x1f8] ss:$2 sm:$0xff]  ;;  %v7252_v62 = vld [vmem:[#allocation2 + $0x1f9] ss:$2 sm:$0xff]  ;;  %v7369_v28 = vmax.f32 %v7305_v8, %v7337_v23  ;;  %vm8468_vm9 = vcmp.eq.s32.totalorder %v8452_v61, 0  ;;  %vm8532_vm11 = vcmp.eq.s32.totalorder %v8452_v61, 7 }
 0x746   :  { %v7124_v14 = vld [vmem:[#allocation2 + $0x1f6] ss:$2 sm:$0xff]  ;;  %v8179_v30 = vadd.f32 %v8100_v25, %v7931_v2  ;;  %v7284_v1 = vmax.f32 %v7220_v53, %v7252_v62  ;;  %v7156_v32 = vld [vmem:[#allocation2 + $0x1f7] ss:$2 sm:$0xff]  ;;  %v7939_v53 = vadd.f32 %v12974_v49, %v12971_v10 }
 0x747   :  { %v7188_v6 = vmax.f32 %v7124_v14, %v7156_v32  ;;  %v8018_v5 = vpack.c.bf16 %v7658_v16, %v7369_v28  ;;  %v7308_v62 = vld [vmem:[#allocation2 + $0x17a] ss:$2 sm:$0xff]  ;;  %v7340_v14 = vld [vmem:[#allocation2 + $0x17b] ss:$2 sm:$0xff] }
 0x748   :  { %v8212_v58 = vadd.f32 %v13007_v55, %v8179_v30  ;;  %v7704_v34 = vpack.c.bf16 %v7284_v1, %v7283_v26  ;;  %v13690_v30 = vld [vmem:[#allocation9_spill] sm:$0xff] }
 0x749   :  { %v7684_v44 = vpack.c.bf16 %v7188_v6, %v7539_v20  ;;  %v7404_v26 = vand.u32 15, %v13690_v30  ;;  %v8453_v6 = vand.u32 7, %v12855_v15  ;;  %v7372_v20 = vmax.f32 %v7308_v62, %v7340_v14 }
 0x74a   :  { %v8244_v17 = vmax.f32 %v8212_v58, 0.0  ;;  %9894 = vmatmul.msk.bf16.gmra.mxu1 %vm7028_vm8, %v7704_v34  ;;  %9940 = vmatmul.msk.bf16.gmra.mxu3 %vm7028_vm8, %v8017_v22  ;;  %v13063_v60 = vpop.f32.mrf.mxu1  ;;  %v7307_v22 = vld [vmem:[#allocation2 + $0x16a] ss:$2 sm:$0xff] }
 0x74b   :  { %9918 = vmatmul.msk.bf16.gmra.mxu2 %vm7028_vm8, %v7684_v44  ;;  %v7339_v44 = vld [vmem:[#allocation2 + $0x16b] ss:$2 sm:$0xff]  ;;  %vm7564_vm1 = vcmp.eq.s32.totalorder %v7404_v26, 15  ;;  %vm8469_vm10 = vcmp.eq.s32.totalorder %v8453_v6, 0  ;;  %vm8533_vm12 = vcmp.eq.s32.totalorder %v8453_v6, 7  ;;  %v7944_v26 = vadd.f32 %v13023_v29, %v13013_v47 }
 0x74c   :  { %8277 = vst.msk [vmem:[#allocation2 + $0x10] sm:$0xff] %vm8275_vm5, %v8244_v17  ;;  %v7941_v17 = vadd.f32 %v12985_v42, %v12979_v7  ;;  %v7660_v23 = vsel %vm7564_vm1, 0.0, %v7372_v20  ;;  %v7371_v16 = vmax.f32 %v7307_v22, %v7339_v44  ;;  %v7342_v22 = vld [vmem:[#allocation2 + $0x19b] ss:$2 sm:$0xff] }
 0x74d   :  { %v8103_v41 = vpop.f32.mrf.mxu3 }
 0x74e   :  { %v8180_v46 = vadd.f32 %v8103_v41, %v12719_v50  ;;  %v13060_v50 = vpop.f32.mrf.mxu2 }
 0x750   :  { %v8213_v31 = vadd.f32 %v13007_v55, %v8180_v46 }
 0x752   :  { %v8245_v4 = vmax.f32 %v8213_v31, 0.0  ;;  %v13077_v37 = vpop.f32.mrf.mxu1 }
 0x753   :  { %v8308_v32 = vld [vmem:[#allocation2 + $0x6] ss:$2 sm:$0xff]  ;;  %v8324_v56 = vld [vmem:[#allocation2 + $0x7] ss:$2 sm:$0xff] }
 0x754   :  { %8278 = vst.msk [vmem:[#allocation2 + $0x18] sm:$0xff] %vm8275_vm5, %v8245_v4  ;;  %v8356_v58 = vld [vmem:[#allocation2 + $0x8] ss:$2 sm:$0xff]  ;;  %v8372_v34 = vld [vmem:[#allocation2 + $0x9] ss:$2 sm:$0xff]  ;;  %v8340_v45 = vmax.f32 %v8308_v32, %v8324_v56 }
 0x755   :  { %v8105_v63 = vpop.f32.mrf.mxu3  ;;  %v8388_v19 = vmax.f32 %v8356_v58, %v8372_v34  ;;  %v10135_v32 = vld [vmem:[%s13478_s5 + $0x48] sm:$0xff] }
 0x756   :  { %v8181_v2 = vadd.f32 %v8105_v63, %v7936_v52  ;;  %v13073_v10 = vpop.f32.mrf.mxu2  ;;  %v8516_v7 = vsel %vm8468_vm9, 0.0, %v8340_v45  ;;  %8894 = vmatpush.bf16.msrb.mxu3 %v10135_v32  ;;  %v7311_v32 = vld [vmem:[#allocation2 + $0x1aa] ss:$2 sm:$0xff] }
 0x758   :  { %v8214_v9 = vadd.f32 %v13007_v55, %v8181_v2 }
 0x75a   :  { %v8246_v25 = vmax.f32 %v8214_v9, 0.0  ;;  %9941 = vmatmul.msk.bf16.gmra.mxu3 %vm7028_vm8, %v8018_v5 }
 0x75b   :  { %v8404_v2 = vld [vmem:[#allocation2 + $0xa] ss:$2 sm:$0xff]  ;;  %v8420_v28 = vld [vmem:[#allocation2 + $0xb] ss:$2 sm:$0xff] }
 0x75c   :  { %8279 = vst.msk [vmem:[#allocation2 + $0x20] sm:$0xff] %vm8275_vm5, %v8246_v25  ;;  %v8019_v25 = vpack.c.bf16 %v7660_v23, %v7371_v16  ;;  %v8436_v62 = vmax.f32 %v8404_v2, %v8420_v28  ;;  %v7949_v16 = vadd.f32 %v13060_v50, %v13063_v60  ;;  %v7312_v2 = vld [vmem:[#allocation2 + $0x1ba] ss:$2 sm:$0xff]  ;;  %v7344_v28 = vld [vmem:[#allocation2 + $0x1bb] ss:$2 sm:$0xff]  ;;  %v8455_v50 = vand.u32 7, %v13661_v24 }
 0x75d   :  { %v8108_v12 = vpop.f32.mrf.mxu3 }
 0x75e   :  { %v8182_v59 = vadd.f32 %v8108_v12, %v7939_v53  ;;  %v843_v53 = vadd.s32 200, %v10315_v21  ;;  %v13083_v12 = vpop.f32.mrf.mxu2  ;;  %v13095_v61 = vsel %vm8532_vm11, 0.0, %v8436_v62  ;;  %v8454_v62 = vand.u32 7, %v12538_v38 }
 0x75f   :  { %vm8471_vm0 = vcmp.eq.s32.totalorder %v8455_v50, 0  ;;  %vm8535_vm3 = vcmp.eq.s32.totalorder %v8455_v50, 7 }
 0x760   :  { %v8215_v1 = vadd.f32 %v13007_v55, %v8182_v59  ;;  %v7406_v34 = vand.u32 15, %v843_v53  ;;  %vm8470_vm15 = vcmp.eq.s32.totalorder %v8454_v62, 0  ;;  %vm8534_vm2 = vcmp.eq.s32.totalorder %v8454_v62, 7 }
 0x762   :  { %v8247_v49 = vmax.f32 %v8215_v1, 0.0  ;;  %v13089_v1 = vpop.f32.mrf.mxu1  ;;  %vm7566_vm13 = vcmp.eq.s32.totalorder %v7406_v34, 15 }
 0x763   :  { %v8357_v13 = vld [vmem:[#allocation2 + $0x18] ss:$2 sm:$0xff]  ;;  %v8373_v41 = vld [vmem:[#allocation2 + $0x19] ss:$2 sm:$0xff] }
 0x764   :  { %v8309_v46 = vld [vmem:[#allocation2 + $0x16] ss:$2 sm:$0xff]  ;;  %v8389_v31 = vmax.f32 %v8357_v13, %v8373_v41  ;;  %8280 = vst.msk [vmem:[#allocation2 + $0x28] sm:$0xff] %vm8275_vm5, %v8247_v49  ;;  %v8325_v54 = vld [vmem:[#allocation2 + $0x17] ss:$2 sm:$0xff] }
 0x765   :  { %v8110_v4 = vpop.f32.mrf.mxu3  ;;  %v8341_v8 = vmax.f32 %v8309_v46, %v8325_v54  ;;  %v7310_v49 = vld [vmem:[#allocation2 + $0x19a] ss:$2 sm:$0xff]  ;;  %v7309_v13 = vld [vmem:[#allocation2 + $0x18a] ss:$2 sm:$0xff]  ;;  %v7341_v41 = vld [vmem:[#allocation2 + $0x18b] ss:$2 sm:$0xff]  ;;  %v7946_v46 = vadd.f32 %v13051_v35, %v13046_v43 }
 0x766   :  { %v8183_v52 = vadd.f32 %v8110_v4, %v7941_v17  ;;  %v8612_v63 = vpack.c.bf16 %v8389_v31, %v8388_v19  ;;  %v7374_v44 = vmax.f32 %v7310_v49, %v7342_v22  ;;  %v13104_v45 = vpop.f32.mrf.mxu2 }
 0x767   :  { %v8517_v42 = vsel %vm8469_vm10, 0.0, %v8341_v8  ;;  %v7373_v8 = vmax.f32 %v7309_v13, %v7341_v41 }
 0x768   :  { %v8216_v9 = vadd.f32 %v13007_v55, %v8183_v52  ;;  %9971 = vmatmul.msk.bf16.vlgmr.msrb.gmra.mxu1 %vm8275_vm5, %v8612_v63  ;;  %v8596_v5 = vpack.c.bf16 %v8517_v42, %v8516_v7  ;;  %v7662_v31 = vsel %vm7566_vm13, 0.0, %v7374_v44 }
 0x769   :  { %v8020_v52 = vpack.c.bf16 %v7662_v31, %v7373_v8 }
 0x76a   :  { %v8248_v59 = vmax.f32 %v8216_v9, 0.0  ;;  %9995 = vmatmul.msk.bf16.vlgmr.msrb.gmra.mxu2 %vm8275_vm5, %v8596_v5  ;;  %9942 = vmatmul.msk.bf16.gmra.mxu3 %vm7028_vm8, %v8019_v25  ;;  %v13107_v54 = vpop.f32.mrf.mxu1  ;;  %v13691_v9 = vld [vmem:[#allocation53_spill] sm:$0xff] }
 0x76b   :  { %v8405_v14 = vld [vmem:[#allocation2 + $0x1a] ss:$2 sm:$0xff]  ;;  %v8421_v30 = vld [vmem:[#allocation2 + $0x1b] ss:$2 sm:$0xff]  ;;  %v7408_v5 = vand.u32 15, %v13691_v9 }
 0x76c   :  { %8281 = vst.msk [vmem:[#allocation2 + $0x30] sm:$0xff] %vm8275_vm5, %v8248_v59  ;;  %v8437_v56 = vmax.f32 %v8405_v14, %v8421_v30  ;;  %v7376_v30 = vmax.f32 %v7312_v2, %v7344_v28  ;;  %v847_v2 = vadd.s32 232, %v10315_v21 }
 0x76d   :  { %v8113_v58 = vpop.f32.mrf.mxu3  ;;  %vm7568_vm14 = vcmp.eq.s32.totalorder %v7408_v5, 15 }
 0x76e   :  { %v8184_v20 = vadd.f32 %v8113_v58, %v7944_v26  ;;  %v13097_v6 = vsel %vm8533_vm12, 0.0, %v8437_v56  ;;  %v13113_v43 = vpop.f32.mrf.mxu2  ;;  %v7343_v56 = vld [vmem:[#allocation2 + $0x1ab] ss:$2 sm:$0xff]  ;;  %v7951_v58 = vadd.f32 %v13073_v10, %v13077_v37 }
 0x76f   :  { %v8823_v47 = vpack.c.bf16 %v13097_v6, %v13095_v61  ;;  %v7375_v8 = vmax.f32 %v7311_v32, %v7343_v56  ;;  %v7314_v32 = vld [vmem:[#allocation2 + $0x1da] ss:$2 sm:$0xff]  ;;  %v7346_v56 = vld [vmem:[#allocation2 + $0x1db] ss:$2 sm:$0xff] }
 0x770   :  { %v8217_v29 = vadd.f32 %v13007_v55, %v8184_v20 }
 0x772   :  { %v8249_v17 = vmax.f32 %v8217_v29, 0.0  ;;  %v13116_v7 = vpop.f32.mrf.mxu1 }
 0x773   :  { %v8310_v53 = vld [vmem:[#allocation2 + $0x26] ss:$2 sm:$0xff]  ;;  %v8326_v59 = vld [vmem:[#allocation2 + $0x27] ss:$2 sm:$0xff] }
 0x774   :  { %8282 = vst.msk [vmem:[#allocation2 + $0x38] sm:$0xff] %vm8275_vm5, %v8249_v17  ;;  %v8358_v60 = vld [vmem:[#allocation2 + $0x28] ss:$2 sm:$0xff]  ;;  %v8374_v14 = vld [vmem:[#allocation2 + $0x29] ss:$2 sm:$0xff]  ;;  %v8342_v22 = vmax.f32 %v8310_v53, %v8326_v59  ;;  %v7954_v53 = vadd.f32 %v13083_v12, %v13089_v1  ;;  %v7378_v1 = vmax.f32 %v7314_v32, %v7346_v56 }
 0x775   :  { %v8115_v19 = vpop.f32.mrf.mxu3  ;;  %v8390_v29 = vmax.f32 %v8358_v60, %v8374_v14  ;;  %v7410_v14 = vand.u32 15, %v847_v2  ;;  %v7347_v32 = vld [vmem:[#allocation2 + $0x1eb] ss:$2 sm:$0xff] }
 0x776   :  { %v8185_v4 = vadd.f32 %v8115_v19, %v7946_v46  ;;  %v7664_v46 = vsel %vm7568_vm14, 0.0, %v7376_v30  ;;  %v13125_v19 = vpop.f32.mrf.mxu2  ;;  %v8518_v10 = vsel %vm8470_vm15, 0.0, %v8342_v22  ;;  %v7345_v22 = vld [vmem:[#allocation2 + $0x1cb] ss:$2 sm:$0xff] }
 0x777   :  { %vm7570_vm4 = vcmp.eq.s32.totalorder %v7410_v14, 15 }
 0x778   :  { %v8218_v23 = vadd.f32 %v13007_v55, %v8185_v4 }
 0x77a   :  { %v8250_v63 = vmax.f32 %v8218_v23, 0.0  ;;  %9943 = vmatmul.msk.bf16.gmra.mxu3 %vm7028_vm8, %v8020_v52 }
 0x77b   :  { %v8406_v23 = vld [vmem:[#allocation2 + $0x2a] ss:$2 sm:$0xff]  ;;  %v8422_v52 = vld [vmem:[#allocation2 + $0x2b] ss:$2 sm:$0xff] }
 0x77c   :  { %8283 = vst.msk [vmem:[#allocation2 + $0x40] sm:$0xff] %vm8275_vm5, %v8250_v63  ;;  %v13127_v63 = vpop.f32.mrf.mxu1  ;;  %v8438_v9 = vmax.f32 %v8406_v23, %v8422_v52  ;;  %v7316_v52 = vld [vmem:[#allocation2 + $0x1fa] ss:$2 sm:$0xff] }
 0x77d   :  { %v8118_v35 = vpop.f32.mrf.mxu3  ;;  %v7961_v56 = vadd.f32 %v13125_v19, %v13127_v63 }
 0x77e   :  { %v8186_v42 = vadd.f32 %v8118_v35, %v7949_v16  ;;  %v13137_v30 = vpop.f32.mrf.mxu2 }
 0x780   :  { %v8219_v25 = vadd.f32 %v13007_v55, %v8186_v42  ;;  %v8021_v42 = vpack.c.bf16 %v7664_v46, %v7375_v8  ;;  %v10134_v46 = vld [vmem:[%s13478_s5 + $0x40] sm:$0xff] }
 0x781   :  { %8895 = vmatpush.bf16.msrb.mxu3 %v10134_v46 }
 0x782   :  { %v8251_v26 = vmax.f32 %v8219_v25, 0.0 }
 0x783   :  { %v8359_v34 = vld [vmem:[#allocation2 + $0x38] ss:$2 sm:$0xff]  ;;  %v8375_v20 = vld [vmem:[#allocation2 + $0x39] ss:$2 sm:$0xff] }
 0x784   :  { %v8311_v49 = vld [vmem:[#allocation2 + $0x36] ss:$2 sm:$0xff]  ;;  %8284 = vst.msk [vmem:[#allocation2 + $0x48] sm:$0xff] %vm8275_vm5, %v8251_v26  ;;  %v8391_v44 = vmax.f32 %v8359_v34, %v8375_v20  ;;  %v8327_v17 = vld [vmem:[#allocation2 + $0x37] ss:$2 sm:$0xff]  ;;  %v13145_v50 = vpop.f32.mrf.mxu1 }
 0x785   :  { %v8120_v13 = vpop.f32.mrf.mxu3  ;;  %v8343_v41 = vmax.f32 %v8311_v49, %v8327_v17  ;;  %v7313_v49 = vld [vmem:[#allocation2 + $0x1ca] ss:$2 sm:$0xff]  ;;  %v7666_v17 = vsel %vm7570_vm4, 0.0, %v7378_v1 }
 0x786   :  { %v8187_v31 = vadd.f32 %v8120_v13, %v7951_v58  ;;  %v8613_v4 = vpack.c.bf16 %v8391_v44, %v8390_v29  ;;  %v13139_v58 = vsel %vm8534_vm2, 0.0, %v8438_v9  ;;  %v7956_v29 = vadd.f32 %v13104_v45, %v13107_v54 }
 0x787   :  { %v8519_v37 = vsel %vm8471_vm0, 0.0, %v8343_v41  ;;  %v7377_v41 = vmax.f32 %v7313_v49, %v7345_v22  ;;  %v7959_v45 = vadd.f32 %v13113_v43, %v13116_v7 }
 0x788   :  { %v8220_v16 = vadd.f32 %v13007_v55, %v8187_v31  ;;  %9972 = vmatmul.msk.bf16.gmra.mxu1 %vm8275_vm5, %v8613_v4  ;;  %v8597_v35 = vpack.c.bf16 %v8519_v37, %v8518_v10  ;;  %v13154_v31 = vpop.f32.mrf.mxu2 }
 0x789   :  { %v8022_v8 = vpack.c.bf16 %v7666_v17, %v7377_v41 }
 0x78a   :  { %v8252_v28 = vmax.f32 %v8220_v16, 0.0  ;;  %9996 = vmatmul.msk.bf16.gmra.mxu2 %vm8275_vm5, %v8597_v35  ;;  %9944 = vmatmul.msk.bf16.gmra.mxu3 %vm7028_vm8, %v8021_v42  ;;  %v7348_v16 = vld [vmem:[#allocation2 + $0x1fb] ss:$2 sm:$0xff] }
 0x78b   :  { %v8407_v5 = vld [vmem:[#allocation2 + $0x3a] ss:$2 sm:$0xff]  ;;  %v8423_v25 = vld [vmem:[#allocation2 + $0x3b] ss:$2 sm:$0xff]  ;;  %v7380_v43 = vmax.f32 %v7316_v52, %v7348_v16  ;;  %v7964_v16 = vadd.f32 %v13137_v30, %v13145_v50 }
 0x78c   :  { %8285 = vst.msk [vmem:[#allocation2 + $0x50] sm:$0xff] %vm8275_vm5, %v8252_v28  ;;  %v8439_v59 = vmax.f32 %v8407_v5, %v8423_v25  ;;  %v7816_v10 = vpop.f32.mrf.mxu1  ;;  %v13692_v35 = vld [vmem:[#allocation10_spill] sm:$0xff]  ;;  %v8456_v25 = vand.u32 7, %v12387_v18 }
 0x78d   :  { %v8123_v60 = vpop.f32.mrf.mxu3  ;;  %v7412_v42 = vand.u32 15, %v13692_v35 }
 0x78e   :  { %v8188_v26 = vadd.f32 %v8123_v60, %v7954_v53  ;;  %v13141_v34 = vsel %vm8535_vm3, 0.0, %v8439_v59  ;;  %v8457_v53 = vand.u32 7, %v12882_v33  ;;  %vm8472_vm6 = vcmp.eq.s32.totalorder %v8456_v25, 0 }
 0x78f   :  { %v8824_v62 = vpack.c.bf16 %v13141_v34, %v13139_v58  ;;  %vm7572_vm7 = vcmp.eq.s32.totalorder %v7412_v42, 15  ;;  %vm8536_vm12 = vcmp.eq.s32.totalorder %v8456_v25, 7 }
 0x790   :  { %v8221_v12 = vadd.f32 %v13007_v55, %v8188_v26  ;;  %v7968_v2 = vpop.f32.mrf.mxu2  ;;  %v7315_v26 = vld [vmem:[#allocation2 + $0x1ea] ss:$2 sm:$0xff]  ;;  %vm8473_vm1 = vcmp.eq.s32.totalorder %v8457_v53, 0  ;;  %v7668_v41 = vsel %vm7572_vm7, 0.0, %v7380_v43  ;;  %vm8537_vm11 = vcmp.eq.s32.totalorder %v8457_v53, 7 }
 0x791   :  { %v7379_v63 = vmax.f32 %v7315_v26, %v7347_v32 }
 0x792   :  { %v8253_v20 = vmax.f32 %v8221_v12, 0.0 }
 0x793   :  { %v8312_v9 = vld [vmem:[#allocation2 + $0x46] ss:$2 sm:$0xff]  ;;  %v8328_v5 = vld [vmem:[#allocation2 + $0x47] ss:$2 sm:$0xff] }
 0x794   :  { %8286 = vst.msk [vmem:[#allocation2 + $0x58] sm:$0xff] %vm8275_vm5, %v8253_v20  ;;  %v8360_v59 = vld [vmem:[#allocation2 + $0x48] ss:$2 sm:$0xff]  ;;  %v8376_v60 = vld [vmem:[#allocation2 + $0x49] ss:$2 sm:$0xff]  ;;  %v7819_v7 = vpop.f32.mrf.mxu1  ;;  %v8344_v49 = vmax.f32 %v8312_v9, %v8328_v5 }
 0x795   :  { %v8125_v44 = vpop.f32.mrf.mxu3  ;;  %v8392_v22 = vmax.f32 %v8360_v59, %v8376_v60  ;;  %v7966_v60 = vadd.f32 %v13154_v31, %v7816_v10  ;;  %v7969_v30 = vadd.f32 %v7968_v2, %v7819_v7 }
 0x796   :  { %v8189_v13 = vadd.f32 %v8125_v44, %v7956_v29 }
 0x798   :  { %v8222_v4 = vadd.f32 %v13007_v55, %v8189_v13 }
 0x79a   :  { %v8254_v37 = vmax.f32 %v8222_v4, 0.0  ;;  %9945 = vmatmul.msk.bf16.gmra.mxu3 %vm7028_vm8, %v8022_v8  ;;  %v8520_v4 = vsel %vm8472_vm6, 0.0, %v8344_v49 }
 0x79c   :  { %8287 = vst.msk [vmem:[#allocation2 + $0x60] sm:$0xff] %vm8275_vm5, %v8254_v37  ;;  %v7821_v35 = vpop.f32.mrf.mxu1 }
 0x79d   :  { %v8128_v54 = vpop.f32.mrf.mxu3 }
 0x79e   :  { %v8190_v23 = vadd.f32 %v8128_v54, %v7959_v45  ;;  %v8023_v54 = vpack.c.bf16 %v7668_v41, %v7379_v63 }
 0x7a0   :  { %v8223_v28 = vadd.f32 %v13007_v55, %v8190_v23  ;;  %v7970_v23 = vpop.f32.mrf.mxu2 }
 0x7a1   :  { %v7971_v6 = vadd.f32 %v7970_v23, %v7821_v35 }
 0x7a2   :  { %v8255_v14 = vmax.f32 %v8223_v28, 0.0 }
 0x7a3   :  { %v8361_v12 = vld [vmem:[#allocation2 + $0x58] ss:$2 sm:$0xff]  ;;  %v8377_v1 = vld [vmem:[#allocation2 + $0x59] ss:$2 sm:$0xff] }
 0x7a4   :  { %v8313_v20 = vld [vmem:[#allocation2 + $0x56] ss:$2 sm:$0xff]  ;;  %8288 = vst.msk [vmem:[#allocation2 + $0x68] sm:$0xff] %vm8275_vm5, %v8255_v14  ;;  %v8393_v29 = vmax.f32 %v8361_v12, %v8377_v1  ;;  %v8329_v44 = vld [vmem:[#allocation2 + $0x57] ss:$2 sm:$0xff]  ;;  %v7824_v43 = vpop.f32.mrf.mxu1 }
 0x7a5   :  { %v8130_v17 = vpop.f32.mrf.mxu3  ;;  %v8345_v13 = vmax.f32 %v8313_v20, %v8329_v44 }
 0x7a6   :  { %v8191_v46 = vadd.f32 %v8130_v17, %v7961_v56  ;;  %v8614_v19 = vpack.c.bf16 %v8393_v29, %v8392_v22  ;;  %v8458_v22 = vand.u32 7, %v12618_v0  ;;  %v8459_v29 = vand.u32 7, %v13666_v57 }
 0x7a7   :  { %v8521_v8 = vsel %vm8473_vm1, 0.0, %v8345_v13 }
 0x7a8   :  { %v8224_v37 = vadd.f32 %v13007_v55, %v8191_v46  ;;  %9973 = vmatmul.msk.bf16.gmra.mxu1 %vm8275_vm5, %v8614_v19  ;;  %v8598_v45 = vpack.c.bf16 %v8521_v8, %v8520_v4  ;;  %v7973_v5 = vpop.f32.mrf.mxu2  ;;  %vm8474_vm9 = vcmp.eq.s32.totalorder %v8458_v22, 0  ;;  %vm8475_vm10 = vcmp.eq.s32.totalorder %v8459_v29, 0 }
 0x7a9   :  { %vm13218_vm13 = vcmp.eq.s32.totalorder %v8458_v22, 7  ;;  %vm8539_vm14 = vcmp.eq.s32.totalorder %v8459_v29, 7 }
 0x7aa   :  { %v8256_v52 = vmax.f32 %v8224_v37, 0.0  ;;  %9997 = vmatmul.msk.bf16.gmra.mxu2 %vm8275_vm5, %v8598_v45  ;;  %9946 = vmatmul.msk.bf16.gmra.mxu3 %vm7028_vm8, %v8023_v54 }
 0x7ac   :  { %8289 = vst.msk [vmem:[#allocation2 + $0x70] sm:$0xff] %vm8275_vm5, %v8256_v52  ;;  %v7826_v1 = vpop.f32.mrf.mxu1 }
 0x7ad   :  { %v8133_v42 = vpop.f32.mrf.mxu3 }
 0x7ae   :  { %v8192_v28 = vadd.f32 %v8133_v42, %v7964_v16 }
 0x7b0   :  { %v8225_v9 = vadd.f32 %v13007_v55, %v8192_v28  ;;  %v7975_v50 = vpop.f32.mrf.mxu2  ;;  %v7974_v28 = vadd.f32 %v7973_v5, %v7824_v43 }
 0x7b1   :  { %v7976_v34 = vadd.f32 %v7975_v50, %v7826_v1 }
 0x7b2   :  { %v8257_v59 = vmax.f32 %v8225_v9, 0.0 }
 0x7b3   :  { %v8314_v20 = vld [vmem:[#allocation2 + $0x66] ss:$2 sm:$0xff]  ;;  %v8330_v49 = vld [vmem:[#allocation2 + $0x67] ss:$2 sm:$0xff] }
 0x7b4   :  { %8290 = vst.msk [vmem:[#allocation2 + $0x78] sm:$0xff] %vm8275_vm5, %v8257_v59  ;;  %v8362_v44 = vld [vmem:[#allocation2 + $0x68] ss:$2 sm:$0xff]  ;;  %v8378_v17 = vld [vmem:[#allocation2 + $0x69] ss:$2 sm:$0xff]  ;;  %v8346_v13 = vmax.f32 %v8314_v20, %v8330_v49  ;;  %v7829_v37 = vpop.f32.mrf.mxu1 }
 0x7b5   :  { %v8135_v14 = vpop.f32.mrf.mxu3  ;;  %v8394_v46 = vmax.f32 %v8362_v44, %v8378_v17 }
 0x7b6   :  { %v8193_v26 = vadd.f32 %v8135_v14, %v7966_v60  ;;  %v8522_v23 = vsel %vm8474_vm9, 0.0, %v8346_v13  ;;  %v8409_v14 = vld [vmem:[#allocation2 + $0x5a] ss:$2 sm:$0xff] }
 0x7b8   :  { %v8226_v32 = vadd.f32 %v13007_v55, %v8193_v26  ;;  %v7978_v41 = vpop.f32.mrf.mxu2  ;;  %v8425_v26 = vld [vmem:[#allocation2 + $0x5b] ss:$2 sm:$0xff] }
 0x7b9   :  { %v7979_v53 = vadd.f32 %v7978_v41, %v7829_v37 }
 0x7ba   :  { %v8258_v56 = vmax.f32 %v8226_v32, 0.0  ;;  %10027 = vmatmul.msk.bf16.vlgmr.msrb.gmra.mxu3 %vm8275_vm5, %v8823_v47 }
 0x7bb   :  { %v8410_v25 = vld [vmem:[#allocation2 + $0x6a] ss:$2 sm:$0xff] }
 0x7bc   :  { %8291 = vst.msk [vmem:[#allocation2 + $0x80] sm:$0xff] %vm8275_vm5, %v8258_v56  ;;  %v7831_v32 = vpop.f32.mrf.mxu1 }
 0x7bd   :  { %v8138_v12 = vpop.f32.mrf.mxu3 }
 0x7be   :  { %v8194_v31 = vadd.f32 %v8138_v12, %v7969_v30  ;;  %v8408_v30 = vld [vmem:[#allocation2 + $0x4a] ss:$2 sm:$0xff]  ;;  %v8424_v12 = vld [vmem:[#allocation2 + $0x4b] ss:$2 sm:$0xff] }
 0x7bf   :  { %v8440_v58 = vmax.f32 %v8408_v30, %v8424_v12 }
 0x7c0   :  { %v8227_v10 = vadd.f32 %v13007_v55, %v8194_v31  ;;  %v7980_v59 = vpop.f32.mrf.mxu2  ;;  %v8441_v31 = vmax.f32 %v8409_v14, %v8425_v26 }
 0x7c1   :  { %v8584_v49 = vsel %vm8536_vm12, 0.0, %v8440_v58 }
 0x7c2   :  { %v8259_v61 = vmax.f32 %v8227_v10, 0.0  ;;  %v8585_v5 = vsel %vm8537_vm11, 0.0, %v8441_v31 }
 0x7c3   :  { %v8363_v47 = vld [vmem:[#allocation2 + $0x78] ss:$2 sm:$0xff]  ;;  %v8379_v2 = vld [vmem:[#allocation2 + $0x79] ss:$2 sm:$0xff] }
 0x7c4   :  { %v8315_v7 = vld [vmem:[#allocation2 + $0x76] ss:$2 sm:$0xff]  ;;  %8292 = vst.msk [vmem:[#allocation2 + $0x88] sm:$0xff] %vm8275_vm5, %v8259_v61  ;;  %v8395_v19 = vmax.f32 %v8363_v47, %v8379_v2  ;;  %v8331_v63 = vld [vmem:[#allocation2 + $0x77] ss:$2 sm:$0xff]  ;;  %v7834_v44 = vpop.f32.mrf.mxu1  ;;  %v8825_v61 = vpack.c.bf16 %v8585_v5, %v8584_v49 }
 0x7c5   :  { %v8140_v4 = vpop.f32.mrf.mxu3  ;;  %v8347_v8 = vmax.f32 %v8315_v7, %v8331_v63  ;;  %v8426_v7 = vld [vmem:[#allocation2 + $0x6b] ss:$2 sm:$0xff] }
 0x7c6   :  { %v8195_v45 = vadd.f32 %v8140_v4, %v7971_v6  ;;  %v8615_v54 = vpack.c.bf16 %v8395_v19, %v8394_v46  ;;  %v8460_v4 = vand.u32 7, %v10417_v39 }
 0x7c7   :  { %v8523_v52 = vsel %vm8475_vm10, 0.0, %v8347_v8  ;;  %v8461_v8 = vand.u32 7, %v12911_v11  ;;  %v8442_v11 = vmax.f32 %v8410_v25, %v8426_v7 }
 0x7c8   :  { %v8228_v16 = vadd.f32 %v13007_v55, %v8195_v45  ;;  %9974 = vmatmul.msk.bf16.gmra.mxu1 %vm8275_vm5, %v8615_v54  ;;  %v8599_v35 = vpack.c.bf16 %v8523_v52, %v8522_v23  ;;  %v7983_v43 = vpop.f32.mrf.mxu2  ;;  %vm8476_vm15 = vcmp.eq.s32.totalorder %v8460_v4, 0  ;;  %vm8540_vm3 = vcmp.eq.s32.totalorder %v8460_v4, 7 }
 0x7c9   :  { %vm8477_vm0 = vcmp.eq.s32.totalorder %v8461_v8, 0  ;;  %vm8541_vm2 = vcmp.eq.s32.totalorder %v8461_v8, 7 }
 0x7ca   :  { %v8260_v42 = vmax.f32 %v8228_v16, 0.0  ;;  %9998 = vmatmul.msk.bf16.gmra.mxu2 %vm8275_vm5, %v8599_v35  ;;  %10028 = vmatmul.msk.bf16.gmra.mxu3 %vm8275_vm5, %v8824_v62  ;;  %v7981_v16 = vadd.f32 %v7980_v59, %v7831_v32  ;;  %v8586_v59 = vsel %vm13218_vm13, 0.0, %v8442_v11 }
 0x7cb   :  { %v8411_v47 = vld [vmem:[#allocation2 + $0x7a] ss:$2 sm:$0xff]  ;;  %v8427_v2 = vld [vmem:[#allocation2 + $0x7b] ss:$2 sm:$0xff] }
 0x7cc   :  { %8293 = vst.msk [vmem:[#allocation2 + $0x90] sm:$0xff] %vm8275_vm5, %v8260_v42  ;;  %v8443_v41 = vmax.f32 %v8411_v47, %v8427_v2  ;;  %v7836_v37 = vpop.f32.mrf.mxu1 }
 0x7cd   :  { %v8143_v9 = vpop.f32.mrf.mxu3 }
 0x7ce   :  { %v8196_v60 = vadd.f32 %v8143_v9, %v7974_v28 }
 0x7d0   :  { %v8229_v56 = vadd.f32 %v13007_v55, %v8196_v60  ;;  %v7985_v13 = vpop.f32.mrf.mxu2 }
 0x7d2   :  { %v8261_v10 = vmax.f32 %v8229_v56, 0.0  ;;  %v8587_v56 = vsel %vm8539_vm14, 0.0, %v8443_v41 }
 0x7d3   :  { %v8316_v19 = vld [vmem:[#allocation2 + $0x86] ss:$2 sm:$0xff]  ;;  %v8332_v63 = vld [vmem:[#allocation2 + $0x87] ss:$2 sm:$0xff] }
 0x7d4   :  { %8294 = vst.msk [vmem:[#allocation2 + $0x98] sm:$0xff] %vm8275_vm5, %v8261_v10  ;;  %v8364_v45 = vld [vmem:[#allocation2 + $0x88] ss:$2 sm:$0xff]  ;;  %v8380_v54 = vld [vmem:[#allocation2 + $0x89] ss:$2 sm:$0xff]  ;;  %v8348_v28 = vmax.f32 %v8316_v19, %v8332_v63 }
 0x7d5   :  { %v8145_v62 = vpop.f32.mrf.mxu3  ;;  %v8396_v9 = vmax.f32 %v8364_v45, %v8380_v54 }
 0x7d6   :  { %v8197_v20 = vadd.f32 %v8145_v62, %v7976_v34  ;;  %v8524_v31 = vsel %vm8476_vm15, 0.0, %v8348_v28  ;;  %v8826_v34 = vpack.c.bf16 %v8587_v56, %v8586_v59  ;;  %v7839_v62 = vpop.f32.mrf.mxu1  ;;  %v8463_v28 = vand.u32 7, %v13673_v48 }
 0x7d8   :  { %v8230_v17 = vadd.f32 %v13007_v55, %v8197_v20  ;;  %v7988_v32 = vpop.f32.mrf.mxu2  ;;  %v7984_v20 = vadd.f32 %v7983_v43, %v7834_v44  ;;  %vm8479_vm7 = vcmp.eq.s32.totalorder %v8463_v28, 0  ;;  %vm8543_vm1 = vcmp.eq.s32.totalorder %v8463_v28, 7 }
 0x7da   :  { %v8262_v6 = vmax.f32 %v8230_v17, 0.0  ;;  %10029 = vmatmul.msk.bf16.gmra.mxu3 %vm8275_vm5, %v8825_v61 }
 0x7dc   :  { %8295 = vst.msk [vmem:[#allocation2 + $0xa0] sm:$0xff] %vm8275_vm5, %v8262_v6 }
 0x7dd   :  { %v8148_v50 = vpop.f32.mrf.mxu3 }
 0x7de   :  { %v8198_v1 = vadd.f32 %v8148_v50, %v7979_v53  ;;  %v8412_v50 = vld [vmem:[#allocation2 + $0x8a] ss:$2 sm:$0xff]  ;;  %v7841_v19 = vpop.f32.mrf.mxu1 }
 0x7e0   :  { %v8231_v46 = vadd.f32 %v13007_v55, %v8198_v1  ;;  %v8428_v1 = vld [vmem:[#allocation2 + $0x8b] ss:$2 sm:$0xff]  ;;  %v7990_v2 = vpop.f32.mrf.mxu2 }
 0x7e1   :  { %v8444_v7 = vmax.f32 %v8412_v50, %v8428_v1 }
 0x7e2   :  { %v8263_v23 = vmax.f32 %v8231_v46, 0.0  ;;  %v7986_v46 = vadd.f32 %v7985_v13, %v7836_v37 }
 0x7e3   :  { %v8365_v35 = vld [vmem:[#allocation2 + $0x98] ss:$2 sm:$0xff]  ;;  %v8381_v42 = vld [vmem:[#allocation2 + $0x99] ss:$2 sm:$0xff]  ;;  %v8588_v45 = vsel %vm8540_vm3, 0.0, %v8444_v7 }
 0x7e4   :  { %v8317_v39 = vld [vmem:[#allocation2 + $0x96] ss:$2 sm:$0xff]  ;;  %8296 = vst.msk [vmem:[#allocation2 + $0xa8] sm:$0xff] %vm8275_vm5, %v8263_v23  ;;  %v8397_v60 = vmax.f32 %v8365_v35, %v8381_v42  ;;  %v8333_v14 = vld [vmem:[#allocation2 + $0x97] ss:$2 sm:$0xff] }
 0x7e5   :  { %v8150_v22 = vpop.f32.mrf.mxu3  ;;  %v8349_v26 = vmax.f32 %v8317_v39, %v8333_v14  ;;  %v8462_v39 = vand.u32 7, %v12687_v51  ;;  %v7991_v14 = vadd.f32 %v7990_v2, %v7841_v19 }
 0x7e6   :  { %v8199_v30 = vadd.f32 %v8150_v22, %v7981_v16  ;;  %v8616_v12 = vpack.c.bf16 %v8397_v60, %v8396_v9  ;;  %v7989_v16 = vadd.f32 %v7988_v32, %v7839_v62  ;;  %v7844_v35 = vpop.f32.mrf.mxu1 }
 0x7e7   :  { %v8525_v29 = vsel %vm8477_vm0, 0.0, %v8349_v26  ;;  %vm8478_vm4 = vcmp.eq.s32.totalorder %v8462_v39, 0  ;;  %vm8542_vm6 = vcmp.eq.s32.totalorder %v8462_v39, 7 }
 0x7e8   :  { %v8232_v10 = vadd.f32 %v13007_v55, %v8199_v30  ;;  %9975 = vmatmul.msk.bf16.gmra.mxu1 %vm8275_vm5, %v8616_v12  ;;  %v8600_v58 = vpack.c.bf16 %v8525_v29, %v8524_v31  ;;  %v7993_v23 = vpop.f32.mrf.mxu2 }
 0x7e9   :  { %v7994_v1 = vadd.f32 %v7993_v23, %v7844_v35 }
 0x7ea   :  { %v8264_v5 = vmax.f32 %v8232_v10, 0.0  ;;  %9999 = vmatmul.msk.bf16.gmra.mxu2 %vm8275_vm5, %v8600_v58  ;;  %10030 = vmatmul.msk.bf16.gmra.mxu3 %vm8275_vm5, %v8826_v34 }
 0x7eb   :  { %v8413_v61 = vld [vmem:[#allocation2 + $0x9a] ss:$2 sm:$0xff]  ;;  %v8429_v6 = vld [vmem:[#allocation2 + $0x9b] ss:$2 sm:$0xff] }
 0x7ec   :  { %8297 = vst.msk [vmem:[#allocation2 + $0xb0] sm:$0xff] %vm8275_vm5, %v8264_v5  ;;  %v8445_v47 = vmax.f32 %v8413_v61, %v8429_v6 }
 0x7ed   :  { %v8153_v49 = vpop.f32.mrf.mxu3 }
 0x7ee   :  { %v8200_v17 = vadd.f32 %v8153_v49, %v7984_v20  ;;  %v8589_v44 = vsel %vm8541_vm2, 0.0, %v8445_v47  ;;  %v7846_v10 = vpop.f32.mrf.mxu1 }
 0x7ef   :  { %v8827_v41 = vpack.c.bf16 %v8589_v44, %v8588_v45  ;;  %v13248_v44 = vld [vmem:[%s13474_s1 + $0x4] ss:$0 sm:$0xff] }
 0x7f0   :  { %v8233_v53 = vadd.f32 %v13007_v55, %v8200_v17  ;;  %v7995_v12 = vpop.f32.mrf.mxu2 }
 0x7f2   :  { %v8265_v25 = vmax.f32 %v8233_v53, 0.0 }
 0x7f3   :  { %v8318_v4 = vld [vmem:[#allocation2 + $0xa6] ss:$2 sm:$0xff]  ;;  %v8334_v42 = vld [vmem:[#allocation2 + $0xa7] ss:$2 sm:$0xff] }
 0x7f4   :  { %8298 = vst.msk [vmem:[#allocation2 + $0xb8] sm:$0xff] %vm8275_vm5, %v8265_v25  ;;  %v8366_v11 = vld [vmem:[#allocation2 + $0xa8] ss:$2 sm:$0xff]  ;;  %v8382_v9 = vld [vmem:[#allocation2 + $0xa9] ss:$2 sm:$0xff]  ;;  %v8350_v30 = vmax.f32 %v8318_v4, %v8334_v42 }
 0x7f5   :  { %v8155_v43 = vpop.f32.mrf.mxu3  ;;  %v8398_v31 = vmax.f32 %v8366_v11, %v8382_v9 }
 0x7f6   :  { %v8201_v63 = vadd.f32 %v8155_v43, %v7986_v46  ;;  %v8526_v34 = vsel %vm8478_vm4, 0.0, %v8350_v30  ;;  %v7849_v7 = vpop.f32.mrf.mxu1 }
 0x7f8   :  { %v8234_v54 = vadd.f32 %v13007_v55, %v8201_v63  ;;  %v7998_v47 = vpop.f32.mrf.mxu2 }
 0x7fa   :  { %v8266_v52 = vmax.f32 %v8234_v54, 0.0  ;;  %10031 = vmatmul.msk.bf16.gmra.mxu3 %vm8275_vm5, %v8827_v41  ;;  %v7996_v54 = vadd.f32 %v7995_v12, %v7846_v10 }
 0x7fb   :  { %v8414_v5 = vld [vmem:[#allocation2 + $0xaa] ss:$2 sm:$0xff]  ;;  %v8430_v20 = vld [vmem:[#allocation2 + $0xab] ss:$2 sm:$0xff] }
 0x7fc   :  { %8299 = vst.msk [vmem:[#allocation2 + $0xc0] sm:$0xff] %vm8275_vm5, %v8266_v52  ;;  %v8446_v6 = vmax.f32 %v8414_v5, %v8430_v20 }
 0x7fd   :  { %v8158_v13 = vpop.f32.mrf.mxu3 }
 0x7fe   :  { %v8202_v8 = vadd.f32 %v8158_v13, %v7989_v16  ;;  %v7851_v16 = vpop.f32.mrf.mxu1 }
 0x800   :  { %v8235_v37 = vadd.f32 %v13007_v55, %v8202_v8  ;;  %v8000_v23 = vpop.f32.mrf.mxu2  ;;  %v7999_v8 = vadd.f32 %v7998_v47, %v7849_v7 }
 0x801   :  { %v8001_v30 = vadd.f32 %v8000_v23, %v7851_v16 }
 0x802   :  { %v8267_v60 = vmax.f32 %v8235_v37, 0.0 }
 0x803   :  { %v8367_v22 = vld [vmem:[#allocation2 + $0xb8] ss:$2 sm:$0xff]  ;;  %v8383_v26 = vld [vmem:[#allocation2 + $0xb9] ss:$2 sm:$0xff] }
 0x804   :  { %v8319_v56 = vld [vmem:[#allocation2 + $0xb6] ss:$2 sm:$0xff]  ;;  %8300 = vst.msk [vmem:[#allocation2 + $0xc8] sm:$0xff] %vm8275_vm5, %v8267_v60  ;;  %v8399_v29 = vmax.f32 %v8367_v22, %v8383_v26  ;;  %v8335_v59 = vld [vmem:[#allocation2 + $0xb7] ss:$2 sm:$0xff]  ;;  %v8464_v60 = vand.u32 7, %v13635_v36 }
 0x805   :  { %v8160_v32 = vpop.f32.mrf.mxu3  ;;  %v8351_v51 = vmax.f32 %v8319_v56, %v8335_v59 }
 0x806   :  { %v8203_v48 = vadd.f32 %v8160_v32, %v7991_v14  ;;  %v8617_v58 = vpack.c.bf16 %v8399_v29, %v8398_v31  ;;  %v7854_v39 = vpop.f32.mrf.mxu1  ;;  %v8465_v14 = vand.u32 7, %v12955_v40  ;;  %vm8480_vm9 = vcmp.eq.s32.totalorder %v8464_v60, 0 }
 0x807   :  { %v8527_v62 = vsel %vm8479_vm7, 0.0, %v8351_v51  ;;  %vm8544_vm11 = vcmp.eq.s32.totalorder %v8464_v60, 7  ;;  %v8466_v60 = vand.u32 7, %v12751_v27  ;;  %v10143_v27 = vld [vmem:[%s13479_s6 + $0x28] sm:$0xff] }
 0x808   :  { %v8236_v49 = vadd.f32 %v13007_v55, %v8203_v48  ;;  %9976 = vmatmul.msk.bf16.gmra.mxu1 %vm8275_vm5, %v8617_v58  ;;  %v8601_v17 = vpack.c.bf16 %v8527_v62, %v8526_v34  ;;  %v8590_v55 = vsel %vm8542_vm6, 0.0, %v8446_v6  ;;  %v8003_v4 = vpop.f32.mrf.mxu2  ;;  %vm8481_vm10 = vcmp.eq.s32.totalorder %v8465_v14, 0 }
 0x809   :  { %vm8545_vm12 = vcmp.eq.s32.totalorder %v8465_v14, 7  ;;  %v8467_v14 = vand.u32 7, %v13680_v3  ;;  %vm13291_vm13 = vcmp.eq.s32.totalorder %v8466_v60, 0  ;;  %vm8546_vm15 = vcmp.eq.s32.totalorder %v8466_v60, 7 }
 0x80a   :  { %v8268_v61 = vmax.f32 %v8236_v49, 0.0  ;;  %10000 = vmatmul.msk.bf16.gmra.mxu2 %vm8275_vm5, %v8601_v17 }
 0x80b   :  { %v8415_v53 = vld [vmem:[#allocation2 + $0xba] ss:$2 sm:$0xff]  ;;  %v8431_v50 = vld [vmem:[#allocation2 + $0xbb] ss:$2 sm:$0xff]  ;;  %vm13295_vm14 = vcmp.eq.s32.totalorder %v8467_v14, 0  ;;  %vm8547_vm0 = vcmp.eq.s32.totalorder %v8467_v14, 7 }
 0x80c   :  { %8301 = vst.msk [vmem:[#allocation2 + $0xd0] sm:$0xff] %vm8275_vm5, %v8268_v61  ;;  %v8447_v2 = vmax.f32 %v8415_v53, %v8431_v50 }
 0x80d   :  { %v8163_v25 = vpop.f32.mrf.mxu3 }
 0x80e   :  { %v8204_v46 = vadd.f32 %v8163_v25, %v7994_v1  ;;  %v8591_v19 = vsel %vm8543_vm1, 0.0, %v8447_v2  ;;  %v7856_v6 = vpop.f32.mrf.mxu1  ;;  %v8004_v2 = vadd.f32 %v8003_v4, %v7854_v39  ;;  %v10141_v4 = vld [vmem:[%s13479_s6 + $0x18] sm:$0xff] }
 0x80f   :  { %v8828_v43 = vpack.c.bf16 %v8591_v19, %v8590_v55  ;;  %9276 = vmatpush.bf16.msra.mxu2 %v10141_v4 }
 0x810   :  { %v8237_v63 = vadd.f32 %v13248_v44, %v8204_v46  ;;  %v8005_v49 = vpop.f32.mrf.mxu2 }
 0x811   :  { %10032 = vmatmul.msk.bf16.gmra.mxu3 %vm8275_vm5, %v8828_v43  ;;  %v8006_v23 = vadd.f32 %v8005_v49, %v7856_v6 }
 0x812   :  { %v8269_v45 = vmax.f32 %v8237_v63, 0.0 }
 0x813   :  { %v8320_v11 = vld [vmem:[#allocation2 + $0xc6] ss:$2 sm:$0xff]  ;;  %v8336_v9 = vld [vmem:[#allocation2 + $0xc7] ss:$2 sm:$0xff] }
 0x814   :  { %8302 = vst.msk [vmem:[#allocation2 + $0xd8] sm:$0xff] %vm8275_vm5, %v8269_v45  ;;  %v8368_v22 = vld [vmem:[#allocation2 + $0xc8] ss:$2 sm:$0xff]  ;;  %v8384_v26 = vld [vmem:[#allocation2 + $0xc9] ss:$2 sm:$0xff]  ;;  %v8352_v59 = vmax.f32 %v8320_v11, %v8336_v9 }
 0x815   :  { %v8165_v41 = vpop.f32.mrf.mxu3  ;;  %v8400_v32 = vmax.f32 %v8368_v22, %v8384_v26  ;;  %v10144_v11 = vld [vmem:[%s13479_s6 + $0x30] sm:$0xff] }
 0x816   :  { %v8205_v52 = vadd.f32 %v8165_v41, %v7996_v54  ;;  %v8528_v40 = vsel %vm8480_vm9, 0.0, %v8352_v59  ;;  %v8686_v54 = vpop.f32.mrf.mxu1  ;;  %v10140_v22 = vld [vmem:[%s13479_s6 + $0x10] sm:$0xff] }
 0x817   :  { %9277 = vmatpush.bf16.msra.mxu2 %v10140_v22 }
 0x818   :  { %v8238_v35 = vadd.f32 %v13248_v44, %v8205_v52  ;;  %v8783_v63 = vpop.f32.mrf.mxu2 }
 0x81a   :  { %v8270_v13 = vmax.f32 %v8238_v35, 0.0 }
 0x81b   :  { %v8416_v5 = vld [vmem:[#allocation2 + $0xca] ss:$2 sm:$0xff]  ;;  %v8432_v20 = vld [vmem:[#allocation2 + $0xcb] ss:$2 sm:$0xff] }
 0x81c   :  { %8303 = vst.msk [vmem:[#allocation2 + $0xe0] sm:$0xff] %vm8275_vm5, %v8270_v13  ;;  %v8448_v50 = vmax.f32 %v8416_v5, %v8432_v20  ;;  %v10145_v13 = vld [vmem:[%s13479_s6 + $0x38] sm:$0xff] }
 0x81d   :  { %v8168_v37 = vpop.f32.mrf.mxu3  ;;  %9211 = vmatpush.bf16.msra.mxu1 %v10145_v13 }
 0x81e   :  { %v8206_v42 = vadd.f32 %v8168_v37, %v7999_v8  ;;  %v8592_v55 = vsel %vm8544_vm11, 0.0, %v8448_v50  ;;  %v8688_v39 = vpop.f32.mrf.mxu1 }
 0x820   :  { %v8239_v28 = vadd.f32 %v13248_v44, %v8206_v42  ;;  %v8785_v8 = vpop.f32.mrf.mxu2  ;;  %v8784_v42 = vadd.f32 %v8783_v63, %v8686_v54 }
 0x821   :  { %9212 = vmatpush.bf16.msra.mxu1 %v10144_v11 }
 0x822   :  { %v8271_v56 = vmax.f32 %v8239_v28, 0.0  ;;  %v13277_v28 = vld [vmem:[%s13474_s1 + $0x5] ss:$0 sm:$0xff] }
 0x823   :  { %v8369_v12 = vld [vmem:[#allocation2 + $0xd8] ss:$2 sm:$0xff]  ;;  %v8385_v31 = vld [vmem:[#allocation2 + $0xd9] ss:$2 sm:$0xff] }
 0x824   :  { %v8321_v29 = vld [vmem:[#allocation2 + $0xd6] ss:$2 sm:$0xff]  ;;  %8304 = vst.msk [vmem:[#allocation2 + $0xe8] sm:$0xff] %vm8275_vm5, %v8271_v56  ;;  %v8401_v51 = vmax.f32 %v8369_v12, %v8385_v31  ;;  %v8337_v10 = vld [vmem:[#allocation2 + $0xd7] ss:$2 sm:$0xff] }
 0x825   :  { %v8170_v48 = vpop.f32.mrf.mxu3  ;;  %v8353_v58 = vmax.f32 %v8321_v29, %v8337_v10  ;;  %9213 = vmatpush.bf16.msra.mxu1 %v10143_v27  ;;  %v9074_v10 = vand.u32 3, %v10315_v21 }
 0x826   :  { %v8207_v36 = vadd.f32 %v8170_v48, %v8001_v30  ;;  %v8618_v34 = vpack.c.bf16 %v8401_v51, %v8400_v32  ;;  %v10139_v48 = vld [vmem:[%s13479_s6 + $0x8] sm:$0xff]  ;;  %v8691_v20 = vpop.f32.mrf.mxu1 }
 0x827   :  { %v8529_v62 = vsel %vm8481_vm10, 0.0, %v8353_v58  ;;  %v10149_v58 = vld [vmem:[%s13479_s6 + $0x58] sm:$0xff]  ;;  %9278 = vmatpush.bf16.msra.mxu2 %v10139_v48  ;;  %v9075_v48 = vand.u32 3, %v12855_v15  ;;  %vm9082_vm2 = vcmp.eq.s32.totalorder %v9074_v10, 0  ;;  %vm9114_vm4 = vcmp.eq.s32.totalorder %v9074_v10, 3 }
 0x828   :  { %v8240_v17 = vadd.f32 %v13248_v44, %v8207_v36  ;;  %9977 = vmatmul.msk.bf16.gmra.mxu1 %vm8275_vm5, %v8618_v34  ;;  %v8602_v61 = vpack.c.bf16 %v8529_v62, %v8528_v40  ;;  %v8788_v32 = vpop.f32.mrf.mxu2  ;;  %v8786_v36 = vadd.f32 %v8785_v8, %v8688_v39  ;;  %9354 = vmatpush.bf16.msra.mxu3 %v10149_v58 }
 0x829   :  { %v8789_v8 = vadd.f32 %v8788_v32, %v8691_v20  ;;  %vm9083_vm3 = vcmp.eq.s32.totalorder %v9075_v48, 0  ;;  %vm9115_vm7 = vcmp.eq.s32.totalorder %v9075_v48, 3 }
 0x82a   :  { %v8272_v53 = vmax.f32 %v8240_v17, 0.0  ;;  %10001 = vmatmul.msk.bf16.gmra.mxu2 %vm8275_vm5, %v8602_v61 }
 0x82b   :  { %v8417_v1 = vld [vmem:[#allocation2 + $0xda] ss:$2 sm:$0xff]  ;;  %v8433_v47 = vld [vmem:[#allocation2 + $0xdb] ss:$2 sm:$0xff] }
 0x82c   :  { %8305 = vst.msk [vmem:[#allocation2 + $0xf0] sm:$0xff] %vm8275_vm5, %v8272_v53  ;;  %v8449_v25 = vmax.f32 %v8417_v1, %v8433_v47 }
 0x82d   :  { %v8173_v7 = vpop.f32.mrf.mxu3 }
 0x82e   :  { %v8208_v46 = vadd.f32 %v8173_v7, %v8004_v2  ;;  %v8593_v19 = vsel %vm8545_vm12, 0.0, %v8449_v25  ;;  %v10142_v2 = vld [vmem:[%s13479_s6 + $0x20] sm:$0xff] }
 0x82f   :  { %v8829_v43 = vpack.c.bf16 %v8593_v19, %v8592_v55  ;;  %v10138_v55 = vld [vmem:[%s13479_s6] sm:$0xff]  ;;  %v10148_v19 = vld [vmem:[%s13479_s6 + $0x50] sm:$0xff]  ;;  %9214 = vmatpush.bf16.msra.mxu1 %v10142_v2 }
 0x830   :  { %v8241_v45 = vadd.f32 %v13248_v44, %v8208_v46  ;;  %9279 = vmatpush.bf16.msra.mxu2 %v10138_v55  ;;  %9355 = vmatpush.bf16.msra.mxu3 %v10148_v19  ;;  %v8790_v13 = vpop.f32.mrf.mxu2 }
 0x831   :  { %10033 = vmatmul.msk.bf16.gmra.mxu3 %vm8275_vm5, %v8829_v43 }
 0x832   :  { %v8273_v41 = vmax.f32 %v8241_v45, 0.0 }
 0x833   :  { %v8370_v26 = vld [vmem:[#allocation2 + $0xe8] ss:$2 sm:$0xff]  ;;  %v8386_v30 = vld [vmem:[#allocation2 + $0xe9] ss:$2 sm:$0xff] }
 0x834   :  { %8306 = vst.msk [vmem:[#allocation2 + $0xf8] sm:$0xff] %vm8275_vm5, %v8273_v41  ;;  %v8322_v12 = vld [vmem:[#allocation2 + $0xe6] ss:$2 sm:$0xff]  ;;  %v8338_v31 = vld [vmem:[#allocation2 + $0xe7] ss:$2 sm:$0xff]  ;;  %v8402_v49 = vmax.f32 %v8370_v26, %v8386_v30 }
 0x835   :  { %v8175_v52 = vpop.f32.mrf.mxu3  ;;  %v8354_v5 = vmax.f32 %v8322_v12, %v8338_v31 }
 0x836   :  { %v8209_v16 = vadd.f32 %v8175_v52, %v8006_v23 }
 0x837   :  { %v8530_v43 = vsel %vm13291_vm13, 0.0, %v8354_v5 }
 0x838   :  { %v8242_v35 = vadd.f32 %v13248_v44, %v8209_v16 }
 0x83a   :  { %v8274_v37 = vmax.f32 %v8242_v35, 0.0  ;;  %v10147_v35 = vld [vmem:[%s13479_s6 + $0x48] sm:$0xff] }
 0x83b   :  { %v8418_v29 = vld [vmem:[#allocation2 + $0xea] ss:$2 sm:$0xff]  ;;  %v8434_v59 = vld [vmem:[#allocation2 + $0xeb] ss:$2 sm:$0xff]  ;;  %9356 = vmatpush.bf16.msra.mxu3 %v10147_v35 }
 0x83c   :  { %8307 = vst.msk [vmem:[#allocation2 + $0x100] sm:$0xff] %vm8275_vm5, %v8274_v37  ;;  %v8450_v53 = vmax.f32 %v8418_v29, %v8434_v59  ;;  %v8693_v37 = vpop.f32.mrf.mxu1 }
 0x83d   :  { %v8897_v44 = vpop.f32.mrf.mxu3  ;;  %v8791_v60 = vadd.f32 %v8790_v13, %v8693_v37 }
 0x83e   :  { %v8937_v9 = vadd.f32 %v8897_v44, %v8784_v42  ;;  %v8594_v41 = vsel %vm8546_vm15, 0.0, %v8450_v53  ;;  %v10146_v42 = vld [vmem:[%s13479_s6 + $0x40] sm:$0xff] }
 0x83f   :  { %9357 = vmatpush.bf16.msra.mxu3 %v10146_v42 }
 0x840   :  { %v8954_v56 = vadd.f32 %v13277_v28, %v8937_v9  ;;  %v8793_v9 = vpop.f32.mrf.mxu2 }
 0x842   :  { %v8970_v3 = vmax.f32 %v8954_v56, 0.0 }
 0x843   :  { %v8371_v34 = vld [vmem:[#allocation2 + $0xf8] ss:$2 sm:$0xff]  ;;  %v8387_v40 = vld [vmem:[#allocation2 + $0xf9] ss:$2 sm:$0xff] }
 0x844   :  { %v8323_v62 = vld [vmem:[#allocation2 + $0xf6] ss:$2 sm:$0xff]  ;;  %8986 = vst.msk [vmem:[#allocation2 + $0x8] sm:$0xff] %vm8275_vm5, %v8970_v3  ;;  %v8403_v17 = vmax.f32 %v8371_v34, %v8387_v40  ;;  %v8339_v61 = vld [vmem:[#allocation2 + $0xf7] ss:$2 sm:$0xff]  ;;  %v8696_v14 = vpop.f32.mrf.mxu1 }
 0x845   :  { %v8419_v6 = vld [vmem:[#allocation2 + $0xfa] ss:$2 sm:$0xff]  ;;  %v8899_v50 = vpop.f32.mrf.mxu3  ;;  %v8355_v1 = vmax.f32 %v8323_v62, %v8339_v61  ;;  %v8435_v47 = vld [vmem:[#allocation2 + $0xfb] ss:$2 sm:$0xff]  ;;  %v8794_v12 = vadd.f32 %v8793_v9, %v8696_v14 }
 0x846   :  { %v8938_v25 = vadd.f32 %v8899_v50, %v8786_v36  ;;  %v8619_v7 = vpack.c.bf16 %v8403_v17, %v8402_v49  ;;  %v8451_v46 = vmax.f32 %v8419_v6, %v8435_v47 }
 0x847   :  { %v8531_v63 = vsel %vm13295_vm14, 0.0, %v8355_v1 }
 0x848   :  { %v8955_v45 = vadd.f32 %v13277_v28, %v8938_v25  ;;  %9978 = vmatmul.msk.bf16.gmra.mxu1 %vm8275_vm5, %v8619_v7  ;;  %v8603_v54 = vpack.c.bf16 %v8531_v63, %v8530_v43  ;;  %v8595_v23 = vsel %vm8547_vm0, 0.0, %v8451_v46  ;;  %v8795_v31 = vpop.f32.mrf.mxu2 }
 0x849   :  { %v8830_v52 = vpack.c.bf16 %v8595_v23, %v8594_v41 }
 0x84a   :  { %v8971_v16 = vmax.f32 %v8955_v45, 0.0  ;;  %10002 = vmatmul.msk.bf16.gmra.mxu2 %vm8275_vm5, %v8603_v54 }
 0x84b   :  { %10034 = vmatmul.msk.bf16.gmra.mxu3 %vm8275_vm5, %v8830_v52 }
 0x84c   :  { %8987 = vst.msk [vmem:[#allocation2 + $0x10] sm:$0xff] %vm8275_vm5, %v8971_v16  ;;  %v8698_v27 = vpop.f32.mrf.mxu1 }
 0x84d   :  { %v8902_v4 = vpop.f32.mrf.mxu3  ;;  %v8796_v40 = vadd.f32 %v8795_v31, %v8698_v27  ;;  %v9076_v31 = vand.u32 3, %v12538_v38 }
 0x84e   :  { %v8939_v39 = vadd.f32 %v8902_v4, %v8789_v8 }
 0x84f   :  { %vm13350_vm6 = vcmp.eq.s32.totalorder %v9076_v31, 0  ;;  %vm9116_vm9 = vcmp.eq.s32.totalorder %v9076_v31, 3 }
 0x850   :  { %v8956_v44 = vadd.f32 %v13277_v28, %v8939_v39  ;;  %v8798_v53 = vpop.f32.mrf.mxu2 }
 0x852   :  { %v8972_v11 = vmax.f32 %v8956_v44, 0.0 }
 0x853   :  { %v9002_v3 = vld [vmem:[#allocation2 + $0x6] ss:$2 sm:$0xff]  ;;  %v9010_v51 = vld [vmem:[#allocation2 + $0x7] ss:$2 sm:$0xff] }
 0x854   :  { %8988 = vst.msk [vmem:[#allocation2 + $0x18] sm:$0xff] %vm8275_vm5, %v8972_v11  ;;  %v9026_v58 = vld [vmem:[#allocation2 + $0x8] ss:$2 sm:$0xff]  ;;  %v9034_v36 = vld [vmem:[#allocation2 + $0x9] ss:$2 sm:$0xff]  ;;  %v9018_v49 = vmax.f32 %v9002_v3, %v9010_v51  ;;  %v8701_v47 = vpop.f32.mrf.mxu1 }
 0x855   :  { %v8904_v22 = vpop.f32.mrf.mxu3  ;;  %v9042_v17 = vmax.f32 %v9026_v58, %v9034_v36  ;;  %v8799_v41 = vadd.f32 %v8798_v53, %v8701_v47 }
 0x856   :  { %v8940_v26 = vadd.f32 %v8904_v22, %v8791_v60  ;;  %v9106_v2 = vsel %vm9082_vm2, 0.0, %v9018_v49 }
 0x858   :  { %v8957_v56 = vadd.f32 %v13277_v28, %v8940_v26  ;;  %v8800_v8 = vpop.f32.mrf.mxu2 }
 0x85a   :  { %v8973_v30 = vmax.f32 %v8957_v56, 0.0 }
 0x85b   :  { %v9050_v7 = vld [vmem:[#allocation2 + $0xa] ss:$2 sm:$0xff]  ;;  %v9058_v46 = vld [vmem:[#allocation2 + $0xb] ss:$2 sm:$0xff] }
 0x85c   :  { %8989 = vst.msk [vmem:[#allocation2 + $0x20] sm:$0xff] %vm8275_vm5, %v8973_v30  ;;  %v9066_v63 = vmax.f32 %v9050_v7, %v9058_v46  ;;  %v8703_v42 = vpop.f32.mrf.mxu1 }
 0x85d   :  { %v8907_v29 = vpop.f32.mrf.mxu3  ;;  %v8801_v44 = vadd.f32 %v8800_v8, %v8703_v42 }
 0x85e   :  { %v8941_v59 = vadd.f32 %v8907_v29, %v8794_v12  ;;  %v9138_v35 = vsel %vm9114_vm4, 0.0, %v9066_v63 }
 0x860   :  { %v8958_v32 = vadd.f32 %v13277_v28, %v8941_v59 }
 0x862   :  { %v8974_v34 = vmax.f32 %v8958_v32, 0.0  ;;  %v9077_v32 = vand.u32 3, %v13661_v24 }
 0x863   :  { %v9027_v62 = vld [vmem:[#allocation2 + $0x18] ss:$2 sm:$0xff]  ;;  %v9035_v5 = vld [vmem:[#allocation2 + $0x19] ss:$2 sm:$0xff] }
 0x864   :  { %v9003_v20 = vld [vmem:[#allocation2 + $0x16] ss:$2 sm:$0xff]  ;;  %8990 = vst.msk [vmem:[#allocation2 + $0x28] sm:$0xff] %vm8275_vm5, %v8974_v34  ;;  %v9043_v61 = vmax.f32 %v9027_v62, %v9035_v5  ;;  %v9011_v6 = vld [vmem:[#allocation2 + $0x17] ss:$2 sm:$0xff]  ;;  %vm9085_vm1 = vcmp.eq.s32.totalorder %v9077_v32, 0 }
 0x865   :  { %v8909_v50 = vpop.f32.mrf.mxu3  ;;  %v9019_v21 = vmax.f32 %v9003_v20, %v9011_v6  ;;  %v8706_v22 = vpop.f32.mrf.mxu1  ;;  %vm9117_vm10 = vcmp.eq.s32.totalorder %v9077_v32, 3 }
 0x866   :  { %v8942_v1 = vadd.f32 %v8909_v50, %v8796_v40  ;;  %v9158_v15 = vpack.c.bf16 %v9043_v61, %v9042_v17 }
 0x867   :  { %v9107_v25 = vsel %vm9083_vm3, 0.0, %v9019_v21 }
 0x868   :  { %v8959_v55 = vadd.f32 %v13277_v28, %v8942_v1  ;;  %10059 = vmatmul.msk.bf16.vlgmr.msra.gmra.mxu1 %vm8275_vm5, %v9158_v15  ;;  %v9146_v19 = vpack.c.bf16 %v9107_v25, %v9106_v2 }
 0x86a   :  { %v8975_v43 = vmax.f32 %v8959_v55, 0.0  ;;  %10079 = vmatmul.msk.bf16.vlgmr.msra.gmra.mxu2 %vm8275_vm5, %v9146_v19 }
 0x86b   :  { %v9051_v45 = vld [vmem:[#allocation2 + $0x1a] ss:$2 sm:$0xff]  ;;  %v9059_v54 = vld [vmem:[#allocation2 + $0x1b] ss:$2 sm:$0xff] }
 0x86c   :  { %8991 = vst.msk [vmem:[#allocation2 + $0x30] sm:$0xff] %vm8275_vm5, %v8975_v43  ;;  %v9067_v23 = vmax.f32 %v9051_v45, %v9059_v54 }
 0x86d   :  { %v8912_v52 = vpop.f32.mrf.mxu3  ;;  %v8803_v60 = vpop.f32.mrf.mxu2 }
 0x86e   :  { %v8943_v16 = vadd.f32 %v8912_v52, %v8799_v41  ;;  %v9139_v13 = vsel %vm9115_vm7, 0.0, %v9067_v23  ;;  %v8804_v56 = vadd.f32 %v8803_v60, %v8706_v22  ;;  %v8708_v36 = vpop.f32.mrf.mxu1  ;;  %v9079_v22 = vand.u32 3, %v12882_v33 }
 0x86f   :  { %v9301_v37 = vpack.c.bf16 %v9139_v13, %v9138_v35 }
 0x870   :  { %v8960_v4 = vadd.f32 %v13277_v28, %v8943_v16  ;;  %vm9087_vm12 = vcmp.eq.s32.totalorder %v9079_v22, 0  ;;  %vm9119_vm14 = vcmp.eq.s32.totalorder %v9079_v22, 3  ;;  %v9438_v22 = vld [vmem:[%s13481_s8 + $0x18] sm:$0xff] }
 0x871   :  { %10107 = vmatmul.msk.bf16.vlgmr.msra.gmra.mxu3 %vm8275_vm5, %v9301_v37 }
 0x872   :  { %v8976_v39 = vmax.f32 %v8960_v4, 0.0 }
 0x873   :  { %v9004_v59 = vld [vmem:[#allocation2 + $0x26] ss:$2 sm:$0xff]  ;;  %v9012_v27 = vld [vmem:[#allocation2 + $0x27] ss:$2 sm:$0xff] }
 0x874   :  { %8992 = vst.msk [vmem:[#allocation2 + $0x38] sm:$0xff] %vm8275_vm5, %v8976_v39  ;;  %v9028_v51 = vld [vmem:[#allocation2 + $0x28] ss:$2 sm:$0xff]  ;;  %v9036_v10 = vld [vmem:[#allocation2 + $0x29] ss:$2 sm:$0xff]  ;;  %v9020_v5 = vmax.f32 %v9004_v59, %v9012_v27 }
 0x875   :  { %v8914_v11 = vpop.f32.mrf.mxu3  ;;  %v8805_v3 = vpop.f32.mrf.mxu2  ;;  %v9044_v20 = vmax.f32 %v9028_v51, %v9036_v10 }
 0x876   :  { %v8944_v9 = vadd.f32 %v8914_v11, %v8801_v44  ;;  %v8806_v38 = vadd.f32 %v8805_v3, %v8708_v36  ;;  %v9108_v50 = vsel %vm13350_vm6, 0.0, %v9020_v5 }
 0x878   :  { %v8961_v14 = vadd.f32 %v13277_v28, %v8944_v9 }
 0x87a   :  { %v8977_v26 = vmax.f32 %v8961_v14, 0.0  ;;  %v9078_v14 = vand.u32 3, %v12387_v18 }
 0x87b   :  { %v9052_v1 = vld [vmem:[#allocation2 + $0x2a] ss:$2 sm:$0xff]  ;;  %v9060_v15 = vld [vmem:[#allocation2 + $0x2b] ss:$2 sm:$0xff] }
 0x87c   :  { %8993 = vst.msk [vmem:[#allocation2 + $0x40] sm:$0xff] %vm8275_vm5, %v8977_v26  ;;  %v9068_v7 = vmax.f32 %v9052_v1, %v9060_v15  ;;  %vm9086_vm11 = vcmp.eq.s32.totalorder %v9078_v14, 0  ;;  %vm9118_vm13 = vcmp.eq.s32.totalorder %v9078_v14, 3 }
 0x87d   :  { %v8917_v30 = vpop.f32.mrf.mxu3 }
 0x87e   :  { %v8945_v12 = vadd.f32 %v8917_v30, %v8804_v56  ;;  %v9140_v63 = vsel %vm9116_vm9, 0.0, %v9068_v7 }
 0x880   :  { %v8962_v29 = vadd.f32 %v13277_v28, %v8945_v12 }
 0x882   :  { %v8978_v48 = vmax.f32 %v8962_v29, 0.0 }
 0x883   :  { %v9029_v34 = vld [vmem:[#allocation2 + $0x38] ss:$2 sm:$0xff]  ;;  %v9037_v40 = vld [vmem:[#allocation2 + $0x39] ss:$2 sm:$0xff] }
 0x884   :  { %v9005_v62 = vld [vmem:[#allocation2 + $0x36] ss:$2 sm:$0xff]  ;;  %8994 = vst.msk [vmem:[#allocation2 + $0x48] sm:$0xff] %vm8275_vm5, %v8978_v48  ;;  %v9045_v49 = vmax.f32 %v9029_v34, %v9037_v40  ;;  %v9013_v17 = vld [vmem:[#allocation2 + $0x37] ss:$2 sm:$0xff] }
 0x885   :  { %v8919_v24 = vpop.f32.mrf.mxu3  ;;  %v9021_v61 = vmax.f32 %v9005_v62, %v9013_v17  ;;  %v8711_v54 = vpop.f32.mrf.mxu1 }
 0x886   :  { %v8946_v6 = vadd.f32 %v8919_v24, %v8806_v38  ;;  %v9159_v53 = vpack.c.bf16 %v9045_v49, %v9044_v20 }
 0x887   :  { %v9109_v21 = vsel %vm9085_vm1, 0.0, %v9021_v61 }
 0x888   :  { %v8963_v47 = vadd.f32 %v13277_v28, %v8946_v6  ;;  %10060 = vmatmul.msk.bf16.gmra.mxu1 %vm8275_vm5, %v9159_v53  ;;  %v9147_v2 = vpack.c.bf16 %v9109_v21, %v9108_v50 }
 0x88a   :  { %v8979_v25 = vmax.f32 %v8963_v47, 0.0  ;;  %10080 = vmatmul.msk.bf16.gmra.mxu2 %vm8275_vm5, %v9147_v2 }
 0x88b   :  { %v9053_v46 = vld [vmem:[#allocation2 + $0x3a] ss:$2 sm:$0xff]  ;;  %v9061_v55 = vld [vmem:[#allocation2 + $0x3b] ss:$2 sm:$0xff] }
 0x88c   :  { %8995 = vst.msk [vmem:[#allocation2 + $0x50] sm:$0xff] %vm8275_vm5, %v8979_v25  ;;  %v9069_v19 = vmax.f32 %v9053_v46, %v9061_v55 }
 0x88d   :  { %v8808_v43 = vpop.f32.mrf.mxu2  ;;  %v8713_v37 = vpop.f32.mrf.mxu1 }
 0x88e   :  { %v9141_v45 = vsel %vm9117_vm10, 0.0, %v9069_v19  ;;  %v8809_v23 = vadd.f32 %v8808_v43, %v8711_v54 }
 0x88f   :  { %v9302_v41 = vpack.c.bf16 %v9141_v45, %v9140_v63 }
 0x891   :  { %10108 = vmatmul.msk.bf16.gmra.mxu3 %vm8275_vm5, %v9302_v41 }
 0x893   :  { %v9006_v9 = vld [vmem:[#allocation2 + $0x46] ss:$2 sm:$0xff]  ;;  %v9014_v60 = vld [vmem:[#allocation2 + $0x47] ss:$2 sm:$0xff] }
 0x894   :  { %v8922_v52 = vpop.f32.mrf.mxu3  ;;  %v9030_v26 = vld [vmem:[#allocation2 + $0x48] ss:$2 sm:$0xff]  ;;  %v9038_v56 = vld [vmem:[#allocation2 + $0x49] ss:$2 sm:$0xff]  ;;  %v9022_v29 = vmax.f32 %v9006_v9, %v9014_v60 }
 0x895   :  { %v8947_v16 = vadd.f32 %v8922_v52, %v8809_v23  ;;  %v8810_v13 = vpop.f32.mrf.mxu2  ;;  %v9046_v59 = vmax.f32 %v9030_v26, %v9038_v56 }
 0x896   :  { %v8811_v4 = vadd.f32 %v8810_v13, %v8713_v37  ;;  %v9110_v48 = vsel %vm9086_vm11, 0.0, %v9022_v29  ;;  %v9080_v37 = vand.u32 3, %v12618_v0 }
 0x897   :  { %v8964_v35 = vadd.f32 %v13277_v28, %v8947_v16 }
 0x898   :  { %vm13381_vm15 = vcmp.eq.s32.totalorder %v9080_v37, 0  ;;  %vm13389_vm2 = vcmp.eq.s32.totalorder %v9080_v37, 3  ;;  %v10161_v37 = vld [vmem:[%s13474_s1 + $0x6] ss:$0 sm:$0xff] }
 0x899   :  { %v8980_v8 = vmax.f32 %v8964_v35, 0.0 }
 0x89b   :  { %8996 = vst.msk [vmem:[#allocation2 + $0x58] sm:$0xff] %vm8275_vm5, %v8980_v8 }
 0x89c   :  { %v8924_v42 = vpop.f32.mrf.mxu3 }
 0x89d   :  { %v8948_v39 = vadd.f32 %v8924_v42, %v8811_v4  ;;  %v9081_v4 = vand.u32 3, %v13666_v57 }
 0x89f   :  { %v8965_v44 = vadd.f32 %v13277_v28, %v8948_v39  ;;  %vm13385_vm0 = vcmp.eq.s32.totalorder %v9081_v4, 0  ;;  %vm13393_vm3 = vcmp.eq.s32.totalorder %v9081_v4, 3 }
 0x8a1   :  { %v8981_v11 = vmax.f32 %v8965_v44, 0.0 }
 0x8a2   :  { %v9054_v61 = vld [vmem:[#allocation2 + $0x4a] ss:$2 sm:$0xff]  ;;  %v9062_v6 = vld [vmem:[#allocation2 + $0x4b] ss:$2 sm:$0xff] }
 0x8a3   :  { %8997 = vst.msk [vmem:[#allocation2 + $0x60] sm:$0xff] %vm8275_vm5, %v8981_v11  ;;  %v9070_v21 = vmax.f32 %v9054_v61, %v9062_v6 }
 0x8a5   :  { %v8716_v33 = vpop.f32.mrf.mxu1  ;;  %v9142_v2 = vsel %vm9118_vm13, 0.0, %v9070_v21 }
 0x8aa   :  { %v9031_v30 = vld [vmem:[#allocation2 + $0x58] ss:$2 sm:$0xff]  ;;  %v9039_v12 = vld [vmem:[#allocation2 + $0x59] ss:$2 sm:$0xff] }
 0x8ab   :  { %v9007_v31 = vld [vmem:[#allocation2 + $0x56] ss:$2 sm:$0xff]  ;;  %v9047_v27 = vmax.f32 %v9031_v30, %v9039_v12  ;;  %v9015_v32 = vld [vmem:[#allocation2 + $0x57] ss:$2 sm:$0xff] }
 0x8ac   :  { %v9023_v3 = vmax.f32 %v9007_v31, %v9015_v32 }
 0x8ad   :  { %v9160_v51 = vpack.c.bf16 %v9047_v27, %v9046_v59  ;;  %v8813_v10 = vpop.f32.mrf.mxu2  ;;  %v8718_v20 = vpop.f32.mrf.mxu1 }
 0x8ae   :  { %v9111_v58 = vsel %vm9087_vm12, 0.0, %v9023_v3  ;;  %v8814_v36 = vadd.f32 %v8813_v10, %v8716_v33 }
 0x8af   :  { %10061 = vmatmul.msk.bf16.gmra.mxu1 %vm8275_vm5, %v9160_v51  ;;  %v9148_v18 = vpack.c.bf16 %v9111_v58, %v9110_v48 }
 0x8b1   :  { %10081 = vmatmul.msk.bf16.gmra.mxu2 %vm8275_vm5, %v9148_v18 }
 0x8b4   :  { %v8927_v34 = vpop.f32.mrf.mxu3 }
 0x8b5   :  { %v8949_v40 = vadd.f32 %v8927_v34, %v8814_v36  ;;  %v8815_v5 = vpop.f32.mrf.mxu2 }
 0x8b6   :  { %v8816_v49 = vadd.f32 %v8815_v5, %v8718_v20 }
 0x8b7   :  { %v8966_v62 = vadd.f32 %v13277_v28, %v8949_v40 }
 0x8b9   :  { %v8982_v38 = vmax.f32 %v8966_v62, 0.0 }
 0x8bb   :  { %8998 = vst.msk [vmem:[#allocation2 + $0x68] sm:$0xff] %vm8275_vm5, %v8982_v38 }
 0x8bc   :  { %v8929_v17 = vpop.f32.mrf.mxu3 }
 0x8bd   :  { %v8950_v24 = vadd.f32 %v8929_v17, %v8816_v49 }
 0x8bf   :  { %v8967_v53 = vadd.f32 %v13277_v28, %v8950_v24 }
 0x8c1   :  { %v8983_v50 = vmax.f32 %v8967_v53, 0.0 }
 0x8c2   :  { %v9055_v1 = vld [vmem:[#allocation2 + $0x5a] ss:$2 sm:$0xff]  ;;  %v9063_v15 = vld [vmem:[#allocation2 + $0x5b] ss:$2 sm:$0xff] }
 0x8c3   :  { %8999 = vst.msk [vmem:[#allocation2 + $0x70] sm:$0xff] %vm8275_vm5, %v8983_v50  ;;  %v9071_v47 = vmax.f32 %v9055_v1, %v9063_v15 }
 0x8c5   :  { %v9143_v25 = vsel %vm9119_vm14, 0.0, %v9071_v47  ;;  %v8721_v46 = vpop.f32.mrf.mxu1 }
 0x8c6   :  { %v9303_v7 = vpack.c.bf16 %v9143_v25, %v9142_v2 }
 0x8c8   :  { %10109 = vmatmul.msk.bf16.gmra.mxu3 %vm8275_vm5, %v9303_v7 }
 0x8ca   :  { %v9008_v42 = vld [vmem:[#allocation2 + $0x66] ss:$2 sm:$0xff]  ;;  %v9016_v39 = vld [vmem:[#allocation2 + $0x67] ss:$2 sm:$0xff] }
 0x8cb   :  { %v9032_v9 = vld [vmem:[#allocation2 + $0x68] ss:$2 sm:$0xff]  ;;  %v9040_v60 = vld [vmem:[#allocation2 + $0x69] ss:$2 sm:$0xff]  ;;  %v9024_v30 = vmax.f32 %v9008_v42, %v9016_v39 }
 0x8cc   :  { %v9048_v31 = vmax.f32 %v9032_v9, %v9040_v60 }
 0x8cd   :  { %v8818_v55 = vpop.f32.mrf.mxu2  ;;  %v8723_v41 = vpop.f32.mrf.mxu1  ;;  %v9112_v48 = vsel %vm13381_vm15, 0.0, %v9024_v30 }
 0x8ce   :  { %v8819_v19 = vadd.f32 %v8818_v55, %v8721_v46  ;;  %v8932_v43 = vpop.f32.mrf.mxu3 }
 0x8d0   :  { %v8951_v63 = vadd.f32 %v8932_v43, %v8819_v19 }
 0x8d2   :  { %v8968_v45 = vadd.f32 %v13277_v28, %v8951_v63 }
 0x8d4   :  { %v8984_v54 = vmax.f32 %v8968_v45, 0.0 }
 0x8d5   :  { %v8820_v23 = vpop.f32.mrf.mxu2 }
 0x8d6   :  { %9000 = vst.msk [vmem:[#allocation2 + $0x78] sm:$0xff] %vm8275_vm5, %v8984_v54  ;;  %v8821_v52 = vadd.f32 %v8820_v23, %v8723_v41  ;;  %v8934_v16 = vpop.f32.mrf.mxu3  ;;  %v9442_v41 = vld [vmem:[%s13481_s8 + $0x38] sm:$0xff]  ;;  %v9441_v23 = vld [vmem:[%s13481_s8 + $0x30] sm:$0xff] }
 0x8d7   :  { %9458 = vmatpush.msrb.mxu2 %v9442_v41 }
 0x8d8   :  { %v8952_v35 = vadd.f32 %v8934_v16, %v8821_v52 }
 0x8d9   :  { %9459 = vmatpush.msrb.mxu2 %v9441_v23 }
 0x8da   :  { %v8969_v13 = vadd.f32 %v13277_v28, %v8952_v35 }
 0x8dc   :  { %v8985_v8 = vmax.f32 %v8969_v13, 0.0 }
 0x8dd   :  { %v9056_v44 = vld [vmem:[#allocation2 + $0x6a] ss:$2 sm:$0xff]  ;;  %v9064_v11 = vld [vmem:[#allocation2 + $0x6b] ss:$2 sm:$0xff] }
 0x8de   :  { %9001 = vst.msk [vmem:[#allocation2 + $0x80] sm:$0xff] %vm8275_vm5, %v8985_v8  ;;  %v9072_v12 = vmax.f32 %v9056_v44, %v9064_v11  ;;  %v9440_v8 = vld [vmem:[%s13481_s8 + $0x28] sm:$0xff]  ;;  %v9439_v44 = vld [vmem:[%s13481_s8 + $0x20] sm:$0xff] }
 0x8df   :  { %9460 = vmatpush.msrb.mxu2 %v9440_v8 }
 0x8e0   :  { %v9144_v18 = vsel %vm13389_vm2, 0.0, %v9072_v12 }
 0x8e1   :  { %9461 = vmatpush.msrb.mxu2 %v9439_v44 }
 0x8e3   :  { %9462 = vmatpush.msrb.mxu2 %v9438_v22 }
 0x8e5   :  { %v9033_v57 = vld [vmem:[#allocation2 + $0x78] ss:$2 sm:$0xff]  ;;  %v9041_v26 = vld [vmem:[#allocation2 + $0x79] ss:$2 sm:$0xff]  ;;  %v9216_v40 = vpop.f32.mrf.mxu1 }
 0x8e6   :  { %v9009_v56 = vld [vmem:[#allocation2 + $0x76] ss:$2 sm:$0xff]  ;;  %v9049_v29 = vmax.f32 %v9033_v57, %v9041_v26  ;;  %v9017_v59 = vld [vmem:[#allocation2 + $0x77] ss:$2 sm:$0xff] }
 0x8e7   :  { %v9057_v27 = vld [vmem:[#allocation2 + $0x7a] ss:$2 sm:$0xff]  ;;  %v9065_v32 = vld [vmem:[#allocation2 + $0x7b] ss:$2 sm:$0xff]  ;;  %v9025_v3 = vmax.f32 %v9009_v56, %v9017_v59  ;;  %v9437_v56 = vld [vmem:[%s13481_s8 + $0x10] sm:$0xff] }
 0x8e8   :  { %v9073_v51 = vmax.f32 %v9057_v27, %v9065_v32  ;;  %v9161_v10 = vpack.c.bf16 %v9049_v29, %v9048_v31  ;;  %v9436_v59 = vld [vmem:[%s13481_s8 + $0x8] sm:$0xff]  ;;  %9463 = vmatpush.msrb.mxu2 %v9437_v56 }
 0x8e9   :  { %v9113_v58 = vsel %vm13385_vm0, 0.0, %v9025_v3 }
 0x8ea   :  { %v9145_v33 = vsel %vm13393_vm3, 0.0, %v9073_v51  ;;  %10062 = vmatmul.msk.bf16.gmra.mxu1 %vm8275_vm5, %v9161_v10  ;;  %v9149_v36 = vpack.c.bf16 %v9113_v58, %v9112_v48  ;;  %9464 = vmatpush.msrb.mxu2 %v9436_v59 }
 0x8eb   :  { %v9304_v34 = vpack.c.bf16 %v9145_v33, %v9144_v18 }
 0x8ec   :  { %10082 = vmatmul.msk.bf16.gmra.mxu2 %vm8275_vm5, %v9149_v36 }
 0x8ed   :  { %10110 = vmatmul.msk.bf16.gmra.mxu3 %vm8275_vm5, %v9304_v34  ;;  %v9281_v62 = vpop.f32.mrf.mxu2  ;;  %v9218_v49 = vpop.f32.mrf.mxu1 }
 0x8ee   :  { %v9282_v5 = vadd.f32 %v9281_v62, %v9216_v40  ;;  %v9404_v40 = vld [vmem:[%s13480_s7] sm:$0xff]  ;;  %v9405_v62 = vld [vmem:[%s13480_s7 + $0x8] sm:$0xff] }
 0x8f4   :  { %v9359_v38 = vpop.f32.mrf.mxu3 }
 0x8f5   :  { %v13408_v20 = vadd.f32 %v9359_v38, %v9282_v5  ;;  %v9283_v17 = vpop.f32.mrf.mxu2  ;;  %v9435_v5 = vld [vmem:[%s13481_s8] sm:$0xff] }
 0x8f6   :  { %v9284_v30 = vadd.f32 %v9283_v17, %v9218_v49  ;;  %9465 = vmatpush.msrb.mxu2 %v9435_v5  ;;  %v10162_v49 = vld [vmem:[%s13474_s1 + $0x7] ss:$0 sm:$0xff] }
 0x8f7   :  { %v9388_v18 = vadd.f32 %v10161_v37, %v13408_v20 }
 0x8f9   :  { %v9396_v34 = vmax.f32 %v9388_v18, 0.0 }
 0x8fc   :  { %v9361_v24 = vpop.f32.mrf.mxu3 }
 0x8fd   :  { %v9380_v27 = vadd.f32 %v9361_v24, %v9284_v30 }
 0x8ff   :  { %v9389_v48 = vadd.f32 %v10161_v37, %v9380_v27 }
 0x901   :  { %v9397_v36 = vmax.f32 %v9389_v48, 0.0 }
 0x905   :  { %v9221_v61 = vpop.f32.mrf.mxu1 }
 0x90d   :  { %v9286_v6 = vpop.f32.mrf.mxu2  ;;  %v9223_v50 = vpop.f32.mrf.mxu1 }
 0x90e   :  { %v9287_v28 = vadd.f32 %v9286_v6, %v9221_v61 }
 0x914   :  { %v9364_v53 = vpop.f32.mrf.mxu3 }
 0x915   :  { %v9288_v21 = vpop.f32.mrf.mxu2  ;;  %v9381_v12 = vadd.f32 %v9364_v53, %v9287_v28 }
 0x916   :  { %v9289_v11 = vadd.f32 %v9288_v21, %v9223_v50 }
 0x917   :  { %v9390_v51 = vadd.f32 %v10161_v37, %v9381_v12 }
 0x919   :  { %v9398_v33 = vmax.f32 %v9390_v51, 0.0 }
 0x91c   :  { %v9366_v1 = vpop.f32.mrf.mxu3 }
 0x91d   :  { %v9382_v0 = vadd.f32 %v9366_v1, %v9289_v11 }
 0x91f   :  { %v9391_v32 = vadd.f32 %v10161_v37, %v9382_v0 }
 0x921   :  { %v9399_v58 = vmax.f32 %v9391_v32, 0.0 }
 0x92c   :  { %v9226_v15 = vpop.f32.mrf.mxu1 }
 0x934   :  { %v9291_v47 = vpop.f32.mrf.mxu2  ;;  %v9228_v25 = vpop.f32.mrf.mxu1 }
 0x935   :  { %v9292_v4 = vadd.f32 %v9291_v47, %v9226_v15 }
 0x93c   :  { %v9293_v7 = vpop.f32.mrf.mxu2 }
 0x93d   :  { %v9294_v52 = vadd.f32 %v9293_v7, %v9228_v25  ;;  %v9509_v25 = vld [vmem:[%s13482_s9 + $0x10] sm:$0xff]  ;;  %v9508_v7 = vld [vmem:[%s13482_s9 + $0x8] sm:$0xff] }
 0x94b   :  { %v9369_v2 = vpop.f32.mrf.mxu3 }
 0x94c   :  { %v9383_v9 = vadd.f32 %v9369_v2, %v9292_v4  ;;  %v9510_v2 = vld [vmem:[%s13482_s9 + $0x18] sm:$0xff] }
 0x94d   :  { %9530 = vmatpush.msrb.mxu3 %v9510_v2 }
 0x94e   :  { %v9392_v31 = vadd.f32 %v10161_v37, %v9383_v9 }
 0x94f   :  { %9531 = vmatpush.msrb.mxu3 %v9509_v25 }
 0x950   :  { %v9400_v10 = vmax.f32 %v9392_v31, 0.0 }
 0x951   :  { %9532 = vmatpush.msrb.mxu3 %v9508_v7 }
 0x953   :  { %v9371_v46 = vpop.f32.mrf.mxu3 }
 0x954   :  { %v9384_v42 = vadd.f32 %v9371_v46, %v9294_v52  ;;  %v9507_v46 = vld [vmem:[%s13482_s9] sm:$0xff] }
 0x955   :  { %9533 = vmatpush.msrb.mxu3 %v9507_v46 }
 0x956   :  { %v9393_v57 = vadd.f32 %v10161_v37, %v9384_v42 }
 0x958   :  { %v9401_v3 = vmax.f32 %v9393_v57, 0.0 }
 0x967   :  { %v9231_v55 = vpop.f32.mrf.mxu1 }
 0x96f   :  { %v9296_v19 = vpop.f32.mrf.mxu2  ;;  %v9233_v45 = vpop.f32.mrf.mxu1 }
 0x970   :  { %v9374_v43 = vpop.f32.mrf.mxu3  ;;  %v9297_v63 = vadd.f32 %v9296_v19, %v9231_v55 }
 0x972   :  { %v9385_v16 = vadd.f32 %v9374_v43, %v9297_v63 }
 0x974   :  { %v9394_v60 = vadd.f32 %v10161_v37, %v9385_v16 }
 0x976   :  { %v9402_v29 = vmax.f32 %v9394_v60, 0.0  ;;  %v10163_v60 = vld [vmem:[%s13474_s1 + $0x8] ss:$0 sm:$0xff] }
 0x977   :  { %v9298_v54 = vpop.f32.mrf.mxu2 }
 0x978   :  { %v9299_v35 = vadd.f32 %v9298_v54, %v9233_v45  ;;  %v9376_v13 = vpop.f32.mrf.mxu3 }
 0x97a   :  { %v9386_v39 = vadd.f32 %v9376_v13, %v9299_v35 }
 0x97c   :  { %v9395_v14 = vadd.f32 %v10161_v37, %v9386_v39 }
 0x97e   :  { %v9403_v26 = vmax.f32 %v9395_v14, 0.0 }
 0x980   :  { %9420 = vmatpush.msrb.mxu1 %v9403_v26 }
 0x982   :  { %9421 = vmatpush.msrb.mxu1 %v9402_v29 }
 0x984   :  { %9422 = vmatpush.msrb.mxu1 %v9401_v3 }
 0x986   :  { %9423 = vmatpush.msrb.mxu1 %v9400_v10 }
 0x988   :  { %9424 = vmatpush.msrb.mxu1 %v9399_v58 }
 0x98a   :  { %9425 = vmatpush.msrb.mxu1 %v9398_v33 }
 0x98c   :  { %9426 = vmatpush.msrb.mxu1 %v9397_v36 }
 0x98e   :  { %9427 = vmatpush.msrb.mxu1 %v9396_v34 }
 0x98f   :  { %10111 = vmatmul.msk.f32.vlgmr.msrb.gmra.mxu1 %vm8275_vm5, %v9404_v40 }
 0x997   :  { %10112 = vmatmul.msk.f32.gmra.mxu1 %vm8275_vm5, %v9405_v62 }
 0xa0c   :  { %v9429_v38 = vpop.f32.mrf.mxu1 }
 0xa0d   :  { %10113 = vmatmul.msk.f32.vlgmr.msrb.gmra.mxu2 %vm8275_vm5, %v9429_v38 }
 0xa14   :  { %v9432_v20 = vpop.f32.mrf.mxu1 }
 0xa15   :  { %10114 = vmatmul.msk.f32.gmra.mxu2 %vm8275_vm5, %v9432_v20 }
 0xa90   :  { %v9467_v17 = vpop.f32.mrf.mxu2 }
 0xa91   :  { %v9468_v24 = vadd.f32 %v10162_v49, %v9467_v17 }
 0xa93   :  { %v9473_v61 = vmax.f32 %v9468_v24, 0.0 }
 0xa95   :  { %v9475_v6 = vmul.f32 %v9473_v61, %v9473_v61 }
 0xa97   :  { %v9477_v53 = vsel %vm7028_vm8, %v9475_v6, 0.0 }
 0xa98   :  { %9478 = vadd.xlane.f32.xlu0 %v9477_v53  ;;  %v9470_v50 = vpop.f32.mrf.mxu2 }
 0xa99   :  { %v9471_v21 = vadd.f32 %v10162_v49, %v9470_v50 }
 0xa9b   :  { %v9474_v1 = vmax.f32 %v9471_v21, 0.0 }
 0xa9d   :  { %v9476_v15 = vmul.f32 %v9474_v1, %v9474_v1 }
 0xa9f   :  { %v9480_v47 = vsel %vm7028_vm8, %v9476_v15, 0.0 }
 0xaa0   :  { %9481 = vadd.xlane.f32.xlu0 %v9480_v47 }
 0xb0b   :  { %v9479_v55 = vpop.xlane.xlu0 %9478 }
 0xb0c   :  { %v9483_v19 = vmax.f32 %v9479_v55, 1e-24 }
 0xb0e   :  { %10164 = vrsqrt.f32 %v9483_v19  ;;  %vm9491_vm4 = vweird.f32 %v9483_v19 }
 0xb13   :  { %v9482_v43 = vpop.xlane.xlu0 %9481 }
 0xb14   :  { %v10165_v63 = vpop.eup %10164  ;;  %v9484_v45 = vmax.f32 %v9482_v43, 1e-24 }
 0xb15   :  { %v9486_v54 = vmul.f32 %v10165_v63, %v9483_v19  ;;  %vm9492_vm5 = vweird.f32 %v10165_v63 }
 0xb16   :  { %10166 = vrsqrt.f32 %v9484_v45  ;;  %vm9493_vm7 = vmor %vm9491_vm4, %vm9492_vm5  ;;  %vm9501_vm1 = vweird.f32 %v9484_v45 }
 0xb17   :  { %v9487_v41 = vmul.f32 %v10165_v63, %v9486_v54 }
 0xb19   :  { %v9488_v23 = vmul.f32 0.5, %v9487_v41 }
 0xb1b   :  { %v9489_v52 = vsub.f32 1.5, %v9488_v23 }
 0xb1c   :  { %v10167_v16 = vpop.eup %10166 }
 0xb1d   :  { %v9490_v35 = vmul.f32 %v10165_v63, %v9489_v52  ;;  %v9496_v13 = vmul.f32 %v10167_v16, %v9484_v45  ;;  %vm9502_vm6 = vweird.f32 %v10167_v16 }
 0xb1e   :  { %vm9503_vm9 = vmor %vm9501_vm1, %vm9502_vm6 }
 0xb1f   :  { %v9494_v8 = vsel %vm9493_vm7, %v10165_v63, %v9490_v35  ;;  %v9497_v37 = vmul.f32 %v10167_v16, %v9496_v13 }
 0xb20   :  { %v9505_v4 = vmul.f32 %v9494_v8, %v9473_v61 }
 0xb21   :  { %v9498_v42 = vmul.f32 0.5, %v9497_v37 }
 0xb22   :  { %10115 = vmatmul.msk.f32.vlgmr.msrb.gmra.mxu3 %vm7028_vm8, %v9505_v4 }
 0xb23   :  { %v9499_v39 = vsub.f32 1.5, %v9498_v42 }
 0xb25   :  { %v9500_v44 = vmul.f32 %v10167_v16, %v9499_v39 }
 0xb27   :  { %v9504_v11 = vsel %vm9503_vm9, %v10167_v16, %v9500_v44 }
 0xb28   :  { %v9506_v9 = vmul.f32 %v9504_v11, %v9474_v1 }
 0xb2a   :  { %10116 = vmatmul.msk.f32.gmra.mxu3 %vm7028_vm8, %v9506_v9 }
 0xba5   :  { %v9535_v14 = vpop.f32.mrf.mxu3 }
 0xba6   :  { %v9536_v22 = vadd.f32 %v10163_v60, %v9535_v14 }
 0xba8   :  { %9541 = vst [vmem:[#allocation3] sm:$0xff] %v9536_v22 }
 0xbad   :  { %v9538_v28 = vpop.f32.mrf.mxu3 }
 0xbae   :  { %v9539_v0 = vadd.f32 %v10163_v60, %v9538_v28 }
 0xbb0   :  { %9542 = vst [vmem:[#allocation3 + $0x8] sm:$0xff] %v9539_v0 }
 0xbb1   :  { %9555 = dma.vmem_to_hbm [thread:$0]  %s9548_s3, 256, %s9550_s2, [#allocation4], %s10210_s19, %s10210_s19, %s10211_s20  }
 0xbb2   :  { %10207 = dma.done.wait [#allocation4], 256  }
 0xbb3   :  { %10208 = vsyncadd [#allocation4], 4294967040 }
 0xbb4   :  { %9560 = vsyncpa [#allocation4], 1 }

</bundles_post_ra>
